<compile_context>
chip_gen: v7x
topology: tpu7x:2x2x1
jax: 0.10.0
libtpu: 0.0.40
codegen_flags: <defaults>
</compile_context>

<pallas_src>
import jax
import jax.numpy as jnp
from jax.experimental import pallas as pl
from jax.experimental.pallas import tpu as pltpu

EPS = 1e-3  # BatchNorm2d eps=0.001


def dwconv_bn_kernel(x_ref, w_ref, gamma_ref, beta_ref, o_ref, xp_ref):
    # x_ref:     (N, H, W, Cb)      NHWC channel block (no spatial padding)
    # w_ref:     (9, Cb)            depthwise 3x3 taps, row-major (di*3 + dj)
    # gamma_ref: (1, Cb)            BN scale
    # beta_ref:  (1, Cb)            BN shift
    # o_ref:     (N, H, W, Cb)
    # xp_ref:    (N, H+2, W+2, Cb)  f32 VMEM scratch, data + zero halo frame
    N, H, W, Cb = o_ref.shape
    Wp = W + 2

    # ---- Build the halo slab in VMEM (no extra HBM traffic) -----------------
    # Rows 1..H hold x rows 0..H-1; columns 0..W-1 hold x columns 0..W-1 (aligned
    # start-0 store). Rows {0, H+1} and columns {W, W+1} are the zero halo.
    # Only the frame is zeroed (not the whole scratch), every step, so the kernel
    # never reads scratch state written by a different grid step / core.
    zrow = jnp.zeros((N, 1, Wp, Cb), jnp.float32)
    xp_ref[:, pl.ds(0, 1), :, :] = zrow                       # top halo row
    xp_ref[:, pl.ds(H + 1, 1), :, :] = zrow                   # bottom halo row
    xp_ref[:, :, pl.ds(W, 2), :] = jnp.zeros((N, H + 2, 2, Cb), jnp.float32)
    xp_ref[:, pl.ds(1, H), pl.ds(0, W), :] = x_ref[...].astype(jnp.float32)

    xp = xp_ref[...]          # (N, H+2, W+2, Cb) single aligned load
    w9 = w_ref[...]           # (9, Cb) taps stay resident

    # ---- Depthwise 3x3 conv as 9 shifted slabs * per-channel taps (VPU) -----
    # out[i,j] = sum_{di,dj} x_pad[i+di, j+dj] * tap[di,dj]
    # W-direction (sublane) shift per dj is one XLU roll of the whole padded slab;
    # column -1 wraps onto the zero column W+1, column W is a zero column, so the
    # roll also provides the left/right padding. di offsets are cheap leading-axis
    # slices (H is not a sublane/lane dim).
    acc = jnp.zeros((N, H, Wp, Cb), jnp.float32)
    for dj in range(3):
        sh = (1 - dj) % Wp                     # dj=0 -> +1, dj=1 -> 0, dj=2 -> Wp-1
        slab = xp if sh == 0 else pltpu.roll(xp, shift=sh, axis=2)
        for di in range(3):
            acc = acc + slab[:, di:di + H, :, :] * w9[di * 3 + dj]
    acc = acc[:, :, :W, :]                     # drop the 2 halo/garbage columns

    # ---- BatchNorm, training-mode batch statistics (biased variance) --------
    # Single-pass moments in f32: var = E[y^2] - E[y]^2, clamped >= 0.
    # TODO(synk): switch to two-pass/Welford if activations move to bf16 or gain
    # large offsets (cancellation risk); f32 with 196 samples/channel is fine here.
    cnt_inv = 1.0 / float(N * H * W)
    s = jnp.sum(acc, axis=(0, 1, 2), keepdims=True)           # (1,1,1,Cb)
    ss = jnp.sum(acc * acc, axis=(0, 1, 2), keepdims=True)    # (1,1,1,Cb)
    mean = s * cnt_inv
    var = jnp.maximum(ss * cnt_inv - mean * mean, 0.0)
    scale = jax.lax.rsqrt(var + EPS) * gamma_ref[0, :]
    shift_v = beta_ref[0, :] - mean * scale
    o_ref[...] = (acc * scale + shift_v).astype(o_ref.dtype)


def depthwise_conv_bn(x_nchw, w_oihw, gamma, beta, *, c_block=512):
    """x_nchw: (N, C, H, W); w_oihw: (C, 1, 3, 3); gamma/beta: (C,).

    c_block=512 -> C padded 864->1024, grid=(2,): one block per TensorCore on v7x
    (dimension_semantics=("parallel",)), and only 2 cheap steps on v5e/v6e.
    Per-step VMEM footprint is ~4-5 MiB, far under every generation's budget.
    """
    N, C, H, W = x_nchw.shape
    n_blocks = pl.cdiv(C, c_block)
    C_pad = n_blocks * c_block
    pad_c = C_pad - C

    # NCHW -> NHWC (channels on lanes) and pad C to a multiple of 128 lanes.
    # Padded channels see zero input / zero taps / zero gamma/beta -> conv output 0,
    # mean 0, var 0 -> scale 0, shift 0 -> output exactly 0 and finite (rsqrt(eps));
    # they are sliced off below. Keep the pad values zero if this is ever changed.
    x = jnp.transpose(x_nchw, (0, 2, 3, 1))
    x = jnp.pad(x, ((0, 0), (0, 0), (0, 0), (0, pad_c)))

    # (C,1,3,3) -> (3,3,C) -> (9,C): w9[di*3+dj, c] == w_oihw[c,0,di,dj].
    w9 = jnp.transpose(w_oihw[:, 0, :, :], (1, 2, 0)).reshape(9, C)
    w9 = jnp.pad(w9, ((0, 0), (0, pad_c)))
    g2 = jnp.pad(gamma, (0, pad_c)).reshape(1, C_pad)
    b2 = jnp.pad(beta, (0, pad_c)).reshape(1, C_pad)

    out_nhwc = pl.pallas_call(
        dwconv_bn_kernel,
        out_shape=jax.ShapeDtypeStruct((N, H, W, C_pad), x_nchw.dtype),
        grid=(n_blocks,),
        in_specs=[
            pl.BlockSpec((N, H, W, c_block), lambda c: (0, 0, 0, c)),
            pl.BlockSpec((9, c_block), lambda c: (0, c)),
            pl.BlockSpec((1, c_block), lambda c: (0, c)),
            pl.BlockSpec((1, c_block), lambda c: (0, c)),
        ],
        out_specs=pl.BlockSpec((N, H, W, c_block), lambda c: (0, 0, 0, c)),
        scratch_shapes=[pltpu.VMEM((N, H + 2, W + 2, c_block), jnp.float32)],
        compiler_params=pltpu.CompilerParams(
            # Channel blocks are fully independent (BN stats are per-channel over
            # N,H,W) and the kernel does not rely on scratch persistence, so this
            # axis is safely "parallel" -> megacore sharding on v7x.
            dimension_semantics=("parallel",),
            vmem_limit_bytes=32 * 1024 * 1024,
        ),
    )(x, w9, g2, b2)

    return jnp.transpose(out_nhwc[..., :C], (0, 3, 1, 2))


def _reference(x_nchw, w_oihw, gamma, beta):
    C = x_nchw.shape[1]
    y = jax.lax.conv_general_dilated(
        x_nchw, w_oihw,
        window_strides=(1, 1), padding=((1, 1), (1, 1)),
        dimension_numbers=("NCHW", "OIHW", "NCHW"),
        feature_group_count=C)
    mean = jnp.mean(y, axis=(0, 2, 3), keepdims=True)
    var = jnp.mean((y - mean) ** 2, axis=(0, 2, 3), keepdims=True)
    return (y - mean) * jax.lax.rsqrt(var + EPS) * gamma.reshape(1, C, 1, 1) \
        + beta.reshape(1, C, 1, 1)


if __name__ == "__main__":
    # Shapes implied by the module: x261 ~ (1, 864, 14, 14), depthwise 3x3.
    N, C, H, W = 1, 864, 14, 14

    key = jax.random.PRNGKey(0)
    kx, kw, kg, kb = jax.random.split(key, 4)

    x = jax.random.normal(kx, (N, C, H, W), dtype=jnp.float32)
    # Conv2d(864, 864, 3, groups=864, bias=False) weight shape: (864, 1, 3, 3)
    w = 0.1 * jax.random.normal(kw, (C, 1, 3, 3), dtype=jnp.float32)
    # BatchNorm2d affine params (perturbed from default 1/0 init to exercise the path)
    gamma = 1.0 + 0.1 * jax.random.normal(kg, (C,), dtype=jnp.float32)
    beta = 0.1 * jax.random.normal(kb, (C,), dtype=jnp.float32)

    out = depthwise_conv_bn(x, w, gamma, beta)
    out = jax.block_until_ready(out)

    ref = _reference(x, w, gamma, beta)
    assert out.shape == (N, C, H, W)
    assert jnp.allclose(out, ref, atol=1e-4, rtol=1e-4), "mismatch vs reference"

    print("KERNEL_OK")
</pallas_src>

<mosaic_0001>
module attributes {stable_mosaic.version = 11 : i64} {
  func.func @dwconv_bn_kernel(%arg0: i32, %arg1: memref<1x14x14x512xf32, #tpu.memory_space<vmem>>, %arg2: memref<9x512xf32, #tpu.memory_space<vmem>>, %arg3: memref<1x512xf32, #tpu.memory_space<vmem>>, %arg4: memref<1x512xf32, #tpu.memory_space<vmem>>, %arg5: memref<1x14x14x512xf32, #tpu.memory_space<vmem>>, %arg6: memref<1x16x16x512xf32, #tpu.memory_space<vmem>>) attributes {dimension_semantics = [#tpu.dimension_semantics<parallel>], iteration_bounds = array<i64: 2>, scalar_prefetch = 0 : i64, scratch_operands = 1 : i64, tpu.core_type = #tpu.core_type<tc>, window_params = [{transform_indices = @transform_0, window_bounds = array<i64: 1, 14, 14, 512>}, {transform_indices = @transform_1, window_bounds = array<i64: 9, 512>}, {transform_indices = @transform_2, window_bounds = array<i64: 1, 512>}, {transform_indices = @transform_3, window_bounds = array<i64: 1, 512>}, {transform_indices = @transform_4, window_bounds = array<i64: 1, 14, 14, 512>}]} {
    %cst = arith.constant 0.000000e+00 : f32
    %0 = vector.broadcast %cst : f32 to vector<1x1x16x512xf32>
    %c0 = arith.constant 0 : index
    %c0_0 = arith.constant 0 : index
    %c0_1 = arith.constant 0 : index
    %c0_2 = arith.constant 0 : index
    %1 = vector.load %arg6[%c0, %c0_0, %c0_1, %c0_2] : memref<1x16x16x512xf32, #tpu.memory_space<vmem>>, vector<1x1x16x512xf32>
    tpu.vector_store %arg6[%c0, %c0_0, %c0_1, %c0_2], %0 {strides = array<i32>} : memref<1x16x16x512xf32, #tpu.memory_space<vmem>>, vector<1x1x16x512xf32>,
    %c0_3 = arith.constant 0 : index
    %c15 = arith.constant 15 : index
    %c0_4 = arith.constant 0 : index
    %c0_5 = arith.constant 0 : index
    %2 = vector.load %arg6[%c0_3, %c15, %c0_4, %c0_5] : memref<1x16x16x512xf32, #tpu.memory_space<vmem>>, vector<1x1x16x512xf32>
    tpu.vector_store %arg6[%c0_3, %c15, %c0_4, %c0_5], %0 {strides = array<i32>} : memref<1x16x16x512xf32, #tpu.memory_space<vmem>>, vector<1x1x16x512xf32>,
    %cst_6 = arith.constant 0.000000e+00 : f32
    %3 = vector.broadcast %cst_6 : f32 to vector<1x16x2x512xf32>
    %c0_7 = arith.constant 0 : index
    %c0_8 = arith.constant 0 : index
    %c14 = arith.constant 14 : index
    %c0_9 = arith.constant 0 : index
    %4 = vector.load %arg6[%c0_7, %c0_8, %c14, %c0_9] : memref<1x16x16x512xf32, #tpu.memory_space<vmem>>, vector<1x16x2x512xf32>
    tpu.vector_store %arg6[%c0_7, %c0_8, %c14, %c0_9], %3 {strides = array<i32>} : memref<1x16x16x512xf32, #tpu.memory_space<vmem>>, vector<1x16x2x512xf32>,
    %c0_10 = arith.constant 0 : index
    %c0_11 = arith.constant 0 : index
    %c0_12 = arith.constant 0 : index
    %c0_13 = arith.constant 0 : index
    %5 = vector.load %arg1[%c0_10, %c0_11, %c0_12, %c0_13] : memref<1x14x14x512xf32, #tpu.memory_space<vmem>>, vector<1x14x14x512xf32>
    %c0_14 = arith.constant 0 : index
    %c1 = arith.constant 1 : index
    %c0_15 = arith.constant 0 : index
    %c0_16 = arith.constant 0 : index
    %6 = vector.load %arg6[%c0_14, %c1, %c0_15, %c0_16] : memref<1x16x16x512xf32, #tpu.memory_space<vmem>>, vector<1x14x14x512xf32>
    tpu.vector_store %arg6[%c0_14, %c1, %c0_15, %c0_16], %5 {strides = array<i32>} : memref<1x16x16x512xf32, #tpu.memory_space<vmem>>, vector<1x14x14x512xf32>,
    %c0_17 = arith.constant 0 : index
    %c0_18 = arith.constant 0 : index
    %c0_19 = arith.constant 0 : index
    %c0_20 = arith.constant 0 : index
    %7 = vector.load %arg6[%c0_17, %c0_18, %c0_19, %c0_20] : memref<1x16x16x512xf32, #tpu.memory_space<vmem>>, vector<1x16x16x512xf32>
    %c0_21 = arith.constant 0 : index
    %c0_22 = arith.constant 0 : index
    %8 = vector.load %arg2[%c0_21, %c0_22] : memref<9x512xf32, #tpu.memory_space<vmem>>, vector<9x512xf32>
    %cst_23 = arith.constant 0.000000e+00 : f32
    %9 = vector.broadcast %cst_23 : f32 to vector<1x14x16x512xf32>
    %c1_i32 = arith.constant 1 : i32
    %10 = tpu.dynamic_rotate %7 by %c1_i32 dim 2 : vector<1x16x16x512xf32>, i32 -> vector<1x16x16x512xf32>
    %11 = vector.extract_strided_slice %10 {offsets = [0, 0, 0, 0], sizes = [1, 14, 16, 512], strides = [1, 1, 1, 1]} : vector<1x16x16x512xf32> to vector<1x14x16x512xf32>
    %12 = vector.extract_strided_slice %8 {offsets = [0, 0], sizes = [1, 512], strides = [1, 1]} : vector<9x512xf32> to vector<1x512xf32>
    %13 = vector.shape_cast %12 : vector<1x512xf32> to vector<512xf32>
    %14 = vector.shape_cast %13 : vector<512xf32> to vector<1x1x1x512xf32>
    %15 = vector.broadcast %14 : vector<1x1x1x512xf32> to vector<1x14x16x512xf32>
    %16 = arith.mulf %11, %15 : vector<1x14x16x512xf32>
    %17 = arith.addf %9, %16 : vector<1x14x16x512xf32>
    %18 = vector.extract_strided_slice %10 {offsets = [0, 1, 0, 0], sizes = [1, 14, 16, 512], strides = [1, 1, 1, 1]} : vector<1x16x16x512xf32> to vector<1x14x16x512xf32>
    %19 = vector.extract_strided_slice %8 {offsets = [3, 0], sizes = [1, 512], strides = [1, 1]} : vector<9x512xf32> to vector<1x512xf32>
    %20 = vector.shape_cast %19 : vector<1x512xf32> to vector<512xf32>
    %21 = vector.shape_cast %20 : vector<512xf32> to vector<1x1x1x512xf32>
    %22 = vector.broadcast %21 : vector<1x1x1x512xf32> to vector<1x14x16x512xf32>
    %23 = arith.mulf %18, %22 : vector<1x14x16x512xf32>
    %24 = arith.addf %17, %23 : vector<1x14x16x512xf32>
    %25 = vector.extract_strided_slice %10 {offsets = [0, 2, 0, 0], sizes = [1, 14, 16, 512], strides = [1, 1, 1, 1]} : vector<1x16x16x512xf32> to vector<1x14x16x512xf32>
    %26 = vector.extract_strided_slice %8 {offsets = [6, 0], sizes = [1, 512], strides = [1, 1]} : vector<9x512xf32> to vector<1x512xf32>
    %27 = vector.shape_cast %26 : vector<1x512xf32> to vector<512xf32>
    %28 = vector.shape_cast %27 : vector<512xf32> to vector<1x1x1x512xf32>
    %29 = vector.broadcast %28 : vector<1x1x1x512xf32> to vector<1x14x16x512xf32>
    %30 = arith.mulf %25, %29 : vector<1x14x16x512xf32>
    %31 = arith.addf %24, %30 : vector<1x14x16x512xf32>
    %32 = vector.extract_strided_slice %7 {offsets = [0, 0, 0, 0], sizes = [1, 14, 16, 512], strides = [1, 1, 1, 1]} : vector<1x16x16x512xf32> to vector<1x14x16x512xf32>
    %33 = vector.extract_strided_slice %8 {offsets = [1, 0], sizes = [1, 512], strides = [1, 1]} : vector<9x512xf32> to vector<1x512xf32>
    %34 = vector.shape_cast %33 : vector<1x512xf32> to vector<512xf32>
    %35 = vector.shape_cast %34 : vector<512xf32> to vector<1x1x1x512xf32>
    %36 = vector.broadcast %35 : vector<1x1x1x512xf32> to vector<1x14x16x512xf32>
    %37 = arith.mulf %32, %36 : vector<1x14x16x512xf32>
    %38 = arith.addf %31, %37 : vector<1x14x16x512xf32>
    %39 = vector.extract_strided_slice %7 {offsets = [0, 1, 0, 0], sizes = [1, 14, 16, 512], strides = [1, 1, 1, 1]} : vector<1x16x16x512xf32> to vector<1x14x16x512xf32>
    %40 = vector.extract_strided_slice %8 {offsets = [4, 0], sizes = [1, 512], strides = [1, 1]} : vector<9x512xf32> to vector<1x512xf32>
    %41 = vector.shape_cast %40 : vector<1x512xf32> to vector<512xf32>
    %42 = vector.shape_cast %41 : vector<512xf32> to vector<1x1x1x512xf32>
    %43 = vector.broadcast %42 : vector<1x1x1x512xf32> to vector<1x14x16x512xf32>
    %44 = arith.mulf %39, %43 : vector<1x14x16x512xf32>
    %45 = arith.addf %38, %44 : vector<1x14x16x512xf32>
    %46 = vector.extract_strided_slice %7 {offsets = [0, 2, 0, 0], sizes = [1, 14, 16, 512], strides = [1, 1, 1, 1]} : vector<1x16x16x512xf32> to vector<1x14x16x512xf32>
    %47 = vector.extract_strided_slice %8 {offsets = [7, 0], sizes = [1, 512], strides = [1, 1]} : vector<9x512xf32> to vector<1x512xf32>
    %48 = vector.shape_cast %47 : vector<1x512xf32> to vector<512xf32>
    %49 = vector.shape_cast %48 : vector<512xf32> to vector<1x1x1x512xf32>
    %50 = vector.broadcast %49 : vector<1x1x1x512xf32> to vector<1x14x16x512xf32>
    %51 = arith.mulf %46, %50 : vector<1x14x16x512xf32>
    %52 = arith.addf %45, %51 : vector<1x14x16x512xf32>
    %c15_i32 = arith.constant 15 : i32
    %53 = tpu.dynamic_rotate %7 by %c15_i32 dim 2 : vector<1x16x16x512xf32>, i32 -> vector<1x16x16x512xf32>
    %54 = vector.extract_strided_slice %53 {offsets = [0, 0, 0, 0], sizes = [1, 14, 16, 512], strides = [1, 1, 1, 1]} : vector<1x16x16x512xf32> to vector<1x14x16x512xf32>
    %55 = vector.extract_strided_slice %8 {offsets = [2, 0], sizes = [1, 512], strides = [1, 1]} : vector<9x512xf32> to vector<1x512xf32>
    %56 = vector.shape_cast %55 : vector<1x512xf32> to vector<512xf32>
    %57 = vector.shape_cast %56 : vector<512xf32> to vector<1x1x1x512xf32>
    %58 = vector.broadcast %57 : vector<1x1x1x512xf32> to vector<1x14x16x512xf32>
    %59 = arith.mulf %54, %58 : vector<1x14x16x512xf32>
    %60 = arith.addf %52, %59 : vector<1x14x16x512xf32>
    %61 = vector.extract_strided_slice %53 {offsets = [0, 1, 0, 0], sizes = [1, 14, 16, 512], strides = [1, 1, 1, 1]} : vector<1x16x16x512xf32> to vector<1x14x16x512xf32>
    %62 = vector.extract_strided_slice %8 {offsets = [5, 0], sizes = [1, 512], strides = [1, 1]} : vector<9x512xf32> to vector<1x512xf32>
    %63 = vector.shape_cast %62 : vector<1x512xf32> to vector<512xf32>
    %64 = vector.shape_cast %63 : vector<512xf32> to vector<1x1x1x512xf32>
    %65 = vector.broadcast %64 : vector<1x1x1x512xf32> to vector<1x14x16x512xf32>
    %66 = arith.mulf %61, %65 : vector<1x14x16x512xf32>
    %67 = arith.addf %60, %66 : vector<1x14x16x512xf32>
    %68 = vector.extract_strided_slice %53 {offsets = [0, 2, 0, 0], sizes = [1, 14, 16, 512], strides = [1, 1, 1, 1]} : vector<1x16x16x512xf32> to vector<1x14x16x512xf32>
    %69 = vector.extract_strided_slice %8 {offsets = [8, 0], sizes = [1, 512], strides = [1, 1]} : vector<9x512xf32> to vector<1x512xf32>
    %70 = vector.shape_cast %69 : vector<1x512xf32> to vector<512xf32>
    %71 = vector.shape_cast %70 : vector<512xf32> to vector<1x1x1x512xf32>
    %72 = vector.broadcast %71 : vector<1x1x1x512xf32> to vector<1x14x16x512xf32>
    %73 = arith.mulf %68, %72 : vector<1x14x16x512xf32>
    %74 = arith.addf %67, %73 : vector<1x14x16x512xf32>
    %75 = vector.extract_strided_slice %74 {offsets = [0, 0, 0, 0], sizes = [1, 14, 14, 512], strides = [1, 1, 1, 1]} : vector<1x14x16x512xf32> to vector<1x14x14x512xf32>
    %cst_24 = arith.constant dense<0.000000e+00> : vector<512xf32>
    %76 = vector.multi_reduction <add>, %75, %cst_24 [0, 1, 2] : vector<1x14x14x512xf32> to vector<512xf32>
    %77 = vector.shape_cast %76 : vector<512xf32> to vector<1x1x1x512xf32>
    %78 = arith.mulf %75, %75 : vector<1x14x14x512xf32>
    %cst_25 = arith.constant dense<0.000000e+00> : vector<512xf32>
    %79 = vector.multi_reduction <add>, %78, %cst_25 [0, 1, 2] : vector<1x14x14x512xf32> to vector<512xf32>
    %80 = vector.shape_cast %79 : vector<512xf32> to vector<1x1x1x512xf32>
    %cst_26 = arith.constant 0.00510204071 : f32
    %81 = vector.broadcast %cst_26 : f32 to vector<1x1x1x512xf32>
    %82 = arith.mulf %77, %81 : vector<1x1x1x512xf32>
    %cst_27 = arith.constant 0.00510204071 : f32
    %83 = vector.broadcast %cst_27 : f32 to vector<1x1x1x512xf32>
    %84 = arith.mulf %80, %83 : vector<1x1x1x512xf32>
    %85 = arith.mulf %82, %82 : vector<1x1x1x512xf32>
    %86 = arith.subf %84, %85 : vector<1x1x1x512xf32>
    %cst_28 = arith.constant 0.000000e+00 : f32
    %87 = vector.broadcast %cst_28 : f32 to vector<1x1x1x512xf32>
    %88 = arith.maximumf %86, %87 : vector<1x1x1x512xf32>
    %cst_29 = arith.constant 1.000000e-03 : f32
    %89 = vector.broadcast %cst_29 : f32 to vector<1x1x1x512xf32>
    %90 = arith.addf %88, %89 : vector<1x1x1x512xf32>
    %91 = math.rsqrt %90 : vector<1x1x1x512xf32>
    %c0_30 = arith.constant 0 : index
    %c0_31 = arith.constant 0 : index
    %92 = vector.load %arg3[%c0_30, %c0_31] : memref<1x512xf32, #tpu.memory_space<vmem>>, vector<1x512xf32>
    %93 = vector.shape_cast %92 : vector<1x512xf32> to vector<512xf32>
    %94 = vector.shape_cast %93 : vector<512xf32> to vector<1x1x1x512xf32>
    %95 = arith.mulf %91, %94 : vector<1x1x1x512xf32>
    %c0_32 = arith.constant 0 : index
    %c0_33 = arith.constant 0 : index
    %96 = vector.load %arg4[%c0_32, %c0_33] : memref<1x512xf32, #tpu.memory_space<vmem>>, vector<1x512xf32>
    %97 = vector.shape_cast %96 : vector<1x512xf32> to vector<512xf32>
    %98 = arith.mulf %82, %95 : vector<1x1x1x512xf32>
    %99 = vector.shape_cast %97 : vector<512xf32> to vector<1x1x1x512xf32>
    %100 = arith.subf %99, %98 : vector<1x1x1x512xf32>
    %101 = vector.broadcast %95 : vector<1x1x1x512xf32> to vector<1x14x14x512xf32>
    %102 = arith.mulf %75, %101 : vector<1x14x14x512xf32>
    %103 = vector.broadcast %100 : vector<1x1x1x512xf32> to vector<1x14x14x512xf32>
    %104 = arith.addf %102, %103 : vector<1x14x14x512xf32>
    %c0_34 = arith.constant 0 : index
    %c0_35 = arith.constant 0 : index
    %c0_36 = arith.constant 0 : index
    %c0_37 = arith.constant 0 : index
    %105 = vector.load %arg5[%c0_34, %c0_35, %c0_36, %c0_37] : memref<1x14x14x512xf32, #tpu.memory_space<vmem>>, vector<1x14x14x512xf32>
    tpu.vector_store %arg5[%c0_34, %c0_35, %c0_36, %c0_37], %104 {strides = array<i32>} : memref<1x14x14x512xf32, #tpu.memory_space<vmem>>, vector<1x14x14x512xf32>,
    return
  }
  func.func @transform_0(%arg0: i32) -> (i32, i32, i32, i32) {
    %c0_i32 = arith.constant 0 : i32
    %c0_i32_0 = arith.constant 0 : i32
    %c0_i32_1 = arith.constant 0 : i32
    %c0_i32_2 = arith.constant 0 : i32
    return %c0_i32, %c0_i32_0, %c0_i32_1, %arg0 : i32, i32, i32, i32
  }
  func.func @transform_1(%arg0: i32) -> (i32, i32) {
    %c0_i32 = arith.constant 0 : i32
    %c0_i32_0 = arith.constant 0 : i32
    return %c0_i32, %arg0 : i32, i32
  }
  func.func @transform_2(%arg0: i32) -> (i32, i32) {
    %c0_i32 = arith.constant 0 : i32
    %c0_i32_0 = arith.constant 0 : i32
    return %c0_i32, %arg0 : i32, i32
  }
  func.func @transform_3(%arg0: i32) -> (i32, i32) {
    %c0_i32 = arith.constant 0 : i32
    %c0_i32_0 = arith.constant 0 : i32
    return %c0_i32, %arg0 : i32, i32
  }
  func.func @transform_4(%arg0: i32) -> (i32, i32, i32, i32) {
    %c0_i32 = arith.constant 0 : i32
    %c0_i32_0 = arith.constant 0 : i32
    %c0_i32_1 = arith.constant 0 : i32
    %c0_i32_2 = arith.constant 0 : i32
    return %c0_i32, %c0_i32_0, %c0_i32_1, %arg0 : i32, i32, i32, i32
  }
}

</mosaic_0001>

<bundles_post_ra>
// kernel: tpu_custom_call.1
= control target key start
LH: loop header
LB: loop body
LE: loop exit
PB: predicated region body
PF: predicated region fallthrough
CT: control target
= control target key end

     0   :  { %s5119_s15 = smov 0   ;;  %s5121_s16 = smov 0   ;;  %s12827_s0 = inlined_call_operand.vmem [shape: f32[1,14,14,1024], index: 0, kind: input, shape index: {}]   ;;  %s12828_s1 = inlined_call_operand.vmem [shape: f32[9,1024], index: 1, kind: input, shape index: {}]   ;;  %s12829_s2 = inlined_call_operand.vmem [shape: f32[1,1024], index: 2, kind: input, shape index: {}]   ;;  %s12830_s3 = inlined_call_operand.vmem [shape: f32[1,1024], index: 3, kind: input, shape index: {}]   ;;  %s12831_s4 = inlined_call_operand.vmem [shape: f32[1,14,14,1024], index: 4, kind: output, shape index: {}]  }
   0x1   :  { %s5123_s17 = smov 0  }
   0x2 LB: > { %s5135_s18 = sadd.s32 4294967295, %s5090_s17   ;;  %s5138_s19 = sadd.s32 1, %s5090_s17   ;;  %s5090_s17 = sphi %s5123_s17, %s15036_s17   ;;  %s5086_s16 = sphi %s5121_s16, %s15035_s16   ;;  %s5082_s15 = sphi %s5119_s15, %s15034_s15  }
   0x3   : > { %s18_s20 = ssub.s32 %s5090_s17, %s5138_s19  ;;  %s21_s21 = sadd.s32 1, %s5086_s16 }
   0x4   : > { %p19_p0 = scmp.eq.s32.totalorder %s18_s20, 0  ;;  %p28_p1 = scmp.ne.s32.totalorder %s5086_s16, %s5082_s15 }
   0x5   : > { %p29_p2 = scmp.eq.s32.totalorder %s5090_s17, 0  ;;  %p136_p3 = scmp.eq.s32.totalorder %s5135_s18, 1 }
   0x6   : > { %s5148_s22 = scalar_select %p19_p0, %s5086_s16, %s21_s21  }
   0x7   : > { %p5150_p4 = por %p29_p2, %p28_p1  ;;  %p5154_p5 = por %p136_p3, %p28_p1 }
   0x8   : > { %p4942_p6 = scmp.ge.s32.totalorder %s5090_s17, 2 }
   0xa   : > { %158 = sbr.rel (%p4942_p6) target bundleno = 86 (0x56), region = 16 }
  0x11   : > { %161 = sbr.rel (!%p5150_p4) target bundleno = 78 (0x4e), region = 20  ;;  %s163_s25 = sand.u32 (%p5150_p4), 1, %s5086_s16  }
  0x12   : > { %s4960_s26 = sshll.u32 (%p5150_p4), %s5090_s17, 5  ;;  %s4963_s27 = smul.u32 (%p5150_p4), 896, %s163_s25 }
  0x13   : > { %s5166_s30 = scalar_lea.vmem (%p5150_p4), %s12827_s0, %s4960_s26 }
  0x14   : > { %v181_v0 = vld [vmem:[%s5166_s30] sm:$0xff] (%p5150_p4)  ;;  %v183_v1 = vld [vmem:[%s5166_s30 + $0x8] sm:$0xff] (%p5150_p4)  ;;  %v185_v2 = vld [vmem:[%s5166_s30 + $0x10] sm:$0xff] (%p5150_p4)  ;;  %s5174_s5 = scalar_lea.vmem (%p5150_p4), [#allocation3], %s4963_s27 }
  0x15   : > { %v187_v3 = vld [vmem:[%s5166_s30 + $0x18] sm:$0xff] (%p5150_p4)  ;;  %v189_v4 = vld [vmem:[%s5166_s30 + $0x40] sm:$0xff] (%p5150_p4)  ;;  %v191_v5 = vld [vmem:[%s5166_s30 + $0x48] sm:$0xff] (%p5150_p4)  ;;  %182 = vst [vmem:[%s5174_s5] sm:$0xff] (%p5150_p4), %v181_v0 }
  0x16   : > { %184 = vst [vmem:[%s5174_s5 + $0x8] sm:$0xff] (%p5150_p4), %v183_v1  ;;  %186 = vst [vmem:[%s5174_s5 + $0x10] sm:$0xff] (%p5150_p4), %v185_v2  ;;  %v193_v6 = vld [vmem:[%s5166_s30 + $0x50] sm:$0xff] (%p5150_p4)  ;;  %v195_v7 = vld [vmem:[%s5166_s30 + $0x58] sm:$0xff] (%p5150_p4) }
  0x17   : > { %188 = vst [vmem:[%s5174_s5 + $0x18] sm:$0xff] (%p5150_p4), %v187_v3  ;;  %190 = vst [vmem:[%s5174_s5 + $0x20] sm:$0xff] (%p5150_p4), %v189_v4  ;;  %v197_v8 = vld [vmem:[%s5166_s30 + $0x80] sm:$0xff] (%p5150_p4)  ;;  %v199_v9 = vld [vmem:[%s5166_s30 + $0x88] sm:$0xff] (%p5150_p4) }
  0x18   : > { %192 = vst [vmem:[%s5174_s5 + $0x28] sm:$0xff] %v191_v5  ;;  %194 = vst [vmem:[%s5174_s5 + $0x30] sm:$0xff] %v193_v6  ;;  %v201_v10 = vld [vmem:[%s5166_s30 + $0x90] sm:$0xff]  ;;  %v203_v11 = vld [vmem:[%s5166_s30 + $0x98] sm:$0xff] }
  0x19   : > { %196 = vst [vmem:[%s5174_s5 + $0x38] sm:$0xff] %v195_v7  ;;  %198 = vst [vmem:[%s5174_s5 + $0x40] sm:$0xff] %v197_v8  ;;  %v205_v12 = vld [vmem:[%s5166_s30 + $0xc0] sm:$0xff]  ;;  %v207_v13 = vld [vmem:[%s5166_s30 + $0xc8] sm:$0xff] }
  0x1a   : > { %200 = vst [vmem:[%s5174_s5 + $0x48] sm:$0xff] %v199_v9  ;;  %202 = vst [vmem:[%s5174_s5 + $0x50] sm:$0xff] %v201_v10  ;;  %v209_v14 = vld [vmem:[%s5166_s30 + $0xd0] sm:$0xff]  ;;  %v211_v15 = vld [vmem:[%s5166_s30 + $0xd8] sm:$0xff] }
  0x1b   : > { %204 = vst [vmem:[%s5174_s5 + $0x58] sm:$0xff] %v203_v11  ;;  %206 = vst [vmem:[%s5174_s5 + $0x60] sm:$0xff] %v205_v12  ;;  %v213_v16 = vld [vmem:[%s5166_s30 + $0x100] sm:$0xff]  ;;  %v215_v17 = vld [vmem:[%s5166_s30 + $0x108] sm:$0xff] }
  0x1c   : > { %208 = vst [vmem:[%s5174_s5 + $0x68] sm:$0xff] %v207_v13  ;;  %210 = vst [vmem:[%s5174_s5 + $0x70] sm:$0xff] %v209_v14  ;;  %v217_v18 = vld [vmem:[%s5166_s30 + $0x110] sm:$0xff]  ;;  %v219_v19 = vld [vmem:[%s5166_s30 + $0x118] sm:$0xff] }
  0x1d   : > { %212 = vst [vmem:[%s5174_s5 + $0x78] sm:$0xff] %v211_v15  ;;  %214 = vst [vmem:[%s5174_s5 + $0x80] sm:$0xff] %v213_v16  ;;  %v221_v20 = vld [vmem:[%s5166_s30 + $0x140] sm:$0xff]  ;;  %v223_v21 = vld [vmem:[%s5166_s30 + $0x148] sm:$0xff] }
  0x1e   : > { %216 = vst [vmem:[%s5174_s5 + $0x88] sm:$0xff] %v215_v17  ;;  %218 = vst [vmem:[%s5174_s5 + $0x90] sm:$0xff] %v217_v18  ;;  %v225_v22 = vld [vmem:[%s5166_s30 + $0x150] sm:$0xff]  ;;  %v227_v23 = vld [vmem:[%s5166_s30 + $0x158] sm:$0xff] }
  0x1f   : > { %220 = vst [vmem:[%s5174_s5 + $0x98] sm:$0xff] %v219_v19  ;;  %222 = vst [vmem:[%s5174_s5 + $0xa0] sm:$0xff] %v221_v20  ;;  %v229_v24 = vld [vmem:[%s5166_s30 + $0x180] sm:$0xff]  ;;  %v231_v25 = vld [vmem:[%s5166_s30 + $0x188] sm:$0xff] }
  0x20   : > { %224 = vst [vmem:[%s5174_s5 + $0xa8] sm:$0xff] %v223_v21  ;;  %226 = vst [vmem:[%s5174_s5 + $0xb0] sm:$0xff] %v225_v22  ;;  %v233_v26 = vld [vmem:[%s5166_s30 + $0x190] sm:$0xff]  ;;  %v235_v27 = vld [vmem:[%s5166_s30 + $0x198] sm:$0xff] }
  0x21   : > { %228 = vst [vmem:[%s5174_s5 + $0xb8] sm:$0xff] %v227_v23  ;;  %230 = vst [vmem:[%s5174_s5 + $0xc0] sm:$0xff] %v229_v24  ;;  %v237_v28 = vld [vmem:[%s5166_s30 + $0x1c0] sm:$0xff]  ;;  %v239_v29 = vld [vmem:[%s5166_s30 + $0x1c8] sm:$0xff] }
  0x22   : > { %232 = vst [vmem:[%s5174_s5 + $0xc8] sm:$0xff] %v231_v25  ;;  %234 = vst [vmem:[%s5174_s5 + $0xd0] sm:$0xff] %v233_v26  ;;  %v241_v30 = vld [vmem:[%s5166_s30 + $0x1d0] sm:$0xff]  ;;  %v243_v31 = vld [vmem:[%s5166_s30 + $0x1d8] sm:$0xff] }
  0x23   : > { %236 = vst [vmem:[%s5174_s5 + $0xd8] sm:$0xff] %v235_v27  ;;  %238 = vst [vmem:[%s5174_s5 + $0xe0] sm:$0xff] %v237_v28  ;;  %v245_v32 = vld [vmem:[%s5166_s30 + $0x200] sm:$0xff]  ;;  %v247_v33 = vld [vmem:[%s5166_s30 + $0x208] sm:$0xff] }
  0x24   : > { %240 = vst [vmem:[%s5174_s5 + $0xe8] sm:$0xff] %v239_v29  ;;  %242 = vst [vmem:[%s5174_s5 + $0xf0] sm:$0xff] %v241_v30  ;;  %v249_v34 = vld [vmem:[%s5166_s30 + $0x210] sm:$0xff]  ;;  %v251_v35 = vld [vmem:[%s5166_s30 + $0x218] sm:$0xff] }
  0x25   : > { %244 = vst [vmem:[%s5174_s5 + $0xf8] sm:$0xff] %v243_v31  ;;  %246 = vst [vmem:[%s5174_s5 + $0x100] sm:$0xff] %v245_v32  ;;  %v253_v36 = vld [vmem:[%s5166_s30 + $0x240] sm:$0xff]  ;;  %v255_v37 = vld [vmem:[%s5166_s30 + $0x248] sm:$0xff] }
  0x26   : > { %248 = vst [vmem:[%s5174_s5 + $0x108] sm:$0xff] %v247_v33  ;;  %250 = vst [vmem:[%s5174_s5 + $0x110] sm:$0xff] %v249_v34  ;;  %v257_v38 = vld [vmem:[%s5166_s30 + $0x250] sm:$0xff]  ;;  %v259_v39 = vld [vmem:[%s5166_s30 + $0x258] sm:$0xff] }
  0x27   : > { %252 = vst [vmem:[%s5174_s5 + $0x118] sm:$0xff] %v251_v35  ;;  %254 = vst [vmem:[%s5174_s5 + $0x120] sm:$0xff] %v253_v36  ;;  %v261_v40 = vld [vmem:[%s5166_s30 + $0x280] sm:$0xff]  ;;  %v263_v41 = vld [vmem:[%s5166_s30 + $0x288] sm:$0xff] }
  0x28   : > { %256 = vst [vmem:[%s5174_s5 + $0x128] sm:$0xff] %v255_v37  ;;  %258 = vst [vmem:[%s5174_s5 + $0x130] sm:$0xff] %v257_v38  ;;  %v265_v42 = vld [vmem:[%s5166_s30 + $0x290] sm:$0xff]  ;;  %v267_v43 = vld [vmem:[%s5166_s30 + $0x298] sm:$0xff] }
  0x29   : > { %260 = vst [vmem:[%s5174_s5 + $0x138] sm:$0xff] %v259_v39  ;;  %262 = vst [vmem:[%s5174_s5 + $0x140] sm:$0xff] %v261_v40  ;;  %v269_v44 = vld [vmem:[%s5166_s30 + $0x2c0] sm:$0xff]  ;;  %v271_v45 = vld [vmem:[%s5166_s30 + $0x2c8] sm:$0xff] }
  0x2a   : > { %264 = vst [vmem:[%s5174_s5 + $0x148] sm:$0xff] %v263_v41  ;;  %266 = vst [vmem:[%s5174_s5 + $0x150] sm:$0xff] %v265_v42  ;;  %v273_v46 = vld [vmem:[%s5166_s30 + $0x2d0] sm:$0xff]  ;;  %v275_v47 = vld [vmem:[%s5166_s30 + $0x2d8] sm:$0xff] }
  0x2b   : > { %268 = vst [vmem:[%s5174_s5 + $0x158] sm:$0xff] %v267_v43  ;;  %270 = vst [vmem:[%s5174_s5 + $0x160] sm:$0xff] %v269_v44  ;;  %v277_v48 = vld [vmem:[%s5166_s30 + $0x300] sm:$0xff]  ;;  %v279_v49 = vld [vmem:[%s5166_s30 + $0x308] sm:$0xff] }
  0x2c   : > { %272 = vst [vmem:[%s5174_s5 + $0x168] sm:$0xff] %v271_v45  ;;  %274 = vst [vmem:[%s5174_s5 + $0x170] sm:$0xff] %v273_v46  ;;  %v281_v50 = vld [vmem:[%s5166_s30 + $0x310] sm:$0xff]  ;;  %v283_v51 = vld [vmem:[%s5166_s30 + $0x318] sm:$0xff] }
  0x2d   : > { %276 = vst [vmem:[%s5174_s5 + $0x178] sm:$0xff] %v275_v47  ;;  %278 = vst [vmem:[%s5174_s5 + $0x180] sm:$0xff] %v277_v48  ;;  %v285_v52 = vld [vmem:[%s5166_s30 + $0x340] sm:$0xff]  ;;  %v287_v53 = vld [vmem:[%s5166_s30 + $0x348] sm:$0xff] }
  0x2e   : > { %280 = vst [vmem:[%s5174_s5 + $0x188] sm:$0xff] %v279_v49  ;;  %282 = vst [vmem:[%s5174_s5 + $0x190] sm:$0xff] %v281_v50  ;;  %v289_v54 = vld [vmem:[%s5166_s30 + $0x350] sm:$0xff]  ;;  %v291_v55 = vld [vmem:[%s5166_s30 + $0x358] sm:$0xff] }
  0x2f   : > { %284 = vst [vmem:[%s5174_s5 + $0x198] sm:$0xff] %v283_v51  ;;  %286 = vst [vmem:[%s5174_s5 + $0x1a0] sm:$0xff] %v285_v52  ;;  %v293_v56 = vld [vmem:[%s5166_s30 + $0x380] sm:$0xff]  ;;  %v295_v57 = vld [vmem:[%s5166_s30 + $0x388] sm:$0xff] }
  0x30   : > { %288 = vst [vmem:[%s5174_s5 + $0x1a8] sm:$0xff] %v287_v53  ;;  %290 = vst [vmem:[%s5174_s5 + $0x1b0] sm:$0xff] %v289_v54  ;;  %v297_v58 = vld [vmem:[%s5166_s30 + $0x390] sm:$0xff]  ;;  %v299_v59 = vld [vmem:[%s5166_s30 + $0x398] sm:$0xff] }
  0x31   : > { %292 = vst [vmem:[%s5174_s5 + $0x1b8] sm:$0xff] %v291_v55  ;;  %294 = vst [vmem:[%s5174_s5 + $0x1c0] sm:$0xff] %v293_v56  ;;  %v301_v60 = vld [vmem:[%s5166_s30 + $0x3c0] sm:$0xff]  ;;  %v303_v61 = vld [vmem:[%s5166_s30 + $0x3c8] sm:$0xff] }
  0x32   : > { %296 = vst [vmem:[%s5174_s5 + $0x1c8] sm:$0xff] %v295_v57  ;;  %298 = vst [vmem:[%s5174_s5 + $0x1d0] sm:$0xff] %v297_v58  ;;  %v305_v62 = vld [vmem:[%s5166_s30 + $0x3d0] sm:$0xff]  ;;  %v307_v63 = vld [vmem:[%s5166_s30 + $0x3d8] sm:$0xff] }
  0x33   : > { %300 = vst [vmem:[%s5174_s5 + $0x1d8] sm:$0xff] %v299_v59  ;;  %302 = vst [vmem:[%s5174_s5 + $0x1e0] sm:$0xff] %v301_v60  ;;  %v309_v0 = vld [vmem:[%s5166_s30 + $0x400] sm:$0xff]  ;;  %v311_v1 = vld [vmem:[%s5166_s30 + $0x408] sm:$0xff] }
  0x34   : > { %304 = vst [vmem:[%s5174_s5 + $0x1e8] sm:$0xff] %v303_v61  ;;  %306 = vst [vmem:[%s5174_s5 + $0x1f0] sm:$0xff] %v305_v62  ;;  %v313_v2 = vld [vmem:[%s5166_s30 + $0x410] sm:$0xff]  ;;  %v315_v3 = vld [vmem:[%s5166_s30 + $0x418] sm:$0xff] }
  0x35   : > { %308 = vst [vmem:[%s5174_s5 + $0x1f8] sm:$0xff] %v307_v63  ;;  %310 = vst [vmem:[%s5174_s5 + $0x200] sm:$0xff] %v309_v0  ;;  %v317_v4 = vld [vmem:[%s5166_s30 + $0x440] sm:$0xff]  ;;  %v319_v5 = vld [vmem:[%s5166_s30 + $0x448] sm:$0xff] }
  0x36   : > { %312 = vst [vmem:[%s5174_s5 + $0x208] sm:$0xff] %v311_v1  ;;  %314 = vst [vmem:[%s5174_s5 + $0x210] sm:$0xff] %v313_v2  ;;  %v321_v6 = vld [vmem:[%s5166_s30 + $0x450] sm:$0xff]  ;;  %v323_v7 = vld [vmem:[%s5166_s30 + $0x458] sm:$0xff] }
  0x37   : > { %316 = vst [vmem:[%s5174_s5 + $0x218] sm:$0xff] %v315_v3  ;;  %318 = vst [vmem:[%s5174_s5 + $0x220] sm:$0xff] %v317_v4  ;;  %v325_v8 = vld [vmem:[%s5166_s30 + $0x480] sm:$0xff]  ;;  %v327_v9 = vld [vmem:[%s5166_s30 + $0x488] sm:$0xff] }
  0x38   : > { %320 = vst [vmem:[%s5174_s5 + $0x228] sm:$0xff] %v319_v5  ;;  %322 = vst [vmem:[%s5174_s5 + $0x230] sm:$0xff] %v321_v6  ;;  %v329_v10 = vld [vmem:[%s5166_s30 + $0x490] sm:$0xff]  ;;  %v331_v11 = vld [vmem:[%s5166_s30 + $0x498] sm:$0xff] }
  0x39   : > { %324 = vst [vmem:[%s5174_s5 + $0x238] sm:$0xff] %v323_v7  ;;  %326 = vst [vmem:[%s5174_s5 + $0x240] sm:$0xff] %v325_v8  ;;  %v333_v12 = vld [vmem:[%s5166_s30 + $0x4c0] sm:$0xff]  ;;  %v335_v13 = vld [vmem:[%s5166_s30 + $0x4c8] sm:$0xff] }
  0x3a   : > { %328 = vst [vmem:[%s5174_s5 + $0x248] sm:$0xff] %v327_v9  ;;  %330 = vst [vmem:[%s5174_s5 + $0x250] sm:$0xff] %v329_v10  ;;  %v337_v14 = vld [vmem:[%s5166_s30 + $0x4d0] sm:$0xff]  ;;  %v339_v15 = vld [vmem:[%s5166_s30 + $0x4d8] sm:$0xff] }
  0x3b   : > { %332 = vst [vmem:[%s5174_s5 + $0x258] sm:$0xff] %v331_v11  ;;  %334 = vst [vmem:[%s5174_s5 + $0x260] sm:$0xff] %v333_v12  ;;  %v341_v16 = vld [vmem:[%s5166_s30 + $0x500] sm:$0xff]  ;;  %v343_v17 = vld [vmem:[%s5166_s30 + $0x508] sm:$0xff] }
  0x3c   : > { %336 = vst [vmem:[%s5174_s5 + $0x268] sm:$0xff] %v335_v13  ;;  %338 = vst [vmem:[%s5174_s5 + $0x270] sm:$0xff] %v337_v14  ;;  %v345_v18 = vld [vmem:[%s5166_s30 + $0x510] sm:$0xff]  ;;  %v347_v19 = vld [vmem:[%s5166_s30 + $0x518] sm:$0xff] }
  0x3d   : > { %340 = vst [vmem:[%s5174_s5 + $0x278] sm:$0xff] %v339_v15  ;;  %342 = vst [vmem:[%s5174_s5 + $0x280] sm:$0xff] %v341_v16  ;;  %v349_v20 = vld [vmem:[%s5166_s30 + $0x540] sm:$0xff]  ;;  %v351_v21 = vld [vmem:[%s5166_s30 + $0x548] sm:$0xff] }
  0x3e   : > { %344 = vst [vmem:[%s5174_s5 + $0x288] sm:$0xff] %v343_v17  ;;  %346 = vst [vmem:[%s5174_s5 + $0x290] sm:$0xff] %v345_v18  ;;  %v353_v22 = vld [vmem:[%s5166_s30 + $0x550] sm:$0xff]  ;;  %v355_v23 = vld [vmem:[%s5166_s30 + $0x558] sm:$0xff] }
  0x3f   : > { %348 = vst [vmem:[%s5174_s5 + $0x298] sm:$0xff] %v347_v19  ;;  %350 = vst [vmem:[%s5174_s5 + $0x2a0] sm:$0xff] %v349_v20  ;;  %v357_v24 = vld [vmem:[%s5166_s30 + $0x580] sm:$0xff]  ;;  %v359_v25 = vld [vmem:[%s5166_s30 + $0x588] sm:$0xff] }
  0x40   : > { %352 = vst [vmem:[%s5174_s5 + $0x2a8] sm:$0xff] %v351_v21  ;;  %354 = vst [vmem:[%s5174_s5 + $0x2b0] sm:$0xff] %v353_v22  ;;  %v361_v26 = vld [vmem:[%s5166_s30 + $0x590] sm:$0xff]  ;;  %v363_v27 = vld [vmem:[%s5166_s30 + $0x598] sm:$0xff] }
  0x41   : > { %356 = vst [vmem:[%s5174_s5 + $0x2b8] sm:$0xff] %v355_v23  ;;  %358 = vst [vmem:[%s5174_s5 + $0x2c0] sm:$0xff] %v357_v24  ;;  %v365_v28 = vld [vmem:[%s5166_s30 + $0x5c0] sm:$0xff]  ;;  %v367_v29 = vld [vmem:[%s5166_s30 + $0x5c8] sm:$0xff] }
  0x42   : > { %360 = vst [vmem:[%s5174_s5 + $0x2c8] sm:$0xff] %v359_v25  ;;  %362 = vst [vmem:[%s5174_s5 + $0x2d0] sm:$0xff] %v361_v26  ;;  %v369_v30 = vld [vmem:[%s5166_s30 + $0x5d0] sm:$0xff]  ;;  %v371_v31 = vld [vmem:[%s5166_s30 + $0x5d8] sm:$0xff] }
  0x43   : > { %364 = vst [vmem:[%s5174_s5 + $0x2d8] sm:$0xff] %v363_v27  ;;  %366 = vst [vmem:[%s5174_s5 + $0x2e0] sm:$0xff] %v365_v28  ;;  %v373_v32 = vld [vmem:[%s5166_s30 + $0x600] sm:$0xff]  ;;  %v375_v33 = vld [vmem:[%s5166_s30 + $0x608] sm:$0xff] }
  0x44   : > { %368 = vst [vmem:[%s5174_s5 + $0x2e8] sm:$0xff] %v367_v29  ;;  %370 = vst [vmem:[%s5174_s5 + $0x2f0] sm:$0xff] %v369_v30  ;;  %v377_v34 = vld [vmem:[%s5166_s30 + $0x610] sm:$0xff]  ;;  %v379_v35 = vld [vmem:[%s5166_s30 + $0x618] sm:$0xff] }
  0x45   : > { %372 = vst [vmem:[%s5174_s5 + $0x2f8] sm:$0xff] %v371_v31  ;;  %374 = vst [vmem:[%s5174_s5 + $0x300] sm:$0xff] %v373_v32  ;;  %v381_v36 = vld [vmem:[%s5166_s30 + $0x640] sm:$0xff]  ;;  %v383_v37 = vld [vmem:[%s5166_s30 + $0x648] sm:$0xff] }
  0x46   : > { %376 = vst [vmem:[%s5174_s5 + $0x308] sm:$0xff] %v375_v33  ;;  %378 = vst [vmem:[%s5174_s5 + $0x310] sm:$0xff] %v377_v34  ;;  %v385_v38 = vld [vmem:[%s5166_s30 + $0x650] sm:$0xff]  ;;  %v387_v39 = vld [vmem:[%s5166_s30 + $0x658] sm:$0xff] }
  0x47   : > { %380 = vst [vmem:[%s5174_s5 + $0x318] sm:$0xff] %v379_v35  ;;  %382 = vst [vmem:[%s5174_s5 + $0x320] sm:$0xff] %v381_v36  ;;  %v389_v40 = vld [vmem:[%s5166_s30 + $0x680] sm:$0xff]  ;;  %v391_v41 = vld [vmem:[%s5166_s30 + $0x688] sm:$0xff] }
  0x48   : > { %384 = vst [vmem:[%s5174_s5 + $0x328] sm:$0xff] %v383_v37  ;;  %386 = vst [vmem:[%s5174_s5 + $0x330] sm:$0xff] %v385_v38  ;;  %v393_v42 = vld [vmem:[%s5166_s30 + $0x690] sm:$0xff]  ;;  %v395_v43 = vld [vmem:[%s5166_s30 + $0x698] sm:$0xff] }
  0x49   : > { %388 = vst [vmem:[%s5174_s5 + $0x338] sm:$0xff] %v387_v39  ;;  %390 = vst [vmem:[%s5174_s5 + $0x340] sm:$0xff] %v389_v40  ;;  %v397_v44 = vld [vmem:[%s5166_s30 + $0x6c0] sm:$0xff]  ;;  %v399_v45 = vld [vmem:[%s5166_s30 + $0x6c8] sm:$0xff] }
  0x4a   : > { %392 = vst [vmem:[%s5174_s5 + $0x348] sm:$0xff] %v391_v41  ;;  %394 = vst [vmem:[%s5174_s5 + $0x350] sm:$0xff] %v393_v42  ;;  %v401_v46 = vld [vmem:[%s5166_s30 + $0x6d0] sm:$0xff]  ;;  %v403_v47 = vld [vmem:[%s5166_s30 + $0x6d8] sm:$0xff] }
  0x4b   : > { %396 = vst [vmem:[%s5174_s5 + $0x358] sm:$0xff] %v395_v43  ;;  %398 = vst [vmem:[%s5174_s5 + $0x360] sm:$0xff] %v397_v44 }
  0x4c   : > { %400 = vst [vmem:[%s5174_s5 + $0x368] sm:$0xff] %v399_v45  ;;  %402 = vst [vmem:[%s5174_s5 + $0x370] sm:$0xff] %v401_v46 }
  0x4d   : > { %404 = vst [vmem:[%s5174_s5 + $0x378] sm:$0xff] %v403_v47 }
  0x4e PF: > { %410 = sbr.rel (!%p5150_p4) target bundleno = 86 (0x56), region = 43  ;;  %s412_s6 = sand.u32 (%p5150_p4), 1, %s5086_s16  }
  0x4f   : > { %s4961_s7 = sshll.u32 (%p5150_p4), %s5090_s17, 5  ;;  %s4945_s8 = sshll.u32 (%p5150_p4), %s412_s6, 6 }
  0x50   : > { %s417_s11 = scalar_lea.vmem (%p5150_p4), %s12828_s1, %s4961_s7  ;;  %s414_s12 = scalar_lea.vmem (%p5150_p4), [#allocation4], %s4945_s8 }
  0x51   : > { %v430_v48 = vld [vmem:[%s417_s11] sm:$0xff] (%p5150_p4)  ;;  %v432_v49 = vld [vmem:[%s417_s11 + $0x8] sm:$0xff] (%p5150_p4)  ;;  %v434_v50 = vld [vmem:[%s417_s11 + $0x10] sm:$0xff] (%p5150_p4) }
  0x52   : > { %431 = vst [vmem:[%s414_s12] sm:$0xff] (%p5150_p4), %v430_v48  ;;  %433 = vst [vmem:[%s414_s12 + $0x8] sm:$0xff] (%p5150_p4), %v432_v49  ;;  %v436_v51 = vld [vmem:[%s417_s11 + $0x18] sm:$0xff] (%p5150_p4)  ;;  %v438_v52 = vld [vmem:[%s417_s11 + $0x40] sm:$0xff] (%p5150_p4) }
  0x53   : > { %435 = vst [vmem:[%s414_s12 + $0x10] sm:$0xff] (%p5150_p4), %v434_v50  ;;  %v440_v53 = vld [vmem:[%s417_s11 + $0x48] sm:$0xff] (%p5150_p4)  ;;  %437 = vst [vmem:[%s414_s12 + $0x18] sm:$0xff] (%p5150_p4), %v436_v51  ;;  %v442_v54 = vld [vmem:[%s417_s11 + $0x50] sm:$0xff] (%p5150_p4) }
  0x54   : > { %439 = vst [vmem:[%s414_s12 + $0x20] sm:$0xff] (%p5150_p4), %v438_v52  ;;  %441 = vst [vmem:[%s414_s12 + $0x28] sm:$0xff] (%p5150_p4), %v440_v53  ;;  %v444_v55 = vld [vmem:[%s417_s11 + $0x58] sm:$0xff] (%p5150_p4) }
  0x55   : > { %443 = vst [vmem:[%s414_s12 + $0x30] sm:$0xff] %v442_v54  ;;  %445 = vst [vmem:[%s414_s12 + $0x38] sm:$0xff] %v444_v55 }
  0x56 PF: > { %p4948_p7 = scmp.ge.s32.totalorder %s5090_s17, 1  ;;  %p466_p8 = scmp.lt.s32.totalorder %s5090_s17, 3 }
  0x58   : > { %p467_p9 = pnand %p4948_p7, %p466_p8 }
  0x5a   : > { %470 = sbr.rel (%p467_p9) target bundleno = 1111 (0x457), region = 74 }
  0x61   : > { %s473_s13 = sand.u32 1, %s5082_s15   ;;  %v12832_v56 = vmov 0.0   ;;  %v1099_v1 = vlaneseq  ;;  %vm3647_vm2 = vcmask 1045504   ;;  %s4950_s21 = sshll.u32 %s5135_s18, 2 }
  0x62   : > { %533 = vst [vmem:[#allocation2 + $0x20] sm:$0xff] %v12832_v56  ;;  %529 = vst [vmem:[#allocation2] sm:$0xff] %v12832_v56  ;;  %s5471_s14 = smul.u32 896, %s473_s13  ;;  %s4949_s20 = sshll.u32 %s473_s13, 6  ;;  %v5522_v14 = vrot.slane %v12832_v56, 7 }
  0x63   : > { %534 = vst [vmem:[#allocation2 + $0x28] sm:$0xff] %v12832_v56  ;;  %535 = vst [vmem:[#allocation2 + $0x30] sm:$0xff] %v12832_v56  ;;  %v5510_v6 = vshrl.u32 %v1099_v1, 7  ;;  %s5539_s15 = scalar_lea.vmem [#allocation4], %s4949_s20  ;;  %p519_p10 = scmp.lt.s32.totalorder %s4950_s21, 7 }
  0x64   : > { %536 = vst [vmem:[#allocation2 + $0x38] sm:$0xff] %v12832_v56  ;;  %542 = vst [vmem:[#allocation2 + $0x3e0] sm:$0xff] %v12832_v56  ;;  %s5482_s17 = scalar_lea.vmem [#allocation3], %s5471_s14  ;;  %v5542_v20 = vld [vmem:[%s5539_s15 + $0x8] sm:$0xff]  ;;  %v5545_v21 = vld [vmem:[%s5539_s15 + $0x10] sm:$0xff]  ;;  %s12266_s30 = scalar_lea.vmem [#allocation5], %s5471_s14 }
  0x65   : > { %543 = vst [vmem:[#allocation2 + $0x3e8] sm:$0xff] %v12832_v56  ;;  %544 = vst [vmem:[#allocation2 + $0x3f0] sm:$0xff] %v12832_v56  ;;  %v610_v57 = vld [vmem:[%s5482_s17] sm:$0xff]  ;;  %v5486_v58 = vld [vmem:[%s5482_s17 + $0x8] sm:$0xff]  ;;  %v5530_v17 = vsub.s32 1, %v5510_v6  ;;  %vm1101_vm0 = vcmp.lt.s32.totalorder %v5510_v6, 1 }
  0x66   : > { %545 = vst [vmem:[#allocation2 + $0x3f8] sm:$0xff] %v12832_v56  ;;  %550 = vst [vmem:[#allocation2 + $0x60] sm:$0xc0] %v12832_v56  ;;  %v5489_v59 = vld [vmem:[%s5482_s17 + $0x10] sm:$0xff]  ;;  %v5492_v60 = vld [vmem:[%s5482_s17 + $0x18] sm:$0xff]  ;;  %v5534_v18 = vsub.s32 0, %v5510_v6 }
  0x67   : > { %551 = vst [vmem:[#allocation2 + $0x68] sm:$0xc0] %v12832_v56  ;;  %552 = vst [vmem:[#allocation2 + $0x70] sm:$0xc0] %v12832_v56  ;;  %v614_v61 = vld [vmem:[%s5482_s17 + $0x20] sm:$0x3f]  ;;  %v5605_v44 = vrot.slane %v5542_v20, %v5530_v17  ;;  %v5609_v45 = vrot.slane %v5545_v21, %v5530_v17 }
  0x68   : > { %553 = vst [vmem:[#allocation2 + $0x78] sm:$0xc0] %v12832_v56  ;;  %554 = vst [vmem:[#allocation2 + $0xa0] sm:$0xc0] %v12832_v56  ;;  %v615_v62 = vld [vmem:[%s5482_s17 + $0x28] sm:$0x3f]  ;;  %v5582_v37 = vrot.slane %v5542_v20, %v5534_v18  ;;  %v5586_v38 = vrot.slane %v5545_v21, %v5534_v18 }
  0x69   : > { %555 = vst [vmem:[#allocation2 + $0xa8] sm:$0xc0] %v12832_v56  ;;  %556 = vst [vmem:[#allocation2 + $0xb0] sm:$0xc0] %v12832_v56  ;;  %v616_v63 = vld [vmem:[%s5482_s17 + $0x30] sm:$0x3f] }
  0x6a   : > { %557 = vst [vmem:[#allocation2 + $0xb8] sm:$0xc0] %v12832_v56  ;;  %558 = vst [vmem:[#allocation2 + $0xe0] sm:$0xc0] %v12832_v56  ;;  %v617_v0 = vld [vmem:[%s5482_s17 + $0x38] sm:$0x3f] }
  0x6b   : > { %559 = vst [vmem:[#allocation2 + $0xe8] sm:$0xc0] %v12832_v56  ;;  %560 = vst [vmem:[#allocation2 + $0xf0] sm:$0xc0] %v12832_v56  ;;  %v618_v2 = vld [vmem:[%s5482_s17 + $0x40] sm:$0xff]  ;;  %v5500_v3 = vld [vmem:[%s5482_s17 + $0x48] sm:$0xff] }
  0x6c   : > { %561 = vst [vmem:[#allocation2 + $0xf8] sm:$0xc0] %v12832_v56  ;;  %562 = vst [vmem:[#allocation2 + $0x120] sm:$0xc0] %v12832_v56  ;;  %v5503_v4 = vld [vmem:[%s5482_s17 + $0x50] sm:$0xff]  ;;  %v5508_v5 = vld [vmem:[%s5482_s17 + $0x58] sm:$0xff] }
  0x6d   : > { %563 = vst [vmem:[#allocation2 + $0x128] sm:$0xc0] %v12832_v56  ;;  %564 = vst [vmem:[#allocation2 + $0x130] sm:$0xc0] %v12832_v56  ;;  %v622_v7 = vld [vmem:[%s5482_s17 + $0x60] sm:$0x3f] }
  0x6e   : > { %565 = vst [vmem:[#allocation2 + $0x138] sm:$0xc0] %v12832_v56  ;;  %566 = vst [vmem:[#allocation2 + $0x160] sm:$0xc0] %v12832_v56  ;;  %v623_v8 = vld [vmem:[%s5482_s17 + $0x68] sm:$0x3f] }
  0x6f   : > { %567 = vst [vmem:[#allocation2 + $0x168] sm:$0xc0] %v12832_v56  ;;  %568 = vst [vmem:[#allocation2 + $0x170] sm:$0xc0] %v12832_v56  ;;  %v626_v9 = vld [vmem:[%s5482_s17 + $0x80] sm:$0xff]  ;;  %v5527_v16 = vld [vmem:[%s5482_s17 + $0x88] sm:$0xff] }
  0x70   : > { %569 = vst [vmem:[#allocation2 + $0x178] sm:$0xc0] %v12832_v56  ;;  %570 = vst [vmem:[#allocation2 + $0x1a0] sm:$0xc0] %v12832_v56  ;;  %v624_v10 = vld [vmem:[%s5482_s17 + $0x70] sm:$0x3f] }
  0x71   : > { %571 = vst [vmem:[#allocation2 + $0x1a8] sm:$0xc0] %v12832_v56  ;;  %572 = vst [vmem:[#allocation2 + $0x1b0] sm:$0xc0] %v12832_v56  ;;  %v625_v13 = vld [vmem:[%s5482_s17 + $0x78] sm:$0x3f] }
  0x72   : > { %573 = vst [vmem:[#allocation2 + $0x1b8] sm:$0xc0] %v12832_v56  ;;  %574 = vst [vmem:[#allocation2 + $0x1e0] sm:$0xc0] %v12832_v56  ;;  %v5537_v19 = vsub.s32 2, %v5510_v6  ;;  %v5548_v22 = vld [vmem:[%s5539_s15 + $0x18] sm:$0xff] }
  0x73   : > { %575 = vst [vmem:[#allocation2 + $0x1e8] sm:$0xc0] %v12832_v56  ;;  %576 = vst [vmem:[#allocation2 + $0x1f0] sm:$0xc0] %v12832_v56  ;;  %v5552_v23 = vld [vmem:[%s5482_s17 + $0x90] sm:$0xff]  ;;  %v5555_v24 = vld [vmem:[%s5482_s17 + $0x98] sm:$0xff]  ;;  %v5590_v39 = vrot.slane %v5548_v22, %v5534_v18  ;;  %v5613_v46 = vrot.slane %v5548_v22, %v5530_v17 }
  0x74   : > { %577 = vst [vmem:[#allocation2 + $0x1f8] sm:$0xc0] %v12832_v56  ;;  %578 = vst [vmem:[#allocation2 + $0x220] sm:$0xc0] %v12832_v56  ;;  %v630_v27 = vld [vmem:[%s5482_s17 + $0xa0] sm:$0x3f]  ;;  %v5625_v51 = vrot.slane %v5542_v20, %v5537_v19  ;;  %v5629_v52 = vrot.slane %v5545_v21, %v5537_v19 }
  0x75   : > { %579 = vst [vmem:[#allocation2 + $0x228] sm:$0xc0] %v12832_v56  ;;  %580 = vst [vmem:[#allocation2 + $0x230] sm:$0xc0] %v12832_v56  ;;  %v631_v28 = vld [vmem:[%s5482_s17 + $0xa8] sm:$0x3f] }
  0x76   : > { %581 = vst [vmem:[#allocation2 + $0x238] sm:$0xc0] %v12832_v56  ;;  %582 = vst [vmem:[#allocation2 + $0x260] sm:$0xc0] %v12832_v56  ;;  %v632_v30 = vld [vmem:[%s5482_s17 + $0xb0] sm:$0x3f] }
  0x77   : > { %583 = vst [vmem:[#allocation2 + $0x268] sm:$0xc0] %v12832_v56  ;;  %584 = vst [vmem:[#allocation2 + $0x270] sm:$0xc0] %v12832_v56  ;;  %v633_v31 = vld [vmem:[%s5482_s17 + $0xb8] sm:$0x3f] }
  0x78   : > { %585 = vst [vmem:[#allocation2 + $0x278] sm:$0xc0] %v12832_v56  ;;  %586 = vst [vmem:[#allocation2 + $0x2a0] sm:$0xc0] %v12832_v56  ;;  %v634_v32 = vld [vmem:[%s5482_s17 + $0xc0] sm:$0xff]  ;;  %v5568_v33 = vsub.s32 4, %v5510_v6 }
  0x79   : > { %587 = vst [vmem:[#allocation2 + $0x2a8] sm:$0xc0] %v12832_v56  ;;  %588 = vst [vmem:[#allocation2 + $0x2b0] sm:$0xc0] %v12832_v56  ;;  %v5571_v34 = vld [vmem:[%s5482_s17 + $0xc8] sm:$0xff]  ;;  %v5574_v35 = vld [vmem:[%s5482_s17 + $0xd0] sm:$0xff] }
  0x7a   : > { %589 = vst [vmem:[#allocation2 + $0x2b8] sm:$0xc0] %v12832_v56  ;;  %590 = vst [vmem:[#allocation2 + $0x2e0] sm:$0xc0] %v12832_v56  ;;  %v5577_v36 = vld [vmem:[%s5482_s17 + $0xd8] sm:$0xff]  ;;  %vm2798_vm1 = vcmp.lt.s32.totalorder %v5510_v6, 7 }
  0x7b   : > { %591 = vst [vmem:[#allocation2 + $0x2e8] sm:$0xc0] %v12832_v56  ;;  %592 = vst [vmem:[#allocation2 + $0x2f0] sm:$0xc0] %v12832_v56  ;;  %v5593_v40 = vsub.s32 3, %v5510_v6  ;;  %v642_v53 = vld [vmem:[%s5482_s17 + $0x100] sm:$0xff] }
  0x7c   : > { %593 = vst [vmem:[#allocation2 + $0x2f8] sm:$0xc0] %v12832_v56  ;;  %594 = vst [vmem:[#allocation2 + $0x320] sm:$0xc0] %v12832_v56  ;;  %v638_v41 = vld [vmem:[%s5482_s17 + $0xe0] sm:$0x3f] }
  0x7d   : > { %595 = vst [vmem:[#allocation2 + $0x328] sm:$0xc0] %v12832_v56  ;;  %596 = vst [vmem:[#allocation2 + $0x330] sm:$0xc0] %v12832_v56  ;;  %v639_v42 = vld [vmem:[%s5482_s17 + $0xe8] sm:$0x3f] }
  0x7e   : > { %597 = vst [vmem:[#allocation2 + $0x338] sm:$0xc0] %v12832_v56  ;;  %598 = vst [vmem:[#allocation2 + $0x360] sm:$0xc0] %v12832_v56  ;;  %v640_v47 = vld [vmem:[%s5482_s17 + $0xf0] sm:$0x3f] }
  0x7f   : > { %599 = vst [vmem:[#allocation2 + $0x368] sm:$0xc0] %v12832_v56  ;;  %600 = vst [vmem:[#allocation2 + $0x370] sm:$0xc0] %v12832_v56  ;;  %v641_v48 = vld [vmem:[%s5482_s17 + $0xf8] sm:$0x3f] }
  0x80   : > { %601 = vst [vmem:[#allocation2 + $0x378] sm:$0xc0] %v12832_v56  ;;  %602 = vst [vmem:[#allocation2 + $0x3a0] sm:$0xc0] %v12832_v56  ;;  %v643_v54 = vld [vmem:[%s5482_s17 + $0x108] sm:$0xff]  ;;  %s15038_s21 = smov (!%p519_p10, %s4950_s21), 7 }
  0x81   : > { %603 = vst [vmem:[#allocation2 + $0x3a8] sm:$0xc0] %v12832_v56  ;;  %604 = vst [vmem:[#allocation2 + $0x3b0] sm:$0xc0] %v12832_v56  ;;  %s521_s26 = scalar_lea.vmem %s12829_s2, %s15038_s21  ;;  %s526_s29 = scalar_lea.vmem %s12830_s3, %s15038_s21 }
  0x82   : > { %605 = vst [vmem:[#allocation2 + $0x3b8] sm:$0xc0] %v12832_v56  ;;  %546 = vst [vmem:[#allocation2 + $0x20] sm:$0xc0] %v12832_v56  ;;  %s4962_s5 = sshll.u32 (%p5154_p5), %s5135_s18, 5 }
  0x83   : > { %547 = vst [vmem:[#allocation2 + $0x28] sm:$0xc0] %v12832_v56  ;;  %548 = vst [vmem:[#allocation2 + $0x30] sm:$0xc0] %v12832_v56  ;;  %s12594_s8 = scalar_lea.vmem (%p5154_p5), %s12831_s4, %s4962_s5 }
  0x84   : > { %549 = vst [vmem:[#allocation2 + $0x38] sm:$0xc0] %v12832_v56  ;;  %606 = vst [vmem:[#allocation2 + $0x3e0] sm:$0xc0] %v12832_v56 }
  0x85   : > { %607 = vst [vmem:[#allocation2 + $0x3e8] sm:$0xc0] %v12832_v56  ;;  %608 = vst [vmem:[#allocation2 + $0x3f0] sm:$0xc0] %v12832_v56 }
  0x86   : > { %609 = vst [vmem:[#allocation2 + $0x3f8] sm:$0xc0] %v12832_v56  ;;  %723 = vst [vmem:[#allocation2 + $0x40] sm:$0xff] %v610_v57  ;;  %v645_v56 = vld [vmem:[%s5482_s17 + $0x118] sm:$0xff] }
  0x87   : > { %727 = vst [vmem:[#allocation2 + $0x60] sm:$0x3f] %v614_v61  ;;  %728 = vst [vmem:[#allocation2 + $0x68] sm:$0x3f] %v615_v62  ;;  %v5641_v61 = vrot.slane %v5548_v22, %v5537_v19  ;;  %v976_v62 = vrot.slane %v5486_v58, 7 }
  0x88   : > { %729 = vst [vmem:[#allocation2 + $0x70] sm:$0x3f] %v616_v63  ;;  %730 = vst [vmem:[#allocation2 + $0x78] sm:$0x3f] %v617_v0  ;;  %v646_v63 = vld [vmem:[%s5482_s17 + $0x120] sm:$0x3f] }
  0x89   : > { %731 = vst [vmem:[#allocation2 + $0x80] sm:$0xff] %v618_v2  ;;  %735 = vst [vmem:[#allocation2 + $0xa0] sm:$0x3f] %v622_v7  ;;  %v5651_v2 = vmul.f32 %v5605_v44, %v5486_v58  ;;  %v5655_v7 = vrot.slane %v5542_v20, %v5568_v33 }
  0x8a   : > { %736 = vst [vmem:[#allocation2 + $0xa8] sm:$0x3f] %v623_v8  ;;  %739 = vst [vmem:[#allocation2 + $0xc0] sm:$0xff] %v626_v9  ;;  %v5516_v11 = vld [vmem:[#allocation2 + $0x28] sm:$0xff]  ;;  %v5518_v12 = vld [vmem:[#allocation2 + $0x30] sm:$0xff] }
  0x8b   : > { %737 = vst [vmem:[#allocation2 + $0xb0] sm:$0x3f] %v624_v10  ;;  %13311 = vst [vmem:[#allocation6_spill] sm:$0xff] %v5522_v14  ;;  %v5524_v15 = vld [vmem:[#allocation2 + $0x38] sm:$0xff]  ;;  %v1036_v25 = vrot.slane %v5516_v11, 7  ;;  %v1037_v26 = vrot.slane %v5518_v12, 7 }
  0x8c   : > { %738 = vst [vmem:[#allocation2 + $0xb8] sm:$0x3f] %v625_v13  ;;  %13312 = vst [vmem:[#allocation7_spill] sm:$0xff] %v5527_v16  ;;  %v1038_v29 = vrot.slane %v5524_v15, 7  ;;  %v5667_v13 = vmul.f32 %v5609_v45, %v5489_v59 }
  0x8d   : > { %13313 = vst [vmem:[#allocation8_spill] sm:$0xff] %v5530_v17  ;;  %13314 = vst [vmem:[#allocation9_spill] sm:$0xff] %v5534_v18  ;;  %v1167_v43 = vsel %vm1101_vm0, %v1036_v25, %v5522_v14  ;;  %v1168_v49 = vsel %vm1101_vm0, %v1037_v26, %v5522_v14  ;;  %v1103_v55 = vsel %vm1101_vm0, %v5522_v14, %v1036_v25 }
  0x8e   : > { %13315 = vst [vmem:[#allocation10_spill] sm:$0xff] %v5537_v19  ;;  %740 = vst [vmem:[#allocation2 + $0xc8] sm:$0xff] %v5527_v16  ;;  %v1169_v50 = vsel %vm1101_vm0, %v1038_v29, %v5522_v14  ;;  %v1104_v57 = vsel %vm1101_vm0, %v5522_v14, %v1037_v26  ;;  %v1105_v0 = vsel %vm1101_vm0, %v5522_v14, %v1038_v29  ;;  %v5657_v8 = vld [vmem:[#allocation2 + $0x68] sm:$0xff]  ;;  %v1967_v16 = vmul.f32 0.0, %v5605_v44 }
  0x8f   : > { %13316 = vst [vmem:[#allocation11_spill] sm:$0xff] %v5552_v23  ;;  %13317 = vst [vmem:[#allocation12_spill] sm:$0xff] %v5555_v24  ;;  %v1247_v1 = vmul.f32 %v5582_v37, %v1167_v43  ;;  %v5660_v9 = vmul.f32 %v5586_v38, %v1168_v49  ;;  %v5663_v10 = vmul.f32 %v5590_v39, %v1169_v50  ;;  %v647_v43 = vld [vmem:[%s5482_s17 + $0x128] sm:$0x3f]  ;;  %v2739_v49 = vrot.slane %v5657_v8, 1  ;;  %v5705_v50 = vld [vmem:[#allocation2 + $0x70] sm:$0xff] }
  0x90   : > { %741 = vst [vmem:[#allocation2 + $0xd0] sm:$0xff] %v5552_v23  ;;  %742 = vst [vmem:[#allocation2 + $0xd8] sm:$0xff] %v5555_v24  ;;  %v5671_v25 = vrot.slane %v5545_v21, %v5568_v33  ;;  %v1251_v26 = vmul.f32 %v5582_v37, %v1103_v55  ;;  %v5684_v29 = vrot.slane %v5548_v22, %v5568_v33  ;;  %v2740_v14 = vrot.slane %v5705_v50, 1 }
  0x91   : > { %743 = vst [vmem:[#allocation2 + $0xe0] sm:$0x3f] %v630_v27  ;;  %744 = vst [vmem:[#allocation2 + $0xe8] sm:$0x3f] %v631_v28  ;;  %v5676_v27 = vmul.f32 %v5655_v7, %v5486_v58  ;;  %v5680_v28 = vmul.f32 %v5613_v46, %v5492_v60 }
  0x92   : > { %13318 = vst [vmem:[#allocation13_spill] sm:$0xff] %v5568_v33  ;;  %745 = vst [vmem:[#allocation2 + $0xf0] sm:$0x3f] %v632_v30  ;;  %v2675_v30 = vrot.slane %v5486_v58, 1  ;;  %v5702_v58 = vmul.f32 %v5684_v29, %v5492_v60  ;;  %v5882_v23 = vmul.f32 %v5684_v29, %v5508_v5 }
  0x93   : > { %746 = vst [vmem:[#allocation2 + $0xf8] sm:$0x3f] %v633_v31  ;;  %747 = vst [vmem:[#allocation2 + $0x100] sm:$0xff] %v634_v32  ;;  %v5689_v31 = vmul.f32 %v5671_v25, %v5489_v59  ;;  %v1040_v32 = vrot.slane %v5657_v8, 7 }
  0x94   : > { %13319 = vst [vmem:[#allocation14_spill] sm:$0xff] %v5571_v34  ;;  %13320 = vst [vmem:[#allocation15_spill] sm:$0xff] %v5574_v35  ;;  %v2804_v18 = vsel %vm2798_vm1, %v2675_v30, %v2739_v49 }
  0x95   : > { %13321 = vst [vmem:[#allocation16_spill] sm:$0xff] %v5577_v36  ;;  %13322 = vst [vmem:[#allocation17_spill] sm:$0xff] %v5582_v37  ;;  %v1107_v55 = vsel %vm1101_vm0, %v976_v62, %v1040_v32 }
  0x96   : > { %13323 = vst [vmem:[#allocation18_spill] sm:$0xff] %v5586_v38  ;;  %13324 = vst [vmem:[#allocation19_spill] sm:$0xff] %v5590_v39 }
  0x97   : > { %13325 = vst [vmem:[#allocation20_spill] sm:$0xff] %v5593_v40  ;;  %748 = vst [vmem:[#allocation2 + $0x108] sm:$0xff] %v5571_v34 }
  0x98   : > { %749 = vst [vmem:[#allocation2 + $0x110] sm:$0xff] %v5574_v35  ;;  %750 = vst [vmem:[#allocation2 + $0x118] sm:$0xff] %v5577_v36 }
  0x99   : > { %13326 = vst [vmem:[#allocation21_spill] sm:$0xff] %v5605_v44  ;;  %13327 = vst [vmem:[#allocation22_spill] sm:$0xff] %v5609_v45 }
  0x9a   : > { %13328 = vst [vmem:[#allocation23_spill] sm:$0xff] %v5613_v46  ;;  %751 = vst [vmem:[#allocation2 + $0x120] sm:$0x3f] %v638_v41  ;;  %v5694_v41 = vrot.slane %v5542_v20, %v5593_v40 }
  0x9b   : > { %752 = vst [vmem:[#allocation2 + $0x128] sm:$0x3f] %v639_v42  ;;  %13329 = vst [vmem:[#allocation24_spill] sm:$0xff] %v5625_v51  ;;  %v644_v42 = vld [vmem:[%s5482_s17 + $0x110] sm:$0xff] }
  0x9c   : > { %13330 = vst [vmem:[#allocation25_spill] sm:$0xff] %v5629_v52  ;;  %753 = vst [vmem:[#allocation2 + $0x130] sm:$0x3f] %v640_v47  ;;  %v977_v47 = vrot.slane %v5489_v59, 7  ;;  %v1491_v33 = vmul.f32 %v5694_v41, %v1107_v55 }
  0x9d   : > { %754 = vst [vmem:[#allocation2 + $0x138] sm:$0x3f] %v641_v48  ;;  %13331 = vst [vmem:[#allocation26_spill] sm:$0xff] %v5641_v61  ;;  %v2676_v48 = vrot.slane %v5489_v59, 1  ;;  %v5714_v59 = vsub.s32 5, %v5510_v6 }
  0x9e   : > { %755 = vst [vmem:[#allocation2 + $0x140] sm:$0xff] %v642_v53  ;;  %756 = vst [vmem:[#allocation2 + $0x148] sm:$0xff] %v643_v54  ;;  %v648_v53 = vld [vmem:[%s5482_s17 + $0x130] sm:$0x3f]  ;;  %v978_v54 = vrot.slane %v5492_v60, 7  ;;  %v5736_v36 = vadd.f32 %v1491_v33, %v1251_v26  ;;  %v1252_v26 = vmul.f32 %v5586_v38, %v1104_v57 }
  0x9f   : > { %13332 = vst [vmem:[#allocation27_spill] sm:$0xff] %v5651_v2  ;;  %13333 = vst [vmem:[#allocation28_spill] sm:$0xff] %v5655_v7  ;;  %v5771_v34 = vrot.slane %v5545_v21, %v5714_v59 }
  0xa0   : > { %759 = vst [vmem:[#allocation2 + $0x160] sm:$0x3f] %v646_v63  ;;  %13334 = vst [vmem:[#allocation29_spill] sm:$0xff] %v5667_v13  ;;  %v1171_v63 = vsel %vm1101_vm0, %v1040_v32, %v976_v62  ;;  %v2868_v62 = vsel %vm2798_vm1, %v2739_v49, %v2675_v30  ;;  %v5731_v32 = vrot.slane %v5542_v20, %v5714_v59 }
  0xa1   : > { %13335 = vst [vmem:[#allocation30_spill] sm:$0xff] %v5671_v25  ;;  %13336 = vst [vmem:[#allocation31_spill] sm:$0xff] %v5680_v28  ;;  %v5718_v19 = vmul.f32 %v5582_v37, %v1171_v63 }
  0xa2   : > { %13337 = vst [vmem:[#allocation32_spill] sm:$0xff] %v5684_v29  ;;  %13338 = vst [vmem:[#allocation33_spill] sm:$0xff] %v5694_v41  ;;  %v5747_v30 = vmul.f32 %v5731_v32, %v2804_v18  ;;  %v5750_v49 = vmul.f32 %v5731_v32, %v2868_v62  ;;  %v2679_v29 = vrot.slane %v5500_v3, 1 }
  0xa3   : > { %13339 = vst [vmem:[#allocation34_spill] sm:$0xff] %v5702_v58  ;;  %757 = vst [vmem:[#allocation2 + $0x150] sm:$0xff] %v644_v42  ;;  %v5721_v42 = vmul.f32 %v5582_v37, %v1107_v55  ;;  %v5739_v55 = vmul.f32 %v5625_v51, %v2804_v18  ;;  %v5765_v18 = vrot.slane %v5545_v21, %v5593_v40 }
  0xa4   : > { %760 = vst [vmem:[#allocation2 + $0x168] sm:$0x3f] %v647_v43  ;;  %13340 = vst [vmem:[#allocation35_spill] sm:$0xff] %v5714_v59  ;;  %v1487_v43 = vmul.f32 %v5694_v41, %v1171_v63  ;;  %v5744_v63 = vld [vmem:[#allocation2 + $0x78] sm:$0xff] }
  0xa5   : > { %761 = vst [vmem:[#allocation2 + $0x170] sm:$0x3f] %v648_v53  ;;  %758 = vst [vmem:[#allocation2 + $0x158] sm:$0xff] %v645_v56  ;;  %v1041_v53 = vrot.slane %v5705_v50, 7  ;;  %v5742_v56 = vmul.f32 %v5625_v51, %v2868_v62  ;;  %v1253_v62 = vmul.f32 %v5590_v39, %v1105_v0  ;;  %v1042_v57 = vrot.slane %v5744_v63, 7 }
  0xa6   : > { %13341 = vst [vmem:[#allocation36_spill] sm:$0xff] %v5731_v32  ;;  %v5734_v17 = vadd.f32 %v1487_v43, %v1247_v1  ;;  %13342 = vst [vmem:[#allocation37_spill] sm:$0xff] %v5739_v55  ;;  %v2805_v0 = vsel %vm2798_vm1, %v2676_v48, %v2740_v14  ;;  %v2869_v55 = vsel %vm2798_vm1, %v2740_v14, %v2676_v48 }
  0xa7   : > { %13343 = vst [vmem:[#allocation38_spill] sm:$0xff] %v5742_v56  ;;  %13344 = vst [vmem:[#allocation39_spill] sm:$0xff] %v5744_v63  ;;  %v1108_v1 = vsel %vm1101_vm0, %v977_v47, %v1041_v53  ;;  %v1172_v33 = vsel %vm1101_vm0, %v1041_v53, %v977_v47  ;;  %v649_v47 = vld [vmem:[%s5482_s17 + $0x138] sm:$0x3f]  ;;  %v2677_v53 = vrot.slane %v5492_v60, 1  ;;  %v5780_v56 = vrot.slane %v5548_v22, %v5593_v40 }
  0xa8   : > { %v5758_v43 = vmul.f32 %v5586_v38, %v1172_v33  ;;  %v5761_v35 = vmul.f32 %v5586_v38, %v1108_v1  ;;  %13345 = vst [vmem:[#allocation40_spill] sm:$0xff] %v5765_v18  ;;  %13346 = vst [vmem:[#allocation41_spill] sm:$0xff] %v5771_v34  ;;  %v1488_v28 = vmul.f32 %v5765_v18, %v1172_v33 }
  0xa9   : > { %v1492_v13 = vmul.f32 %v5765_v18, %v1108_v1  ;;  %13347 = vst [vmem:[#allocation42_spill] sm:$0xff] %v5780_v56  ;;  %762 = vst [vmem:[#allocation2 + $0x178] sm:$0x3f] %v649_v47  ;;  %v1109_v24 = vsel %vm1101_vm0, %v978_v54, %v1042_v57  ;;  %v1173_v60 = vsel %vm1101_vm0, %v1042_v57, %v978_v54  ;;  %v2741_v54 = vrot.slane %v5744_v63, 1 }
  0xaa   : > { %v5791_v33 = vadd.f32 %v1488_v28, %v5660_v9  ;;  %v5796_v40 = vmul.f32 %v5629_v52, %v2805_v0  ;;  %v5799_v47 = vmul.f32 %v5629_v52, %v2869_v55  ;;  %v5802_v2 = vmul.f32 %v5771_v34, %v2805_v0  ;;  %13369 = vst [vmem:[#allocation63_spill] sm:$0xff] %v5882_v23 }
  0xab   : > { %v5793_v1 = vadd.f32 %v1492_v13, %v1252_v26  ;;  %v5805_v14 = vmul.f32 %v5771_v34, %v2869_v55  ;;  %v5808_v48 = vmul.f32 %v5590_v39, %v1173_v60  ;;  %v5811_v9 = vmul.f32 %v5590_v39, %v1109_v24 }
  0xac   : > { %13348 = vst [vmem:[#allocation43_spill] sm:$0xff] %v5796_v40  ;;  %13349 = vst [vmem:[#allocation44_spill] sm:$0xff] %v5799_v47  ;;  %v1489_v13 = vmul.f32 %v5780_v56, %v1173_v60  ;;  %v1493_v28 = vmul.f32 %v5780_v56, %v1109_v24  ;;  %v5818_v26 = vrot.slane %v5548_v22, %v5714_v59 }
  0xad   : > { %13350 = vst [vmem:[#allocation45_spill] sm:$0xff] %v5808_v48  ;;  %13351 = vst [vmem:[#allocation46_spill] sm:$0xff] %v5811_v9  ;;  %v5822_v55 = vmul.f32 %v5605_v44, %v5500_v3  ;;  %v5826_v57 = vmul.f32 %v5655_v7, %v5500_v3  ;;  %v2806_v24 = vsel %vm2798_vm1, %v2677_v53, %v2741_v54 }
  0xae   : > { %13352 = vst [vmem:[#allocation47_spill] sm:$0xff] %v5818_v26  ;;  %v5829_v0 = vadd.f32 %v1489_v13, %v5663_v10  ;;  %v5831_v60 = vadd.f32 %v1493_v28, %v1253_v62  ;;  %v2870_v59 = vsel %vm2798_vm1, %v2741_v54, %v2677_v53  ;;  %v5838_v47 = vmul.f32 %v5641_v61, %v2806_v24  ;;  %v5859_v54 = vld [vmem:[#allocation2 + $0xa8] sm:$0xff] }
  0xaf   : > { %13353 = vst [vmem:[#allocation48_spill] sm:$0xff] %v5822_v55  ;;  %13354 = vst [vmem:[#allocation49_spill] sm:$0xff] %v5826_v57  ;;  %v5841_v55 = vmul.f32 %v5641_v61, %v2870_v59  ;;  %v5844_v40 = vmul.f32 %v5818_v26, %v2806_v24  ;;  %v5847_v10 = vmul.f32 %v5818_v26, %v2870_v59  ;;  %v13361_v62 = vmov 0.0  }
  0xb0   : > { %13355 = vst [vmem:[#allocation50_spill] sm:$0xff] %v5829_v0  ;;  %13356 = vst [vmem:[#allocation51_spill] sm:$0xff] %v5831_v60  ;;  %v5850_v13 = vrot.slane %v13361_v62, 1  ;;  %v5853_v28 = vsub.s32 7, %v5510_v6  ;;  %v5857_v53 = vmul.f32 %v5609_v45, %v5503_v4  ;;  %v2736_v24 = vrot.slane %v5518_v12, 1 }
  0xb1   : > { %13357 = vst [vmem:[#allocation52_spill] sm:$0xff] %v5838_v47  ;;  %13358 = vst [vmem:[#allocation53_spill] sm:$0xff] %v5841_v55  ;;  %v2735_v55 = vrot.slane %v5516_v11, 1  ;;  %v5865_v59 = vmul.f32 %v5671_v25, %v5503_v4  ;;  %v5869_v62 = vmul.f32 %v5613_v46, %v5508_v5  ;;  %v980_v47 = vrot.slane %v5500_v3, 7 }
  0xb2   : > { %13359 = vst [vmem:[#allocation54_spill] sm:$0xff] %v5844_v40  ;;  %13360 = vst [vmem:[#allocation55_spill] sm:$0xff] %v5847_v10  ;;  %v5874_v57 = vrot.slane %v5542_v20, %v5853_v28  ;;  %v5890_v40 = vsub.s32 6, %v5510_v6  ;;  %v5894_v10 = vmul.f32 0.0, %v5609_v45  ;;  %v5908_v26 = vsel %vm2798_vm1, %v5850_v13, %v2736_v24 }
  0xb3   : > { %13362 = vst [vmem:[#allocation56_spill] sm:$0xff] %v5850_v13  ;;  %13363 = vst [vmem:[#allocation57_spill] sm:$0xff] %v5853_v28  ;;  %v1971_v61 = vmul.f32 %v5605_v44, %v5516_v11 }
  0xb4   : > { %13364 = vst [vmem:[#allocation58_spill] sm:$0xff] %v5857_v53  ;;  %13365 = vst [vmem:[#allocation59_spill] sm:$0xff] %v5865_v59  ;;  %v5878_v53 = vrot.slane %v5545_v21, %v5853_v28  ;;  %v5886_v59 = vrot.slane %v5548_v22, %v5853_v28  ;;  %v2447_v58 = vmul.f32 %v5874_v57, %v5500_v3 }
  0xb5   : > { %13366 = vst [vmem:[#allocation60_spill] sm:$0xff] %v5869_v62  ;;  %13367 = vst [vmem:[#allocation61_spill] sm:$0xff] %v5874_v57  ;;  %v1044_v62 = vrot.slane %v5859_v54, 7  ;;  %v2800_v28 = vsel %vm2798_vm1, %v5850_v13, %v2735_v55  ;;  %v5923_v60 = vrot.slane %v5542_v20, %v5890_v40  ;;  %v5939_v20 = vsel %vm2798_vm1, %v2736_v24, %v5850_v13 }
  0xb6   : > { %13368 = vst [vmem:[#allocation62_spill] sm:$0xff] %v5878_v53  ;;  %13370 = vst [vmem:[#allocation64_spill] sm:$0xff] %v5886_v59  ;;  %v5900_v23 = vmul.f32 %v5878_v53, %v5503_v4  ;;  %v5914_v0 = vmul.f32 %v5886_v59, %v5508_v5  ;;  %v2944_v24 = vmul.f32 %v5625_v51, %v2800_v28  ;;  %v5957_v59 = vld [vmem:[%s5539_s15 + $0x28] ss:$0 sm:$0xff] }
  0xb7   : > { %13371 = vst [vmem:[#allocation65_spill] sm:$0xff] %v5890_v40  ;;  %v1111_v63 = vsel %vm1101_vm0, %v980_v47, %v1044_v62  ;;  %v1175_v48 = vsel %vm1101_vm0, %v1044_v62, %v980_v47  ;;  %13373 = vst [vmem:[#allocation67_spill] sm:$0xff] %v5923_v60 }
  0xb8   : > { %13372 = vst [vmem:[#allocation66_spill] sm:$0xff] %v5914_v0  ;;  %v5926_v9 = vmul.f32 %v5582_v37, %v1175_v48  ;;  %v5929_v11 = vmul.f32 %v5582_v37, %v1111_v63  ;;  %v1495_v44 = vmul.f32 %v5694_v41, %v1175_v48  ;;  %v1499_v3 = vmul.f32 %v5694_v41, %v1111_v63 }
  0xb9   : > { %v2864_v0 = vsel %vm2798_vm1, %v2735_v55, %v5850_v13  ;;  %v1727_v47 = vmul.f32 %v5923_v60, %v1175_v48  ;;  %v1731_v62 = vmul.f32 %v5923_v60, %v1111_v63  ;;  %v981_v37 = vrot.slane %v5503_v4, 7  ;;  %13377 = vst [vmem:[#allocation71_spill] sm:$0xff] %v5957_v59 }
  0xba   : > { %13374 = vst [vmem:[#allocation68_spill] sm:$0xff] %v5926_v9  ;;  %13375 = vst [vmem:[#allocation69_spill] sm:$0xff] %v5929_v11  ;;  %v5943_v9 = vld [vmem:[#allocation2 + $0xb0] sm:$0xff]  ;;  %v5947_v11 = vadd.f32 %v1495_v44, %v5718_v19  ;;  %v5950_v41 = vadd.f32 %v1499_v3, %v5721_v42  ;;  %v2743_v55 = vrot.slane %v5859_v54, 1  ;;  %v2211_v48 = vmul.f32 %v5655_v7, %v5657_v8 }
  0xbb   : > { %v1839_v63 = vadd.f32 %v1727_v47, %v5734_v17  ;;  %v1843_v60 = vadd.f32 %v1731_v62, %v5736_v36  ;;  %v2451_v19 = vmul.f32 %v5874_v57, %v5859_v54  ;;  %v1045_v28 = vrot.slane %v5943_v9, 7  ;;  %v650_v36 = vld [vmem:[%s5482_s17 + $0x140] sm:$0xff] }
  0xbc   : > { %13376 = vst [vmem:[#allocation70_spill] sm:$0xff] %v5950_v41  ;;  %v2808_v44 = vsel %vm2798_vm1, %v2679_v29, %v2743_v55  ;;  %v5967_v42 = vsel %vm2798_vm1, %v2743_v55, %v2679_v29  ;;  %763 = vst [vmem:[#allocation2 + $0x180] sm:$0xff] %v650_v36  ;;  %v5999_v36 = vrot.slane %v5545_v21, %v5890_v40 }
  0xbd   : > { %13378 = vst [vmem:[#allocation72_spill] sm:$0xff] %v5967_v42  ;;  %v2079_v3 = vadd.f32 %v1967_v16, %v1839_v63  ;;  %v2083_v7 = vadd.f32 %v1971_v61, %v1843_v60  ;;  %v5971_v41 = vmul.f32 %v5625_v51, %v2808_v44  ;;  %v5974_v17 = vmul.f32 %v5731_v32, %v2808_v44 }
  0xbe   : > { %v5979_v47 = vmul.f32 %v5731_v32, %v5967_v42  ;;  %v3424_v62 = vmul.f32 %v5957_v59, %v2808_v44  ;;  %v3428_v29 = vmul.f32 %v5957_v59, %v5967_v42  ;;  %v1112_v16 = vsel %vm1101_vm0, %v981_v37, %v1045_v28  ;;  %13381 = vst [vmem:[#allocation75_spill] sm:$0xff] %v5999_v36 }
  0xbf   : > { %13379 = vst [vmem:[#allocation73_spill] sm:$0xff] %v5971_v41  ;;  %v2319_v61 = vadd.f32 %v5676_v27, %v2079_v3  ;;  %v2323_v60 = vadd.f32 %v2211_v48, %v2083_v7  ;;  %v1176_v55 = vsel %vm1101_vm0, %v1045_v28, %v981_v37  ;;  %v5990_v63 = vmul.f32 %v5586_v38, %v1112_v16 }
  0xc0   : > { %13380 = vst [vmem:[#allocation74_spill] sm:$0xff] %v5979_v47  ;;  %v5993_v41 = vmul.f32 %v5586_v38, %v1176_v55  ;;  %v1496_v44 = vmul.f32 %v5765_v18, %v1176_v55  ;;  %v1500_v32 = vmul.f32 %v5765_v18, %v1112_v16  ;;  %v2948_v7 = vmul.f32 %v5625_v51, %v2864_v0 }
  0xc1   : > { %v2680_v27 = vrot.slane %v5503_v4, 1  ;;  %v2559_v37 = vadd.f32 %v2447_v58, %v2319_v61  ;;  %v2563_v48 = vadd.f32 %v2451_v19, %v2323_v60  ;;  %v1728_v38 = vmul.f32 %v5999_v36, %v1176_v55  ;;  %v6018_v19 = vld [vmem:[%s5539_s15 + $0x30] ss:$0 sm:$0xff] }
  0xc2   : > { %v6004_v28 = vadd.f32 %v1496_v44, %v5758_v43  ;;  %v6007_v3 = vadd.f32 %v1500_v32, %v5761_v35  ;;  %v1732_v42 = vmul.f32 %v5999_v36, %v1112_v16  ;;  %v1972_v21 = vmul.f32 %v5609_v45, %v5518_v12  ;;  %v654_v16 = vld [vmem:[%s5482_s17 + $0x160] sm:$0x3f]  ;;  %v651_v44 = vld [vmem:[%s5482_s17 + $0x148] sm:$0xff] }
  0xc3   : > { %v3056_v47 = vadd.f32 %v2944_v24, %v2559_v37  ;;  %v3060_v0 = vadd.f32 %v2948_v7, %v2563_v48  ;;  %v2744_v4 = vrot.slane %v5943_v9, 1  ;;  %v2212_v58 = vmul.f32 %v5671_v25, %v5705_v50  ;;  %767 = vst [vmem:[#allocation2 + $0x1a0] sm:$0x3f] %v654_v16  ;;  %764 = vst [vmem:[#allocation2 + $0x188] sm:$0xff] %v651_v44  ;;  %v652_v48 = vld [vmem:[%s5482_s17 + $0x150] sm:$0xff]  ;;  %v653_v16 = vld [vmem:[%s5482_s17 + $0x158] sm:$0xff] }
  0xc4   : > { %v982_v43 = vrot.slane %v5508_v5, 7  ;;  %v1840_v35 = vadd.f32 %v1728_v38, %v5791_v33  ;;  %v1844_v32 = vadd.f32 %v1732_v42, %v5793_v1  ;;  %v2452_v37 = vmul.f32 %v5878_v53, %v5943_v9  ;;  %765 = vst [vmem:[#allocation2 + $0x190] sm:$0xff] %v652_v48  ;;  %766 = vst [vmem:[#allocation2 + $0x198] sm:$0xff] %v653_v16 }
  0xc5   : > { %v3296_v61 = vadd.f32 %v5747_v30, %v3056_v47  ;;  %v3300_v12 = vadd.f32 %v5750_v49, %v3060_v0  ;;  %v2809_v24 = vsel %vm2798_vm1, %v2680_v27, %v2744_v4  ;;  %v6029_v60 = vsel %vm2798_vm1, %v2744_v4, %v2680_v27 }
  0xc6   : > { %13382 = vst [vmem:[#allocation76_spill] sm:$0xff] %v6029_v60  ;;  %v2080_v55 = vadd.f32 %v5894_v10, %v1840_v35  ;;  %v2084_v38 = vadd.f32 %v1972_v21, %v1844_v32  ;;  %v6033_v33 = vmul.f32 %v5629_v52, %v2809_v24  ;;  %v6036_v30 = vmul.f32 %v5771_v34, %v2809_v24  ;;  %v6047_v10 = vld [vmem:[#allocation2 + $0xb8] sm:$0xff]  ;;  %v655_v21 = vld [vmem:[%s5482_s17 + $0x168] sm:$0x3f] }
  0xc7   : > { %v6038_v49 = vadd.f32 %v3424_v62, %v3296_v61  ;;  %v6040_v1 = vadd.f32 %v3428_v29, %v3300_v12  ;;  %v6044_v42 = vmul.f32 %v5771_v34, %v6029_v60  ;;  %v3425_v47 = vmul.f32 %v6018_v19, %v2809_v24  ;;  %768 = vst [vmem:[#allocation2 + $0x1a8] sm:$0x3f] %v655_v21  ;;  %v656_v24 = vld [vmem:[%s5482_s17 + $0x170] sm:$0x3f] }
  0xc8   : > { %13383 = vst [vmem:[#allocation77_spill] sm:$0xff] %v6033_v33  ;;  %v2320_v7 = vadd.f32 %v5689_v31, %v2080_v55  ;;  %v2324_v27 = vadd.f32 %v2212_v58, %v2084_v38  ;;  %v3429_v62 = vmul.f32 %v6018_v19, %v6029_v60  ;;  %v2945_v29 = vmul.f32 %v5629_v52, %v5908_v26 }
  0xc9   : > { %13384 = vst [vmem:[#allocation78_spill] sm:$0xff] %v6038_v49  ;;  %13385 = vst [vmem:[#allocation79_spill] sm:$0xff] %v6040_v1  ;;  %v2949_v0 = vmul.f32 %v5629_v52, %v5939_v20  ;;  %v1046_v58 = vrot.slane %v6047_v10, 7  ;;  %v2737_v35 = vrot.slane %v5524_v15, 1  ;;  %v1969_v32 = vmul.f32 0.0, %v5613_v46  ;;  %v13403_v1 = vld [vmem:[#allocation7_spill] sm:$0xff] }
  0xca   : > { %v2560_v31 = vadd.f32 %v5900_v23, %v2320_v7  ;;  %v2564_v4 = vadd.f32 %v2452_v37, %v2324_v27  ;;  %v6067_v26 = vrot.slane %v5548_v22, %v5890_v40  ;;  %v2681_v61 = vrot.slane %v5508_v5, 1  ;;  %769 = vst [vmem:[#allocation2 + $0x1b0] sm:$0x3f] %v656_v24  ;;  %v13401_v40 = vld [vmem:[#allocation66_spill] sm:$0xff] }
  0xcb   : > { %v1113_v23 = vsel %vm1101_vm0, %v982_v43, %v1046_v58  ;;  %v1177_v55 = vsel %vm1101_vm0, %v1046_v58, %v982_v43  ;;  %v1973_v43 = vmul.f32 %v5613_v46, %v5524_v15  ;;  %v2745_v16 = vrot.slane %v6047_v10, 1  ;;  %v13394_v15 = vld [vmem:[#allocation50_spill] sm:$0xff] }
  0xcc   : > { %13386 = vst [vmem:[#allocation80_spill] sm:$0xff] %v6067_v26  ;;  %v3057_v12 = vadd.f32 %v2945_v29, %v2560_v31  ;;  %v3061_v20 = vadd.f32 %v2949_v0, %v2564_v4  ;;  %v6077_v38 = vmul.f32 %v5590_v39, %v1113_v23  ;;  %v1501_v44 = vmul.f32 %v5780_v56, %v1113_v23  ;;  %v13387_v29 = vld [vmem:[#allocation46_spill] sm:$0xff]  ;;  %v13388_v0 = vld [vmem:[#allocation51_spill] sm:$0xff] }
  0xcd   : > { %v1733_v22 = vmul.f32 %v6067_v26, %v1113_v23  ;;  %v6084_v27 = vmul.f32 %v5590_v39, %v1177_v55  ;;  %v1497_v37 = vmul.f32 %v5780_v56, %v1177_v55  ;;  %v1729_v21 = vmul.f32 %v6067_v26, %v1177_v55 }
  0xce   : > { %v3297_v5 = vadd.f32 %v5802_v2, %v3057_v12  ;;  %v3301_v7 = vadd.f32 %v5805_v14, %v3061_v20  ;;  %v6090_v48 = vadd.f32 %v1501_v44, %v13387_v29  ;;  %v13391_v14 = vld [vmem:[#allocation45_spill] sm:$0xff]  ;;  %v13392_v12 = vld [vmem:[#allocation39_spill] sm:$0xff]  ;;  %v13393_v20 = vld [vmem:[#allocation32_spill] sm:$0xff]  ;;  %v2866_v55 = vsel %vm2798_vm1, %v2737_v35, %v5850_v13 }
  0xcf   : > { %v1845_v31 = vadd.f32 %v1733_v22, %v13388_v0  ;;  %v6099_v58 = vadd.f32 %v1497_v37, %v13391_v14  ;;  %v2213_v23 = vmul.f32 %v13393_v20, %v13392_v12  ;;  %v1841_v24 = vadd.f32 %v1729_v21, %v13394_v15  ;;  %v657_v29 = vld [vmem:[%s5482_s17 + $0x178] sm:$0x3f]  ;;  %v13397_v0 = vld [vmem:[#allocation26_spill] sm:$0xff]  ;;  %v13399_v14 = vld [vmem:[#allocation47_spill] sm:$0xff] }
  0xd0   : > { %v6094_v4 = vadd.f32 %v3425_v47, %v3297_v5  ;;  %v6096_v2 = vadd.f32 %v3429_v62, %v3301_v7  ;;  %v6110_v47 = vld [vmem:[%s5539_s15 + $0x38] ss:$0 sm:$0xff]  ;;  %v2810_v62 = vsel %vm2798_vm1, %v2681_v61, %v2745_v16  ;;  %770 = vst [vmem:[#allocation2 + $0x1b8] sm:$0x3f] %v657_v29  ;;  %v13395_v7 = vld [vmem:[#allocation64_spill] sm:$0xff]  ;;  %v6118_v21 = vsel %vm2798_vm1, %v2745_v16, %v2681_v61 }
  0xd1   : > { %v2085_v44 = vadd.f32 %v1973_v43, %v1845_v31  ;;  %v2081_v22 = vadd.f32 %v1969_v32, %v1841_v24  ;;  %v2453_v37 = vmul.f32 %v13395_v7, %v6047_v10  ;;  %13396 = vst [vmem:[#allocation45_spill] sm:$0xff] %v6118_v21  ;;  %v2802_v43 = vsel %vm2798_vm1, %v5850_v13, %v2737_v35  ;;  %v13400_v24 = vld [vmem:[#allocation34_spill] sm:$0xff] }
  0xd2   : > { %13389 = vst [vmem:[#allocation46_spill] sm:$0xff] %v6094_v4  ;;  %13390 = vst [vmem:[#allocation51_spill] sm:$0xff] %v6096_v2  ;;  %v6124_v31 = vmul.f32 %v13397_v0, %v2810_v62  ;;  %v6127_v15 = vmul.f32 %v13399_v14, %v2810_v62  ;;  %v6131_v32 = vmul.f32 %v13399_v14, %v6118_v21  ;;  %v13402_v2 = vld [vmem:[#allocation55_spill] sm:$0xff]  ;;  %v13404_v13 = vld [vmem:[#allocation54_spill] sm:$0xff] }
  0xd3   : > { %v2325_v5 = vadd.f32 %v2213_v23, %v2085_v44  ;;  %v2950_v23 = vmul.f32 %v13397_v0, %v2866_v55  ;;  %v2321_v44 = vadd.f32 %v13400_v24, %v2081_v22  ;;  %v3426_v16 = vmul.f32 %v6110_v47, %v2810_v62  ;;  %v6141_v14 = vld [vmem:[#allocation2 + $0xe8] sm:$0xff] }
  0xd4   : > { %13398 = vst [vmem:[#allocation39_spill] sm:$0xff] %v6124_v31  ;;  %v3430_v35 = vmul.f32 %v6110_v47, %v6118_v21  ;;  %v2946_v29 = vmul.f32 %v13397_v0, %v2802_v43  ;;  %v984_v55 = vrot.slane %v13403_v1, 7  ;;  %v1048_v62 = vrot.slane %v6141_v14, 7  ;;  %v13412_v24 = vld [vmem:[#allocation11_spill] sm:$0xff]  ;;  %v13420_v21 = vld [vmem:[#allocation49_spill] sm:$0xff] }
  0xd5   : > { %v2565_v61 = vadd.f32 %v2453_v37, %v2325_v5  ;;  %v2561_v39 = vadd.f32 %v13401_v40, %v2321_v44  ;;  %v13409_v40 = vld [vmem:[#allocation33_spill] sm:$0xff]  ;;  %v985_v44 = vrot.slane %v13412_v24, 7  ;;  %v13417_v0 = vld [vmem:[#allocation27_spill] sm:$0xff]  ;;  %v2459_v52 = vmul.f32 %v5874_v57, %v6141_v14 }
  0xd6   : > { %v6152_v43 = vsel %vm1101_vm0, %v984_v55, %v1048_v62 }
  0xd7   : > { %v3062_v4 = vadd.f32 %v2950_v23, %v2565_v61  ;;  %v3058_v49 = vadd.f32 %v2946_v29, %v2561_v39  ;;  %13407 = vst [vmem:[#allocation66_spill] sm:$0xff] %v6152_v43  ;;  %v6156_v39 = vsel %vm1101_vm0, %v1048_v62, %v984_v55  ;;  %v6166_v23 = vld [vmem:[#allocation2 + $0xf0] sm:$0xff] }
  0xd8   : > { %13408 = vst [vmem:[#allocation55_spill] sm:$0xff] %v6156_v39  ;;  %13411 = vst [vmem:[#allocation7_spill] sm:$0xff] %v6166_v23  ;;  %v13413_v61 = vld [vmem:[#allocation68_spill] sm:$0xff] }
  0xd9   : > { %v3302_v31 = vadd.f32 %v13402_v2, %v3062_v4  ;;  %v3298_v22 = vadd.f32 %v13404_v13, %v3058_v49  ;;  %v1503_v4 = vmul.f32 %v13409_v40, %v6156_v39  ;;  %v1507_v13 = vmul.f32 %v13409_v40, %v6152_v43  ;;  %v13410_v49 = vld [vmem:[#allocation67_spill] sm:$0xff] }
  0xda   : > { %v1735_v2 = vmul.f32 %v13410_v49, %v6156_v39  ;;  %v2683_v40 = vrot.slane %v13403_v1, 1  ;;  %v13416_v39 = vld [vmem:[#allocation70_spill] sm:$0xff] }
  0xdb   : > { %v6145_v5 = vadd.f32 %v3430_v35, %v3302_v31  ;;  %v6148_v37 = vadd.f32 %v3426_v16, %v3298_v22  ;;  %v1739_v31 = vmul.f32 %v13410_v49, %v6152_v43  ;;  %v6170_v16 = vadd.f32 %v1503_v4, %v13413_v61  ;;  %v13414_v35 = vld [vmem:[#allocation69_spill] sm:$0xff] }
  0xdc   : > { %v6173_v29 = vadd.f32 %v1507_v13, %v13414_v35  ;;  %v1847_v55 = vadd.f32 %v1735_v2, %v5947_v11  ;;  %v13415_v22 = vld [vmem:[#allocation21_spill] sm:$0xff]  ;;  %v2747_v43 = vrot.slane %v6141_v14, 1  ;;  %v1049_v61 = vrot.slane %v6166_v23, 7  ;;  %v13418_v11 = vld [vmem:[#allocation28_spill] sm:$0xff] }
  0xdd   : > { %13405 = vst [vmem:[#allocation50_spill] sm:$0xff] %v6145_v5  ;;  %13406 = vst [vmem:[#allocation34_spill] sm:$0xff] %v6148_v37  ;;  %v1979_v62 = vmul.f32 %v13415_v22, %v5657_v8  ;;  %v1851_v37 = vadd.f32 %v1739_v31, %v13416_v39  ;;  %v2455_v5 = vmul.f32 %v5874_v57, %v13403_v1  ;;  %v13419_v39 = vld [vmem:[#allocation12_spill] sm:$0xff] }
  0xde   : > { %v2087_v4 = vadd.f32 %v13417_v0, %v1847_v55  ;;  %v1980_v13 = vmul.f32 %v5609_v45, %v5705_v50  ;;  %v2219_v2 = vmul.f32 %v13418_v11, %v5859_v54  ;;  %v2220_v8 = vmul.f32 %v5671_v25, %v5943_v9  ;;  %v6201_v50 = vld [vmem:[#allocation2 + $0xf8] sm:$0xff] }
  0xdf   : > { %v2091_v35 = vadd.f32 %v1979_v62, %v1851_v37  ;;  %v986_v31 = vrot.slane %v13419_v39, 7  ;;  %v6195_v34 = vsel %vm1101_vm0, %v985_v44, %v1049_v61  ;;  %v6199_v0 = vsel %vm1101_vm0, %v1049_v61, %v985_v44 }
  0xe0   : > { %v2327_v33 = vadd.f32 %v13420_v21, %v2087_v4  ;;  %13421 = vst [vmem:[#allocation54_spill] sm:$0xff] %v6195_v34  ;;  %13422 = vst [vmem:[#allocation11_spill] sm:$0xff] %v6199_v0  ;;  %v6207_v37 = vsel %vm2798_vm1, %v2683_v40, %v2747_v43  ;;  %v1504_v21 = vmul.f32 %v5765_v18, %v6199_v0 }
  0xe1   : > { %v2331_v55 = vadd.f32 %v2219_v2, %v2091_v35  ;;  %13423 = vst [vmem:[#allocation68_spill] sm:$0xff] %v6207_v37  ;;  %v1508_v4 = vmul.f32 %v5765_v18, %v6195_v34  ;;  %v1736_v44 = vmul.f32 %v5999_v36, %v6199_v0  ;;  %v1740_v61 = vmul.f32 %v5999_v36, %v6195_v34 }
  0xe2   : > { %v2567_v62 = vadd.f32 %v2455_v5, %v2327_v33  ;;  %v6219_v35 = vsel %vm2798_vm1, %v2747_v43, %v2683_v40  ;;  %v6222_v60 = vadd.f32 %v1504_v21, %v5993_v41  ;;  %v1050_v33 = vrot.slane %v6201_v50, 7  ;;  %v13425_v5 = vld [vmem:[#allocation37_spill] sm:$0xff]  ;;  %v13426_v40 = vld [vmem:[#allocation38_spill] sm:$0xff] }
  0xe3   : > { %v2571_v2 = vadd.f32 %v2459_v52, %v2331_v55  ;;  %13424 = vst [vmem:[#allocation69_spill] sm:$0xff] %v6219_v35  ;;  %v6227_v18 = vadd.f32 %v1508_v4, %v5990_v63  ;;  %v1848_v0 = vadd.f32 %v1736_v44, %v6004_v28  ;;  %v1852_v45 = vadd.f32 %v1740_v61, %v6007_v3  ;;  %v658_v21 = vld [vmem:[%s5482_s17 + $0x180] sm:$0xff] }
  0xe4   : > { %v3064_v25 = vadd.f32 %v13425_v5, %v2567_v62  ;;  %v2456_v52 = vmul.f32 %v5878_v53, %v13412_v24  ;;  %v2684_v43 = vrot.slane %v13412_v24, 1  ;;  %v3432_v41 = vmul.f32 %v5957_v59, %v6207_v37  ;;  %v13427_v62 = vld [vmem:[#allocation29_spill] sm:$0xff]  ;;  %771 = vst [vmem:[#allocation2 + $0x1c0] sm:$0xff] %v658_v21  ;;  %v13428_v44 = vld [vmem:[#allocation74_spill] sm:$0xff] }
  0xe5   : > { %v3068_v55 = vadd.f32 %v13426_v40, %v2571_v2  ;;  %v3436_v28 = vmul.f32 %v5957_v59, %v6219_v35  ;;  %v2088_v3 = vadd.f32 %v13427_v62, %v1848_v0  ;;  %v2092_v4 = vadd.f32 %v1980_v13, %v1852_v45  ;;  %v659_v13 = vld [vmem:[%s5482_s17 + $0x188] sm:$0xff]  ;;  %v662_v0 = vld [vmem:[%s5482_s17 + $0x1a0] sm:$0x3f] }
  0xe6   : > { %v3304_v63 = vadd.f32 %v5974_v17, %v3064_v25  ;;  %v2748_v5 = vrot.slane %v6166_v23, 1  ;;  %v6246_v2 = vsel %vm1101_vm0, %v986_v31, %v1050_v33  ;;  %v6250_v40 = vsel %vm1101_vm0, %v1050_v33, %v986_v31  ;;  %v13432_v17 = vld [vmem:[#allocation59_spill] sm:$0xff]  ;;  %772 = vst [vmem:[#allocation2 + $0x1c8] sm:$0xff] %v659_v13  ;;  %775 = vst [vmem:[#allocation2 + $0x1e0] sm:$0x3f] %v662_v0 }
  0xe7   : > { %v3308_v61 = vadd.f32 %v13428_v44, %v3068_v55  ;;  %13429 = vst [vmem:[#allocation21_spill] sm:$0xff] %v6246_v2  ;;  %13430 = vst [vmem:[#allocation70_spill] sm:$0xff] %v6250_v40  ;;  %v2328_v34 = vadd.f32 %v13432_v17, %v2088_v3  ;;  %v2332_v59 = vadd.f32 %v2220_v8, %v2092_v4  ;;  %v13435_v3 = vld [vmem:[#allocation43_spill] sm:$0xff]  ;;  %v13436_v44 = vld [vmem:[#allocation44_spill] sm:$0xff] }
  0xe8   : > { %v6252_v25 = vadd.f32 %v3432_v41, %v3304_v63  ;;  %v2460_v45 = vmul.f32 %v5878_v53, %v6166_v23  ;;  %v1505_v21 = vmul.f32 %v5780_v56, %v6250_v40  ;;  %v1509_v31 = vmul.f32 %v5780_v56, %v6246_v2  ;;  %v661_v17 = vld [vmem:[%s5482_s17 + $0x198] sm:$0xff] }
  0xe9   : > { %v6259_v55 = vadd.f32 %v3436_v28, %v3308_v61  ;;  %v2568_v33 = vadd.f32 %v2456_v52, %v2328_v34  ;;  %v6267_v8 = vsel %vm2798_vm1, %v2684_v43, %v2748_v5  ;;  %v6271_v63 = vsel %vm2798_vm1, %v2748_v5, %v2684_v43  ;;  %v660_v61 = vld [vmem:[%s5482_s17 + $0x190] sm:$0xff]  ;;  %774 = vst [vmem:[#allocation2 + $0x1d8] sm:$0xff] %v661_v17  ;;  %v13443_v17 = vld [vmem:[#allocation53_spill] sm:$0xff] }
  0xea   : > { %13431 = vst [vmem:[#allocation27_spill] sm:$0xff] %v6252_v25  ;;  %v2572_v41 = vadd.f32 %v2460_v45, %v2332_v59  ;;  %13434 = vst [vmem:[#allocation49_spill] sm:$0xff] %v6271_v63  ;;  %v6274_v28 = vadd.f32 %v1505_v21, %v6084_v27  ;;  %v6277_v62 = vadd.f32 %v1509_v31, %v6077_v38 }
  0xeb   : > { %13433 = vst [vmem:[#allocation12_spill] sm:$0xff] %v6259_v55  ;;  %v3065_v4 = vadd.f32 %v13435_v3, %v2568_v33  ;;  %v1737_v59 = vmul.f32 %v6067_v26, %v6250_v40  ;;  %v1741_v52 = vmul.f32 %v6067_v26, %v6246_v2  ;;  %v3433_v27 = vmul.f32 %v6018_v19, %v6267_v8  ;;  %v13439_v33 = vld [vmem:[#allocation31_spill] sm:$0xff]  ;;  %v13454_v2 = vld [vmem:[#allocation48_spill] sm:$0xff] }
  0xec   : > { %v3069_v34 = vadd.f32 %v13436_v44, %v2572_v41  ;;  %v3437_v38 = vmul.f32 %v6018_v19, %v6271_v63  ;;  %773 = vst [vmem:[#allocation2 + $0x1d0] sm:$0xff] %v660_v61  ;;  %v1981_v45 = vmul.f32 %v5613_v46, %v13392_v12  ;;  %v2221_v21 = vmul.f32 %v13393_v20, %v6047_v10 }
  0xed   : > { %v3305_v43 = vadd.f32 %v6036_v30, %v3065_v4  ;;  %v1849_v13 = vadd.f32 %v1737_v59, %v6099_v58  ;;  %v1853_v0 = vadd.f32 %v1741_v52, %v6090_v48  ;;  %v2457_v31 = vmul.f32 %v13395_v7, %v13419_v39  ;;  %v13440_v4 = vld [vmem:[#allocation63_spill] sm:$0xff]  ;;  %v664_v52 = vld [vmem:[%s5482_s17 + $0x1b0] sm:$0x3f] }
  0xee   : > { %v3309_v5 = vadd.f32 %v6044_v42, %v3069_v34  ;;  %v2685_v12 = vrot.slane %v13419_v39, 1  ;;  %v2749_v58 = vrot.slane %v6201_v50, 1  ;;  %v2461_v34 = vmul.f32 %v13395_v7, %v6201_v50  ;;  %v663_v59 = vld [vmem:[%s5482_s17 + $0x1a8] sm:$0x3f]  ;;  %777 = vst [vmem:[#allocation2 + $0x1f0] sm:$0x3f] %v664_v52 }
  0xef   : > { %v6297_v30 = vadd.f32 %v3433_v27, %v3305_v43  ;;  %v2089_v41 = vadd.f32 %v13439_v33, %v1849_v13  ;;  %v2093_v3 = vadd.f32 %v1981_v45, %v1853_v0  ;;  %776 = vst [vmem:[#allocation2 + $0x1e8] sm:$0x3f] %v663_v59  ;;  %v13442_v27 = vld [vmem:[#allocation52_spill] sm:$0xff]  ;;  %v6323_v13 = vld [vmem:[#allocation2 + $0x128] sm:$0xff]  ;;  %v6325_v0 = vld [vmem:[#allocation2 + $0x3e0] sm:$0xff]  ;;  %v1987_v56 = vmul.f32 %v13415_v22, %v5859_v54 }
  0xf0   : > { %v6299_v42 = vadd.f32 %v3437_v38, %v3309_v5  ;;  %v6315_v5 = vsel %vm2798_vm1, %v2685_v12, %v2749_v58  ;;  %v6319_v39 = vsel %vm2798_vm1, %v2749_v58, %v2685_v12  ;;  %13444 = vst [vmem:[#allocation74_spill] sm:$0xff] %v6323_v13  ;;  %v665_v12 = vld [vmem:[%s5482_s17 + $0x1b8] sm:$0x3f]  ;;  %v6336_v58 = vld [vmem:[#allocation2 + $0x3f0] sm:$0xff]  ;;  %v2467_v25 = vmul.f32 %v5874_v57, %v6323_v13 }
  0xf1   : > { %13437 = vst [vmem:[#allocation37_spill] sm:$0xff] %v6297_v30  ;;  %v2329_v48 = vadd.f32 %v13440_v4, %v2089_v41  ;;  %v2333_v44 = vadd.f32 %v2221_v21, %v2093_v3  ;;  %13441 = vst [vmem:[#allocation29_spill] sm:$0xff] %v6319_v39  ;;  %v6327_v21 = vld [vmem:[#allocation2 + $0x3e8] sm:$0xff]  ;;  %v3434_v41 = vmul.f32 %v6110_v47, %v6315_v5  ;;  %v13445_v4 = vld [vmem:[#allocation14_spill] sm:$0xff] }
  0xf2   : > { %13438 = vst [vmem:[#allocation38_spill] sm:$0xff] %v6299_v42  ;;  %v3438_v3 = vmul.f32 %v6110_v47, %v6319_v39  ;;  %778 = vst [vmem:[#allocation2 + $0x1f8] sm:$0x3f] %v665_v12  ;;  %v6346_v52 = vld [vmem:[#allocation2 + $0x3f8] sm:$0xff]  ;;  %v13458_v42 = vld [vmem:[#allocation36_spill] sm:$0xff] }
  0xf3   : > { %v2569_v61 = vadd.f32 %v2457_v31, %v2329_v48  ;;  %v2573_v43 = vadd.f32 %v2461_v34, %v2333_v44  ;;  %v988_v48 = vrot.slane %v13445_v4, 7  ;;  %v1052_v44 = vrot.slane %v6323_v13, 7 }
  0xf4   : > { %v3200_v30 = vmul.f32 %v13458_v42, %v6207_v37 }
  0xf5   : > { %v3066_v38 = vadd.f32 %v13442_v27, %v2569_v61  ;;  %v3070_v45 = vadd.f32 %v13443_v17, %v2573_v43  ;;  %v12923_v61 = vrot.slane %v6336_v58, 7  ;;  %v6351_v43 = vsel %vm1101_vm0, %v1052_v44, %v988_v48 }
  0xf6   : > { %13448 = vst [vmem:[#allocation44_spill] sm:$0xff] %v6351_v43  ;;  %v6355_v27 = vsel %vm1101_vm0, %v988_v48, %v1052_v44  ;;  %v1098_v17 = vrot.slane %v6346_v52, 7  ;;  %v2223_v48 = vmul.f32 %v13418_v11, %v13403_v1  ;;  %v2751_v1 = vrot.slane %v6323_v13, 1 }
  0xf7   : > { %v3306_v31 = vadd.f32 %v6127_v15, %v3066_v38  ;;  %v3310_v33 = vadd.f32 %v6131_v32, %v3070_v45  ;;  %v1095_v15 = vrot.slane %v6325_v0, 7  ;;  %v12914_v32 = vrot.slane %v6327_v21, 7  ;;  %13449 = vst [vmem:[#allocation31_spill] sm:$0xff] %v6355_v27  ;;  %v13450_v45 = vld [vmem:[#allocation6_spill] sm:$0xff] }
  0xf8   : > { %v1743_v38 = vmul.f32 %v13410_v49, %v6351_v43  ;;  %v6381_v12 = vsel %vm1101_vm0, %v13450_v45, %v12923_v61  ;;  %v13453_v43 = vld [vmem:[#allocation15_spill] sm:$0xff]  ;;  %v2687_v61 = vrot.slane %v13445_v4, 1 }
  0xf9   : > { %v6340_v34 = vadd.f32 %v3434_v41, %v3306_v31  ;;  %v6342_v59 = vadd.f32 %v3438_v3, %v3310_v33  ;;  %v6363_v31 = vsel %vm1101_vm0, %v13450_v45, %v1095_v15  ;;  %v6370_v33 = vsel %vm1101_vm0, %v13450_v45, %v12914_v32  ;;  %v6374_v3 = vld [vmem:[#allocation2 + $0x130] sm:$0xff] }
  0xfa   : > { %13451 = vst [vmem:[#allocation63_spill] sm:$0xff] %v6363_v31  ;;  %v1747_v41 = vmul.f32 %v13410_v49, %v6355_v27  ;;  %v1855_v44 = vadd.f32 %v1743_v38, %v6170_v16  ;;  %v13452_v31 = vld [vmem:[#allocation72_spill] sm:$0xff]  ;;  %v2463_v27 = vmul.f32 %v5874_v57, %v13445_v4  ;;  %v1053_v16 = vrot.slane %v6374_v3, 7 }
  0xfb   : > { %13446 = vst [vmem:[#allocation59_spill] sm:$0xff] %v6340_v34  ;;  %13447 = vst [vmem:[#allocation43_spill] sm:$0xff] %v6342_v59  ;;  %v2964_v32 = vmul.f32 %v5625_v51, %v13452_v31  ;;  %v989_v59 = vrot.slane %v13453_v43, 7  ;;  %v6401_v38 = vsel %vm1101_vm0, %v13450_v45, %v1098_v17  ;;  %v6406_v54 = vsel %vm1101_vm0, %v1095_v15, %v13450_v45 }
  0xfc   : > { %v1859_v34 = vadd.f32 %v1747_v41, %v6173_v29  ;;  %v2095_v40 = vadd.f32 %v13454_v2, %v1855_v44  ;;  %13455 = vst [vmem:[#allocation52_spill] sm:$0xff] %v6406_v54  ;;  %v2227_v29 = vmul.f32 %v13418_v11, %v6141_v14  ;;  %v13456_v2 = vld [vmem:[#allocation22_spill] sm:$0xff]  ;;  %v13465_v11 = vld [vmem:[#allocation25_spill] sm:$0xff] }
  0xfd   : > { %v1988_v31 = vmul.f32 %v13456_v2, %v5943_v9  ;;  %v13457_v41 = vld [vmem:[#allocation30_spill] sm:$0xff]  ;;  %v6420_v15 = vsel %vm1101_vm0, %v989_v59, %v1053_v16 }
  0xfe   : > { %v2099_v4 = vadd.f32 %v1987_v56, %v1859_v34  ;;  %v2224_v44 = vmul.f32 %v13457_v41, %v13412_v24  ;;  %v2335_v51 = vadd.f32 %v2223_v48, %v2095_v40  ;;  %13459 = vst [vmem:[#allocation53_spill] sm:$0xff] %v6420_v15  ;;  %v6424_v56 = vsel %vm1101_vm0, %v1053_v16, %v989_v59  ;;  %v13462_v16 = vld [vmem:[#allocation73_spill] sm:$0xff] }
  0xff   : > { %13460 = vst [vmem:[#allocation14_spill] sm:$0xff] %v6424_v56  ;;  %v6428_v24 = vsel %vm2798_vm1, %v2687_v61, %v2751_v1  ;;  %v1744_v40 = vmul.f32 %v5999_v36, %v6424_v56  ;;  %v1748_v34 = vmul.f32 %v5999_v36, %v6420_v15  ;;  %v3204_v48 = vmul.f32 %v13458_v42, %v6219_v35  ;;  %v13463_v42 = vld [vmem:[#allocation71_spill] sm:$0xff] }
 0x100   : > { %v2339_v55 = vadd.f32 %v2227_v29, %v2099_v4  ;;  %v2575_v9 = vadd.f32 %v2463_v27, %v2335_v51  ;;  %v2228_v29 = vmul.f32 %v13457_v41, %v6166_v23  ;;  %v2464_v59 = vmul.f32 %v5878_v53, %v13453_v43  ;;  %v13464_v41 = vld [vmem:[#allocation76_spill] sm:$0xff] }
 0x101   : > { %v6442_v27 = vsel %vm2798_vm1, %v2751_v1, %v2687_v61  ;;  %v1856_v54 = vadd.f32 %v1744_v40, %v6222_v60  ;;  %v1860_v15 = vadd.f32 %v1748_v34, %v6227_v18  ;;  %v2688_v56 = vrot.slane %v13453_v43, 1  ;;  %v13466_v61 = vld [vmem:[#allocation58_spill] sm:$0xff]  ;;  %v13467_v60 = vld [vmem:[#allocation16_spill] sm:$0xff] }
 0x102   : > { %v2579_v51 = vadd.f32 %v2467_v25, %v2339_v55  ;;  %13461 = vst [vmem:[#allocation6_spill] sm:$0xff] %v6442_v27  ;;  %v3072_v4 = vadd.f32 %v13462_v16, %v2575_v9  ;;  %v3440_v13 = vmul.f32 %v13463_v42, %v6428_v24  ;;  %v2965_v23 = vmul.f32 %v13465_v11, %v13464_v41  ;;  %v6452_v25 = vld [vmem:[#allocation2 + $0x138] sm:$0xff] }
 0x103   : > { %v2096_v1 = vadd.f32 %v13466_v61, %v1856_v54  ;;  %v2100_v37 = vadd.f32 %v1988_v31, %v1860_v15  ;;  %v2752_v9 = vrot.slane %v6374_v3, 1  ;;  %v990_v40 = vrot.slane %v13467_v60, 7  ;;  %v13472_v61 = vld [vmem:[#allocation41_spill] sm:$0xff] }
 0x104   : > { %v3076_v35 = vadd.f32 %v2964_v32, %v2579_v51  ;;  %v3312_v55 = vadd.f32 %v3200_v30, %v3072_v4  ;;  %v3444_v32 = vmul.f32 %v13463_v42, %v6442_v27  ;;  %v2468_v43 = vmul.f32 %v5878_v53, %v6374_v3 }
 0x105   : > { %v2336_v41 = vadd.f32 %v2224_v44, %v2096_v1  ;;  %v2340_v51 = vadd.f32 %v2228_v29, %v2100_v37  ;;  %v1054_v30 = vrot.slane %v6452_v25, 7  ;;  %v13469_v54 = vrot.slane %v6327_v21, 7 }
 0x106   : > { %v3316_v18 = vadd.f32 %v3204_v48, %v3076_v35  ;;  %v6461_v34 = vadd.f32 %v3440_v13, %v3312_v55  ;;  %v13470_v35 = vrot.slane %v6336_v58, 7  ;;  %v6481_v37 = vsel %vm1101_vm0, %v1098_v17, %v13450_v45 }
 0x107   : > { %v6469_v31 = vsel %vm1101_vm0, %v13469_v54, %v13450_v45  ;;  %v2794_v44 = vrot.slane %v6325_v0, 1  ;;  %v2576_v48 = vadd.f32 %v2464_v59, %v2336_v41  ;;  %v2580_v29 = vadd.f32 %v2468_v43, %v2340_v51 }
 0x108   : > { %13468 = vst [vmem:[#allocation72_spill] sm:$0xff] %v6461_v34  ;;  %v6476_v15 = vsel %vm1101_vm0, %v13470_v35, %v13450_v45  ;;  %v6483_v13 = vadd.f32 %v3444_v32, %v3316_v18  ;;  %v6488_v16 = vsel %vm2798_vm1, %v2688_v56, %v2752_v9  ;;  %v2795_v4 = vrot.slane %v6327_v21, 1  ;;  %v13474_v45 = vld [vmem:[#allocation77_spill] sm:$0xff] }
 0x109   : > { %v2796_v55 = vrot.slane %v6336_v58, 1  ;;  %v3201_v1 = vmul.f32 %v13472_v61, %v6267_v8  ;;  %v6496_v17 = vsel %vm2798_vm1, %v2752_v9, %v2688_v56  ;;  %v3205_v0 = vmul.f32 %v13472_v61, %v6271_v63  ;;  %v666_v9 = vld [vmem:[%s5482_s17 + $0x1c0] sm:$0xff] }
 0x10a   : > { %13471 = vst [vmem:[#allocation15_spill] sm:$0xff] %v6483_v13  ;;  %13473 = vst [vmem:[#allocation48_spill] sm:$0xff] %v6496_v17  ;;  %v3073_v59 = vadd.f32 %v13474_v45, %v2576_v48  ;;  %v3077_v60 = vadd.f32 %v2965_v23, %v2580_v29  ;;  %v6503_v18 = vsel %vm1101_vm0, %v1054_v30, %v990_v40  ;;  %v2797_v32 = vrot.slane %v6346_v52, 1  ;;  %v13477_v48 = vld [vmem:[#allocation56_spill] sm:$0xff]  ;;  %v13482_v13 = vld [vmem:[#allocation45_spill] sm:$0xff] }
 0x10b   : > { %13475 = vst [vmem:[#allocation73_spill] sm:$0xff] %v6503_v18  ;;  %v3441_v43 = vmul.f32 %v6018_v19, %v6488_v16  ;;  %v6510_v41 = vsel %vm1101_vm0, %v990_v40, %v1054_v30  ;;  %v1745_v56 = vmul.f32 %v6067_v26, %v6503_v18  ;;  %v3445_v54 = vmul.f32 %v6018_v19, %v6496_v17  ;;  %v6527_v30 = vld [vmem:[#allocation2 + $0xd8] sm:$0xff]  ;;  %v13483_v17 = vld [vmem:[#allocation26_spill] sm:$0xff] }
 0x10c   : > { %13476 = vst [vmem:[#allocation71_spill] sm:$0xff] %v6510_v41  ;;  %v3313_v51 = vadd.f32 %v3201_v1, %v3073_v59  ;;  %v3317_v23 = vadd.f32 %v3205_v0, %v3077_v60  ;;  %v1749_v35 = vmul.f32 %v6067_v26, %v6510_v41  ;;  %779 = vst [vmem:[#allocation2 + $0x200] sm:$0xff] %v666_v9  ;;  %v6545_v41 = vld [vmem:[#allocation2 + $0x118] sm:$0xff] }
 0x10d   : > { %v6522_v29 = vsel %vm2798_vm1, %v13477_v48, %v2794_v44  ;;  %v2860_v40 = vsel %vm2798_vm1, %v13477_v48, %v2795_v4  ;;  %v2225_v1 = vmul.f32 %v6527_v30, %v13393_v20  ;;  %v1857_v0 = vadd.f32 %v1745_v56, %v6274_v28  ;;  %v13481_v56 = vld [vmem:[#allocation60_spill] sm:$0xff] }
 0x10e   : > { %13478 = vst [vmem:[#allocation76_spill] sm:$0xff] %v6522_v29  ;;  %v6535_v45 = vsel %vm2798_vm1, %v13477_v48, %v2796_v55  ;;  %v6537_v59 = vadd.f32 %v3441_v43, %v3313_v51  ;;  %v6539_v60 = vadd.f32 %v3445_v54, %v3317_v23  ;;  %v1861_v9 = vadd.f32 %v1749_v35, %v6277_v62  ;;  %v670_v29 = vld [vmem:[%s5482_s17 + $0x1e0] sm:$0x3f] }
 0x10f   : > { %v1989_v63 = vmul.f32 %v5613_v46, %v6047_v10  ;;  %v2465_v28 = vmul.f32 %v6545_v41, %v13395_v7  ;;  %v2097_v18 = vadd.f32 %v13481_v56, %v1857_v0  ;;  %v2966_v43 = vmul.f32 %v13483_v17, %v13482_v13  ;;  %783 = vst [vmem:[#allocation2 + $0x220] sm:$0x3f] %v670_v29  ;;  %v667_v0 = vld [vmem:[%s5482_s17 + $0x1c8] sm:$0xff] }
 0x110   : > { %13479 = vst [vmem:[#allocation58_spill] sm:$0xff] %v6537_v59  ;;  %13480 = vst [vmem:[#allocation16_spill] sm:$0xff] %v6539_v60  ;;  %v6555_v62 = vsel %vm2798_vm1, %v13477_v48, %v2797_v32  ;;  %v6560_v10 = vsel %vm2798_vm1, %v2794_v44, %v13477_v48  ;;  %v2689_v51 = vrot.slane %v6545_v41, 1  ;;  %v2753_v23 = vrot.slane %v6452_v25, 1 }
 0x111   : > { %13484 = vst [vmem:[#allocation77_spill] sm:$0xff] %v6560_v10  ;;  %v2924_v13 = vsel %vm2798_vm1, %v2795_v4, %v13477_v48  ;;  %v2229_v54 = vmul.f32 %v13393_v20, %v6201_v50  ;;  %v2101_v35 = vadd.f32 %v1989_v63, %v1861_v9  ;;  %v2337_v29 = vadd.f32 %v2225_v1, %v2097_v18  ;;  %v6576_v10 = vld [vmem:[#allocation2] sm:$0xff] }
 0x112   : > { %v2925_v44 = vsel %vm2798_vm1, %v2796_v55, %v13477_v48  ;;  %v2926_v56 = vsel %vm2798_vm1, %v2797_v32, %v13477_v48  ;;  %13485 = vst [vmem:[#allocation56_spill] sm:$0xff] %v6576_v10  ;;  %v6580_v4 = vmul.f32 %v6576_v10, %v5874_v57  ;;  %v6584_v63 = vmul.f32 %v5874_v57, %v6327_v21  ;;  %v668_v48 = vld [vmem:[%s5482_s17 + $0x1d0] sm:$0xff]  ;;  %v13491_v21 = vld [vmem:[#allocation79_spill] sm:$0xff] }
 0x113   : > { %780 = vst [vmem:[#allocation2 + $0x208] sm:$0xff] %v667_v0  ;;  %v6588_v18 = vmul.f32 %v6576_v10, %v5878_v53  ;;  %v2341_v55 = vadd.f32 %v2229_v54, %v2101_v35  ;;  %v2469_v1 = vmul.f32 %v13395_v7, %v6452_v25  ;;  %v2577_v32 = vadd.f32 %v2465_v28, %v2337_v29  ;;  %v669_v54 = vld [vmem:[%s5482_s17 + $0x1d8] sm:$0xff] }
 0x114   : > { %13486 = vst [vmem:[#allocation60_spill] sm:$0xff] %v6580_v4  ;;  %13487 = vst [vmem:[#allocation45_spill] sm:$0xff] %v6584_v63  ;;  %v6595_v9 = vmul.f32 %v5878_v53, %v6336_v58  ;;  %v6599_v4 = vmul.f32 %v6576_v10, %v13395_v7  ;;  %v3841_v0 = vmul.f32 %v13491_v21, %v13491_v21  ;;  %v13493_v58 = vld [vmem:[#allocation47_spill] sm:$0xff] }
 0x115   : > { %13488 = vst [vmem:[#allocation81_spill] sm:$0xff] %v6588_v18  ;;  %v6605_v18 = vsel %vm2798_vm1, %v2689_v51, %v2753_v23  ;;  %781 = vst [vmem:[#allocation2 + $0x210] sm:$0xff] %v668_v48  ;;  %v6610_v28 = vmul.f32 %v13395_v7, %v6346_v52  ;;  %v3202_v35 = vmul.f32 %v13493_v58, %v6315_v5  ;;  %v13497_v48 = vld [vmem:[#allocation51_spill] sm:$0xff] }
 0x116   : > { %13489 = vst [vmem:[#allocation82_spill] sm:$0xff] %v6595_v9  ;;  %13490 = vst [vmem:[#allocation83_spill] sm:$0xff] %v6599_v4  ;;  %v2581_v29 = vadd.f32 %v2469_v1, %v2341_v55  ;;  %v13494_v9 = vld [vmem:[#allocation39_spill] sm:$0xff]  ;;  %v6617_v4 = vmul.f32 %v13410_v49, %v6469_v31  ;;  %v6621_v10 = vmul.f32 %v13410_v49, %v6370_v33  ;;  %v3695_v33 = vsel %vm3647_vm2, %v13491_v21, 0.0 }
 0x117   : > { %13492 = vst [vmem:[#allocation84_spill] sm:$0xff] %v6610_v28  ;;  %v3074_v63 = vadd.f32 %v13494_v9, %v2577_v32  ;;  %782 = vst [vmem:[#allocation2 + $0x218] sm:$0xff] %v669_v54  ;;  %v3842_v53 = vmul.f32 %v13497_v48, %v13497_v48  ;;  %v6627_v52 = vsel %vm2798_vm1, %v2753_v23, %v2689_v51  ;;  %v13499_v9 = vld [vmem:[#allocation78_spill] sm:$0xff]  ;;  %v3995_v28 = vsel %vm3647_vm2, %v3841_v0, 0.0 }
 0x118   : > { %13495 = vst [vmem:[#allocation39_spill] sm:$0xff] %v6617_v4  ;;  %13496 = vst [vmem:[#allocation85_spill] sm:$0xff] %v6621_v10  ;;  %v3206_v55 = vmul.f32 %v13493_v58, %v6319_v39  ;;  %v3078_v1 = vadd.f32 %v2966_v43, %v2581_v29  ;;  %v3442_v31 = vmul.f32 %v6110_v47, %v6605_v18  ;;  %v13501_v23 = vld [vmem:[#allocation46_spill] sm:$0xff]  ;;  %v3742_v21 = vsel %vm3647_vm2, %v13497_v48, 0.0  ;;  %v13532_v39 = vld [vmem:[#allocation7_spill] sm:$0xff] }
 0x119   : > { %13498 = vst [vmem:[#allocation86_spill] sm:$0xff] %v6627_v52  ;;  %v3314_v32 = vadd.f32 %v3202_v35, %v3074_v63  ;;  %v3837_v54 = vmul.f32 %v13499_v9, %v13499_v9  ;;  %v6639_v51 = vmul.f32 %v13463_v42, %v2860_v40  ;;  %v3838_v10 = vmul.f32 %v13501_v23, %v13501_v23 }
 0x11a   : > { %v3318_v43 = vadd.f32 %v3206_v55, %v3078_v1  ;;  %v3446_v63 = vmul.f32 %v6110_v47, %v6627_v52  ;;  %v6648_v29 = vmul.f32 %v13463_v42, %v2924_v13  ;;  %v4042_v0 = vsel %vm3647_vm2, %v3842_v53, 0.0  ;;  %v6668_v13 = vld [vmem:[%s5539_s15] sm:$0xff] }
 0x11b   : > { %13500 = vst [vmem:[#allocation87_spill] sm:$0xff] %v6639_v51  ;;  %v6645_v35 = vadd.f32 %v3442_v31, %v3314_v32  ;;  %v6655_v40 = vmul.f32 %v5999_v36, %v6476_v15  ;;  %v6659_v55 = vmul.f32 %v5999_v36, %v6381_v12  ;;  %v6663_v1 = vmul.f32 %v6018_v19, %v6535_v45  ;;  %v13507_v32 = vld [vmem:[#allocation50_spill] sm:$0xff] }
 0x11c   : > { %13503 = vst [vmem:[#allocation89_spill] sm:$0xff] %v6648_v29  ;;  %v3843_v42 = vmul.f32 %v13507_v32, %v13507_v32  ;;  %13508 = vst [vmem:[#allocation93_spill] sm:$0xff] %v6668_v13  ;;  %v6670_v31 = vadd.f32 %v3446_v63, %v3318_v43  ;;  %v3696_v53 = vadd.f32 %v3695_v33, %v13499_v9  ;;  %v3789_v29 = vsel %vm3647_vm2, %v13507_v32, 0.0  ;;  %v5003_v63 = vld [vmem:[#allocation2 + $0xd0] sm:$0xff] }
 0x11d   : > { %13502 = vst [vmem:[#allocation88_spill] sm:$0xff] %v6645_v35  ;;  %13504 = vst [vmem:[#allocation90_spill] sm:$0xff] %v6655_v40  ;;  %v3996_v48 = vadd.f32 %v3995_v28, %v3837_v54  ;;  %v6674_v15 = vmul.f32 %v6018_v19, %v2925_v44  ;;  %v6678_v12 = vmul.f32 %v6067_v26, %v6481_v37  ;;  %v13513_v28 = vld [vmem:[#allocation34_spill] sm:$0xff]  ;;  %v5002_v54 = vld [vmem:[#allocation2 + $0xc8] sm:$0xff] }
 0x11e   : > { %13505 = vst [vmem:[#allocation91_spill] sm:$0xff] %v6659_v55  ;;  %13506 = vst [vmem:[#allocation92_spill] sm:$0xff] %v6663_v1  ;;  %v3743_v45 = vadd.f32 %v3742_v21, %v13501_v23  ;;  %v4043_v1 = vadd.f32 %v4042_v0, %v3838_v10  ;;  %v6685_v43 = vmul.f32 %v6067_v26, %v6401_v38  ;;  %v13516_v21 = vld [vmem:[#allocation8_spill] sm:$0xff]  ;;  %v4089_v33 = vsel %vm3647_vm2, %v3843_v42, 0.0  ;;  %v13530_v40 = vld [vmem:[#allocation11_spill] sm:$0xff] }
 0x11f   : > { %13509 = vst [vmem:[#allocation94_spill] sm:$0xff] %v6670_v31  ;;  %13510 = vst [vmem:[#allocation95_spill] sm:$0xff] %v6674_v15  ;;  %v3839_v19 = vmul.f32 %v13513_v28, %v13513_v28  ;;  %v6691_v44 = vmul.f32 %v6110_v47, %v6555_v62  ;;  %v6694_v37 = vmul.f32 %v6110_v47, %v2926_v56  ;;  %v863_v47 = vld [vmem:[#allocation2 + $0xe0] sm:$0xff]  ;;  %v671_v56 = vld [vmem:[%s5482_s17 + $0x1e8] sm:$0x3f] }
 0x120   : > { %13511 = vst [vmem:[#allocation96_spill] sm:$0xff] %v6678_v12  ;;  %13512 = vst [vmem:[#allocation97_spill] sm:$0xff] %v6685_v43  ;;  %v6698_v10 = vrot.slane %v6668_v13, %v13516_v21  ;;  %v6702_v38 = vmul.f32 %v5002_v54, %v13415_v22  ;;  %v6705_v0 = vmul.f32 %v5003_v63, %v13456_v2  ;;  %v672_v32 = vld [vmem:[%s5482_s17 + $0x1f0] sm:$0x3f]  ;;  %v13521_v54 = vld [vmem:[#allocation27_spill] sm:$0xff] }
 0x121   : > { %13514 = vst [vmem:[#allocation98_spill] sm:$0xff] %v6691_v44  ;;  %13515 = vst [vmem:[#allocation99_spill] sm:$0xff] %v6694_v37  ;;  %v6709_v62 = vmul.f32 %v6527_v30, %v5613_v46  ;;  %v3790_v23 = vadd.f32 %v3789_v29, %v13513_v28  ;;  %v6719_v42 = vmul.f32 %v13415_v22, %v6141_v14  ;;  %v673_v21 = vld [vmem:[%s5482_s17 + $0x1f8] sm:$0x3f]  ;;  %v13522_v30 = vld [vmem:[#allocation55_spill] sm:$0xff] }
 0x122   : > { %13517 = vst [vmem:[#allocation100_spill] sm:$0xff] %v6698_v10  ;;  %13518 = vst [vmem:[#allocation101_spill] sm:$0xff] %v6705_v0  ;;  %v6715_v9 = vmul.f32 %v6698_v10, %v863_v47  ;;  %v3845_v63 = vmul.f32 %v13521_v54, %v13521_v54  ;;  %v13523_v37 = vld [vmem:[#allocation17_spill] sm:$0xff]  ;;  %v13524_v44 = vld [vmem:[#allocation66_spill] sm:$0xff]  ;;  %v3697_v29 = vadd.f32 %v3696_v53, %v13521_v54 }
 0x123   : > { %13519 = vst [vmem:[#allocation102_spill] sm:$0xff] %v6709_v62  ;;  %784 = vst [vmem:[#allocation2 + $0x228] sm:$0x3f] %v671_v56  ;;  %v1271_v15 = vmul.f32 %v13523_v37, %v13522_v30  ;;  %v1275_v51 = vmul.f32 %v13523_v37, %v13524_v44  ;;  %v13525_v47 = vld [vmem:[#allocation12_spill] sm:$0xff]  ;;  %v4090_v14 = vadd.f32 %v4089_v33, %v3839_v19  ;;  %v13531_v30 = vld [vmem:[#allocation18_spill] sm:$0xff] }
 0x124   : > { %13520 = vst [vmem:[#allocation103_spill] sm:$0xff] %v6715_v9  ;;  %785 = vst [vmem:[#allocation2 + $0x230] sm:$0x3f] %v672_v32  ;;  %v3849_v28 = vmul.f32 %v13525_v47, %v13525_v47  ;;  %v13526_v9 = vld [vmem:[#allocation68_spill] sm:$0xff]  ;;  %v3997_v56 = vadd.f32 %v3996_v48, %v3845_v63  ;;  %v13529_v32 = vld [vmem:[#allocation37_spill] sm:$0xff]  ;;  %v1272_v4 = vmul.f32 %v13531_v30, %v13530_v40 }
 0x125   : > { %786 = vst [vmem:[#allocation2 + $0x238] sm:$0x3f] %v673_v21  ;;  %v13527_v43 = vld [vmem:[#allocation24_spill] sm:$0xff]  ;;  %v3846_v12 = vmul.f32 %v13529_v32, %v13529_v32  ;;  %v6741_v44 = vmul.f32 %v13456_v2, %v13532_v39  ;;  %v3744_v53 = vadd.f32 %v3743_v45, %v13529_v32  ;;  %v13534_v54 = vld [vmem:[#allocation38_spill] sm:$0xff]  ;;  %v6752_v33 = vmul.f32 %v13465_v11, %v6267_v8  ;;  %v13538_v26 = vld [vmem:[#allocation19_spill] sm:$0xff] }
 0x126   : > { %v6733_v55 = vmul.f32 %v13527_v43, %v13526_v9  ;;  %v3850_v19 = vmul.f32 %v13534_v54, %v13534_v54  ;;  %v3698_v9 = vsel %vm3647_vm2, %v13525_v47, 0.0  ;;  %v13535_v21 = vld [vmem:[#allocation54_spill] sm:$0xff]  ;;  %v3998_v39 = vsel %vm3647_vm2, %v3849_v28, 0.0  ;;  %v13539_v32 = vld [vmem:[#allocation21_spill] sm:$0xff]  ;;  %v13549_v0 = vld [vmem:[#allocation31_spill] sm:$0xff] }
 0x127   : > { %13533 = vst [vmem:[#allocation66_spill] sm:$0xff] %v6741_v44  ;;  %v1276_v48 = vmul.f32 %v13531_v30, %v13535_v21  ;;  %13536 = vst [vmem:[#allocation68_spill] sm:$0xff] %v6752_v33  ;;  %v4044_v40 = vadd.f32 %v4043_v1, %v3846_v12  ;;  %v3699_v63 = vadd.f32 %v3698_v9, %v3697_v29  ;;  %v13537_v62 = vld [vmem:[#allocation70_spill] sm:$0xff]  ;;  %v3745_v21 = vsel %vm3647_vm2, %v13534_v54, 0.0  ;;  %v5004_v1 = vld [vmem:[#allocation2 + $0x108] sm:$0xff] }
 0x128   : > { %13528 = vst [vmem:[#allocation55_spill] sm:$0xff] %v6733_v55  ;;  %v6757_v45 = vmul.f32 %v13538_v26, %v13537_v62  ;;  %v6761_v55 = vmul.f32 %v13538_v26, %v13539_v32  ;;  %v3999_v47 = vadd.f32 %v3998_v39, %v3997_v56  ;;  %v6767_v8 = vmul.f32 %v5613_v46, %v6201_v50  ;;  %v13543_v56 = vld [vmem:[#allocation59_spill] sm:$0xff]  ;;  %v13545_v54 = vld [vmem:[#allocation28_spill] sm:$0xff]  ;;  %v13548_v33 = vld [vmem:[#allocation33_spill] sm:$0xff] }
 0x129   : > { %v6770_v12 = vmul.f32 %v5004_v1, %v13415_v22  ;;  %v6772_v28 = vadd.f32 %v3745_v21, %v3744_v53  ;;  %v4045_v62 = vsel %vm3647_vm2, %v3850_v19, 0.0  ;;  %v6777_v29 = vmul.f32 %v13483_v17, %v6315_v5  ;;  %v13544_v39 = vld [vmem:[#allocation43_spill] sm:$0xff]  ;;  %v871_v5 = vld [vmem:[#allocation2 + $0x120] sm:$0xff] }
 0x12a   : > { %13540 = vst [vmem:[#allocation11_spill] sm:$0xff] %v6767_v8  ;;  %v3847_v32 = vmul.f32 %v13543_v56, %v13543_v56  ;;  %v6781_v9 = vadd.f32 %v4045_v62, %v4044_v40  ;;  %v3851_v50 = vmul.f32 %v13544_v39, %v13544_v39  ;;  %v6786_v8 = vmul.f32 %v5004_v1, %v13545_v54  ;;  %v13550_v62 = vld [vmem:[#allocation30_spill] sm:$0xff] }
 0x12b   : > { %13541 = vst [vmem:[#allocation7_spill] sm:$0xff] %v6770_v12  ;;  %13542 = vst [vmem:[#allocation54_spill] sm:$0xff] %v6777_v29  ;;  %v5005_v12 = vld [vmem:[#allocation2 + $0x110] sm:$0xff]  ;;  %v3791_v19 = vadd.f32 %v3790_v23, %v13543_v56  ;;  %v1515_v40 = vmul.f32 %v13548_v33, %v13549_v0  ;;  %v6801_v1 = vmul.f32 %v6545_v41, %v5613_v46 }
 0x12c   : > { %v6789_v53 = vmul.f32 %v5005_v12, %v13456_v2  ;;  %v4091_v21 = vadd.f32 %v4090_v14, %v3847_v32  ;;  %v13547_v29 = vld [vmem:[#allocation44_spill] sm:$0xff]  ;;  %v6797_v35 = vmul.f32 %v5005_v12, %v13550_v62  ;;  %v6808_v23 = vmul.f32 %v6698_v10, %v871_v5  ;;  %v13556_v12 = vld [vmem:[#allocation74_spill] sm:$0xff] }
 0x12d   : > { %v1511_v31 = vmul.f32 %v13548_v33, %v13547_v29  ;;  %13552 = vst [vmem:[#allocation28_spill] sm:$0xff] %v6801_v1  ;;  %v3792_v14 = vsel %vm3647_vm2, %v13544_v39, 0.0  ;;  %v6814_v32 = vmul.f32 %v13523_v37, %v13547_v29  ;;  %v6818_v56 = vmul.f32 %v13415_v22, %v13556_v12  ;;  %v13559_v39 = vld [vmem:[#allocation14_spill] sm:$0xff] }
 0x12e   : > { %13546 = vst [vmem:[#allocation70_spill] sm:$0xff] %v6789_v53  ;;  %13551 = vst [vmem:[#allocation21_spill] sm:$0xff] %v6797_v35  ;;  %v6805_v53 = vmul.f32 %v6545_v41, %v13393_v20  ;;  %v6822_v1 = vmul.f32 %v13545_v54, %v13556_v12  ;;  %v6824_v41 = vld [vmem:[#allocation2 + $0x168] sm:$0xff]  ;;  %v4092_v5 = vsel %vm3647_vm2, %v3851_v50, 0.0  ;;  %v6835_v35 = vadd.f32 %v3792_v14, %v3791_v19  ;;  %v13563_v50 = vld [vmem:[#allocation36_spill] sm:$0xff] }
 0x12f   : > { %13554 = vst [vmem:[#allocation31_spill] sm:$0xff] %v6808_v23  ;;  %13555 = vst [vmem:[#allocation104_spill] sm:$0xff] %v6814_v32  ;;  %v6829_v23 = vmul.f32 %v13523_v37, %v13549_v0  ;;  %v13561_v32 = vld [vmem:[#allocation53_spill] sm:$0xff]  ;;  %v1623_v12 = vadd.f32 %v1511_v31, %v1271_v15  ;;  %v1627_v44 = vadd.f32 %v1515_v40, %v1275_v51 }
 0x130   : > { %13553 = vst [vmem:[#allocation44_spill] sm:$0xff] %v6805_v53  ;;  %13557 = vst [vmem:[#allocation74_spill] sm:$0xff] %v6818_v56  ;;  %v13560_v53 = vld [vmem:[#allocation40_spill] sm:$0xff]  ;;  %v6837_v56 = vadd.f32 %v4092_v5, %v4091_v21  ;;  %v6841_v13 = vmul.f32 %v13527_v43, %v6428_v24  ;;  %v6845_v0 = vmul.f32 %v13563_v50, %v6428_v24 }
 0x131   : > { %13558 = vst [vmem:[#allocation105_spill] sm:$0xff] %v6829_v23  ;;  %v1512_v29 = vmul.f32 %v13560_v53, %v13559_v39  ;;  %v1516_v33 = vmul.f32 %v13560_v53, %v13561_v32  ;;  %v6847_v23 = vld [vmem:[#allocation2 + $0x148] sm:$0xff]  ;;  %v1056_v53 = vrot.slane %v6824_v41, 7  ;;  %v6853_v19 = vmul.f32 %v13563_v50, %v6442_v27  ;;  %v13574_v27 = vld [vmem:[#allocation73_spill] sm:$0xff] }
 0x132   : > { %13562 = vst [vmem:[#allocation14_spill] sm:$0xff] %v6841_v13  ;;  %v992_v37 = vrot.slane %v6847_v23, 7  ;;  %v6857_v51 = vmul.f32 %v13531_v30, %v13559_v39  ;;  %v6861_v31 = vmul.f32 %v13456_v2, %v6374_v3  ;;  %v6865_v24 = vmul.f32 %v13550_v62, %v6374_v3  ;;  %v13569_v3 = vld [vmem:[#allocation48_spill] sm:$0xff] }
 0x133   : > { %v6869_v15 = vmul.f32 %v13531_v30, %v13561_v32  ;;  %v6871_v21 = vadd.f32 %v1512_v29, %v1272_v4  ;;  %v1628_v40 = vadd.f32 %v1516_v33, %v1276_v48  ;;  %v6875_v14 = vmul.f32 %v13465_v11, %v6488_v16  ;;  %v6891_v48 = vld [vmem:[#allocation2 + $0x170] sm:$0xff]  ;;  %v13572_v32 = vld [vmem:[#allocation15_spill] sm:$0xff] }
 0x134   : > { %13564 = vst [vmem:[#allocation53_spill] sm:$0xff] %v6857_v51  ;;  %13565 = vst [vmem:[#allocation106_spill] sm:$0xff] %v6861_v31  ;;  %v3853_v39 = vmul.f32 %v6461_v34, %v6461_v34  ;;  %v6881_v5 = vmul.f32 %v13472_v61, %v6488_v16  ;;  %v6885_v13 = vmul.f32 %v13472_v61, %v13569_v3  ;;  %v13575_v31 = vld [vmem:[#allocation42_spill] sm:$0xff] }
 0x135   : > { %13566 = vst [vmem:[#allocation107_spill] sm:$0xff] %v6869_v15  ;;  %13567 = vst [vmem:[#allocation108_spill] sm:$0xff] %v6875_v14  ;;  %v6889_v4 = vmul.f32 %v5613_v46, %v6452_v25  ;;  %v3700_v33 = vadd.f32 %v3699_v63, %v6461_v34  ;;  %v3857_v29 = vmul.f32 %v13572_v32, %v13572_v32  ;;  %v13576_v34 = vld [vmem:[#allocation71_spill] sm:$0xff]  ;;  %v3701_v15 = vsel %vm3647_vm2, %v13572_v32, 0.0 }
 0x136   : > { %13568 = vst [vmem:[#allocation109_spill] sm:$0xff] %v6881_v5  ;;  %13570 = vst [vmem:[#allocation110_spill] sm:$0xff] %v6885_v13  ;;  %v6898_v14 = vmul.f32 %v13393_v20, %v6452_v25  ;;  %v6902_v16 = vsel %vm1101_vm0, %v1056_v53, %v992_v37  ;;  %v4000_v3 = vadd.f32 %v3999_v47, %v3853_v39  ;;  %v6914_v25 = vld [vmem:[#allocation2 + $0x150] sm:$0xff]  ;;  %v1057_v39 = vrot.slane %v6891_v48, 7 }
 0x137   : > { %13571 = vst [vmem:[#allocation111_spill] sm:$0xff] %v6889_v4  ;;  %v1513_v61 = vmul.f32 %v13575_v31, %v13574_v27  ;;  %v6908_v4 = vsel %vm1101_vm0, %v992_v37, %v1056_v53  ;;  %v1751_v63 = vmul.f32 %v13410_v49, %v6902_v16  ;;  %v1517_v5 = vmul.f32 %v13575_v31, %v13576_v34 }
 0x138   : > { %13573 = vst [vmem:[#allocation112_spill] sm:$0xff] %v6898_v14  ;;  %v993_v14 = vrot.slane %v6914_v25, 7  ;;  %v1755_v47 = vmul.f32 %v13410_v49, %v6908_v4  ;;  %v3854_v37 = vmul.f32 %v6537_v59, %v6537_v59  ;;  %v6926_v53 = vmul.f32 %v13538_v26, %v13574_v27 }
 0x139   : > { %v6930_v31 = vmul.f32 %v13538_v26, %v13576_v34  ;;  %v6932_v13 = vadd.f32 %v3701_v15, %v3700_v33  ;;  %v4001_v49 = vsel %vm3647_vm2, %v3857_v29, 0.0  ;;  %v3747_v51 = vadd.f32 %v6772_v28, %v6537_v59  ;;  %v6948_v15 = vld [vmem:[#allocation2 + $0x140] sm:$0xff]  ;;  %v679_v59 = vld [vmem:[%s5482_s17 + $0x228] sm:$0x3f] }
 0x13a   : > { %13577 = vst [vmem:[#allocation73_spill] sm:$0xff] %v6926_v53  ;;  %v3858_v32 = vmul.f32 %v6539_v60, %v6539_v60  ;;  %v6939_v30 = vadd.f32 %v4001_v49, %v4000_v3  ;;  %v4047_v50 = vadd.f32 %v6781_v9, %v3854_v37  ;;  %v6943_v27 = vadd.f32 %v1513_v61, %v6757_v45  ;;  %v674_v49 = vld [vmem:[%s5482_s17 + $0x200] sm:$0xff] }
 0x13b   : > { %v1863_v53 = vadd.f32 %v1751_v63, %v1623_v12  ;;  %v6946_v34 = vadd.f32 %v1517_v5, %v6761_v55  ;;  %13578 = vst [vmem:[#allocation71_spill] sm:$0xff] %v6948_v15  ;;  %v1867_v29 = vadd.f32 %v1755_v47, %v1627_v44  ;;  %v6953_v28 = vsel %vm1101_vm0, %v993_v14, %v1057_v39  ;;  %v13587_v33 = vld [vmem:[#allocation62_spill] sm:$0xff] }
 0x13c   : > { %v3748_v9 = vsel %vm3647_vm2, %v6539_v60, 0.0  ;;  %v6960_v61 = vmul.f32 %v6948_v15, %v6698_v10  ;;  %v6964_v55 = vsel %vm1101_vm0, %v1057_v39, %v993_v14  ;;  %v1756_v44 = vmul.f32 %v5999_v36, %v6953_v28  ;;  %787 = vst [vmem:[#allocation2 + $0x240] sm:$0xff] %v674_v49  ;;  %v678_v39 = vld [vmem:[%s5482_s17 + $0x220] sm:$0x3f]  ;;  %792 = vst [vmem:[#allocation2 + $0x268] sm:$0x3f] %v679_v59 }
 0x13d   : > { %v6968_v45 = vadd.f32 %v3748_v9, %v3747_v51  ;;  %v4048_v12 = vsel %vm3647_vm2, %v3858_v32, 0.0  ;;  %v6973_v5 = vmul.f32 %v13483_v17, %v6605_v18  ;;  %v1752_v3 = vmul.f32 %v5999_v36, %v6964_v55  ;;  %v6987_v51 = vld [vmem:[#allocation2 + $0x160] sm:$0xff]  ;;  %791 = vst [vmem:[#allocation2 + $0x260] sm:$0x3f] %v678_v39  ;;  %v7017_v39 = vld [vmem:[#allocation2 + $0x158] sm:$0xff] }
 0x13e   : > { %13579 = vst [vmem:[#allocation113_spill] sm:$0xff] %v6960_v61  ;;  %v6977_v63 = vadd.f32 %v4048_v12, %v4047_v50  ;;  %v6981_v14 = vmul.f32 %v13493_v58, %v6605_v18  ;;  %v6985_v47 = vmul.f32 %v13493_v58, %v6627_v52  ;;  %13582 = vst [vmem:[#allocation116_spill] sm:$0xff] %v6987_v51  ;;  %v2691_v9 = vrot.slane %v6847_v23, 1  ;;  %v13591_v52 = vld [vmem:[#allocation93_spill] sm:$0xff] }
 0x13f   : > { %13580 = vst [vmem:[#allocation114_spill] sm:$0xff] %v6973_v5  ;;  %v2103_v32 = vadd.f32 %v6702_v38, %v1863_v53  ;;  %v6993_v37 = vmul.f32 %v6847_v23, %v13415_v22  ;;  %v6997_v50 = vmul.f32 %v6847_v23, %v13545_v54  ;;  %v2471_v18 = vmul.f32 %v6847_v23, %v5874_v57  ;;  %v675_v23 = vld [vmem:[%s5482_s17 + $0x208] sm:$0xff]  ;;  %v13590_v5 = vld [vmem:[#allocation9_spill] sm:$0xff] }
 0x140   : > { %13581 = vst [vmem:[#allocation115_spill] sm:$0xff] %v6981_v14  ;;  %v2107_v49 = vadd.f32 %v6719_v42, %v1867_v29  ;;  %v7005_v38 = vmul.f32 %v6914_v25, %v13456_v2  ;;  %v7009_v53 = vmul.f32 %v6914_v25, %v13550_v62  ;;  %v1868_v12 = vadd.f32 %v1756_v44, %v1628_v40  ;;  %v7066_v14 = vld [vmem:[#allocation2 + $0x178] sm:$0xff] }
 0x141   : > { %13583 = vst [vmem:[#allocation117_spill] sm:$0xff] %v6993_v37  ;;  %13584 = vst [vmem:[#allocation118_spill] sm:$0xff] %v6997_v50  ;;  %v2472_v60 = vmul.f32 %v6914_v25, %v13587_v33  ;;  %v1864_v29 = vadd.f32 %v1752_v3, %v6871_v21  ;;  %v994_v61 = vrot.slane %v7017_v39, 7  ;;  %v7026_v40 = vmul.f32 %v7017_v39, %v13393_v20  ;;  %v676_v37 = vld [vmem:[%s5482_s17 + $0x210] sm:$0xff]  ;;  %v13596_v3 = vld [vmem:[#allocation66_spill] sm:$0xff] }
 0x142   : > { %13585 = vst [vmem:[#allocation119_spill] sm:$0xff] %v7005_v38  ;;  %13586 = vst [vmem:[#allocation120_spill] sm:$0xff] %v7009_v53  ;;  %v7022_v38 = vmul.f32 %v7017_v39, %v5613_v46  ;;  %v2343_v44 = vadd.f32 %v6786_v8, %v2103_v32  ;;  %v7032_v21 = vmul.f32 %v7017_v39, %v13395_v7  ;;  %v13594_v32 = vld [vmem:[#allocation13_spill] sm:$0xff] }
 0x143   : > { %13589 = vst [vmem:[#allocation121_spill] sm:$0xff] %v7026_v40  ;;  %788 = vst [vmem:[#allocation2 + $0x248] sm:$0xff] %v675_v23  ;;  %v2347_v42 = vadd.f32 %v6822_v1, %v2107_v49  ;;  %v7041_v40 = vrot.slane %v13591_v52, %v13590_v5  ;;  %v7045_v8 = vmul.f32 %v6698_v10, %v6987_v51  ;;  %v677_v1 = vld [vmem:[%s5482_s17 + $0x218] sm:$0xff]  ;;  %v13597_v49 = vld [vmem:[#allocation88_spill] sm:$0xff]  ;;  %v13598_v5 = vrot.slane %v6987_v51, 7 }
 0x144   : > { %13588 = vst [vmem:[#allocation62_spill] sm:$0xff] %v7022_v38  ;;  %v2475_v38 = vmul.f32 %v5874_v57, %v6824_v41  ;;  %v7049_v23 = vrot.slane %v13591_v52, %v13594_v32  ;;  %v2108_v53 = vadd.f32 %v13596_v3, %v1868_v12  ;;  %789 = vst [vmem:[#allocation2 + $0x250] sm:$0xff] %v676_v37  ;;  %v13599_v57 = vrot.slane %v6948_v15, 7  ;;  %v13601_v32 = vld [vmem:[#allocation101_spill] sm:$0xff]  ;;  %v13602_v37 = vld [vmem:[#allocation94_spill] sm:$0xff] }
 0x145   : > { %13592 = vst [vmem:[#allocation122_spill] sm:$0xff] %v7041_v40  ;;  %13593 = vst [vmem:[#allocation123_spill] sm:$0xff] %v7045_v8  ;;  %v3794_v50 = vadd.f32 %v6835_v35, %v13597_v49  ;;  %v3855_v59 = vmul.f32 %v13597_v49, %v13597_v49  ;;  %v2104_v52 = vadd.f32 %v13601_v32, %v1864_v29  ;;  %v13606_v15 = vld [vmem:[#allocation69_spill] sm:$0xff] }
 0x146   : > { %13595 = vst [vmem:[#allocation13_spill] sm:$0xff] %v7049_v23  ;;  %v7063_v8 = vsel %vm1101_vm0, %v13599_v57, %v13598_v5  ;;  %790 = vst [vmem:[#allocation2 + $0x258] sm:$0xff] %v677_v1  ;;  %v3859_v12 = vmul.f32 %v13602_v37, %v13602_v37  ;;  %v7072_v35 = vmul.f32 %v7049_v23, %v6987_v51  ;;  %v3795_v57 = vsel %vm3647_vm2, %v13602_v37, 0.0 }
 0x147   : > { %13600 = vst [vmem:[#allocation66_spill] sm:$0xff] %v7063_v8  ;;  %v7076_v3 = vmul.f32 %v13415_v22, %v6824_v41  ;;  %v2583_v49 = vadd.f32 %v2471_v18, %v2343_v44  ;;  %v7082_v5 = vmul.f32 %v13545_v54, %v6824_v41  ;;  %v2587_v29 = vadd.f32 %v2475_v38, %v2347_v42  ;;  %v13607_v42 = vld [vmem:[#allocation21_spill] sm:$0xff] }
 0x148   : > { %13603 = vst [vmem:[#allocation101_spill] sm:$0xff] %v7072_v35  ;;  %v2755_v1 = vrot.slane %v6824_v41, 1  ;;  %v4094_v32 = vadd.f32 %v6837_v56, %v3855_v59  ;;  %v2348_v35 = vadd.f32 %v6865_v24, %v2108_v53  ;;  %v2476_v51 = vmul.f32 %v13587_v33, %v6891_v48  ;;  %v13608_v24 = vld [vmem:[#allocation17_spill] sm:$0xff] }
 0x149   : > { %13604 = vst [vmem:[#allocation124_spill] sm:$0xff] %v7076_v3  ;;  %v1058_v18 = vrot.slane %v7066_v14, 7  ;;  %v7090_v44 = vadd.f32 %v3795_v57, %v3794_v50  ;;  %v7094_v37 = vmul.f32 %v7041_v40, %v7063_v8  ;;  %v2972_v38 = vmul.f32 %v13527_v43, %v13606_v15  ;;  %v13611_v50 = vld [vmem:[#allocation55_spill] sm:$0xff]  ;;  %v680_v8 = vld [vmem:[%s5482_s17 + $0x230] sm:$0x3f]  ;;  %v13612_v3 = vld [vmem:[#allocation33_spill] sm:$0xff] }
 0x14a   : > { %v2344_v41 = vadd.f32 %v13607_v42, %v2104_v52  ;;  %v4095_v56 = vsel %vm3647_vm2, %v3859_v12, 0.0  ;;  %v7102_v53 = vmul.f32 %v13608_v24, %v6902_v16  ;;  %v7106_v59 = vmul.f32 %v13608_v24, %v6908_v4  ;;  %793 = vst [vmem:[#allocation2 + $0x270] sm:$0x3f] %v680_v8  ;;  %v13614_v24 = vld [vmem:[#allocation80_spill] sm:$0xff] }
 0x14b   : > { %13605 = vst [vmem:[#allocation125_spill] sm:$0xff] %v7094_v37  ;;  %v3080_v57 = vadd.f32 %v13611_v50, %v2583_v49  ;;  %v1519_v37 = vmul.f32 %v13612_v3, %v6902_v16  ;;  %v1523_v52 = vmul.f32 %v13612_v3, %v6908_v4  ;;  %v2820_v15 = vsel %vm2798_vm1, %v2691_v9, %v2755_v1 }
 0x14c   : > { %13609 = vst [vmem:[#allocation69_spill] sm:$0xff] %v7102_v53  ;;  %13610 = vst [vmem:[#allocation21_spill] sm:$0xff] %v7106_v59  ;;  %v3084_v12 = vadd.f32 %v2972_v38, %v2587_v29  ;;  %v7116_v42 = vadd.f32 %v4095_v56, %v4094_v32  ;;  %v7120_v59 = vsel %vm2798_vm1, %v2755_v1, %v2691_v9  ;;  %v2756_v16 = vrot.slane %v6891_v48, 1  ;;  %v7130_v29 = vld [vmem:[%s5539_s15 + $0x28] ss:$0 sm:$0xff]  ;;  %v13616_v1 = vld [vmem:[#allocation49_spill] sm:$0xff] }
 0x14d   : > { %13613 = vst [vmem:[#allocation55_spill] sm:$0xff] %v7120_v59  ;;  %v2588_v49 = vadd.f32 %v2476_v51, %v2348_v35  ;;  %v1125_v50 = vsel %vm1101_vm0, %v994_v61, %v1058_v18  ;;  %v2584_v53 = vadd.f32 %v2472_v60, %v2344_v41  ;;  %v1189_v4 = vsel %vm1101_vm0, %v1058_v18, %v994_v61  ;;  %v13617_v60 = vld [vmem:[#allocation104_spill] sm:$0xff]  ;;  %v13618_v38 = vld [vmem:[#allocation105_spill] sm:$0xff] }
 0x14e   : > { %v1757_v3 = vmul.f32 %v13614_v24, %v1125_v50  ;;  %v3320_v8 = vadd.f32 %v6845_v0, %v3080_v57  ;;  %13615 = vst [vmem:[#allocation126_spill] sm:$0xff] %v7130_v29  ;;  %v3448_v9 = vmul.f32 %v7130_v29, %v2820_v15  ;;  %v2973_v51 = vmul.f32 %v13465_v11, %v13616_v1  ;;  %v13620_v56 = vld [vmem:[#allocation40_spill] sm:$0xff] }
 0x14f   : > { %v1753_v35 = vmul.f32 %v13614_v24, %v1189_v4  ;;  %v7137_v32 = vadd.f32 %v1519_v37, %v13617_v60  ;;  %v7140_v41 = vadd.f32 %v1523_v52, %v13618_v38  ;;  %v3324_v61 = vadd.f32 %v6853_v19, %v3084_v12  ;;  %v13624_v12 = vld [vmem:[#allocation68_spill] sm:$0xff] }
 0x150   : > { %v3452_v0 = vmul.f32 %v7130_v29, %v7120_v59  ;;  %v7146_v18 = vmul.f32 %v13527_v43, %v2820_v15  ;;  %v1520_v57 = vmul.f32 %v13620_v56, %v6964_v55  ;;  %v7152_v1 = vmul.f32 %v13456_v2, %v6891_v48  ;;  %v681_v29 = vld [vmem:[%s5482_s17 + $0x238] sm:$0x3f]  ;;  %v13625_v24 = vld [vmem:[#allocation36_spill] sm:$0xff] }
 0x151   : > { %v3085_v37 = vadd.f32 %v2973_v51, %v2588_v49  ;;  %v1524_v52 = vmul.f32 %v13620_v56, %v6953_v28  ;;  %v13622_v60 = vrot.slane %v6914_v25, 1  ;;  %v3081_v38 = vadd.f32 %v13624_v12, %v2584_v53  ;;  %794 = vst [vmem:[#allocation2 + $0x278] sm:$0x3f] %v681_v29  ;;  %v13632_v25 = vld [vmem:[#allocation53_spill] sm:$0xff] }
 0x152   : > { %13619 = vst [vmem:[#allocation49_spill] sm:$0xff] %v7146_v18  ;;  %13621 = vst [vmem:[#allocation104_spill] sm:$0xff] %v7152_v1  ;;  %v1869_v18 = vadd.f32 %v1757_v3, %v6946_v34  ;;  %v7166_v43 = vmul.f32 %v13625_v24, %v2820_v15  ;;  %v7168_v1 = vadd.f32 %v3448_v9, %v3320_v8  ;;  %v13629_v34 = vld [vmem:[#allocation18_spill] sm:$0xff]  ;;  %v7198_v9 = vld [vmem:[%s5539_s15 + $0x30] ss:$0 sm:$0xff] }
 0x153   : > { %v7160_v19 = vsel %vm2798_vm1, %v2756_v16, %v13622_v60  ;;  %v13627_v49 = vmov %v13622_v60  ;;  %v1865_v56 = vadd.f32 %v1753_v35, %v6943_v27  ;;  %v7177_v60 = vmul.f32 %v13625_v24, %v7120_v59 }
 0x154   : > { %13623 = vst [vmem:[#allocation105_spill] sm:$0xff] %v7160_v19  ;;  %13626 = vst [vmem:[#allocation68_spill] sm:$0xff] %v7168_v1  ;;  %v2821_v51 = vsel %vm2798_vm1, %v13627_v49, %v2756_v16  ;;  %v7179_v53 = vadd.f32 %v3452_v0, %v3324_v61  ;;  %v7183_v3 = vmul.f32 %v13629_v34, %v6964_v55  ;;  %v13633_v16 = vld [vmem:[#allocation110_spill] sm:$0xff]  ;;  %v13634_v55 = vld [vmem:[#allocation107_spill] sm:$0xff] }
 0x155   : > { %v7187_v15 = vmul.f32 %v13629_v34, %v6953_v28  ;;  %v7190_v8 = vadd.f32 %v1520_v57, %v13632_v25  ;;  %v7194_v27 = vmul.f32 %v13550_v62, %v6891_v48  ;;  %v3325_v29 = vadd.f32 %v13633_v16, %v3085_v37  ;;  %v13635_v0 = vld [vmem:[#allocation109_spill] sm:$0xff]  ;;  %v13636_v57 = vld [vmem:[#allocation11_spill] sm:$0xff]  ;;  %v13638_v16 = vld [vmem:[#allocation102_spill] sm:$0xff] }
 0x156   : > { %13628 = vst [vmem:[#allocation127_spill] sm:$0xff] %v7179_v53  ;;  %13630 = vst [vmem:[#allocation128_spill] sm:$0xff] %v7183_v3  ;;  %v3453_v35 = vmul.f32 %v7198_v9, %v7160_v19  ;;  %v7203_v61 = vadd.f32 %v1524_v52, %v13634_v55  ;;  %v3321_v28 = vadd.f32 %v13635_v0, %v3081_v38  ;;  %v13639_v55 = vld [vmem:[#allocation41_spill] sm:$0xff]  ;;  %v13640_v0 = vld [vmem:[#allocation42_spill] sm:$0xff] }
 0x157   : > { %13631 = vst [vmem:[#allocation129_spill] sm:$0xff] %v7187_v15  ;;  %v3449_v12 = vmul.f32 %v7198_v9, %v2821_v51  ;;  %v2109_v49 = vadd.f32 %v13636_v57, %v1869_v18  ;;  %v3703_v48 = vadd.f32 %v6932_v13, %v7168_v1  ;;  %v3861_v37 = vmul.f32 %v7168_v1, %v7168_v1 }
 0x158   : > { %v7213_v25 = vmul.f32 %v13465_v11, %v2821_v51  ;;  %v2105_v59 = vadd.f32 %v13638_v16, %v1865_v56  ;;  %v3865_v52 = vmul.f32 %v7179_v53, %v7179_v53  ;;  %v7219_v38 = vmul.f32 %v13639_v55, %v2821_v51  ;;  %v7233_v16 = vld [vmem:[#allocation2 + $0x1a8] sm:$0xff] }
 0x159   : > { %v7223_v18 = vmul.f32 %v13639_v55, %v7160_v19  ;;  %v1521_v13 = vmul.f32 %v13640_v0, %v1189_v4  ;;  %v4003_v57 = vadd.f32 %v6939_v30, %v3861_v37  ;;  %v7227_v1 = vadd.f32 %v3453_v35, %v3325_v29  ;;  %v13644_v19 = vld [vmem:[#allocation112_spill] sm:$0xff] }
 0x15a   : > { %13637 = vst [vmem:[#allocation53_spill] sm:$0xff] %v7213_v25  ;;  %v7230_v25 = vmul.f32 %v13538_v26, %v1125_v50  ;;  %v1525_v56 = vmul.f32 %v13640_v0, %v1125_v50  ;;  %v3704_v51 = vsel %vm3647_vm2, %v7179_v53, 0.0  ;;  %v7237_v15 = vadd.f32 %v3449_v12, %v3321_v28  ;;  %v13646_v35 = vld [vmem:[#allocation44_spill] sm:$0xff]  ;;  %v13647_v28 = vld [vmem:[#allocation73_spill] sm:$0xff] }
 0x15b   : > { %13641 = vst [vmem:[#allocation110_spill] sm:$0xff] %v7227_v1  ;;  %v2349_v55 = vadd.f32 %v13644_v19, %v2109_v49  ;;  %v2477_v3 = vmul.f32 %v13395_v7, %v7066_v14  ;;  %v7242_v30 = vadd.f32 %v3704_v51, %v3703_v48  ;;  %v7245_v29 = vmul.f32 %v13538_v26, %v1189_v4  ;;  %v7255_v19 = vld [vmem:[#allocation2 + $0x188] sm:$0xff] }
 0x15c   : > { %13642 = vst [vmem:[#allocation107_spill] sm:$0xff] %v7230_v25  ;;  %13643 = vst [vmem:[#allocation109_spill] sm:$0xff] %v7237_v15  ;;  %v2345_v37 = vadd.f32 %v13646_v35, %v2105_v59  ;;  %v2757_v50 = vrot.slane %v7066_v14, 1  ;;  %v7249_v25 = vld [vmem:[#allocation2 + $0x1b0] sm:$0xff]  ;;  %v4004_v53 = vsel %vm3647_vm2, %v3865_v52, 0.0  ;;  %v7253_v12 = vadd.f32 %v1521_v13, %v13647_v28 }
 0x15d   : > { %13645 = vst [vmem:[#allocation11_spill] sm:$0xff] %v7245_v29  ;;  %v996_v49 = vrot.slane %v7255_v19, 7  ;;  %v1060_v48 = vrot.slane %v7233_v16, 7  ;;  %v7259_v51 = vadd.f32 %v4004_v53, %v4003_v57  ;;  %v3750_v59 = vadd.f32 %v6968_v45, %v7237_v15  ;;  %v7270_v28 = vld [vmem:[#allocation2 + $0x190] sm:$0xff] }
 0x15e   : > { %v3866_v4 = vmul.f32 %v7227_v1, %v7227_v1  ;;  %v7266_v35 = vadd.f32 %v1525_v56, %v6930_v31  ;;  %v3862_v52 = vmul.f32 %v7237_v15, %v7237_v15  ;;  %v2589_v13 = vadd.f32 %v2477_v3, %v2349_v55  ;;  %v13651_v56 = vld [vmem:[#allocation29_spill] sm:$0xff] }
 0x15f   : > { %13648 = vst [vmem:[#allocation102_spill] sm:$0xff] %v7259_v51  ;;  %v997_v29 = vrot.slane %v7270_v28, 7  ;;  %v1061_v53 = vrot.slane %v7249_v25, 7  ;;  %v7276_v57 = vmul.f32 %v5613_v46, %v7066_v14  ;;  %v2585_v45 = vadd.f32 %v7032_v21, %v2345_v37 }
 0x160   : > { %v13650_v51 = vrot.slane %v7017_v39, 1  ;;  %v2974_v3 = vmul.f32 %v13483_v17, %v13651_v56  ;;  %v3751_v55 = vsel %vm3647_vm2, %v7227_v1, 0.0  ;;  %v4050_v15 = vadd.f32 %v6977_v63, %v3862_v52 }
 0x161   : > { %13649 = vst [vmem:[#allocation112_spill] sm:$0xff] %v7276_v57  ;;  %v7296_v21 = vsel %vm1101_vm0, %v1060_v48, %v996_v49  ;;  %v7298_v37 = vadd.f32 %v3751_v55, %v3750_v59  ;;  %v7303_v56 = vmul.f32 %v13393_v20, %v7066_v14  ;;  %v7307_v63 = vsel %vm1101_vm0, %v996_v49, %v1060_v48  ;;  %v13658_v49 = vld [vmem:[#allocation67_spill] sm:$0xff] }
 0x162   : > { %v2822_v31 = vsel %vm2798_vm1, %v13650_v51, %v2757_v50  ;;  %v13652_v0 = vmov %v13650_v51  ;;  %v4051_v51 = vsel %vm3647_vm2, %v3866_v4, 0.0  ;;  %v7317_v59 = vsel %vm1101_vm0, %v1061_v53, %v997_v29  ;;  %v13656_v4 = vld [vmem:[#allocation54_spill] sm:$0xff] }
 0x163   : > { %v7292_v57 = vsel %vm2798_vm1, %v2757_v50, %v13652_v0  ;;  %v7310_v39 = vmul.f32 %v13483_v17, %v2822_v31  ;;  %v3086_v0 = vadd.f32 %v2974_v3, %v2589_v13  ;;  %v7313_v50 = vmul.f32 %v13493_v58, %v2822_v31  ;;  %v7333_v3 = vld [vmem:[%s5539_s15 + $0x38] ss:$0 sm:$0xff] }
 0x164   : > { %13653 = vst [vmem:[#allocation44_spill] sm:$0xff] %v7292_v57  ;;  %v3082_v52 = vadd.f32 %v13656_v4, %v2585_v45  ;;  %v7322_v14 = vmul.f32 %v13493_v58, %v7292_v57  ;;  %v1759_v48 = vmul.f32 %v13658_v49, %v7296_v21  ;;  %v7328_v55 = vsel %vm1101_vm0, %v997_v29, %v1061_v53  ;;  %v13678_v17 = vld [vmem:[#allocation93_spill] sm:$0xff] }
 0x165   : > { %13654 = vst [vmem:[#allocation73_spill] sm:$0xff] %v7310_v39  ;;  %13655 = vst [vmem:[#allocation29_spill] sm:$0xff] %v7313_v50  ;;  %v7330_v13 = vadd.f32 %v4051_v51, %v4050_v15  ;;  %v3450_v1 = vmul.f32 %v7333_v3, %v2822_v31  ;;  %v3454_v45 = vmul.f32 %v7333_v3, %v7292_v57  ;;  %v7340_v39 = vld [vmem:[#allocation2 + $0x180] sm:$0xff] }
 0x166   : > { %13657 = vst [vmem:[#allocation54_spill] sm:$0xff] %v7322_v14  ;;  %13660 = vst [vmem:[#allocation131_spill] sm:$0xff] %v7333_v3  ;;  %v1763_v4 = vmul.f32 %v13658_v49, %v7307_v63  ;;  %v7345_v29 = vmul.f32 %v7340_v39, %v6698_v10  ;;  %v7349_v15 = vmul.f32 %v7340_v39, %v7049_v23  ;;  %v13665_v49 = vld [vmem:[#allocation115_spill] sm:$0xff] }
 0x167   : > { %13659 = vst [vmem:[#allocation130_spill] sm:$0xff] %v7330_v13  ;;  %13661 = vst [vmem:[#allocation132_spill] sm:$0xff] %v7340_v39  ;;  %v1760_v53 = vmul.f32 %v5999_v36, %v7317_v59  ;;  %v3326_v31 = vadd.f32 %v6985_v47, %v3086_v0  ;;  %v7357_v57 = vmul.f32 %v7255_v19, %v13415_v22  ;;  %v13683_v13 = vld [vmem:[#allocation57_spill] sm:$0xff] }
 0x168   : > { %13662 = vst [vmem:[#allocation133_spill] sm:$0xff] %v7345_v29  ;;  %13663 = vst [vmem:[#allocation134_spill] sm:$0xff] %v7349_v15  ;;  %v1764_v14 = vmul.f32 %v5999_v36, %v7328_v55  ;;  %v3322_v29 = vadd.f32 %v13665_v49, %v3082_v52  ;;  %v7364_v50 = vmul.f32 %v7255_v19, %v13545_v54  ;;  %v13667_v15 = vld [vmem:[#allocation61_spill] sm:$0xff]  ;;  %v7378_v52 = vld [vmem:[#allocation2 + $0x1a0] sm:$0xff] }
 0x169   : > { %13664 = vst [vmem:[#allocation135_spill] sm:$0xff] %v7357_v57  ;;  %v2479_v3 = vmul.f32 %v7255_v19, %v13667_v15  ;;  %v1871_v47 = vadd.f32 %v1759_v48, %v7137_v32  ;;  %v7372_v51 = vmul.f32 %v7270_v28, %v13456_v2  ;;  %v7376_v57 = vmul.f32 %v7270_v28, %v13550_v62  ;;  %v7386_v48 = vld [vmem:[#allocation2 + $0x198] sm:$0xff] }
 0x16a   : > { %13666 = vst [vmem:[#allocation115_spill] sm:$0xff] %v7364_v50  ;;  %13670 = vst [vmem:[#allocation137_spill] sm:$0xff] %v7378_v52  ;;  %v1875_v49 = vadd.f32 %v1763_v4, %v7140_v41  ;;  %v7383_v50 = vmul.f32 %v7270_v28, %v13587_v33  ;;  %v998_v0 = vrot.slane %v7386_v48, 7  ;;  %v7390_v36 = vadd.f32 %v3454_v45, %v3326_v31  ;;  %v13676_v45 = vld [vmem:[#allocation7_spill] sm:$0xff]  ;;  %v682_v31 = vld [vmem:[%s5482_s17 + $0x240] sm:$0xff] }
 0x16b   : > { %13668 = vst [vmem:[#allocation61_spill] sm:$0xff] %v7372_v51  ;;  %13669 = vst [vmem:[#allocation136_spill] sm:$0xff] %v7376_v57  ;;  %v1872_v51 = vadd.f32 %v1760_v53, %v7190_v8  ;;  %v7394_v57 = vmul.f32 %v7386_v48, %v5613_v46  ;;  %v7398_v41 = vmul.f32 %v7386_v48, %v13393_v20  ;;  %v683_v8 = vld [vmem:[%s5482_s17 + $0x248] sm:$0xff] }
 0x16c   : > { %13671 = vst [vmem:[#allocation138_spill] sm:$0xff] %v7386_v48  ;;  %13672 = vst [vmem:[#allocation139_spill] sm:$0xff] %v7390_v36  ;;  %v1876_v4 = vadd.f32 %v1764_v14, %v7203_v61  ;;  %v7401_v32 = vadd.f32 %v3450_v1, %v3322_v29  ;;  %v7405_v58 = vmul.f32 %v7386_v48, %v13395_v7  ;;  %v13681_v61 = vld [vmem:[#allocation74_spill] sm:$0xff]  ;;  %v7420_v29 = vld [vmem:[#allocation2 + $0x1b8] sm:$0xff] }
 0x16d   : > { %13673 = vst [vmem:[#allocation140_spill] sm:$0xff] %v7394_v57  ;;  %13674 = vst [vmem:[#allocation141_spill] sm:$0xff] %v7398_v41  ;;  %v2111_v53 = vadd.f32 %v13676_v45, %v1871_v47  ;;  %v13677_v57 = vld [vmem:[#allocation20_spill] sm:$0xff]  ;;  %v7417_v1 = vmul.f32 %v6698_v10, %v7378_v52  ;;  %v2115_v14 = vadd.f32 %v13681_v61, %v1875_v49  ;;  %v13685_v41 = vld [vmem:[#allocation70_spill] sm:$0xff]  ;;  %v3798_v49 = vsel %vm3647_vm2, %v7390_v36, 0.0 }
 0x16e   : > { %13675 = vst [vmem:[#allocation142_spill] sm:$0xff] %v7401_v32  ;;  %v7413_v20 = vrot.slane %v13678_v17, %v13677_v57  ;;  %795 = vst [vmem:[#allocation2 + $0x280] sm:$0xff] %v682_v31  ;;  %v3797_v47 = vadd.f32 %v7090_v44, %v7401_v32  ;;  %v7427_v45 = vmul.f32 %v7049_v23, %v7378_v52  ;;  %v13686_v44 = vld [vmem:[#allocation106_spill] sm:$0xff] }
 0x16f   : > { %13680 = vst [vmem:[#allocation93_spill] sm:$0xff] %v7417_v1  ;;  %v7431_v57 = vrot.slane %v13678_v17, %v13683_v13  ;;  %v2112_v10 = vadd.f32 %v13685_v41, %v1872_v51  ;;  %796 = vst [vmem:[#allocation2 + $0x288] sm:$0xff] %v683_v8  ;;  %v3867_v31 = vmul.f32 %v7390_v36, %v7390_v36  ;;  %v686_v48 = vld [vmem:[%s5482_s17 + $0x260] sm:$0x3f]  ;;  %v13687_v17 = vrot.slane %v7378_v52, 7 }
 0x170   : > { %13679 = vst [vmem:[#allocation7_spill] sm:$0xff] %v7413_v20  ;;  %13682 = vst [vmem:[#allocation74_spill] sm:$0xff] %v7427_v45  ;;  %v2116_v1 = vadd.f32 %v13686_v44, %v1876_v4  ;;  %v3863_v45 = vmul.f32 %v7401_v32, %v7401_v32  ;;  %v13688_v13 = vrot.slane %v7340_v39, 7  ;;  %v13690_v41 = vld [vmem:[#allocation118_spill] sm:$0xff]  ;;  %v1062_v36 = vrot.slane %v7420_v29, 7  ;;  %v13692_v44 = vld [vmem:[#allocation56_spill] sm:$0xff] }
 0x171   : > { %13684 = vst [vmem:[#allocation57_spill] sm:$0xff] %v7431_v57  ;;  %v2351_v8 = vadd.f32 %v13690_v41, %v2111_v53  ;;  %799 = vst [vmem:[#allocation2 + $0x2a0] sm:$0x3f] %v686_v48  ;;  %v7455_v4 = vmul.f32 %v7431_v57, %v7378_v52  ;;  %v7459_v61 = vmul.f32 %v13692_v44, %v7431_v57  ;;  %v5017_v48 = vld [vmem:[#allocation2 + $0x3e0] sm:$0xff]  ;;  %v4098_v44 = vsel %vm3647_vm2, %v3867_v31, 0.0 }
 0x172   : > { %v7449_v51 = vsel %vm1101_vm0, %v13688_v13, %v13687_v17  ;;  %v2355_v32 = vadd.f32 %v7082_v5, %v2115_v14  ;;  %v2483_v17 = vmul.f32 %v13667_v15, %v7233_v16  ;;  %v7464_v13 = vadd.f32 %v3798_v49, %v3797_v47  ;;  %v684_v49 = vld [vmem:[%s5482_s17 + $0x250] sm:$0xff]  ;;  %v687_v31 = vld [vmem:[%s5482_s17 + $0x268] sm:$0x3f] }
 0x173   : > { %13689 = vst [vmem:[#allocation70_spill] sm:$0xff] %v7449_v51  ;;  %13691 = vst [vmem:[#allocation106_spill] sm:$0xff] %v7455_v4  ;;  %v4097_v53 = vadd.f32 %v7116_v42, %v3863_v45  ;;  %v7468_v41 = vmul.f32 %v5017_v48, %v7431_v57  ;;  %v13695_v4 = vld [vmem:[#allocation120_spill] sm:$0xff]  ;;  %v2356_v5 = vadd.f32 %v7194_v27, %v2116_v1  ;;  %v2759_v27 = vrot.slane %v7233_v16, 1  ;;  %v13698_v1 = vld [vmem:[#allocation6_spill] sm:$0xff] }
 0x174   : > { %13693 = vst [vmem:[#allocation118_spill] sm:$0xff] %v7459_v61  ;;  %v2352_v52 = vadd.f32 %v13695_v4, %v2112_v10  ;;  %v7474_v61 = vmul.f32 %v7041_v40, %v7449_v51  ;;  %v2484_v14 = vmul.f32 %v13587_v33, %v7249_v25  ;;  %v1530_v42 = vmul.f32 %v7413_v20, %v7449_v51  ;;  %v13699_v48 = vld [vmem:[#allocation24_spill] sm:$0xff] }
 0x175   : > { %13694 = vst [vmem:[#allocation56_spill] sm:$0xff] %v7468_v41  ;;  %v7483_v47 = vmul.f32 %v13415_v22, %v7233_v16  ;;  %v2591_v10 = vadd.f32 %v2479_v3, %v2351_v8  ;;  %v7487_v45 = vsel %vm1101_vm0, %v1062_v36, %v998_v0  ;;  %v2595_v4 = vadd.f32 %v2483_v17, %v2355_v32  ;;  %v13700_v3 = vld [vmem:[#allocation33_spill] sm:$0xff] }
 0x176   : > { %13696 = vst [vmem:[#allocation120_spill] sm:$0xff] %v7474_v61  ;;  %v2980_v41 = vmul.f32 %v13699_v48, %v13698_v1  ;;  %v7496_v51 = vsel %vm1101_vm0, %v998_v0, %v1062_v36  ;;  %797 = vst [vmem:[#allocation2 + $0x290] sm:$0xff] %v684_v49  ;;  %v1527_v8 = vmul.f32 %v13700_v3, %v7296_v21  ;;  %v2760_v61 = vrot.slane %v7249_v25, 1  ;;  %v13702_v36 = vld [vmem:[#allocation48_spill] sm:$0xff] }
 0x177   : > { %13697 = vst [vmem:[#allocation143_spill] sm:$0xff] %v7483_v47  ;;  %800 = vst [vmem:[#allocation2 + $0x2a8] sm:$0x3f] %v687_v31  ;;  %v1531_v39 = vmul.f32 %v13700_v3, %v7307_v63  ;;  %v7504_v32 = vmul.f32 %v13545_v54, %v7233_v16  ;;  %v2592_v17 = vadd.f32 %v7383_v50, %v2352_v52  ;;  %v685_v47 = vld [vmem:[%s5482_s17 + $0x258] sm:$0xff]  ;;  %v13703_v49 = vld [vmem:[#allocation80_spill] sm:$0xff] }
 0x178   : > { %v2596_v1 = vadd.f32 %v2484_v14, %v2356_v5  ;;  %v2981_v0 = vmul.f32 %v13465_v11, %v13702_v36  ;;  %v1761_v31 = vmul.f32 %v13703_v49, %v7487_v45  ;;  %798 = vst [vmem:[#allocation2 + $0x298] sm:$0xff] %v685_v47  ;;  %v7513_v40 = vadd.f32 %v4098_v44, %v4097_v53  ;;  %v13704_v3 = vld [vmem:[#allocation125_spill] sm:$0xff]  ;;  %v13705_v16 = vld [vmem:[#allocation14_spill] sm:$0xff] }
 0x179   : > { %13701 = vst [vmem:[#allocation6_spill] sm:$0xff] %v7504_v32  ;;  %v7516_v20 = vadd.f32 %v1530_v42, %v13704_v3  ;;  %v3088_v32 = vadd.f32 %v13705_v16, %v2591_v10  ;;  %v1765_v50 = vmul.f32 %v13703_v49, %v7496_v51  ;;  %v13706_v52 = vld [vmem:[#allocation17_spill] sm:$0xff]  ;;  %v13709_v47 = vrot.slane %v7255_v19, 1 }
 0x17a   : > { %v7523_v5 = vmul.f32 %v13706_v52, %v7296_v21  ;;  %v7527_v14 = vmul.f32 %v13706_v52, %v7307_v63  ;;  %v3092_v44 = vadd.f32 %v2980_v41, %v2595_v4  ;;  %v13710_v42 = vld [vmem:[#allocation69_spill] sm:$0xff]  ;;  %v13714_v63 = vld [vmem:[#allocation108_spill] sm:$0xff]  ;;  %v13716_v41 = vrot.slane %v7270_v28, 1 }
 0x17b   : > { %v2824_v53 = vsel %vm2798_vm1, %v13709_v47, %v2759_v27  ;;  %v7534_v3 = vadd.f32 %v1527_v8, %v13710_v42  ;;  %v13711_v10 = vld [vmem:[#allocation21_spill] sm:$0xff]  ;;  %v13712_v16 = vmov %v13709_v47  ;;  %v3093_v8 = vadd.f32 %v2981_v0, %v2596_v1  ;;  %v13717_v47 = vld [vmem:[#allocation126_spill] sm:$0xff] }
 0x17c   : > { %13707 = vst [vmem:[#allocation24_spill] sm:$0xff] %v7523_v5  ;;  %13708 = vst [vmem:[#allocation48_spill] sm:$0xff] %v7527_v14  ;;  %v7537_v36 = vadd.f32 %v1531_v39, %v13711_v10  ;;  %v7543_v21 = vsel %vm2798_vm1, %v2759_v27, %v13712_v16  ;;  %v3089_v14 = vadd.f32 %v13714_v63, %v2592_v17  ;;  %v688_v5 = vld [vmem:[%s5482_s17 + $0x270] sm:$0x3f]  ;;  %v13718_v42 = vmov %v13716_v41 }
 0x17d   : > { %13713 = vst [vmem:[#allocation125_spill] sm:$0xff] %v7543_v21  ;;  %v7548_v52 = vmul.f32 %v13699_v48, %v2824_v53  ;;  %v2825_v4 = vsel %vm2798_vm1, %v13716_v41, %v2760_v61  ;;  %v1873_v39 = vadd.f32 %v1761_v31, %v7253_v12  ;;  %801 = vst [vmem:[#allocation2 + $0x2b0] sm:$0x3f] %v688_v5  ;;  %v13720_v12 = vld [vmem:[#allocation40_spill] sm:$0xff] }
 0x17e   : > { %v3328_v19 = vadd.f32 %v7166_v43, %v3088_v32  ;;  %v3456_v27 = vmul.f32 %v13717_v47, %v2824_v53  ;;  %v7561_v17 = vsel %vm2798_vm1, %v2760_v61, %v13718_v42  ;;  %v1877_v10 = vadd.f32 %v1765_v50, %v7266_v35  ;;  %v13722_v5 = vld [vmem:[#allocation28_spill] sm:$0xff] }
 0x17f   : > { %13715 = vst [vmem:[#allocation14_spill] sm:$0xff] %v7548_v52  ;;  %13719 = vst [vmem:[#allocation69_spill] sm:$0xff] %v7561_v17  ;;  %v3332_v16 = vadd.f32 %v7177_v60, %v3092_v44  ;;  %v3460_v1 = vmul.f32 %v13717_v47, %v7543_v21  ;;  %v1528_v0 = vmul.f32 %v13720_v12, %v7317_v59  ;;  %v13729_v52 = vld [vmem:[#allocation129_spill] sm:$0xff] }
 0x180   : > { %v1532_v43 = vmul.f32 %v13720_v12, %v7328_v55  ;;  %v7572_v32 = vmul.f32 %v13625_v24, %v2824_v53  ;;  %v7576_v28 = vmul.f32 %v13625_v24, %v7543_v21  ;;  %v3329_v35 = vadd.f32 %v7219_v38, %v3089_v14  ;;  %v13726_v14 = vld [vmem:[#allocation111_spill] sm:$0xff] }
 0x181   : > { %v3457_v60 = vmul.f32 %v7198_v9, %v2825_v4  ;;  %v7582_v61 = vmul.f32 %v13456_v2, %v7249_v25  ;;  %v3333_v31 = vadd.f32 %v7223_v18, %v3093_v8  ;;  %v3461_v50 = vmul.f32 %v7198_v9, %v7561_v17  ;;  %v13728_v18 = vld [vmem:[#allocation128_spill] sm:$0xff] }
 0x182   : > { %v2113_v53 = vadd.f32 %v13722_v5, %v1873_v39  ;;  %v7588_v44 = vadd.f32 %v3456_v27, %v3328_v19  ;;  %v7592_v63 = vmul.f32 %v13629_v34, %v7317_v59  ;;  %v7596_v38 = vmul.f32 %v13629_v34, %v7328_v55  ;;  %v13731_v19 = vld [vmem:[#allocation41_spill] sm:$0xff]  ;;  %v13738_v5 = vld [vmem:[#allocation42_spill] sm:$0xff] }
 0x183   : > { %13721 = vst [vmem:[#allocation21_spill] sm:$0xff] %v7582_v61  ;;  %v2117_v41 = vadd.f32 %v13726_v14, %v1877_v10  ;;  %v7599_v42 = vadd.f32 %v3460_v1, %v3332_v16  ;;  %v7602_v8 = vadd.f32 %v1528_v0, %v13728_v18  ;;  %v7605_v21 = vadd.f32 %v1532_v43, %v13729_v52  ;;  %v13736_v1 = vld [vmem:[#allocation121_spill] sm:$0xff]  ;;  %v7651_v18 = vld [vmem:[#allocation2 + $0x1e8] sm:$0xff]  ;;  %v13741_v61 = vld [vmem:[#allocation26_spill] sm:$0xff] }
 0x184   : > { %13723 = vst [vmem:[#allocation108_spill] sm:$0xff] %v7588_v44  ;;  %13724 = vst [vmem:[#allocation126_spill] sm:$0xff] %v7592_v63  ;;  %v7609_v39 = vmul.f32 %v13550_v62, %v7249_v25  ;;  %v7612_v59 = vmul.f32 %v13465_v11, %v2825_v4  ;;  %v7615_v55 = vmul.f32 %v13731_v19, %v2825_v4 }
 0x185   : > { %13725 = vst [vmem:[#allocation28_spill] sm:$0xff] %v7596_v38  ;;  %13727 = vst [vmem:[#allocation111_spill] sm:$0xff] %v7599_v42  ;;  %v7617_v27 = vadd.f32 %v3457_v60, %v3329_v35  ;;  %v7621_v10 = vmul.f32 %v5613_v46, %v7420_v29  ;;  %v7625_v52 = vmul.f32 %v13731_v19, %v7561_v17  ;;  %v13740_v17 = vld [vmem:[#allocation86_spill] sm:$0xff]  ;;  %v13786_v38 = vld [vmem:[#allocation7_spill] sm:$0xff] }
 0x186   : > { %13730 = vst [vmem:[#allocation128_spill] sm:$0xff] %v7612_v59  ;;  %v7627_v16 = vadd.f32 %v3461_v50, %v3333_v31  ;;  %v7631_v25 = vmul.f32 %v13538_v26, %v7496_v51  ;;  %v2353_v4 = vadd.f32 %v13736_v1, %v2113_v53  ;;  %v3869_v0 = vmul.f32 %v7588_v44, %v7588_v44  ;;  %v689_v1 = vld [vmem:[%s5482_s17 + $0x278] sm:$0x3f] }
 0x187   : > { %13732 = vst [vmem:[#allocation129_spill] sm:$0xff] %v7617_v27  ;;  %13733 = vst [vmem:[#allocation144_spill] sm:$0xff] %v7621_v10  ;;  %v7638_v43 = vmul.f32 %v13538_v26, %v7487_v45  ;;  %v2357_v35 = vadd.f32 %v7303_v56, %v2117_v41  ;;  %v2485_v60 = vmul.f32 %v13395_v7, %v7420_v29  ;;  %v3707_v56 = vsel %vm3647_vm2, %v7599_v42, 0.0  ;;  %v13739_v41 = vld [vmem:[#allocation102_spill] sm:$0xff] }
 0x188   : > { %13734 = vst [vmem:[#allocation145_spill] sm:$0xff] %v7627_v16  ;;  %13735 = vst [vmem:[#allocation146_spill] sm:$0xff] %v7631_v25  ;;  %v3706_v31 = vadd.f32 %v7242_v30, %v7588_v44  ;;  %v3873_v50 = vmul.f32 %v7599_v42, %v7599_v42  ;;  %v1529_v53 = vmul.f32 %v13738_v5, %v7487_v45  ;;  %v2761_v44 = vrot.slane %v7420_v29, 1  ;;  %v13742_v42 = vld [vmem:[#allocation130_spill] sm:$0xff] }
 0x189   : > { %13737 = vst [vmem:[#allocation121_spill] sm:$0xff] %v7638_v43  ;;  %v1533_v14 = vmul.f32 %v13738_v5, %v7496_v51  ;;  %v4006_v10 = vadd.f32 %v13739_v41, %v3869_v0  ;;  %v3870_v30 = vmul.f32 %v7617_v27, %v7617_v27  ;;  %802 = vst [vmem:[#allocation2 + $0x2b8] sm:$0x3f] %v689_v1  ;;  %v7668_v41 = vld [vmem:[#allocation2 + $0x1c8] sm:$0xff]  ;;  %v1064_v1 = vrot.slane %v7651_v18, 7 }
 0x18a   : > { %v3753_v45 = vadd.f32 %v7298_v37, %v7617_v27  ;;  %v3874_v51 = vmul.f32 %v7627_v16, %v7627_v16  ;;  %v2593_v59 = vadd.f32 %v7405_v58, %v2353_v4  ;;  %v2982_v25 = vmul.f32 %v13741_v61, %v13740_v17  ;;  %v13744_v27 = vld [vmem:[#allocation11_spill] sm:$0xff] }
 0x18b   : > { %v4053_v43 = vadd.f32 %v13742_v42, %v3870_v30  ;;  %v2597_v0 = vadd.f32 %v2485_v60, %v2357_v35  ;;  %v1000_v26 = vrot.slane %v7668_v41, 7  ;;  %v7672_v5 = vadd.f32 %v3707_v56, %v3706_v31  ;;  %v13745_v58 = vld [vmem:[#allocation107_spill] sm:$0xff]  ;;  %v13747_v35 = vld [vmem:[#allocation138_spill] sm:$0xff] }
 0x18c   : > { %v4007_v37 = vsel %vm3647_vm2, %v3873_v50, 0.0  ;;  %v7676_v19 = vadd.f32 %v1529_v53, %v13744_v27  ;;  %v7679_v4 = vadd.f32 %v1533_v14, %v13745_v58  ;;  %v3754_v42 = vsel %vm3647_vm2, %v7627_v16, 0.0  ;;  %v13754_v56 = vld [vmem:[#allocation114_spill] sm:$0xff]  ;;  %v7703_v58 = vld [vmem:[#allocation2 + $0x1f0] sm:$0xff] }
 0x18d   : > { %13743 = vst [vmem:[#allocation102_spill] sm:$0xff] %v7672_v5  ;;  %v7681_v17 = vadd.f32 %v4007_v37, %v4006_v10  ;;  %v13748_v60 = vrot.slane %v13747_v35, 1  ;;  %v7695_v27 = vadd.f32 %v3754_v42, %v3753_v45  ;;  %v4054_v53 = vsel %vm3647_vm2, %v3874_v51, 0.0  ;;  %v13752_v10 = vld [vmem:[#allocation32_spill] sm:$0xff]  ;;  %v7707_v35 = vld [vmem:[#allocation2 + $0x1c0] sm:$0xff]  ;;  %v7796_v5 = vld [vmem:[#allocation2 + $0x1d8] sm:$0xff] }
 0x18e   : > { %v7700_v14 = vmul.f32 %v13752_v10, %v7420_v29  ;;  %v3090_v37 = vadd.f32 %v13754_v56, %v2593_v59  ;;  %v7705_v16 = vadd.f32 %v4054_v53, %v4053_v43  ;;  %13756 = vst [vmem:[#allocation114_spill] sm:$0xff] %v7707_v35  ;;  %v7712_v45 = vsel %vm1101_vm0, %v1000_v26, %v1064_v1  ;;  %v13758_v29 = vld [vmem:[#allocation47_spill] sm:$0xff]  ;;  %v7731_v53 = vld [vmem:[#allocation2 + $0x1d0] sm:$0xff] }
 0x18f   : > { %13746 = vst [vmem:[#allocation86_spill] sm:$0xff] %v7681_v17  ;;  %v2826_v30 = vsel %vm2798_vm1, %v13748_v60, %v2761_v44  ;;  %v13749_v31 = vmov %v13748_v60  ;;  %13751 = vst [vmem:[#allocation11_spill] sm:$0xff] %v7695_v27  ;;  %v3094_v60 = vadd.f32 %v2982_v25, %v2597_v0  ;;  %v7726_v25 = vsel %vm1101_vm0, %v1064_v1, %v1000_v26  ;;  %v13761_v43 = vld [vmem:[#allocation131_spill] sm:$0xff] }
 0x190   : > { %v7693_v50 = vsel %vm2798_vm1, %v2761_v44, %v13749_v31  ;;  %13753 = vst [vmem:[#allocation107_spill] sm:$0xff] %v7700_v14  ;;  %13755 = vst [vmem:[#allocation138_spill] sm:$0xff] %v7705_v16  ;;  %v999_v44 = vrot.slane %v7707_v35, 7  ;;  %v7715_v51 = vmul.f32 %v13741_v61, %v2826_v30  ;;  %v7718_v42 = vmul.f32 %v13758_v29, %v2826_v30  ;;  %v13763_v61 = vld [vmem:[#allocation100_spill] sm:$0xff]  ;;  %v13766_v1 = vld [vmem:[#allocation67_spill] sm:$0xff] }
 0x191   : > { %13750 = vst [vmem:[#allocation130_spill] sm:$0xff] %v7693_v50  ;;  %v7722_v59 = vmul.f32 %v13758_v29, %v7693_v50  ;;  %v3458_v0 = vmul.f32 %v13761_v43, %v2826_v30  ;;  %v3462_v31 = vmul.f32 %v13761_v43, %v7693_v50  ;;  %v1001_v56 = vrot.slane %v7731_v53, 7  ;;  %v13767_v50 = vld [vmem:[#allocation54_spill] sm:$0xff]  ;;  %v13780_v14 = vld [vmem:[#allocation65_spill] sm:$0xff] }
 0x192   : > { %13757 = vst [vmem:[#allocation147_spill] sm:$0xff] %v7715_v51  ;;  %13759 = vst [vmem:[#allocation148_spill] sm:$0xff] %v7718_v42  ;;  %v1065_v51 = vrot.slane %v7703_v58, 7  ;;  %v13762_v42 = vld [vmem:[#allocation29_spill] sm:$0xff]  ;;  %v7742_v26 = vmul.f32 %v7707_v35, %v7049_v23  ;;  %v1771_v30 = vmul.f32 %v13766_v1, %v7712_v45  ;;  %v3334_v43 = vadd.f32 %v13767_v50, %v3094_v60 }
 0x193   : > { %13760 = vst [vmem:[#allocation149_spill] sm:$0xff] %v7722_v59  ;;  %v3330_v16 = vadd.f32 %v13762_v42, %v3090_v37  ;;  %v7738_v59 = vmul.f32 %v7707_v35, %v13763_v61  ;;  %v7749_v29 = vmul.f32 %v7707_v35, %v7431_v57  ;;  %v7752_v37 = vld [vmem:[#allocation2 + $0x1e0] sm:$0xff]  ;;  %v1767_v42 = vmul.f32 %v13766_v1, %v7726_v25 }
 0x194   : > { %13765 = vst [vmem:[#allocation150_spill] sm:$0xff] %v7742_v26  ;;  %13769 = vst [vmem:[#allocation151_spill] sm:$0xff] %v7752_v37  ;;  %v7762_v26 = vmul.f32 %v7668_v41, %v13545_v54  ;;  %v7766_v50 = vmul.f32 %v7668_v41, %v13667_v15  ;;  %v7771_v27 = vmul.f32 %v7731_v53, %v13456_v2 }
 0x195   : > { %13764 = vst [vmem:[#allocation29_spill] sm:$0xff] %v7738_v59  ;;  %13768 = vst [vmem:[#allocation54_spill] sm:$0xff] %v7749_v29  ;;  %v7758_v59 = vmul.f32 %v7668_v41, %v13415_v22  ;;  %v7775_v29 = vmul.f32 %v7731_v53, %v13550_v62  ;;  %v7785_v1 = vadd.f32 %v3458_v0, %v3330_v16 }
 0x196   : > { %13771 = vst [vmem:[#allocation153_spill] sm:$0xff] %v7762_v26  ;;  %13772 = vst [vmem:[#allocation154_spill] sm:$0xff] %v7771_v27  ;;  %v7783_v26 = vsel %vm1101_vm0, %v1065_v51, %v1001_v56  ;;  %v7789_v60 = vmul.f32 %v7731_v53, %v13587_v33  ;;  %v1063_v27 = vrot.slane %v7752_v37, 7  ;;  %v1883_v17 = vadd.f32 %v1771_v30, %v7537_v36  ;;  %v13778_v36 = vld [vmem:[#allocation75_spill] sm:$0xff] }
 0x197   : > { %13770 = vst [vmem:[#allocation152_spill] sm:$0xff] %v7758_v59  ;;  %13773 = vst [vmem:[#allocation155_spill] sm:$0xff] %v7775_v29  ;;  %v7779_v59 = vsel %vm1101_vm0, %v1001_v56, %v1065_v51  ;;  %v7793_v29 = vadd.f32 %v3462_v31, %v3334_v43  ;;  %v1879_v56 = vadd.f32 %v1767_v42, %v7534_v3  ;;  %v7818_v42 = vld [vmem:[%s5539_s15] sm:$0xff]  ;;  %v13783_v3 = vld [vmem:[#allocation124_spill] sm:$0xff] }
 0x198   : > { %13774 = vst [vmem:[#allocation156_spill] sm:$0xff] %v7785_v1  ;;  %v7802_v16 = vmul.f32 %v7796_v5, %v5613_v46  ;;  %v7806_v0 = vmul.f32 %v7796_v5, %v13752_v10  ;;  %v1768_v43 = vmul.f32 %v13778_v36, %v7783_v26  ;;  %v1772_v31 = vmul.f32 %v13778_v36, %v7779_v59  ;;  %v13789_v46 = vld [vmem:[#allocation6_spill] sm:$0xff] }
 0x199   : > { %13775 = vst [vmem:[#allocation157_spill] sm:$0xff] %v7793_v29  ;;  %v7814_v30 = vmul.f32 %v7796_v5, %v13395_v7  ;;  %v7822_v51 = vrot.slane %v7818_v42, %v13780_v14  ;;  %v3871_v36 = vmul.f32 %v7785_v1, %v7785_v1  ;;  %v2123_v7 = vadd.f32 %v13783_v3, %v1883_v17 }
 0x19a   : > { %13776 = vst [vmem:[#allocation158_spill] sm:$0xff] %v7802_v16  ;;  %13777 = vst [vmem:[#allocation159_spill] sm:$0xff] %v7806_v0  ;;  %v7826_v16 = vmul.f32 %v13763_v61, %v7752_v37  ;;  %v3800_v0 = vadd.f32 %v7464_v13, %v7785_v1  ;;  %v3875_v10 = vmul.f32 %v7793_v29, %v7793_v29  ;;  %v13785_v13 = vld [vmem:[#allocation117_spill] sm:$0xff] }
 0x19b   : > { %13779 = vst [vmem:[#allocation160_spill] sm:$0xff] %v7814_v30  ;;  %13781 = vst [vmem:[#allocation65_spill] sm:$0xff] %v7822_v51  ;;  %v1130_v30 = vsel %vm1101_vm0, %v999_v44, %v1063_v27  ;;  %v1194_v14 = vsel %vm1101_vm0, %v1063_v27, %v999_v44  ;;  %v2119_v61 = vadd.f32 %v13785_v13, %v1879_v56  ;;  %v3801_v27 = vsel %vm3647_vm2, %v7793_v29, 0.0  ;;  %v13787_v13 = vld [vmem:[#allocation122_spill] sm:$0xff] }
 0x19c   : > { %13782 = vst [vmem:[#allocation161_spill] sm:$0xff] %v7826_v16  ;;  %v7841_v16 = vmul.f32 %v7049_v23, %v7752_v37  ;;  %v7846_v1 = vmul.f32 %v7431_v57, %v7752_v37  ;;  %v1880_v17 = vadd.f32 %v1768_v43, %v7602_v8  ;;  %v1884_v3 = vadd.f32 %v1772_v31, %v7605_v21  ;;  %v7864_v8 = vld [vmem:[#allocation2 + $0x1f8] sm:$0xff]  ;;  %v690_v43 = vld [vmem:[%s5482_s17 + $0x280] sm:$0xff] }
 0x19d   : > { %v4100_v44 = vadd.f32 %v7513_v40, %v3871_v36  ;;  %v1538_v23 = vmul.f32 %v13786_v38, %v1130_v30  ;;  %v7856_v56 = vadd.f32 %v3801_v27, %v3800_v0  ;;  %v7859_v57 = vmul.f32 %v13787_v13, %v1194_v14  ;;  %v13792_v0 = vld [vmem:[#allocation115_spill] sm:$0xff]  ;;  %803 = vst [vmem:[#allocation2 + $0x2c0] sm:$0xff] %v690_v43 }
 0x19e   : > { %13784 = vst [vmem:[#allocation124_spill] sm:$0xff] %v7841_v16  ;;  %v1770_v16 = vmul.f32 %v7822_v51, %v1130_v30  ;;  %v2363_v63 = vadd.f32 %v13789_v46, %v2123_v7  ;;  %v2491_v21 = vmul.f32 %v13667_v15, %v7651_v18  ;;  %v4101_v40 = vsel %vm3647_vm2, %v3875_v10, 0.0  ;;  %v13797_v10 = vld [vmem:[#allocation119_spill] sm:$0xff] }
 0x19f   : > { %13788 = vst [vmem:[#allocation117_spill] sm:$0xff] %v7859_v57  ;;  %v7869_v36 = vmul.f32 %v13787_v13, %v1130_v30  ;;  %v7872_v31 = vmul.f32 %v13786_v38, %v1194_v14  ;;  %v2359_v27 = vadd.f32 %v13792_v0, %v2119_v61  ;;  %v7876_v29 = vmul.f32 %v7822_v51, %v1194_v14  ;;  %v13799_v61 = vld [vmem:[#allocation120_spill] sm:$0xff] }
 0x1a0   : > { %v13794_v46 = vrot.slane %v7707_v35, 1  ;;  %v13795_v7 = vrot.slane %v7752_v37, 1  ;;  %v2120_v30 = vadd.f32 %v13797_v10, %v1880_v17  ;;  %v7889_v38 = vadd.f32 %v4101_v40, %v4100_v44  ;;  %v13800_v35 = vld [vmem:[#allocation35_spill] sm:$0xff]  ;;  %v13803_v44 = vld [vmem:[#allocation52_spill] sm:$0xff]  ;;  %v13811_v37 = vld [vmem:[#allocation33_spill] sm:$0xff] }
 0x1a1   : > { %13790 = vst [vmem:[#allocation6_spill] sm:$0xff] %v7869_v36  ;;  %13791 = vst [vmem:[#allocation162_spill] sm:$0xff] %v7872_v31  ;;  %v13798_v36 = vld [vmem:[#allocation104_spill] sm:$0xff]  ;;  %v691_v31 = vld [vmem:[%s5482_s17 + $0x288] sm:$0xff]  ;;  %v7892_v43 = vadd.f32 %v1538_v23, %v13799_v61  ;;  %v1882_v14 = vadd.f32 %v1770_v16, %v7516_v20  ;;  %v1066_v0 = vrot.slane %v7864_v8, 7  ;;  %v2763_v17 = vrot.slane %v7651_v18, 1 }
 0x1a2   : > { %13793 = vst [vmem:[#allocation115_spill] sm:$0xff] %v7876_v29  ;;  %v7884_v57 = vsel %vm2798_vm1, %v13795_v7, %v13794_v46  ;;  %v2124_v13 = vadd.f32 %v13798_v36, %v1884_v3  ;;  %804 = vst [vmem:[#allocation2 + $0x2c8] sm:$0xff] %v691_v31  ;;  %v7898_v46 = vrot.slane %v7818_v42, %v13800_v35  ;;  %v13802_v10 = vld [vmem:[#allocation55_spill] sm:$0xff]  ;;  %v694_v35 = vld [vmem:[%s5482_s17 + $0x2a0] sm:$0x3f] }
 0x1a3   : > { %13796 = vst [vmem:[#allocation163_spill] sm:$0xff] %v7884_v57  ;;  %v2603_v7 = vadd.f32 %v2491_v21, %v2363_v63  ;;  %v2988_v3 = vmul.f32 %v13699_v48, %v13802_v10  ;;  %v7905_v40 = vmul.f32 %v7822_v51, %v13803_v44  ;;  %v13805_v23 = vld [vmem:[#allocation63_spill] sm:$0xff]  ;;  %v7913_v16 = vmul.f32 %v13415_v22, %v7651_v18  ;;  %v13809_v36 = vld [vmem:[#allocation136_spill] sm:$0xff] }
 0x1a4   : > { %13801 = vst [vmem:[#allocation119_spill] sm:$0xff] %v7898_v46  ;;  %v7909_v20 = vmul.f32 %v7822_v51, %v13805_v23  ;;  %v2599_v63 = vadd.f32 %v7766_v50, %v2359_v27  ;;  %v7919_v21 = vmul.f32 %v7898_v46, %v7884_v57  ;;  %v2360_v31 = vadd.f32 %v13809_v36, %v2120_v30  ;;  %v13810_v44 = vld [vmem:[#allocation123_spill] sm:$0xff] }
 0x1a5   : > { %13804 = vst [vmem:[#allocation104_spill] sm:$0xff] %v7905_v40  ;;  %13807 = vst [vmem:[#allocation35_spill] sm:$0xff] %v7913_v16  ;;  %v2364_v61 = vadd.f32 %v7609_v39, %v2124_v13  ;;  %v2492_v10 = vmul.f32 %v13587_v33, %v7703_v58  ;;  %v2122_v23 = vadd.f32 %v13810_v44, %v1882_v14  ;;  %v13812_v50 = vrot.slane %v7796_v5, 7  ;;  %v692_v16 = vld [vmem:[%s5482_s17 + $0x290] sm:$0xff] }
 0x1a6   : > { %13806 = vst [vmem:[#allocation120_spill] sm:$0xff] %v7909_v20  ;;  %13808 = vst [vmem:[#allocation55_spill] sm:$0xff] %v7919_v21  ;;  %v1535_v29 = vmul.f32 %v13811_v37, %v7726_v25  ;;  %v1539_v13 = vmul.f32 %v13811_v37, %v7712_v45  ;;  %v7944_v14 = vmul.f32 %v13545_v54, %v7651_v18  ;;  %v2764_v40 = vrot.slane %v7703_v58, 1  ;;  %v13818_v18 = vld [vmem:[#allocation105_spill] sm:$0xff] }
 0x1a7   : > { %807 = vst [vmem:[#allocation2 + $0x2e0] sm:$0x3f] %v694_v35  ;;  %v7932_v27 = vsel %vm1101_vm0, %v13812_v50, %v1066_v0  ;;  %v13813_v30 = vmov %v13812_v50  ;;  %v13814_v35 = vrot.slane %v7668_v41, 1  ;;  %v3100_v44 = vadd.f32 %v2988_v3, %v2603_v7  ;;  %v695_v50 = vld [vmem:[%s5482_s17 + $0x2a8] sm:$0x3f]  ;;  %805 = vst [vmem:[#allocation2 + $0x2d0] sm:$0xff] %v692_v16 }
 0x1a8   : > { %v7938_v39 = vsel %vm1101_vm0, %v1066_v0, %v13813_v30  ;;  %v13817_v30 = vld [vmem:[#allocation49_spill] sm:$0xff]  ;;  %v2989_v57 = vmul.f32 %v13465_v11, %v13818_v18  ;;  %808 = vst [vmem:[#allocation2 + $0x2e8] sm:$0x3f] %v695_v50  ;;  %v2604_v7 = vadd.f32 %v2492_v10, %v2364_v61  ;;  %v1773_v3 = vmul.f32 %v13703_v49, %v7932_v27  ;;  %v13821_v50 = vld [vmem:[#allocation24_spill] sm:$0xff] }
 0x1a9   : > { %v2828_v36 = vsel %vm2798_vm1, %v13814_v35, %v2763_v17  ;;  %v13815_v21 = vmov %v13814_v35  ;;  %v3096_v20 = vadd.f32 %v13817_v30, %v2599_v63  ;;  %v2600_v35 = vadd.f32 %v7789_v60, %v2360_v31  ;;  %v13820_v63 = vld [vmem:[#allocation17_spill] sm:$0xff]  ;;  %v13822_v61 = vld [vmem:[#allocation48_spill] sm:$0xff] }
 0x1aa   : > { %v7955_v0 = vsel %vm2798_vm1, %v2763_v17, %v13815_v21  ;;  %v1769_v41 = vmul.f32 %v13703_v49, %v7938_v39  ;;  %v13819_v17 = vld [vmem:[#allocation74_spill] sm:$0xff]  ;;  %v7970_v30 = vmul.f32 %v13820_v63, %v7726_v25  ;;  %v7974_v18 = vmul.f32 %v13820_v63, %v7712_v45  ;;  %v693_v31 = vld [vmem:[%s5482_s17 + $0x298] sm:$0xff] }
 0x1ab   : > { %13816 = vst [vmem:[#allocation52_spill] sm:$0xff] %v7955_v0  ;;  %v2362_v21 = vadd.f32 %v13819_v17, %v2122_v23  ;;  %v7977_v60 = vadd.f32 %v1535_v29, %v13821_v50  ;;  %v7981_v10 = vadd.f32 %v1539_v13, %v13822_v61  ;;  %v7984_v49 = vmul.f32 %v13699_v48, %v2828_v36 }
 0x1ac   : > { %v3340_v16 = vadd.f32 %v7576_v28, %v3100_v44  ;;  %v3468_v25 = vmul.f32 %v13717_v47, %v7955_v0  ;;  %806 = vst [vmem:[#allocation2 + $0x2d8] sm:$0xff] %v693_v31  ;;  %v3336_v45 = vadd.f32 %v7572_v32, %v3096_v20  ;;  %v3464_v23 = vmul.f32 %v13717_v47, %v2828_v36  ;;  %v13827_v28 = vld [vmem:[#allocation53_spill] sm:$0xff] }
 0x1ad   : > { %13823 = vst [vmem:[#allocation63_spill] sm:$0xff] %v7984_v49  ;;  %v13824_v29 = vrot.slane %v7731_v53, 1  ;;  %v3097_v44 = vadd.f32 %v13827_v28, %v2600_v35  ;;  %v3101_v61 = vadd.f32 %v2989_v57, %v2604_v7  ;;  %v1881_v31 = vadd.f32 %v1769_v41, %v7676_v19  ;;  %v13837_v28 = vld [vmem:[#allocation28_spill] sm:$0xff] }
 0x1ae   : > { %v1885_v32 = vadd.f32 %v1773_v3, %v7679_v4  ;;  %v8005_v47 = vadd.f32 %v7846_v1, %v2362_v21  ;;  %v8008_v20 = vmul.f32 %v13625_v24, %v2828_v36  ;;  %v1536_v53 = vmul.f32 %v13720_v12, %v7783_v26 }
 0x1af   : > { %v2829_v13 = vsel %vm2798_vm1, %v13824_v29, %v2764_v40  ;;  %v13825_v17 = vmov %v13824_v29  ;;  %v696_v29 = vld [vmem:[%s5482_s17 + $0x2b0] sm:$0x3f]  ;;  %v8017_v57 = vmul.f32 %v13625_v24, %v7955_v0  ;;  %v8019_v19 = vadd.f32 %v3468_v25, %v3340_v16  ;;  %v13833_v16 = vld [vmem:[#allocation62_spill] sm:$0xff]  ;;  %v8084_v0 = vld [vmem:[#allocation2 + $0x228] sm:$0xff] }
 0x1b0   : > { %v7999_v50 = vsel %vm2798_vm1, %v2764_v40, %v13825_v17  ;;  %13828 = vst [vmem:[#allocation123_spill] sm:$0xff] %v8005_v47  ;;  %v1540_v40 = vmul.f32 %v13720_v12, %v7779_v59  ;;  %v8023_v4 = vmul.f32 %v13456_v2, %v7703_v58  ;;  %v8027_v1 = vmul.f32 %v13550_v62, %v7703_v58  ;;  %v13834_v58 = vld [vmem:[#allocation112_spill] sm:$0xff]  ;;  %v13864_v24 = vld [vmem:[#allocation138_spill] sm:$0xff] }
 0x1b1   : > { %13826 = vst [vmem:[#allocation136_spill] sm:$0xff] %v7999_v50  ;;  %13829 = vst [vmem:[#allocation49_spill] sm:$0xff] %v8019_v19  ;;  %v8029_v36 = vadd.f32 %v3464_v23, %v3336_v45  ;;  %v8033_v35 = vmul.f32 %v13629_v34, %v7783_v26  ;;  %v3465_v7 = vmul.f32 %v7198_v9, %v2829_v13  ;;  %v13836_v23 = vld [vmem:[#allocation126_spill] sm:$0xff] }
 0x1b2   : > { %13830 = vst [vmem:[#allocation105_spill] sm:$0xff] %v8023_v4  ;;  %809 = vst [vmem:[#allocation2 + $0x2f0] sm:$0x3f] %v696_v29  ;;  %v3469_v41 = vmul.f32 %v7198_v9, %v7999_v50  ;;  %v3337_v3 = vadd.f32 %v7615_v55, %v3097_v44  ;;  %v3341_v21 = vadd.f32 %v7625_v52, %v3101_v61  ;;  %v13839_v52 = vld [vmem:[#allocation41_spill] sm:$0xff] }
 0x1b3   : > { %13831 = vst [vmem:[#allocation74_spill] sm:$0xff] %v8029_v36  ;;  %13832 = vst [vmem:[#allocation24_spill] sm:$0xff] %v8033_v35  ;;  %v2121_v25 = vadd.f32 %v13833_v16, %v1881_v31  ;;  %v2125_v17 = vadd.f32 %v13834_v58, %v1885_v32  ;;  %v8044_v45 = vmul.f32 %v13629_v34, %v7779_v59  ;;  %v13842_v59 = vld [vmem:[#allocation23_spill] sm:$0xff]  ;;  %v13844_v32 = vld [vmem:[#allocation102_spill] sm:$0xff] }
 0x1b4   : > { %v8047_v26 = vadd.f32 %v1536_v53, %v13836_v23  ;;  %v8050_v29 = vadd.f32 %v1540_v40, %v13837_v28  ;;  %v8053_v9 = vmul.f32 %v13465_v11, %v2829_v13  ;;  %v3881_v55 = vmul.f32 %v8019_v19, %v8019_v19  ;;  %v13845_v16 = vld [vmem:[#allocation32_spill] sm:$0xff] }
 0x1b5   : > { %13835 = vst [vmem:[#allocation48_spill] sm:$0xff] %v8044_v45  ;;  %v8058_v44 = vmul.f32 %v13839_v52, %v2829_v13  ;;  %v8062_v61 = vmul.f32 %v13839_v52, %v7999_v50  ;;  %v8066_v31 = vmul.f32 %v13842_v59, %v7864_v8  ;;  %v3709_v53 = vadd.f32 %v13844_v32, %v8029_v36  ;;  %v13847_v13 = vld [vmem:[#allocation64_spill] sm:$0xff]  ;;  %v8107_v45 = vld [vmem:[#allocation2 + $0x208] sm:$0xff] }
 0x1b6   : > { %13838 = vst [vmem:[#allocation53_spill] sm:$0xff] %v8053_v9  ;;  %v3877_v40 = vmul.f32 %v8029_v36, %v8029_v36  ;;  %v8074_v58 = vmul.f32 %v13845_v16, %v7864_v8  ;;  %v2493_v23 = vmul.f32 %v13847_v13, %v7864_v8  ;;  %v8078_v28 = vadd.f32 %v3465_v7, %v3337_v3  ;;  %v13850_v9 = vld [vmem:[#allocation141_spill] sm:$0xff]  ;;  %v13852_v36 = vld [vmem:[#allocation86_spill] sm:$0xff]  ;;  %v13854_v3 = vld [vmem:[#allocation19_spill] sm:$0xff] }
 0x1b7   : > { %13840 = vst [vmem:[#allocation62_spill] sm:$0xff] %v8058_v44  ;;  %13841 = vst [vmem:[#allocation112_spill] sm:$0xff] %v8062_v61  ;;  %v8080_v47 = vadd.f32 %v3469_v41, %v3341_v21  ;;  %v2361_v50 = vadd.f32 %v13850_v9, %v2121_v25  ;;  %v3710_v32 = vsel %vm3647_vm2, %v8019_v19, 0.0  ;;  %v4010_v41 = vsel %vm3647_vm2, %v3881_v55, 0.0  ;;  %v13863_v44 = vld [vmem:[#allocation146_spill] sm:$0xff] }
 0x1b8   : > { %13843 = vst [vmem:[#allocation126_spill] sm:$0xff] %v8066_v31  ;;  %13846 = vst [vmem:[#allocation28_spill] sm:$0xff] %v8074_v58  ;;  %v13851_v31 = vld [vmem:[#allocation107_spill] sm:$0xff]  ;;  %v4009_v4 = vadd.f32 %v13852_v36, %v3877_v40  ;;  %v13853_v58 = vld [vmem:[#allocation42_spill] sm:$0xff]  ;;  %v8096_v21 = vmul.f32 %v13854_v3, %v7938_v39  ;;  %v8100_v25 = vmul.f32 %v13854_v3, %v7932_v27  ;;  %v1004_v55 = vrot.slane %v8107_v45, 7 }
 0x1b9   : > { %13848 = vst [vmem:[#allocation102_spill] sm:$0xff] %v8078_v28  ;;  %13849 = vst [vmem:[#allocation164_spill] sm:$0xff] %v8080_v47  ;;  %v2365_v49 = vadd.f32 %v13851_v31, %v2125_v17  ;;  %v1537_v52 = vmul.f32 %v13853_v58, %v7938_v39  ;;  %v1541_v7 = vmul.f32 %v13853_v58, %v7932_v27  ;;  %v2765_v17 = vrot.slane %v7864_v8, 1  ;;  %v13857_v36 = vld [vmem:[#allocation11_spill] sm:$0xff]  ;;  %v13858_v31 = vld [vmem:[#allocation44_spill] sm:$0xff] }
 0x1ba   : > { %13855 = vst [vmem:[#allocation141_spill] sm:$0xff] %v8096_v21  ;;  %13856 = vst [vmem:[#allocation107_spill] sm:$0xff] %v8100_v25  ;;  %v3756_v9 = vadd.f32 %v13857_v36, %v8078_v28  ;;  %v13859_v40 = vld [vmem:[#allocation26_spill] sm:$0xff]  ;;  %v1068_v58 = vrot.slane %v8084_v0, 7  ;;  %v3878_v39 = vmul.f32 %v8078_v28, %v8078_v28  ;;  %v3882_v27 = vmul.f32 %v8080_v47, %v8080_v47  ;;  %v13860_v25 = vld [vmem:[#allocation160_spill] sm:$0xff] }
 0x1bb   : > { %v2990_v19 = vmul.f32 %v13859_v40, %v13858_v31  ;;  %v2601_v8 = vadd.f32 %v13860_v25, %v2361_v50  ;;  %v2605_v21 = vadd.f32 %v2493_v23, %v2365_v49  ;;  %v697_v3 = vld [vmem:[%s5482_s17 + $0x2b8] sm:$0x3f]  ;;  %v8117_v36 = vadd.f32 %v3710_v32, %v3709_v53  ;;  %v8140_v53 = vld [vmem:[#allocation2 + $0x230] sm:$0xff]  ;;  %v13870_v32 = vld [vmem:[#allocation47_spill] sm:$0xff] }
 0x1bc   : > { %v8119_v35 = vadd.f32 %v4010_v41, %v4009_v4  ;;  %v13862_v31 = vld [vmem:[#allocation121_spill] sm:$0xff]  ;;  %v8125_v34 = vadd.f32 %v1541_v7, %v13863_v44  ;;  %810 = vst [vmem:[#allocation2 + $0x2f8] sm:$0x3f] %v697_v3  ;;  %v3757_v28 = vsel %vm3647_vm2, %v8080_v47, 0.0  ;;  %v4056_v12 = vadd.f32 %v13864_v24, %v3878_v39 }
 0x1bd   : > { %v8122_v61 = vadd.f32 %v1537_v52, %v13862_v31  ;;  %v13865_v50 = vrot.slane %v7796_v5, 1  ;;  %v8142_v44 = vadd.f32 %v3757_v28, %v3756_v9  ;;  %v8152_v7 = vsel %vm1101_vm0, %v1068_v58, %v1004_v55  ;;  %v13872_v41 = vld [vmem:[#allocation73_spill] sm:$0xff]  ;;  %v13874_v9 = vld [vmem:[#allocation131_spill] sm:$0xff]  ;;  %v8165_v31 = vld [vmem:[#allocation2 + $0x210] sm:$0xff] }
 0x1be   : > { %13861 = vst [vmem:[#allocation86_spill] sm:$0xff] %v8119_v35  ;;  %v4057_v5 = vsel %vm3647_vm2, %v3882_v27, 0.0  ;;  %v3098_v3 = vadd.f32 %v13872_v41, %v2601_v8  ;;  %v3102_v25 = vadd.f32 %v2990_v19, %v2605_v21  ;;  %v8173_v21 = vld [vmem:[#allocation2 + $0x200] sm:$0xff]  ;;  %v13876_v8 = vld [vmem:[#allocation67_spill] sm:$0xff]  ;;  %v13877_v41 = vld [vmem:[#allocation100_spill] sm:$0xff] }
 0x1bf   : > { %v2830_v49 = vsel %vm2798_vm1, %v13865_v50, %v2765_v17  ;;  %v13866_v4 = vmov %v13865_v50  ;;  %13868 = vst [vmem:[#allocation44_spill] sm:$0xff] %v8142_v44  ;;  %v1005_v50 = vrot.slane %v8165_v31, 7  ;;  %v8169_v27 = vadd.f32 %v4057_v5, %v4056_v12  ;;  %v13881_v5 = vld [vmem:[#allocation57_spill] sm:$0xff] }
 0x1c0   : > { %v8138_v52 = vsel %vm2798_vm1, %v2765_v17, %v13866_v4  ;;  %v8145_v23 = vmul.f32 %v13859_v40, %v2830_v49  ;;  %v8148_v24 = vmul.f32 %v13870_v32, %v2830_v49  ;;  %v8158_v17 = vsel %vm1101_vm0, %v1004_v55, %v1068_v58  ;;  %v8176_v55 = vld [vmem:[#allocation2 + $0x220] sm:$0xff] }
 0x1c1   : > { %13867 = vst [vmem:[#allocation11_spill] sm:$0xff] %v8138_v52  ;;  %v8162_v28 = vmul.f32 %v13870_v32, %v8138_v52  ;;  %v3466_v39 = vmul.f32 %v13874_v9, %v2830_v49  ;;  %v1069_v4 = vrot.slane %v8140_v53, 7  ;;  %13875 = vst [vmem:[#allocation138_spill] sm:$0xff] %v8169_v27  ;;  %v3470_v19 = vmul.f32 %v13874_v9, %v8138_v52  ;;  %v13884_v32 = vld [vmem:[#allocation149_spill] sm:$0xff] }
 0x1c2   : > { %13869 = vst [vmem:[#allocation160_spill] sm:$0xff] %v8145_v23  ;;  %13871 = vst [vmem:[#allocation121_spill] sm:$0xff] %v8148_v24  ;;  %v1003_v58 = vrot.slane %v8173_v21, 7  ;;  %v1775_v49 = vmul.f32 %v13876_v8, %v8152_v7  ;;  %v8182_v47 = vmul.f32 %v8173_v21, %v13877_v41  ;;  %v13879_v23 = vld [vmem:[#allocation13_spill] sm:$0xff]  ;;  %v8190_v9 = vmul.f32 %v8173_v21, %v13881_v5  ;;  %v13883_v24 = vld [vmem:[#allocation148_spill] sm:$0xff] }
 0x1c3   : > { %13873 = vst [vmem:[#allocation146_spill] sm:$0xff] %v8162_v28  ;;  %v8186_v12 = vmul.f32 %v8173_v21, %v13879_v23  ;;  %v1779_v52 = vmul.f32 %v13876_v8, %v8158_v17  ;;  %v3338_v28 = vadd.f32 %v13883_v24, %v3098_v3  ;;  %v3342_v27 = vadd.f32 %v13884_v32, %v3102_v25 }
 0x1c4   : > { %13878 = vst [vmem:[#allocation73_spill] sm:$0xff] %v8182_v47  ;;  %13882 = vst [vmem:[#allocation165_spill] sm:$0xff] %v8190_v9  ;;  %v2702_v40 = vrot.slane %v8173_v21, 1  ;;  %v8199_v47 = vmul.f32 %v8107_v45, %v13415_v22  ;;  %v2495_v9 = vmul.f32 %v8107_v45, %v13667_v15  ;;  %v1067_v44 = vrot.slane %v8176_v55, 7 }
 0x1c5   : > { %13880 = vst [vmem:[#allocation131_spill] sm:$0xff] %v8186_v12  ;;  %v8203_v12 = vmul.f32 %v8107_v45, %v13545_v54  ;;  %v8210_v24 = vsel %vm1101_vm0, %v1069_v4, %v1005_v50  ;;  %v8215_v3 = vmul.f32 %v8165_v31, %v13456_v2  ;;  %v1887_v25 = vadd.f32 %v1775_v49, %v7977_v60  ;;  %v8236_v60 = vld [vmem:[#allocation2 + $0x218] sm:$0xff] }
 0x1c6   : > { %13885 = vst [vmem:[#allocation148_spill] sm:$0xff] %v8199_v47  ;;  %v8220_v21 = vsel %vm1101_vm0, %v1005_v50, %v1069_v4  ;;  %v8224_v47 = vmul.f32 %v8165_v31, %v13550_v62  ;;  %v1891_v8 = vadd.f32 %v1779_v52, %v7981_v10  ;;  %v8232_v35 = vadd.f32 %v3466_v39, %v3338_v28  ;;  %v13891_v4 = vld [vmem:[#allocation75_spill] sm:$0xff] }
 0x1c7   : > { %13886 = vst [vmem:[#allocation149_spill] sm:$0xff] %v8203_v12  ;;  %13887 = vst [vmem:[#allocation166_spill] sm:$0xff] %v8215_v3  ;;  %v8228_v12 = vmul.f32 %v8165_v31, %v13587_v33  ;;  %v8234_v3 = vadd.f32 %v3470_v19, %v3342_v27  ;;  %v1776_v49 = vmul.f32 %v13891_v4, %v8210_v24  ;;  %v13896_v19 = vld [vmem:[#allocation135_spill] sm:$0xff] }
 0x1c8   : > { %13888 = vst [vmem:[#allocation167_spill] sm:$0xff] %v8224_v47  ;;  %13889 = vst [vmem:[#allocation168_spill] sm:$0xff] %v8232_v35  ;;  %v8243_v47 = vmul.f32 %v8236_v60, %v13842_v59  ;;  %v8247_v32 = vmul.f32 %v8236_v60, %v13845_v16  ;;  %v1134_v10 = vsel %vm1101_vm0, %v1003_v58, %v1067_v44  ;;  %v13898_v16 = vld [vmem:[#allocation143_spill] sm:$0xff] }
 0x1c9   : > { %13890 = vst [vmem:[#allocation169_spill] sm:$0xff] %v8234_v3  ;;  %v1780_v52 = vmul.f32 %v13891_v4, %v8220_v21  ;;  %v8255_v28 = vmul.f32 %v8236_v60, %v13847_v13  ;;  %v8260_v27 = vmul.f32 %v13877_v41, %v8176_v55  ;;  %v2127_v50 = vadd.f32 %v13896_v19, %v1887_v25 }
 0x1ca   : > { %13892 = vst [vmem:[#allocation170_spill] sm:$0xff] %v8243_v47  ;;  %13893 = vst [vmem:[#allocation171_spill] sm:$0xff] %v8247_v32  ;;  %v3803_v47 = vadd.f32 %v7856_v56, %v8232_v35  ;;  %v1198_v32 = vsel %vm1101_vm0, %v1067_v44, %v1003_v58  ;;  %v8269_v4 = vmul.f32 %v13879_v23, %v8176_v55  ;;  %v13899_v56 = vld [vmem:[#allocation7_spill] sm:$0xff]  ;;  %v13900_v23 = vld [vmem:[#allocation153_spill] sm:$0xff] }
 0x1cb   : > { %13894 = vst [vmem:[#allocation172_spill] sm:$0xff] %v8255_v28  ;;  %13895 = vst [vmem:[#allocation173_spill] sm:$0xff] %v8260_v27  ;;  %v2131_v28 = vadd.f32 %v13898_v16, %v1891_v8  ;;  %v3879_v39 = vmul.f32 %v8232_v35, %v8232_v35  ;;  %v3883_v27 = vmul.f32 %v8234_v3, %v8234_v3  ;;  %v3804_v8 = vsel %vm3647_vm2, %v8234_v3, 0.0 }
 0x1cc   : > { %13897 = vst [vmem:[#allocation135_spill] sm:$0xff] %v8269_v4  ;;  %v1778_v25 = vmul.f32 %v7822_v51, %v1134_v10  ;;  %v1888_v19 = vadd.f32 %v1776_v49, %v8047_v26  ;;  %v1542_v41 = vmul.f32 %v13899_v56, %v1198_v32  ;;  %v1546_v44 = vmul.f32 %v13899_v56, %v1134_v10  ;;  %v13901_v26 = vld [vmem:[#allocation122_spill] sm:$0xff] }
 0x1cd   : > { %v8282_v58 = vmul.f32 %v13881_v5, %v8176_v55  ;;  %v1892_v16 = vadd.f32 %v1780_v52, %v8050_v29  ;;  %v4103_v35 = vadd.f32 %v7889_v38, %v3879_v39  ;;  %v2766_v4 = vrot.slane %v8176_v55, 1  ;;  %v8299_v52 = vld [vmem:[#allocation2 + $0x238] sm:$0xff] }
 0x1ce   : > { %v2367_v13 = vadd.f32 %v13900_v23, %v2127_v50  ;;  %v8291_v49 = vmul.f32 %v13901_v26, %v1198_v32  ;;  %v8294_v56 = vmul.f32 %v13901_v26, %v1134_v10  ;;  %v2371_v5 = vadd.f32 %v7944_v14, %v2131_v28  ;;  %v13904_v55 = vld [vmem:[#allocation61_spill] sm:$0xff]  ;;  %v13906_v10 = vld [vmem:[#allocation6_spill] sm:$0xff] }
 0x1cf   : > { %v2499_v29 = vmul.f32 %v13667_v15, %v8084_v0  ;;  %v8301_v3 = vadd.f32 %v3804_v8, %v3803_v47  ;;  %v4104_v38 = vsel %vm3647_vm2, %v3883_v27, 0.0  ;;  %v1890_v23 = vadd.f32 %v1778_v25, %v7892_v43  ;;  %v13905_v39 = vld [vmem:[#allocation117_spill] sm:$0xff] }
 0x1d0   : > { %13902 = vst [vmem:[#allocation143_spill] sm:$0xff] %v8291_v49  ;;  %13903 = vst [vmem:[#allocation153_spill] sm:$0xff] %v8294_v56  ;;  %v2128_v50 = vadd.f32 %v13904_v55, %v1888_v19  ;;  %v8307_v49 = vadd.f32 %v1542_v41, %v13905_v39  ;;  %v8310_v56 = vadd.f32 %v1546_v44, %v13906_v10  ;;  %v13908_v28 = vld [vmem:[#allocation21_spill] sm:$0xff]  ;;  %v1070_v25 = vrot.slane %v8299_v52, 7  ;;  %v13913_v39 = vld [vmem:[#allocation10_spill] sm:$0xff] }
 0x1d1   : > { %v8313_v14 = vmul.f32 %v7822_v51, %v1198_v32  ;;  %v2132_v47 = vadd.f32 %v13908_v28, %v1892_v16  ;;  %v8316_v8 = vadd.f32 %v4104_v38, %v4103_v35  ;;  %v8320_v27 = vsel %vm2798_vm1, %v2702_v40, %v2766_v4  ;;  %v13911_v44 = vld [vmem:[#allocation125_spill] sm:$0xff]  ;;  %v698_v16 = vld [vmem:[%s5482_s17 + $0x2c0] sm:$0xff] }
 0x1d2   : > { %13909 = vst [vmem:[#allocation117_spill] sm:$0xff] %v8320_v27  ;;  %v2607_v43 = vadd.f32 %v2495_v9, %v2367_v13  ;;  %v8325_v41 = vsel %vm2798_vm1, %v2766_v4, %v2702_v40  ;;  %v2611_v19 = vadd.f32 %v2499_v29, %v2371_v5  ;;  %v2767_v32 = vrot.slane %v8084_v0, 1  ;;  %v13912_v35 = vld [vmem:[#allocation93_spill] sm:$0xff]  ;;  %v13916_v9 = vld [vmem:[#allocation155_spill] sm:$0xff]  ;;  %811 = vst [vmem:[#allocation2 + $0x300] sm:$0xff] %v698_v16 }
 0x1d3   : > { %13907 = vst [vmem:[#allocation61_spill] sm:$0xff] %v8313_v14  ;;  %13910 = vst [vmem:[#allocation6_spill] sm:$0xff] %v8325_v41  ;;  %v2996_v55 = vmul.f32 %v13699_v48, %v13911_v44  ;;  %v2130_v38 = vadd.f32 %v13912_v35, %v1890_v23  ;;  %v8334_v10 = vrot.slane %v7818_v42, %v13913_v39  ;;  %v699_v5 = vld [vmem:[%s5482_s17 + $0x2c8] sm:$0xff]  ;;  %v13920_v44 = vld [vmem:[#allocation14_spill] sm:$0xff]  ;;  %v13921_v35 = vrot.slane %v8236_v60, 7 }
 0x1d4   : > { %v8338_v13 = vmul.f32 %v7898_v46, %v8320_v27  ;;  %v2368_v40 = vadd.f32 %v13916_v9, %v2128_v50  ;;  %v8344_v4 = vmul.f32 %v7898_v46, %v8325_v41  ;;  %v8348_v29 = vmul.f32 %v13415_v22, %v8084_v0  ;;  %812 = vst [vmem:[#allocation2 + $0x308] sm:$0xff] %v699_v5 }
 0x1d5   : > { %13914 = vst [vmem:[#allocation21_spill] sm:$0xff] %v8334_v10  ;;  %v2372_v42 = vadd.f32 %v8027_v1, %v2132_v47  ;;  %v2500_v23 = vmul.f32 %v13587_v33, %v8140_v53  ;;  %v8355_v50 = vmul.f32 %v8334_v10, %v8320_v27  ;;  %v8359_v28 = vmul.f32 %v13545_v54, %v8084_v0 }
 0x1d6   : > { %13915 = vst [vmem:[#allocation125_spill] sm:$0xff] %v8338_v13  ;;  %13917 = vst [vmem:[#allocation93_spill] sm:$0xff] %v8344_v4  ;;  %v3104_v16 = vadd.f32 %v13920_v44, %v2607_v43  ;;  %v8366_v9 = vsel %vm1101_vm0, %v13921_v35, %v1070_v25  ;;  %v1543_v1 = vmul.f32 %v13811_v37, %v8152_v7  ;;  %v13922_v47 = vrot.slane %v8107_v45, 1  ;;  %v702_v44 = vld [vmem:[%s5482_s17 + $0x2e0] sm:$0x3f] }
 0x1d7   : > { %13918 = vst [vmem:[#allocation155_spill] sm:$0xff] %v8348_v29  ;;  %13919 = vst [vmem:[#allocation174_spill] sm:$0xff] %v8355_v50  ;;  %v3108_v39 = vadd.f32 %v2996_v55, %v2611_v19  ;;  %v13923_v0 = vmov %v13921_v35  ;;  %v13924_v35 = vld [vmem:[#allocation124_spill] sm:$0xff]  ;;  %v1547_v27 = vmul.f32 %v13811_v37, %v8158_v17  ;;  %v2608_v19 = vadd.f32 %v8228_v12, %v2368_v40 }
 0x1d8   : > { %v2832_v5 = vsel %vm2798_vm1, %v13922_v47, %v2767_v32  ;;  %v8378_v43 = vsel %vm1101_vm0, %v1070_v25, %v13923_v0  ;;  %v2370_v13 = vadd.f32 %v13924_v35, %v2130_v38  ;;  %v13925_v14 = vmov %v13922_v47  ;;  %815 = vst [vmem:[#allocation2 + $0x320] sm:$0x3f] %v702_v44  ;;  %v13927_v47 = vld [vmem:[#allocation69_spill] sm:$0xff]  ;;  %v13928_v38 = vld [vmem:[#allocation80_spill] sm:$0xff] }
 0x1d9   : > { %v8388_v50 = vsel %vm2798_vm1, %v2767_v32, %v13925_v14  ;;  %v2612_v55 = vadd.f32 %v2500_v23, %v2372_v42  ;;  %v2768_v25 = vrot.slane %v8140_v53, 1  ;;  %v2997_v0 = vmul.f32 %v13465_v11, %v13927_v47  ;;  %v8402_v32 = vld [vmem:[%s5539_s15 + $0x28] ss:$0 sm:$0xff] }
 0x1da   : > { %13926 = vst [vmem:[#allocation14_spill] sm:$0xff] %v8388_v50  ;;  %v1781_v35 = vmul.f32 %v13928_v38, %v8366_v9  ;;  %v8398_v45 = vmul.f32 %v13820_v63, %v8152_v7  ;;  %v3344_v14 = vadd.f32 %v8008_v20, %v3104_v16  ;;  %13929 = vst [vmem:[#allocation124_spill] sm:$0xff] %v8402_v32  ;;  %v703_v42 = vld [vmem:[%s5482_s17 + $0x2e8] sm:$0x3f]  ;;  %v700_v16 = vld [vmem:[%s5482_s17 + $0x2d0] sm:$0xff] }
 0x1db   : > { %v3472_v12 = vmul.f32 %v8402_v32, %v2832_v5  ;;  %v1777_v40 = vmul.f32 %v13928_v38, %v8378_v43  ;;  %v8410_v23 = vmul.f32 %v13820_v63, %v8158_v17  ;;  %v8413_v44 = vadd.f32 %v1543_v1, %v7970_v30  ;;  %816 = vst [vmem:[#allocation2 + $0x328] sm:$0x3f] %v703_v42  ;;  %v13932_v17 = vld [vmem:[#allocation128_spill] sm:$0xff] }
 0x1dc   : > { %v3348_v7 = vadd.f32 %v8017_v57, %v3108_v39  ;;  %v3476_v20 = vmul.f32 %v8402_v32, %v8388_v50  ;;  %v8420_v47 = vadd.f32 %v8282_v58, %v2370_v13  ;;  %v8423_v29 = vadd.f32 %v1547_v27, %v7974_v18  ;;  %813 = vst [vmem:[#allocation2 + $0x310] sm:$0xff] %v700_v16  ;;  %v13933_v30 = vld [vmem:[#allocation40_spill] sm:$0xff]  ;;  %v701_v18 = vld [vmem:[%s5482_s17 + $0x2d8] sm:$0xff] }
 0x1dd   : > { %v8426_v41 = vmul.f32 %v13699_v48, %v2832_v5  ;;  %v3105_v4 = vadd.f32 %v13932_v17, %v2608_v19  ;;  %v1544_v57 = vmul.f32 %v13933_v30, %v8210_v24  ;;  %v13934_v39 = vrot.slane %v8165_v31, 1  ;;  %814 = vst [vmem:[#allocation2 + $0x318] sm:$0xff] %v701_v18  ;;  %v13941_v31 = vld [vmem:[#allocation18_spill] sm:$0xff]  ;;  %v13947_v18 = vld [vmem:[#allocation144_spill] sm:$0xff] }
 0x1de   : > { %13930 = vst [vmem:[#allocation69_spill] sm:$0xff] %v8420_v47  ;;  %v3109_v58 = vadd.f32 %v2997_v0, %v2612_v55  ;;  %v1893_v13 = vadd.f32 %v1781_v35, %v8125_v34  ;;  %v8437_v27 = vadd.f32 %v3472_v12, %v3344_v14  ;;  %v1548_v42 = vmul.f32 %v13933_v30, %v8220_v21  ;;  %v8471_v14 = vld [vmem:[%s5539_s15 + $0x30] ss:$0 sm:$0xff] }
 0x1df   : > { %13931 = vst [vmem:[#allocation175_spill] sm:$0xff] %v8426_v41  ;;  %v2833_v1 = vsel %vm2798_vm1, %v13934_v39, %v2768_v25  ;;  %v13936_v19 = vmov %v13934_v39  ;;  %v1889_v17 = vadd.f32 %v1777_v40, %v8122_v61  ;;  %v13938_v39 = vld [vmem:[#allocation36_spill] sm:$0xff]  ;;  %v8455_v55 = vadd.f32 %v3476_v20, %v3348_v7 }
 0x1e0   : > { %13935 = vst [vmem:[#allocation128_spill] sm:$0xff] %v8437_v27  ;;  %v8445_v16 = vsel %vm2798_vm1, %v2768_v25, %v13936_v19  ;;  %v8449_v47 = vmul.f32 %v13938_v39, %v2832_v5  ;;  %v8453_v34 = vmul.f32 %v13938_v39, %v8388_v50  ;;  %v8459_v0 = vmul.f32 %v13456_v2, %v8140_v53  ;;  %v13943_v5 = vld [vmem:[#allocation62_spill] sm:$0xff]  ;;  %v13946_v7 = vld [vmem:[#allocation112_spill] sm:$0xff]  ;;  %v8603_v39 = vld [vmem:[%s5539_s15 + $0x38] ss:$0 sm:$0xff] }
 0x1e1   : > { %13937 = vst [vmem:[#allocation176_spill] sm:$0xff] %v8445_v16  ;;  %13939 = vst [vmem:[#allocation177_spill] sm:$0xff] %v8455_v55  ;;  %v8463_v25 = vmul.f32 %v13941_v31, %v8210_v24  ;;  %v8467_v61 = vmul.f32 %v13550_v62, %v8140_v53  ;;  %v3345_v35 = vadd.f32 %v13943_v5, %v3105_v4  ;;  %v13948_v41 = vld [vmem:[#allocation24_spill] sm:$0xff] }
 0x1e2   : > { %13940 = vst [vmem:[#allocation178_spill] sm:$0xff] %v8459_v0  ;;  %13944 = vst [vmem:[#allocation62_spill] sm:$0xff] %v8471_v14  ;;  %v3473_v12 = vmul.f32 %v8471_v14, %v2833_v1  ;;  %v8476_v40 = vmul.f32 %v13941_v31, %v8220_v21  ;;  %v3349_v20 = vadd.f32 %v13946_v7, %v3109_v58  ;;  %v13949_v5 = vld [vmem:[#allocation48_spill] sm:$0xff]  ;;  %v13952_v7 = vld [vmem:[#allocation41_spill] sm:$0xff] }
 0x1e3   : > { %13942 = vst [vmem:[#allocation179_spill] sm:$0xff] %v8463_v25  ;;  %v3477_v24 = vmul.f32 %v8471_v14, %v8445_v16  ;;  %v2133_v19 = vadd.f32 %v13947_v18, %v1893_v13  ;;  %v3885_v53 = vmul.f32 %v8437_v27, %v8437_v27  ;;  %v8485_v4 = vadd.f32 %v1544_v57, %v13948_v41  ;;  %v13950_v0 = vld [vmem:[#allocation140_spill] sm:$0xff] }
 0x1e4   : > { %13945 = vst [vmem:[#allocation180_spill] sm:$0xff] %v8476_v40  ;;  %v8488_v50 = vadd.f32 %v1548_v42, %v13949_v5  ;;  %v2129_v25 = vadd.f32 %v13950_v0, %v1889_v17  ;;  %v3889_v21 = vmul.f32 %v8455_v55, %v8455_v55  ;;  %v8494_v58 = vmul.f32 %v13465_v11, %v2833_v1  ;;  %v704_v41 = vld [vmem:[%s5482_s17 + $0x2f0] sm:$0x3f]  ;;  %v13955_v42 = vld [vmem:[#allocation86_spill] sm:$0xff] }
 0x1e5   : > { %v8497_v40 = vmul.f32 %v13952_v7, %v2833_v1  ;;  %v8501_v13 = vmul.f32 %v13952_v7, %v8445_v16  ;;  %v3712_v57 = vadd.f32 %v8117_v36, %v8437_v27  ;;  %v4012_v18 = vadd.f32 %v13955_v42, %v3885_v53  ;;  %v13957_v0 = vld [vmem:[#allocation42_spill] sm:$0xff]  ;;  %817 = vst [vmem:[#allocation2 + $0x330] sm:$0x3f] %v704_v41  ;;  %v13960_v16 = vld [vmem:[#allocation28_spill] sm:$0xff]  ;;  %v13964_v53 = vld [vmem:[#allocation159_spill] sm:$0xff] }
 0x1e6   : > { %13951 = vst [vmem:[#allocation112_spill] sm:$0xff] %v8494_v58  ;;  %v8507_v17 = vadd.f32 %v3473_v12, %v3345_v35  ;;  %v1545_v5 = vmul.f32 %v13957_v0, %v8378_v43  ;;  %v8511_v58 = vadd.f32 %v3477_v24, %v3349_v20  ;;  %v8515_v1 = vmul.f32 %v13842_v59, %v8299_v52  ;;  %v13961_v14 = vld [vmem:[#allocation64_spill] sm:$0xff] }
 0x1e7   : > { %13953 = vst [vmem:[#allocation144_spill] sm:$0xff] %v8497_v40  ;;  %13954 = vst [vmem:[#allocation24_spill] sm:$0xff] %v8501_v13  ;;  %v2373_v7 = vadd.f32 %v13960_v16, %v2133_v19  ;;  %v2501_v13 = vmul.f32 %v13961_v14, %v8299_v52  ;;  %v1549_v36 = vmul.f32 %v13957_v0, %v8366_v9  ;;  %v13962_v35 = vld [vmem:[#allocation32_spill] sm:$0xff]  ;;  %v2769_v20 = vrot.slane %v8299_v52, 1  ;;  %v13965_v16 = vld [vmem:[#allocation19_spill] sm:$0xff] }
 0x1e8   : > { %13956 = vst [vmem:[#allocation48_spill] sm:$0xff] %v8507_v17  ;;  %13958 = vst [vmem:[#allocation140_spill] sm:$0xff] %v8511_v58  ;;  %v8524_v12 = vmul.f32 %v13962_v35, %v8299_v52  ;;  %v2369_v41 = vadd.f32 %v13964_v53, %v2129_v25  ;;  %v3713_v24 = vsel %vm3647_vm2, %v8455_v55, 0.0  ;;  %v4013_v42 = vsel %vm3647_vm2, %v3889_v21, 0.0  ;;  %v13970_v25 = vld [vmem:[#allocation141_spill] sm:$0xff]  ;;  %v8548_v55 = vld [vmem:[#allocation2 + $0x268] sm:$0xff] }
 0x1e9   : > { %13959 = vst [vmem:[#allocation86_spill] sm:$0xff] %v8515_v1  ;;  %v8533_v19 = vmul.f32 %v13965_v16, %v8378_v43  ;;  %v8537_v27 = vmul.f32 %v13965_v16, %v8366_v9  ;;  %v8539_v1 = vadd.f32 %v3713_v24, %v3712_v57  ;;  %v3886_v52 = vmul.f32 %v8507_v17, %v8507_v17  ;;  %v13972_v21 = vld [vmem:[#allocation44_spill] sm:$0xff]  ;;  %v13974_v57 = vld [vmem:[#allocation26_spill] sm:$0xff]  ;;  %v13976_v0 = vld [vmem:[#allocation107_spill] sm:$0xff] }
 0x1ea   : > { %13963 = vst [vmem:[#allocation28_spill] sm:$0xff] %v8524_v12  ;;  %v8541_v12 = vadd.f32 %v4013_v42, %v4012_v18  ;;  %v8546_v53 = vadd.f32 %v1545_v5, %v13970_v25  ;;  %v3759_v43 = vadd.f32 %v13972_v21, %v8507_v17  ;;  %v2613_v9 = vadd.f32 %v2501_v13, %v2373_v7  ;;  %v8556_v18 = vld [vmem:[#allocation2 + $0x260] sm:$0xff]  ;;  %v13978_v5 = vld [vmem:[#allocation172_spill] sm:$0xff] }
 0x1eb   : > { %13966 = vst [vmem:[#allocation159_spill] sm:$0xff] %v8533_v19  ;;  %13967 = vst [vmem:[#allocation181_spill] sm:$0xff] %v8537_v27  ;;  %v3890_v19 = vmul.f32 %v8511_v58, %v8511_v58  ;;  %v13973_v27 = vld [vmem:[#allocation130_spill] sm:$0xff]  ;;  %v2609_v25 = vadd.f32 %v13978_v5, %v2369_v41  ;;  %v3760_v7 = vsel %vm3647_vm2, %v8511_v58, 0.0 }
 0x1ec   : > { %13968 = vst [vmem:[#allocation182_spill] sm:$0xff] %v8539_v1  ;;  %13969 = vst [vmem:[#allocation183_spill] sm:$0xff] %v8541_v12  ;;  %v2998_v24 = vmul.f32 %v13974_v57, %v13973_v27  ;;  %v13975_v42 = vld [vmem:[#allocation138_spill] sm:$0xff]  ;;  %v8560_v12 = vadd.f32 %v1549_v36, %v13976_v0  ;;  %v13979_v1 = vrot.slane %v8236_v60, 1  ;;  %v1072_v36 = vrot.slane %v8548_v55, 7 }
 0x1ed   : > { %13971 = vst [vmem:[#allocation141_spill] sm:$0xff] %v8546_v53  ;;  %v4059_v16 = vadd.f32 %v13975_v42, %v3886_v52  ;;  %v8575_v52 = vld [vmem:[#allocation2 + $0x248] sm:$0xff]  ;;  %v8585_v5 = vld [vmem:[#allocation2 + $0x240] sm:$0xff]  ;;  %v4060_v58 = vsel %vm3647_vm2, %v3890_v19, 0.0  ;;  %v13990_v19 = vld [vmem:[#allocation100_spill] sm:$0xff] }
 0x1ee   : > { %13977 = vst [vmem:[#allocation44_spill] sm:$0xff] %v8560_v12  ;;  %v2834_v21 = vsel %vm2798_vm1, %v13979_v1, %v2769_v20  ;;  %v13980_v27 = vmov %v13979_v1  ;;  %v1008_v0 = vrot.slane %v8575_v52, 7  ;;  %v13983_v1 = vld [vmem:[#allocation47_spill] sm:$0xff]  ;;  %v1007_v60 = vrot.slane %v8585_v5, 7 }
 0x1ef   : > { %v8573_v13 = vsel %vm2798_vm1, %v2769_v20, %v13980_v27  ;;  %v8580_v41 = vmul.f32 %v13974_v57, %v2834_v21  ;;  %v8583_v42 = vmul.f32 %v13983_v1, %v2834_v21  ;;  %v1071_v20 = vrot.slane %v8556_v18, 7  ;;  %v8596_v57 = vld [vmem:[#allocation2 + $0x270] sm:$0xff] }
 0x1f0   : > { %13981 = vst [vmem:[#allocation130_spill] sm:$0xff] %v8573_v13  ;;  %v8589_v27 = vadd.f32 %v3760_v7, %v3759_v43  ;;  %v3110_v17 = vadd.f32 %v2998_v24, %v2613_v9  ;;  %v8594_v40 = vmul.f32 %v13983_v1, %v8573_v13  ;;  %v8599_v31 = vadd.f32 %v4060_v58, %v4059_v16  ;;  %v13992_v24 = vld [vmem:[#allocation13_spill] sm:$0xff] }
 0x1f1   : > { %13982 = vst [vmem:[#allocation138_spill] sm:$0xff] %v8580_v41  ;;  %13984 = vst [vmem:[#allocation107_spill] sm:$0xff] %v8583_v42  ;;  %v705_v41 = vld [vmem:[%s5482_s17 + $0x2f8] sm:$0x3f]  ;;  %v13988_v42 = vld [vmem:[#allocation147_spill] sm:$0xff]  ;;  %v3474_v53 = vmul.f32 %v8603_v39, %v2834_v21  ;;  %v3478_v43 = vmul.f32 %v8603_v39, %v8573_v13  ;;  %v8610_v9 = vmul.f32 %v8585_v5, %v13990_v19  ;;  %v1073_v13 = vrot.slane %v8596_v57, 7 }
 0x1f2   : > { %13985 = vst [vmem:[#allocation172_spill] sm:$0xff] %v8589_v27  ;;  %13986 = vst [vmem:[#allocation184_spill] sm:$0xff] %v8594_v40  ;;  %v3106_v12 = vadd.f32 %v13988_v42, %v2609_v25  ;;  %v8614_v7 = vmul.f32 %v8585_v5, %v13992_v24  ;;  %v8618_v58 = vsel %vm1101_vm0, %v1008_v0, %v1072_v36  ;;  %v13994_v25 = vld [vmem:[#allocation57_spill] sm:$0xff]  ;;  %v14001_v27 = vld [vmem:[#allocation67_spill] sm:$0xff] }
 0x1f3   : > { %13987 = vst [vmem:[#allocation185_spill] sm:$0xff] %v8599_v31  ;;  %13989 = vst [vmem:[#allocation147_spill] sm:$0xff] %v8603_v39  ;;  %v8622_v16 = vsel %vm1101_vm0, %v1072_v36, %v1008_v0  ;;  %v8626_v21 = vmul.f32 %v8585_v5, %v13994_v25  ;;  %v8638_v0 = vmul.f32 %v8575_v52, %v13415_v22 }
 0x1f4   : > { %818 = vst [vmem:[#allocation2 + $0x338] sm:$0x3f] %v705_v41  ;;  %13991 = vst [vmem:[#allocation186_spill] sm:$0xff] %v8610_v9  ;;  %v8628_v41 = vld [vmem:[#allocation2 + $0x250] sm:$0xff]  ;;  %v1138_v9 = vsel %vm1101_vm0, %v1007_v60, %v1071_v20  ;;  %v8642_v36 = vmul.f32 %v8575_v52, %v13545_v54  ;;  %v8647_v31 = vmul.f32 %v8575_v52, %v13667_v15 }
 0x1f5   : > { %13993 = vst [vmem:[#allocation187_spill] sm:$0xff] %v8614_v7  ;;  %13995 = vst [vmem:[#allocation188_spill] sm:$0xff] %v8626_v21  ;;  %v1009_v42 = vrot.slane %v8628_v41, 7  ;;  %v13997_v7 = vld [vmem:[#allocation146_spill] sm:$0xff]  ;;  %v14000_v21 = vld [vmem:[#allocation121_spill] sm:$0xff]  ;;  %v1783_v30 = vmul.f32 %v14001_v27, %v8622_v16  ;;  %v8656_v39 = vmul.f32 %v8628_v41, %v13456_v2 }
 0x1f6   : > { %13996 = vst [vmem:[#allocation189_spill] sm:$0xff] %v8628_v41  ;;  %v3350_v40 = vadd.f32 %v13997_v7, %v3110_v17  ;;  %13998 = vst [vmem:[#allocation146_spill] sm:$0xff] %v8638_v0  ;;  %v3346_v1 = vadd.f32 %v14000_v21, %v3106_v12  ;;  %v1787_v17 = vmul.f32 %v14001_v27, %v8618_v58 }
 0x1f7   : > { %13999 = vst [vmem:[#allocation190_spill] sm:$0xff] %v8642_v36  ;;  %14002 = vst [vmem:[#allocation121_spill] sm:$0xff] %v8656_v39  ;;  %v8660_v0 = vmul.f32 %v8628_v41, %v13550_v62  ;;  %v1786_v12 = vmul.f32 %v7822_v51, %v1138_v9  ;;  %v8665_v21 = vmul.f32 %v8628_v41, %v13587_v33  ;;  %v8678_v62 = vld [vmem:[#allocation2 + $0x258] sm:$0xff] }
 0x1f8   : > { %v8670_v27 = vsel %vm1101_vm0, %v1009_v42, %v1073_v13  ;;  %v8674_v7 = vsel %vm1101_vm0, %v1073_v13, %v1009_v42  ;;  %v8676_v39 = vadd.f32 %v3478_v43, %v3350_v40  ;;  %v8683_v2 = vmul.f32 %v8678_v62, %v13842_v59 }
 0x1f9   : > { %14003 = vst [vmem:[#allocation191_spill] sm:$0xff] %v8660_v0  ;;  %v8687_v36 = vmul.f32 %v8678_v62, %v13962_v35  ;;  %v8689_v41 = vadd.f32 %v3474_v53, %v3346_v1  ;;  %v8693_v13 = vmul.f32 %v8678_v62, %v13961_v14  ;;  %v1895_v40 = vadd.f32 %v1783_v30, %v8413_v44 }
 0x1fa   : > { %14004 = vst [vmem:[#allocation192_spill] sm:$0xff] %v8676_v39  ;;  %14005 = vst [vmem:[#allocation193_spill] sm:$0xff] %v8683_v2  ;;  %v1899_v43 = vadd.f32 %v1787_v17, %v8423_v29  ;;  %v1202_v42 = vsel %vm1101_vm0, %v1071_v20, %v1007_v60  ;;  %v1898_v0 = vadd.f32 %v1786_v12, %v8310_v56  ;;  %v14009_v2 = vld [vmem:[#allocation75_spill] sm:$0xff] }
 0x1fb   : > { %14006 = vst [vmem:[#allocation194_spill] sm:$0xff] %v8687_v36  ;;  %14007 = vst [vmem:[#allocation195_spill] sm:$0xff] %v8689_v41  ;;  %v1784_v59 = vmul.f32 %v14009_v2, %v8674_v7  ;;  %v1788_v53 = vmul.f32 %v14009_v2, %v8670_v27  ;;  %v8707_v36 = vmul.f32 %v13990_v19, %v8556_v18  ;;  %v14012_v60 = vld [vmem:[#allocation7_spill] sm:$0xff] }
 0x1fc   : > { %14008 = vst [vmem:[#allocation196_spill] sm:$0xff] %v8693_v13  ;;  %v8711_v29 = vmul.f32 %v13992_v24, %v8556_v18  ;;  %v2506_v44 = vmul.f32 %v13994_v25, %v8556_v18  ;;  %v3806_v56 = vadd.f32 %v8301_v3, %v8689_v41  ;;  %v3891_v30 = vmul.f32 %v8676_v39, %v8676_v39  ;;  %v14014_v2 = vld [vmem:[#allocation35_spill] sm:$0xff]  ;;  %v14015_v25 = vld [vmem:[#allocation161_spill] sm:$0xff] }
 0x1fd   : > { %14010 = vst [vmem:[#allocation197_spill] sm:$0xff] %v8707_v36  ;;  %v1550_v20 = vmul.f32 %v14012_v60, %v1202_v42  ;;  %v1554_v17 = vmul.f32 %v14012_v60, %v1138_v9  ;;  %v3887_v12 = vmul.f32 %v8689_v41, %v8689_v41  ;;  %v1782_v1 = vmul.f32 %v7822_v51, %v1202_v42  ;;  %v14013_v36 = vld [vmem:[#allocation152_spill] sm:$0xff] }
 0x1fe   : > { %14011 = vst [vmem:[#allocation198_spill] sm:$0xff] %v8711_v29  ;;  %v2135_v29 = vadd.f32 %v14013_v36, %v1895_v40  ;;  %v2139_v24 = vadd.f32 %v14014_v2, %v1899_v43  ;;  %v2138_v19 = vadd.f32 %v14015_v25, %v1898_v0  ;;  %v2770_v3 = vrot.slane %v8556_v18, 1  ;;  %v14016_v18 = vld [vmem:[#allocation143_spill] sm:$0xff]  ;;  %v14018_v40 = vld [vmem:[#allocation149_spill] sm:$0xff] }
 0x1ff   : > { %v1896_v13 = vadd.f32 %v1784_v59, %v8485_v4  ;;  %v1900_v14 = vadd.f32 %v1788_v53, %v8488_v50  ;;  %v3807_v60 = vsel %vm3647_vm2, %v8676_v39, 0.0  ;;  %v4106_v35 = vadd.f32 %v8316_v8, %v3887_v12  ;;  %v14017_v59 = vld [vmem:[#allocation153_spill] sm:$0xff]  ;;  %v14019_v53 = vld [vmem:[#allocation135_spill] sm:$0xff] }
 0x200   : > { %v8734_v41 = vmul.f32 %v13901_v26, %v1202_v42  ;;  %v8737_v36 = vmul.f32 %v13901_v26, %v1138_v9  ;;  %v8739_v2 = vadd.f32 %v3807_v60, %v3806_v56  ;;  %v4107_v25 = vsel %vm3647_vm2, %v3891_v30, 0.0  ;;  %v8753_v42 = vld [vmem:[#allocation2 + $0x278] sm:$0xff]  ;;  %v14025_v12 = vld [vmem:[#allocation163_spill] sm:$0xff] }
 0x201   : > { %v8743_v0 = vadd.f32 %v1550_v20, %v14016_v18  ;;  %v8746_v50 = vadd.f32 %v1554_v17, %v14017_v59  ;;  %v1894_v4 = vadd.f32 %v1782_v1, %v8307_v49  ;;  %v2375_v8 = vadd.f32 %v14018_v40, %v2135_v29  ;;  %v14021_v20 = vld [vmem:[#allocation154_spill] sm:$0xff]  ;;  %v14022_v49 = vld [vmem:[#allocation105_spill] sm:$0xff] }
 0x202   : > { %v2379_v43 = vadd.f32 %v8359_v28, %v2139_v24  ;;  %v2507_v9 = vmul.f32 %v13667_v15, %v8548_v55  ;;  %v2378_v56 = vadd.f32 %v14019_v53, %v2138_v19  ;;  %v14020_v30 = vrot.slane %v8585_v5, 1  ;;  %v14030_v53 = vld [vmem:[#allocation52_spill] sm:$0xff] }
 0x203   : > { %v2136_v17 = vadd.f32 %v14021_v20, %v1896_v13  ;;  %v2140_v1 = vadd.f32 %v14022_v49, %v1900_v14  ;;  %v8762_v29 = vadd.f32 %v4107_v25, %v4106_v35  ;;  %v3003_v19 = vmul.f32 %v8334_v10, %v14025_v12  ;;  %v14028_v13 = vld [vmem:[#allocation29_spill] sm:$0xff]  ;;  %v8791_v20 = vld [vmem:[%s5539_s15 + $0x20] ss:$0 sm:$0xff] }
 0x204   : > { %v2835_v60 = vsel %vm2798_vm1, %v14020_v30, %v2770_v3  ;;  %v14023_v28 = vmov %v14020_v30  ;;  %v2771_v35 = vrot.slane %v8548_v55, 1  ;;  %v1074_v5 = vrot.slane %v8753_v42, 7 }
 0x205   : > { %v8768_v24 = vsel %vm2798_vm1, %v2770_v3, %v14023_v28  ;;  %v8773_v18 = vmul.f32 %v8334_v10, %v2835_v60  ;;  %v8776_v59 = vmul.f32 %v7898_v46, %v2835_v60  ;;  %v8785_v3 = vadd.f32 %v14028_v13, %v1894_v4  ;;  %v14031_v28 = vld [vmem:[#allocation167_spill] sm:$0xff] }
 0x206   : > { %14024 = vst [vmem:[#allocation152_spill] sm:$0xff] %v8768_v24  ;;  %v8780_v14 = vmul.f32 %v7898_v46, %v8768_v24  ;;  %v2615_v25 = vadd.f32 %v8647_v31, %v2375_v8  ;;  %v2619_v40 = vadd.f32 %v2507_v9, %v2379_v43  ;;  %v3004_v30 = vmul.f32 %v13699_v48, %v14030_v53  ;;  %v14033_v8 = vld [vmem:[#allocation76_spill] sm:$0xff]  ;;  %v707_v13 = vld [vmem:[%s5482_s17 + $0x308] sm:$0xff] }
 0x207   : > { %14026 = vst [vmem:[#allocation35_spill] sm:$0xff] %v8773_v18  ;;  %14029 = vst [vmem:[#allocation143_spill] sm:$0xff] %v8785_v3  ;;  %v2618_v49 = vadd.f32 %v2506_v44, %v2378_v56  ;;  %v2376_v39 = vadd.f32 %v14031_v28, %v2136_v17  ;;  %v2380_v12 = vadd.f32 %v8467_v61, %v2140_v1  ;;  %v14036_v56 = vrot.slane %v8575_v52, 1  ;;  %v14040_v28 = vld [vmem:[#allocation63_spill] sm:$0xff] }
 0x208   : > { %14027 = vst [vmem:[#allocation161_spill] sm:$0xff] %v8780_v14  ;;  %v2508_v18 = vmul.f32 %v13587_v33, %v8596_v57  ;;  %v706_v14 = vld [vmem:[%s5482_s17 + $0x300] sm:$0xff]  ;;  %v8799_v4 = vmul.f32 %v8791_v20, %v2835_v60  ;;  %v3483_v31 = vmul.f32 %v8791_v20, %v8768_v24  ;;  %v8805_v43 = vmul.f32 %v8791_v20, %v14033_v8 }
 0x209   : > { %v8809_v44 = vmul.f32 %v13415_v22, %v8548_v55  ;;  %819 = vst [vmem:[#allocation2 + $0x340] sm:$0xff] %v706_v14  ;;  %v1551_v61 = vmul.f32 %v13811_v37, %v8622_v16  ;;  %v1555_v9 = vmul.f32 %v13811_v37, %v8618_v58  ;;  %v2836_v60 = vsel %vm2798_vm1, %v14036_v56, %v2771_v35 }
 0x20a   : > { %14032 = vst [vmem:[#allocation153_spill] sm:$0xff] %v8799_v4  ;;  %14034 = vst [vmem:[#allocation149_spill] sm:$0xff] %v8805_v43  ;;  %v14037_v17 = vrot.slane %v8678_v62, 7  ;;  %v14038_v14 = vmov %v14036_v56  ;;  %v3112_v8 = vadd.f32 %v14040_v28, %v2615_v25  ;;  %v3116_v43 = vadd.f32 %v3004_v30, %v2619_v40 }
 0x20b   : > { %14035 = vst [vmem:[#allocation135_spill] sm:$0xff] %v8809_v44  ;;  %v8830_v53 = vsel %vm2798_vm1, %v2771_v35, %v14038_v14  ;;  %820 = vst [vmem:[#allocation2 + $0x348] sm:$0xff] %v707_v13  ;;  %v3115_v3 = vadd.f32 %v3003_v19, %v2618_v49  ;;  %v2620_v24 = vadd.f32 %v2508_v18, %v2380_v12  ;;  %v14042_v44 = vld [vmem:[#allocation136_spill] sm:$0xff]  ;;  %v2772_v40 = vrot.slane %v8596_v57, 1  ;;  %v14045_v49 = vld [vmem:[#allocation93_spill] sm:$0xff] }
 0x20c   : > { %v8823_v1 = vsel %vm1101_vm0, %v1074_v5, %v14037_v17  ;;  %14039 = vst [vmem:[#allocation154_spill] sm:$0xff] %v8830_v53  ;;  %v14041_v4 = vmov %v14037_v17  ;;  %v2616_v17 = vadd.f32 %v8665_v21, %v2376_v39  ;;  %v3005_v52 = vmul.f32 %v13465_v11, %v14042_v44  ;;  %v14047_v44 = vld [vmem:[#allocation53_spill] sm:$0xff]  ;;  %v711_v13 = vld [vmem:[%s5482_s17 + $0x328] sm:$0x3f] }
 0x20d   : > { %v8837_v56 = vsel %vm1101_vm0, %v14041_v4, %v1074_v5  ;;  %v8844_v35 = vmul.f32 %v13820_v63, %v8622_v16  ;;  %v8848_v25 = vmul.f32 %v13545_v54, %v8548_v55  ;;  %v1785_v19 = vmul.f32 %v13928_v38, %v8823_v1  ;;  %v710_v5 = vld [vmem:[%s5482_s17 + $0x320] sm:$0x3f]  ;;  %v14046_v4 = vld [vmem:[#allocation40_spill] sm:$0xff]  ;;  %824 = vst [vmem:[#allocation2 + $0x368] sm:$0x3f] %v711_v13 }
 0x20e   : > { %v8856_v39 = vmul.f32 %v13820_v63, %v8618_v58  ;;  %v8859_v21 = vadd.f32 %v1551_v61, %v8398_v45  ;;  %v8862_v16 = vadd.f32 %v1555_v9, %v8410_v23  ;;  %v1789_v55 = vmul.f32 %v13928_v38, %v8837_v56  ;;  %823 = vst [vmem:[#allocation2 + $0x360] sm:$0x3f] %v710_v5 }
 0x20f   : > { %14043 = vst [vmem:[#allocation105_spill] sm:$0xff] %v8844_v35  ;;  %v3352_v12 = vadd.f32 %v8449_v47, %v3112_v8  ;;  %v3356_v18 = vadd.f32 %v8453_v34, %v3116_v43  ;;  %v3480_v30 = vmul.f32 %v8402_v32, %v2836_v60  ;;  %v3484_v58 = vmul.f32 %v8402_v32, %v8830_v53  ;;  %v14048_v34 = vld [vmem:[#allocation189_spill] sm:$0xff]  ;;  %v14110_v32 = vld [vmem:[#allocation47_spill] sm:$0xff] }
 0x210   : > { %14044 = vst [vmem:[#allocation29_spill] sm:$0xff] %v8856_v39  ;;  %v3355_v45 = vadd.f32 %v14045_v49, %v3115_v3  ;;  %v1552_v23 = vmul.f32 %v14046_v4, %v8674_v7  ;;  %v3113_v61 = vadd.f32 %v14047_v44, %v2616_v17  ;;  %v3117_v9 = vadd.f32 %v3005_v52, %v2620_v24  ;;  %v14052_v8 = vld [vmem:[#allocation141_spill] sm:$0xff]  ;;  %v14054_v17 = vld [vmem:[#allocation36_spill] sm:$0xff] }
 0x211   : > { %v1556_v47 = vmul.f32 %v14046_v4, %v8670_v27  ;;  %v14049_v43 = vrot.slane %v14048_v34, 1  ;;  %v1897_v5 = vadd.f32 %v1785_v19, %v14052_v8  ;;  %v8890_v24 = vmul.f32 %v13699_v48, %v2836_v60  ;;  %v14057_v44 = vld [vmem:[#allocation44_spill] sm:$0xff]  ;;  %v14060_v19 = vld [vmem:[#allocation18_spill] sm:$0xff]  ;;  %v9121_v35 = vld [vmem:[#allocation2 + $0x298] sm:$0xff] }
 0x212   : > { %v8893_v52 = vmul.f32 %v14054_v17, %v2836_v60  ;;  %v8897_v49 = vmul.f32 %v14054_v17, %v8830_v53  ;;  %v708_v34 = vld [vmem:[%s5482_s17 + $0x310] sm:$0xff]  ;;  %v8901_v4 = vadd.f32 %v3480_v30, %v3352_v12  ;;  %v8907_v13 = vmul.f32 %v14060_v19, %v8674_v7  ;;  %v709_v60 = vld [vmem:[%s5482_s17 + $0x318] sm:$0xff]  ;;  %v14067_v7 = vld [vmem:[#allocation179_spill] sm:$0xff] }
 0x213   : > { %v2837_v14 = vsel %vm2798_vm1, %v14049_v43, %v2772_v40  ;;  %v14050_v28 = vmov %v14049_v43  ;;  %14053 = vst [vmem:[#allocation167_spill] sm:$0xff] %v8890_v24  ;;  %v1901_v43 = vadd.f32 %v1789_v55, %v14057_v44  ;;  %821 = vst [vmem:[#allocation2 + $0x350] sm:$0xff] %v708_v34  ;;  %v14063_v8 = vld [vmem:[#allocation144_spill] sm:$0xff]  ;;  %v14065_v55 = vld [vmem:[#allocation62_spill] sm:$0xff]  ;;  %v8919_v30 = vadd.f32 %v3483_v31, %v3355_v45 }
 0x214   : > { %v8886_v3 = vsel %vm2798_vm1, %v2772_v40, %v14050_v28  ;;  %14055 = vst [vmem:[#allocation76_spill] sm:$0xff] %v8893_v52  ;;  %14056 = vst [vmem:[#allocation63_spill] sm:$0xff] %v8897_v49  ;;  %v8903_v40 = vadd.f32 %v3484_v58, %v3356_v18  ;;  %v8911_v28 = vmul.f32 %v14060_v19, %v8670_v27  ;;  %v14064_v53 = vld [vmem:[#allocation24_spill] sm:$0xff]  ;;  %v14069_v34 = vld [vmem:[#allocation158_spill] sm:$0xff] }
 0x215   : > { %14051 = vst [vmem:[#allocation52_spill] sm:$0xff] %v8886_v3  ;;  %14058 = vst [vmem:[#allocation136_spill] sm:$0xff] %v8901_v4  ;;  %v3353_v24 = vadd.f32 %v14063_v8, %v3113_v61  ;;  %v3357_v17 = vadd.f32 %v14064_v53, %v3117_v9  ;;  %v3481_v12 = vmul.f32 %v14065_v55, %v2837_v14  ;;  %v14068_v27 = vld [vmem:[#allocation180_spill] sm:$0xff]  ;;  %v14070_v61 = vld [vmem:[#allocation22_spill] sm:$0xff] }
 0x216   : > { %14059 = vst [vmem:[#allocation93_spill] sm:$0xff] %v8903_v40  ;;  %14061 = vst [vmem:[#allocation53_spill] sm:$0xff] %v8907_v13  ;;  %v3485_v18 = vmul.f32 %v14065_v55, %v8886_v3  ;;  %v8922_v58 = vadd.f32 %v1552_v23, %v14067_v7  ;;  %v8925_v44 = vadd.f32 %v1556_v47, %v14068_v27  ;;  %v14072_v9 = vld [vmem:[#allocation30_spill] sm:$0xff] }
 0x217   : > { %14062 = vst [vmem:[#allocation189_spill] sm:$0xff] %v8911_v28  ;;  %822 = vst [vmem:[#allocation2 + $0x358] sm:$0xff] %v709_v60  ;;  %v2137_v28 = vadd.f32 %v14069_v34, %v1897_v5  ;;  %v8930_v53 = vmul.f32 %v14070_v61, %v8596_v57  ;;  %v8934_v8 = vmul.f32 %v14072_v9, %v8596_v57  ;;  %v14073_v60 = vld [vmem:[#allocation23_spill] sm:$0xff]  ;;  %v14075_v45 = vld [vmem:[#allocation126_spill] sm:$0xff] }
 0x218   : > { %14066 = vst [vmem:[#allocation141_spill] sm:$0xff] %v8919_v30  ;;  %v8938_v31 = vmul.f32 %v14073_v60, %v8753_v42  ;;  %v2141_v23 = vadd.f32 %v14075_v45, %v1901_v43  ;;  %v14076_v7 = vld [vmem:[#allocation182_spill] sm:$0xff]  ;;  %v3893_v5 = vmul.f32 %v8901_v4, %v8901_v4  ;;  %v3897_v27 = vmul.f32 %v8903_v40, %v8903_v40  ;;  %v712_v57 = vld [vmem:[%s5482_s17 + $0x330] sm:$0x3f]  ;;  %v14078_v30 = vld [vmem:[#allocation41_spill] sm:$0xff] }
 0x219   : > { %14071 = vst [vmem:[#allocation44_spill] sm:$0xff] %v8930_v53  ;;  %v3715_v47 = vadd.f32 %v14076_v7, %v8901_v4  ;;  %v8948_v34 = vmul.f32 %v13465_v11, %v2837_v14  ;;  %v8952_v53 = vmul.f32 %v14078_v30, %v2837_v14  ;;  %v8958_v43 = vadd.f32 %v3481_v12, %v3353_v24  ;;  %v14083_v7 = vld [vmem:[#allocation183_spill] sm:$0xff]  ;;  %v14084_v13 = vld [vmem:[#allocation42_spill] sm:$0xff] }
 0x21a   : > { %14074 = vst [vmem:[#allocation144_spill] sm:$0xff] %v8938_v31  ;;  %v8956_v31 = vmul.f32 %v14078_v30, %v8886_v3  ;;  %v8960_v45 = vadd.f32 %v3485_v18, %v3357_v17  ;;  %825 = vst [vmem:[#allocation2 + $0x370] sm:$0x3f] %v712_v57  ;;  %v4015_v4 = vadd.f32 %v14083_v7, %v3893_v5  ;;  %v14087_v14 = vld [vmem:[#allocation171_spill] sm:$0xff]  ;;  %v3716_v3 = vsel %vm3647_vm2, %v8903_v40, 0.0  ;;  %v14090_v17 = vld [vmem:[#allocation28_spill] sm:$0xff] }
 0x21b   : > { %14077 = vst [vmem:[#allocation24_spill] sm:$0xff] %v8948_v34  ;;  %14079 = vst [vmem:[#allocation179_spill] sm:$0xff] %v8952_v53  ;;  %v1553_v55 = vmul.f32 %v14084_v13, %v8823_v1  ;;  %v14085_v34 = vld [vmem:[#allocation32_spill] sm:$0xff]  ;;  %v2377_v53 = vadd.f32 %v14087_v14, %v2137_v28  ;;  %v14088_v24 = vld [vmem:[#allocation19_spill] sm:$0xff]  ;;  %v2381_v18 = vadd.f32 %v14090_v17, %v2141_v23  ;;  %v4016_v30 = vsel %vm3647_vm2, %v3897_v27, 0.0 }
 0x21c   : > { %14080 = vst [vmem:[#allocation180_spill] sm:$0xff] %v8956_v31  ;;  %14081 = vst [vmem:[#allocation158_spill] sm:$0xff] %v8958_v43  ;;  %v8967_v19 = vmul.f32 %v14085_v34, %v8753_v42  ;;  %v8974_v12 = vmul.f32 %v14088_v24, %v8823_v1  ;;  %v14091_v5 = vld [vmem:[#allocation64_spill] sm:$0xff]  ;;  %v8979_v7 = vadd.f32 %v3716_v3, %v3715_v47  ;;  %v2773_v28 = vrot.slane %v8753_v42, 1  ;;  %v8987_v14 = vld [vmem:[#allocation2 + $0x2a0] sm:$0xff] }
 0x21d   : > { %14082 = vst [vmem:[#allocation126_spill] sm:$0xff] %v8960_v45  ;;  %v2509_v57 = vmul.f32 %v14091_v5, %v8753_v42  ;;  %v14094_v1 = vld [vmem:[#allocation172_spill] sm:$0xff]  ;;  %v3894_v23 = vmul.f32 %v8958_v43, %v8958_v43  ;;  %v3898_v3 = vmul.f32 %v8960_v45, %v8960_v45  ;;  %v1557_v47 = vmul.f32 %v14084_v13, %v8837_v56  ;;  %v8997_v27 = vld [vmem:[#allocation2 + $0x2a8] sm:$0xff]  ;;  %v9008_v11 = vld [vmem:[#allocation2 + $0x280] sm:$0xff] }
 0x21e   : > { %14086 = vst [vmem:[#allocation182_spill] sm:$0xff] %v8967_v19  ;;  %14089 = vst [vmem:[#allocation183_spill] sm:$0xff] %v8974_v12  ;;  %v8984_v19 = vmul.f32 %v14088_v24, %v8837_v56  ;;  %v3762_v40 = vadd.f32 %v14094_v1, %v8958_v43  ;;  %v8999_v17 = vadd.f32 %v4016_v30, %v4015_v4  ;;  %v14098_v12 = vld [vmem:[#allocation196_spill] sm:$0xff]  ;;  %v14099_v31 = vld [vmem:[#allocation11_spill] sm:$0xff]  ;;  %v1011_v56 = vrot.slane %v9008_v11, 7 }
 0x21f   : > { %14092 = vst [vmem:[#allocation171_spill] sm:$0xff] %v8979_v7  ;;  %v2617_v24 = vadd.f32 %v14098_v12, %v2377_v53  ;;  %v14100_v1 = vld [vmem:[#allocation26_spill] sm:$0xff]  ;;  %v14101_v43 = vld [vmem:[#allocation185_spill] sm:$0xff]  ;;  %v2621_v39 = vadd.f32 %v2509_v57, %v2381_v18  ;;  %v1075_v13 = vrot.slane %v8987_v14, 7  ;;  %v3763_v4 = vsel %vm3647_vm2, %v8960_v45, 0.0  ;;  %v9018_v30 = vld [vmem:[#allocation2 + $0x288] sm:$0xff] }
 0x220   : > { %14093 = vst [vmem:[#allocation28_spill] sm:$0xff] %v8984_v19  ;;  %14095 = vst [vmem:[#allocation172_spill] sm:$0xff] %v8999_v17  ;;  %v14096_v19 = vld [vmem:[#allocation159_spill] sm:$0xff]  ;;  %v3006_v7 = vmul.f32 %v14100_v1, %v14099_v31  ;;  %v4062_v49 = vadd.f32 %v14101_v43, %v3894_v23  ;;  %v1012_v53 = vrot.slane %v9018_v30, 7  ;;  %v1076_v31 = vrot.slane %v8997_v27, 7  ;;  %v14104_v18 = vld [vmem:[#allocation181_spill] sm:$0xff] }
 0x221   : > { %v9002_v42 = vadd.f32 %v1553_v55, %v14096_v19  ;;  %v14102_v19 = vrot.slane %v8678_v62, 1  ;;  %v9022_v43 = vadd.f32 %v3763_v4, %v3762_v40  ;;  %v4063_v12 = vsel %vm3647_vm2, %v3898_v3, 0.0  ;;  %v14114_v4 = vld [vmem:[#allocation147_spill] sm:$0xff] }
 0x222   : > { %v9026_v57 = vadd.f32 %v1557_v47, %v14104_v18  ;;  %v9046_v47 = vadd.f32 %v4063_v12, %v4062_v49  ;;  %v3118_v62 = vadd.f32 %v3006_v7, %v2621_v39  ;;  %v9051_v18 = vsel %vm1101_vm0, %v1075_v13, %v1011_v56  ;;  %v9067_v49 = vld [vmem:[#allocation2 + $0x2b0] sm:$0xff]  ;;  %v14119_v7 = vld [vmem:[#allocation57_spill] sm:$0xff] }
 0x223   : > { %14097 = vst [vmem:[#allocation159_spill] sm:$0xff] %v9002_v42  ;;  %v2838_v55 = vsel %vm2798_vm1, %v14102_v19, %v2773_v28  ;;  %14103 = vst [vmem:[#allocation196_spill] sm:$0xff] %v9022_v43  ;;  %v14106_v23 = vmov %v14102_v19  ;;  %v713_v19 = vld [vmem:[%s5482_s17 + $0x338] sm:$0x3f]  ;;  %v14109_v42 = vld [vmem:[#allocation160_spill] sm:$0xff]  ;;  %v9065_v39 = vsel %vm1101_vm0, %v1076_v31, %v1012_v53  ;;  %v2710_v12 = vrot.slane %v9008_v11, 1 }
 0x224   : > { %14105 = vst [vmem:[#allocation11_spill] sm:$0xff] %v9026_v57  ;;  %v9032_v45 = vsel %vm2798_vm1, %v2773_v28, %v14106_v23  ;;  %v9036_v17 = vmul.f32 %v14100_v1, %v2838_v55  ;;  %v3114_v52 = vadd.f32 %v14109_v42, %v2617_v24  ;;  %v9040_v40 = vmul.f32 %v14110_v32, %v2838_v55  ;;  %v14115_v42 = vld [vmem:[#allocation100_spill] sm:$0xff] }
 0x225   : > { %14107 = vst [vmem:[#allocation185_spill] sm:$0xff] %v9032_v45  ;;  %v9044_v3 = vmul.f32 %v14110_v32, %v9032_v45  ;;  %826 = vst [vmem:[#allocation2 + $0x378] sm:$0x3f] %v713_v19  ;;  %v3482_v28 = vmul.f32 %v14114_v4, %v2838_v55  ;;  %v3486_v24 = vmul.f32 %v14114_v4, %v9032_v45  ;;  %v14121_v45 = vld [vmem:[#allocation107_spill] sm:$0xff]  ;;  %v14123_v32 = vld [vmem:[#allocation184_spill] sm:$0xff] }
 0x226   : > { %14108 = vst [vmem:[#allocation181_spill] sm:$0xff] %v9036_v17  ;;  %14111 = vst [vmem:[#allocation160_spill] sm:$0xff] %v9040_v40  ;;  %v9057_v23 = vmul.f32 %v9008_v11, %v14115_v42  ;;  %v14117_v17 = vld [vmem:[#allocation13_spill] sm:$0xff]  ;;  %v9071_v55 = vmul.f32 %v9008_v11, %v14119_v7  ;;  %v9076_v19 = vmul.f32 %v9018_v30, %v13415_v22  ;;  %v9092_v43 = vld [vmem:[#allocation2 + $0x290] sm:$0xff] }
 0x227   : > { %14112 = vst [vmem:[#allocation199_spill] sm:$0xff] %v9044_v3  ;;  %14113 = vst [vmem:[#allocation200_spill] sm:$0xff] %v9046_v47  ;;  %v9061_v3 = vmul.f32 %v9008_v11, %v14117_v17  ;;  %v9085_v40 = vmul.f32 %v9018_v30, %v13545_v54  ;;  %v1142_v4 = vsel %vm1101_vm0, %v1011_v56, %v1075_v13 }
 0x228   : > { %14116 = vst [vmem:[#allocation201_spill] sm:$0xff] %v9057_v23  ;;  %14120 = vst [vmem:[#allocation203_spill] sm:$0xff] %v9076_v19  ;;  %v9080_v23 = vsel %vm1101_vm0, %v1012_v53, %v1076_v31  ;;  %v1790_v11 = vmul.f32 %v7822_v51, %v9051_v18  ;;  %v3358_v47 = vadd.f32 %v14123_v32, %v3118_v62  ;;  %v1013_v19 = vrot.slane %v9092_v43, 7  ;;  %v14124_v53 = vld [vmem:[#allocation67_spill] sm:$0xff] }
 0x229   : > { %14118 = vst [vmem:[#allocation202_spill] sm:$0xff] %v9061_v3  ;;  %v3354_v3 = vadd.f32 %v14121_v45, %v3114_v52  ;;  %14122 = vst [vmem:[#allocation107_spill] sm:$0xff] %v9085_v40  ;;  %v1791_v31 = vmul.f32 %v14124_v53, %v9065_v39  ;;  %v1077_v52 = vrot.slane %v9067_v49, 7  ;;  %v9100_v45 = vmul.f32 %v9018_v30, %v13667_v15 }
 0x22a   : > { %v9105_v56 = vmul.f32 %v9092_v43, %v14070_v61  ;;  %v1795_v32 = vmul.f32 %v14124_v53, %v9080_v23  ;;  %v9111_v62 = vmul.f32 %v9092_v43, %v14072_v9  ;;  %v9115_v40 = vmul.f32 %v9092_v43, %v13587_v33 }
 0x22b   : > { %v1794_v57 = vmul.f32 %v7822_v51, %v1142_v4  ;;  %v9119_v13 = vadd.f32 %v3482_v28, %v3354_v3  ;;  %v9126_v53 = vmul.f32 %v9121_v35, %v14073_v60  ;;  %v9129_v9 = vadd.f32 %v3486_v24, %v3358_v47  ;;  %v14137_v51 = vld [vmem:[#allocation155_spill] sm:$0xff] }
 0x22c   : > { %14125 = vst [vmem:[#allocation184_spill] sm:$0xff] %v9105_v56  ;;  %14126 = vst [vmem:[#allocation204_spill] sm:$0xff] %v9111_v62  ;;  %v1902_v62 = vadd.f32 %v1790_v11, %v8743_v0  ;;  %v9133_v61 = vmul.f32 %v9121_v35, %v14085_v34  ;;  %v1903_v1 = vadd.f32 %v1791_v31, %v8859_v21  ;;  %v2774_v31 = vrot.slane %v8987_v14, 1  ;;  %v14138_v34 = vld [vmem:[#allocation173_spill] sm:$0xff] }
 0x22d   : > { %14127 = vst [vmem:[#allocation205_spill] sm:$0xff] %v9119_v13  ;;  %14128 = vst [vmem:[#allocation206_spill] sm:$0xff] %v9126_v53  ;;  %v9138_v3 = vsel %vm1101_vm0, %v1077_v52, %v1013_v19  ;;  %v9142_v28 = vmul.f32 %v9121_v35, %v14091_v5  ;;  %v1907_v0 = vadd.f32 %v1795_v32, %v8862_v16  ;;  %v14132_v53 = vld [vmem:[#allocation73_spill] sm:$0xff]  ;;  %v14135_v32 = vld [vmem:[#allocation148_spill] sm:$0xff] }
 0x22e   : > { %14129 = vst [vmem:[#allocation207_spill] sm:$0xff] %v9129_v9  ;;  %14130 = vst [vmem:[#allocation208_spill] sm:$0xff] %v9133_v61  ;;  %v9148_v47 = vsel %vm1101_vm0, %v1013_v19, %v1077_v52  ;;  %v3809_v24 = vadd.f32 %v8739_v2, %v9119_v13  ;;  %v1906_v21 = vadd.f32 %v1794_v57, %v8746_v50  ;;  %v14134_v52 = vld [vmem:[#allocation75_spill] sm:$0xff]  ;;  %v14136_v61 = vld [vmem:[#allocation6_spill] sm:$0xff] }
 0x22f   : > { %v9155_v11 = vmul.f32 %v14115_v42, %v8987_v14  ;;  %v3895_v56 = vmul.f32 %v9119_v13, %v9119_v13  ;;  %v2142_v16 = vadd.f32 %v14132_v53, %v1902_v62  ;;  %v9163_v19 = vmul.f32 %v14117_v17, %v8987_v14 }
 0x230   : > { %v1792_v2 = vmul.f32 %v14134_v52, %v9138_v3  ;;  %v3899_v50 = vmul.f32 %v9129_v9, %v9129_v9  ;;  %v2514_v57 = vmul.f32 %v14119_v7, %v8987_v14  ;;  %v1796_v13 = vmul.f32 %v14134_v52, %v9148_v47 }
 0x231   : > { %14131 = vst [vmem:[#allocation209_spill] sm:$0xff] %v9155_v11  ;;  %14133 = vst [vmem:[#allocation73_spill] sm:$0xff] %v9163_v19  ;;  %v2143_v11 = vadd.f32 %v14135_v32, %v1903_v1  ;;  %v3810_v53 = vsel %vm3647_vm2, %v9129_v9, 0.0  ;;  %v4109_v62 = vadd.f32 %v8762_v29, %v3895_v56  ;;  %v3011_v19 = vmul.f32 %v8334_v10, %v14136_v61  ;;  %v14140_v32 = vld [vmem:[#allocation7_spill] sm:$0xff] }
 0x232   : > { %v2147_v17 = vadd.f32 %v14137_v51, %v1907_v0  ;;  %v9180_v42 = vadd.f32 %v3810_v53, %v3809_v24  ;;  %v2146_v60 = vadd.f32 %v14138_v34, %v1906_v21  ;;  %v2839_v14 = vsel %vm2798_vm1, %v2710_v12, %v2774_v31  ;;  %v14141_v56 = vld [vmem:[#allocation187_spill] sm:$0xff]  ;;  %v9194_v0 = vld [vmem:[#allocation2 + $0x2b8] sm:$0xff]  ;;  %v14142_v21 = vld [vmem:[#allocation190_spill] sm:$0xff] }
 0x233   : > { %v9187_v1 = vsel %vm2798_vm1, %v2774_v31, %v2710_v12  ;;  %v1558_v9 = vmul.f32 %v14140_v32, %v9051_v18  ;;  %v1562_v29 = vmul.f32 %v14140_v32, %v1142_v4  ;;  %v2382_v61 = vadd.f32 %v14141_v56, %v2142_v16 }
 0x234   : > { %14139 = vst [vmem:[#allocation148_spill] sm:$0xff] %v9187_v1  ;;  %v1904_v51 = vadd.f32 %v1792_v2, %v8922_v58  ;;  %v4110_v34 = vsel %vm3647_vm2, %v3899_v50, 0.0  ;;  %v9199_v24 = vmul.f32 %v13901_v26, %v9051_v18  ;;  %v2383_v12 = vadd.f32 %v14142_v21, %v2143_v11  ;;  %v14143_v2 = vld [vmem:[#allocation198_spill] sm:$0xff] }
 0x235   : > { %v1908_v31 = vadd.f32 %v1796_v13, %v8925_v44  ;;  %v9203_v53 = vadd.f32 %v4110_v34, %v4109_v62  ;;  %v9206_v32 = vmul.f32 %v13901_v26, %v1142_v4  ;;  %v2387_v16 = vadd.f32 %v8848_v25, %v2147_v17  ;;  %v14146_v17 = vld [vmem:[#allocation166_spill] sm:$0xff] }
 0x236   : > { %v2515_v58 = vmul.f32 %v13667_v15, %v8997_v27  ;;  %v2386_v50 = vadd.f32 %v14143_v2, %v2146_v60  ;;  %v9213_v56 = vmul.f32 %v8334_v10, %v2839_v14  ;;  %v9216_v18 = vmul.f32 %v7898_v46, %v2839_v14  ;;  %v14148_v21 = vld [vmem:[#allocation178_spill] sm:$0xff] }
 0x237   : > { %v1078_v44 = vrot.slane %v9194_v0, 7  ;;  %v9220_v13 = vadd.f32 %v1558_v9, %v8734_v41  ;;  %v9223_v4 = vadd.f32 %v1562_v29, %v8737_v36  ;;  %v2622_v25 = vadd.f32 %v9071_v55, %v2382_v61  ;;  %v14149_v55 = vld [vmem:[#allocation14_spill] sm:$0xff] }
 0x238   : > { %14144 = vst [vmem:[#allocation155_spill] sm:$0xff] %v9213_v56  ;;  %14145 = vst [vmem:[#allocation173_spill] sm:$0xff] %v9216_v18  ;;  %v2144_v11 = vadd.f32 %v14146_v17, %v1904_v51  ;;  %v9229_v60 = vmul.f32 %v7898_v46, %v9187_v1  ;;  %v2623_v62 = vadd.f32 %v9100_v45, %v2383_v12  ;;  %v2775_v34 = vrot.slane %v8997_v27, 1  ;;  %v714_v2 = vld [vmem:[%s5482_s17 + $0x340] sm:$0xff]  ;;  %v14164_v18 = vld [vmem:[#allocation176_spill] sm:$0xff] }
 0x239   : > { %v2148_v41 = vadd.f32 %v14148_v21, %v1908_v31  ;;  %v3487_v9 = vmul.f32 %v8791_v20, %v2839_v14  ;;  %v9237_v36 = vmul.f32 %v8791_v20, %v9187_v1  ;;  %v2627_v61 = vadd.f32 %v2515_v58, %v2387_v16  ;;  %v14152_v16 = vld [vmem:[#allocation174_spill] sm:$0xff]  ;;  %827 = vst [vmem:[#allocation2 + $0x380] sm:$0xff] %v714_v2 }
 0x23a   : > { %14147 = vst [vmem:[#allocation187_spill] sm:$0xff] %v9229_v60  ;;  %v3012_v29 = vmul.f32 %v13699_v48, %v14149_v55  ;;  %v2626_v51 = vadd.f32 %v2514_v57, %v2386_v50  ;;  %v9243_v45 = vmul.f32 %v13415_v22, %v8997_v27  ;;  %v9247_v12 = vmul.f32 %v13545_v54, %v8997_v27  ;;  %v14153_v50 = vld [vmem:[#allocation191_spill] sm:$0xff]  ;;  %v718_v56 = vld [vmem:[%s5482_s17 + $0x360] sm:$0x3f]  ;;  %v14166_v60 = vld [vmem:[#allocation29_spill] sm:$0xff] }
 0x23b   : > { %v14151_v31 = vrot.slane %v9121_v35, 7  ;;  %v3119_v58 = vadd.f32 %v14152_v16, %v2622_v25  ;;  %v1559_v57 = vmul.f32 %v13811_v37, %v9065_v39  ;;  %v2384_v17 = vadd.f32 %v14153_v50, %v2144_v11  ;;  %v715_v55 = vld [vmem:[%s5482_s17 + $0x348] sm:$0xff]  ;;  %831 = vst [vmem:[#allocation2 + $0x3a0] sm:$0x3f] %v718_v56 }
 0x23c   : > { %14150 = vst [vmem:[#allocation190_spill] sm:$0xff] %v9243_v45  ;;  %v14156_v16 = vld [vmem:[#allocation175_spill] sm:$0xff]  ;;  %v2388_v45 = vadd.f32 %v8934_v8, %v2148_v41  ;;  %v2516_v11 = vmul.f32 %v13587_v33, %v9067_v49  ;;  %828 = vst [vmem:[#allocation2 + $0x388] sm:$0xff] %v715_v55  ;;  %v1563_v2 = vmul.f32 %v13811_v37, %v9080_v23 }
 0x23d   : > { %v9253_v14 = vsel %vm1101_vm0, %v1078_v44, %v14151_v31  ;;  %v14154_v21 = vmov %v14151_v31  ;;  %v14155_v31 = vrot.slane %v9018_v30, 1  ;;  %v3120_v1 = vadd.f32 %v14156_v16, %v2623_v62  ;;  %v719_v41 = vld [vmem:[%s5482_s17 + $0x368] sm:$0x3f] }
 0x23e   : > { %v9264_v27 = vsel %vm1101_vm0, %v14154_v21, %v1078_v44  ;;  %v9278_v44 = vmul.f32 %v13820_v63, %v9065_v39  ;;  %v3124_v50 = vadd.f32 %v3012_v29, %v2627_v61  ;;  %v1793_v21 = vmul.f32 %v13928_v38, %v9253_v14  ;;  %v14161_v29 = vld [vmem:[#allocation105_spill] sm:$0xff]  ;;  %832 = vst [vmem:[#allocation2 + $0x3a8] sm:$0x3f] %v719_v41 }
 0x23f   : > { %v2840_v25 = vsel %vm2798_vm1, %v14155_v31, %v2775_v34  ;;  %v3123_v31 = vadd.f32 %v3011_v19, %v2626_v51  ;;  %v9286_v8 = vmul.f32 %v13820_v63, %v9080_v23  ;;  %v14159_v62 = vrot.slane %v9018_v30, 1  ;;  %v14162_v19 = vld [vmem:[#allocation124_spill] sm:$0xff]  ;;  %v14169_v41 = vld [vmem:[#allocation161_spill] sm:$0xff] }
 0x240   : > { %14157 = vst [vmem:[#allocation198_spill] sm:$0xff] %v9278_v44  ;;  %v1797_v39 = vmul.f32 %v13928_v38, %v9264_v27  ;;  %v3359_v61 = vadd.f32 %v8776_v59, %v3119_v58  ;;  %v9299_v55 = vadd.f32 %v1559_v57, %v14161_v29  ;;  %v3488_v51 = vmul.f32 %v14162_v19, %v2840_v25  ;;  %v14163_v30 = vld [vmem:[#allocation76_spill] sm:$0xff]  ;;  %v14167_v59 = vld [vmem:[#allocation63_spill] sm:$0xff] }
 0x241   : > { %14158 = vst [vmem:[#allocation166_spill] sm:$0xff] %v9286_v8  ;;  %v9292_v56 = vsel %vm2798_vm1, %v2775_v34, %v14159_v62  ;;  %v2624_v23 = vadd.f32 %v9115_v40, %v2384_v17  ;;  %v3360_v16 = vadd.f32 %v14163_v30, %v3120_v1  ;;  %v2628_v34 = vadd.f32 %v2516_v11, %v2388_v45  ;;  %v14165_v8 = vld [vmem:[#allocation25_spill] sm:$0xff]  ;;  %v14168_v29 = vld [vmem:[#allocation159_spill] sm:$0xff]  ;;  %v716_v17 = vld [vmem:[%s5482_s17 + $0x350] sm:$0xff] }
 0x242   : > { %14160 = vst [vmem:[#allocation178_spill] sm:$0xff] %v9292_v56  ;;  %v2776_v62 = vrot.slane %v9067_v49, 1  ;;  %v3013_v44 = vmul.f32 %v14165_v8, %v14164_v18  ;;  %v9308_v38 = vadd.f32 %v1563_v2, %v14166_v60  ;;  %v3364_v58 = vadd.f32 %v14167_v59, %v3124_v50  ;;  %v14171_v45 = vld [vmem:[#allocation36_spill] sm:$0xff]  ;;  %v14172_v18 = vld [vmem:[#allocation11_spill] sm:$0xff]  ;;  %829 = vst [vmem:[#allocation2 + $0x390] sm:$0xff] %v716_v17 }
 0x243   : > { %v3492_v57 = vmul.f32 %v14162_v19, %v9292_v56  ;;  %v1905_v40 = vadd.f32 %v1793_v21, %v14168_v29  ;;  %v3363_v63 = vadd.f32 %v14169_v41, %v3123_v31  ;;  %v9317_v1 = vmul.f32 %v13699_v48, %v2840_v25  ;;  %v717_v60 = vld [vmem:[%s5482_s17 + $0x358] sm:$0xff]  ;;  %v14174_v21 = vld [vmem:[#allocation22_spill] sm:$0xff]  ;;  %v14176_v31 = vld [vmem:[#allocation112_spill] sm:$0xff] }
 0x244   : > { %v9320_v11 = vmul.f32 %v14171_v45, %v2840_v25  ;;  %v1909_v30 = vadd.f32 %v1797_v39, %v14172_v18  ;;  %v9324_v2 = vadd.f32 %v3487_v9, %v3359_v61  ;;  %v9328_v50 = vmul.f32 %v14171_v45, %v9292_v56  ;;  %830 = vst [vmem:[#allocation2 + $0x398] sm:$0xff] %v717_v60  ;;  %v14178_v25 = vld [vmem:[#allocation40_spill] sm:$0xff] }
 0x245   : > { %14170 = vst [vmem:[#allocation14_spill] sm:$0xff] %v9317_v1  ;;  %v9332_v19 = vmul.f32 %v14174_v21, %v9067_v49  ;;  %v3121_v59 = vadd.f32 %v14176_v31, %v2624_v23  ;;  %v9335_v29 = vadd.f32 %v3488_v51, %v3360_v16  ;;  %v1560_v39 = vmul.f32 %v14178_v25, %v9138_v3  ;;  %v14183_v16 = vld [vmem:[#allocation170_spill] sm:$0xff]  ;;  %v14194_v56 = vld [vmem:[#allocation180_spill] sm:$0xff] }
 0x246   : > { %14173 = vst [vmem:[#allocation174_spill] sm:$0xff] %v9324_v2  ;;  %v14179_v9 = vrot.slane %v9092_v43, 1  ;;  %v3125_v17 = vadd.f32 %v3013_v44, %v2628_v34  ;;  %v9343_v41 = vadd.f32 %v3492_v57, %v3364_v58  ;;  %v1564_v18 = vmul.f32 %v14178_v25, %v9148_v47  ;;  %v14185_v2 = vld [vmem:[#allocation18_spill] sm:$0xff]  ;;  %v14189_v43 = vld [vmem:[#allocation171_spill] sm:$0xff] }
 0x247   : > { %14175 = vst [vmem:[#allocation191_spill] sm:$0xff] %v9332_v19  ;;  %14177 = vst [vmem:[#allocation175_spill] sm:$0xff] %v9335_v29  ;;  %v2145_v60 = vadd.f32 %v14183_v16, %v1905_v40  ;;  %v9355_v31 = vadd.f32 %v9237_v36, %v3363_v63  ;;  %v14187_v44 = vld [vmem:[#allocation30_spill] sm:$0xff]  ;;  %v3718_v1 = vadd.f32 %v14189_v43, %v9335_v29  ;;  %v14191_v40 = vld [vmem:[#allocation179_spill] sm:$0xff] }
 0x248   : > { %v2841_v61 = vsel %vm2798_vm1, %v14179_v9, %v2776_v62  ;;  %14180 = vst [vmem:[#allocation105_spill] sm:$0xff] %v9343_v41  ;;  %v14181_v23 = vmov %v14179_v9  ;;  %v9359_v9 = vmul.f32 %v14185_v2, %v9138_v3  ;;  %v9363_v34 = vmul.f32 %v14187_v44, %v9067_v49  ;;  %v14188_v58 = vld [vmem:[#allocation86_spill] sm:$0xff]  ;;  %v720_v16 = vld [vmem:[%s5482_s17 + $0x370] sm:$0x3f]  ;;  %v14195_v43 = vld [vmem:[#allocation189_spill] sm:$0xff] }
 0x249   : > { %v9351_v51 = vsel %vm2798_vm1, %v2776_v62, %v14181_v23  ;;  %14184 = vst [vmem:[#allocation76_spill] sm:$0xff] %v9355_v31  ;;  %v2149_v57 = vadd.f32 %v14188_v58, %v1909_v30  ;;  %v9370_v62 = vmul.f32 %v14185_v2, %v9148_v47  ;;  %v3361_v63 = vadd.f32 %v14191_v40, %v3121_v59  ;;  %v14192_v36 = vld [vmem:[#allocation62_spill] sm:$0xff]  ;;  %v14193_v31 = vld [vmem:[#allocation53_spill] sm:$0xff] }
 0x24a   : > { %14182 = vst [vmem:[#allocation124_spill] sm:$0xff] %v9351_v51  ;;  %14186 = vst [vmem:[#allocation176_spill] sm:$0xff] %v9359_v9  ;;  %v3489_v23 = vmul.f32 %v14192_v36, %v2841_v61  ;;  %v3901_v3 = vmul.f32 %v9335_v29, %v9335_v29  ;;  %v9378_v49 = vadd.f32 %v1560_v39, %v14193_v31  ;;  %v14197_v19 = vld [vmem:[#allocation194_spill] sm:$0xff]  ;;  %v3719_v39 = vsel %vm3647_vm2, %v9343_v41, 0.0  ;;  %v14198_v31 = vld [vmem:[#allocation172_spill] sm:$0xff] }
 0x24b   : > { %14190 = vst [vmem:[#allocation29_spill] sm:$0xff] %v9370_v62  ;;  %v3365_v30 = vadd.f32 %v14194_v56, %v3125_v17  ;;  %v3493_v58 = vmul.f32 %v14192_v36, %v9351_v51  ;;  %833 = vst [vmem:[#allocation2 + $0x3b0] sm:$0x3f] %v720_v16  ;;  %v3905_v47 = vmul.f32 %v9343_v41, %v9343_v41  ;;  %v14199_v17 = vld [vmem:[#allocation182_spill] sm:$0xff]  ;;  %v14201_v9 = vld [vmem:[#allocation41_spill] sm:$0xff] }
 0x24c   : > { %v9386_v59 = vadd.f32 %v1564_v18, %v14195_v43  ;;  %v9389_v40 = vmul.f32 %v14165_v8, %v2841_v61  ;;  %v2385_v29 = vadd.f32 %v14197_v19, %v2145_v60  ;;  %v4018_v56 = vadd.f32 %v14198_v31, %v3901_v3  ;;  %v14206_v3 = vld [vmem:[#allocation42_spill] sm:$0xff] }
 0x24d   : > { %v2389_v62 = vadd.f32 %v14199_v17, %v2149_v57  ;;  %v2517_v36 = vmul.f32 %v14091_v5, %v9194_v0  ;;  %v9398_v16 = vadd.f32 %v3719_v39, %v3718_v1  ;;  %v9401_v18 = vmul.f32 %v14201_v9, %v2841_v61  ;;  %v9416_v39 = vld [vmem:[#allocation2 + $0x2e0] sm:$0xff]  ;;  %v14207_v17 = vld [vmem:[#allocation19_spill] sm:$0xff] }
 0x24e   : > { %14196 = vst [vmem:[#allocation63_spill] sm:$0xff] %v9389_v40  ;;  %v9405_v43 = vmul.f32 %v14201_v9, %v9351_v51  ;;  %v9407_v19 = vadd.f32 %v3489_v23, %v3361_v63  ;;  %v9409_v60 = vadd.f32 %v3493_v58, %v3365_v30  ;;  %v1561_v31 = vmul.f32 %v14206_v3, %v9253_v14  ;;  %v14211_v58 = vld [vmem:[#allocation23_spill] sm:$0xff]  ;;  %v14214_v9 = vld [vmem:[#allocation26_spill] sm:$0xff] }
 0x24f   : > { %14200 = vst [vmem:[#allocation159_spill] sm:$0xff] %v9398_v16  ;;  %14202 = vst [vmem:[#allocation161_spill] sm:$0xff] %v9401_v18  ;;  %v1565_v57 = vmul.f32 %v14206_v3, %v9264_v27  ;;  %v2777_v1 = vrot.slane %v9194_v0, 1  ;;  %v4019_v61 = vsel %vm3647_vm2, %v3905_v47, 0.0  ;;  %v9421_v41 = vmul.f32 %v14207_v17, %v9253_v14  ;;  %v14213_v3 = vld [vmem:[#allocation130_spill] sm:$0xff]  ;;  %v14215_v14 = vld [vmem:[#allocation196_spill] sm:$0xff] }
 0x250   : > { %14203 = vst [vmem:[#allocation11_spill] sm:$0xff] %v9405_v43  ;;  %14204 = vst [vmem:[#allocation112_spill] sm:$0xff] %v9407_v19  ;;  %v9425_v63 = vmul.f32 %v14207_v17, %v9264_v27  ;;  %v2625_v23 = vadd.f32 %v9142_v28, %v2385_v29  ;;  %v9428_v30 = vadd.f32 %v4019_v61, %v4018_v56  ;;  %v9436_v43 = vld [vmem:[#allocation2 + $0x2e8] sm:$0xff]  ;;  %v1079_v29 = vrot.slane %v9416_v39, 7 }
 0x251   : > { %14205 = vst [vmem:[#allocation170_spill] sm:$0xff] %v9409_v60  ;;  %14208 = vst [vmem:[#allocation86_spill] sm:$0xff] %v9421_v41  ;;  %v9432_v40 = vmul.f32 %v14211_v58, %v9194_v0  ;;  %v2629_v51 = vadd.f32 %v2517_v36, %v2389_v62  ;;  %v3014_v47 = vmul.f32 %v14214_v9, %v14213_v3  ;;  %v14216_v56 = vld [vmem:[#allocation183_spill] sm:$0xff]  ;;  %v14217_v3 = vld [vmem:[#allocation28_spill] sm:$0xff]  ;;  %v1080_v25 = vrot.slane %v9436_v43, 7 }
 0x252   : > { %14209 = vst [vmem:[#allocation171_spill] sm:$0xff] %v9425_v63  ;;  %14210 = vst [vmem:[#allocation179_spill] sm:$0xff] %v9428_v30  ;;  %v3765_v41 = vadd.f32 %v14215_v14, %v9407_v19  ;;  %v3902_v27 = vmul.f32 %v9407_v19, %v9407_v19  ;;  %v9442_v63 = vld [vmem:[#allocation2 + $0x2c0] sm:$0xff]  ;;  %v3906_v62 = vmul.f32 %v9409_v60, %v9409_v60  ;;  %v14219_v14 = vrot.slane %v9121_v35, 1  ;;  %v9460_v16 = vld [vmem:[#allocation2 + $0x2c8] sm:$0xff] }
 0x253   : > { %14212 = vst [vmem:[#allocation62_spill] sm:$0xff] %v9432_v40  ;;  %v1015_v28 = vrot.slane %v9442_v63, 7  ;;  %v9449_v36 = vadd.f32 %v1561_v31, %v14216_v56  ;;  %v9452_v61 = vadd.f32 %v1565_v57, %v14217_v3  ;;  %v14220_v40 = vld [vmem:[#allocation200_spill] sm:$0xff]  ;;  %v14221_v30 = vld [vmem:[#allocation138_spill] sm:$0xff]  ;;  %v1016_v2 = vrot.slane %v9460_v16, 7 }
 0x254   : > { %v2842_v19 = vsel %vm2798_vm1, %v14219_v14, %v2777_v1  ;;  %v4065_v17 = vadd.f32 %v14220_v40, %v3902_v27  ;;  %v3122_v18 = vadd.f32 %v14221_v30, %v2625_v23  ;;  %v3766_v31 = vsel %vm3647_vm2, %v9409_v60, 0.0  ;;  %v14222_v57 = vld [vmem:[#allocation32_spill] sm:$0xff] }
 0x255   : > { %14218 = vst [vmem:[#allocation53_spill] sm:$0xff] %v9452_v61  ;;  %v9468_v56 = vmul.f32 %v14222_v57, %v9194_v0  ;;  %v14224_v3 = vmov %v14219_v14  ;;  %v3126_v23 = vadd.f32 %v3014_v47, %v2629_v51  ;;  %v9476_v30 = vadd.f32 %v3766_v31, %v3765_v41  ;;  %v14228_v14 = vld [vmem:[#allocation100_spill] sm:$0xff]  ;;  %v14233_v51 = vld [vmem:[#allocation147_spill] sm:$0xff] }
 0x256   : > { %v9474_v40 = vsel %vm2798_vm1, %v2777_v1, %v14224_v3  ;;  %v9479_v27 = vmul.f32 %v14214_v9, %v2842_v19  ;;  %v9483_v60 = vmul.f32 %v9442_v63, %v14228_v14  ;;  %v9487_v0 = vsel %vm1101_vm0, %v1015_v28, %v1079_v29  ;;  %v14235_v31 = vld [vmem:[#allocation160_spill] sm:$0xff]  ;;  %v14237_v9 = vld [vmem:[#allocation13_spill] sm:$0xff] }
 0x257   : > { %14223 = vst [vmem:[#allocation180_spill] sm:$0xff] %v9468_v56  ;;  %14225 = vst [vmem:[#allocation189_spill] sm:$0xff] %v9474_v40  ;;  %v4066_v35 = vsel %vm3647_vm2, %v3906_v62, 0.0  ;;  %v14230_v56 = vld [vmem:[#allocation47_spill] sm:$0xff]  ;;  %v3490_v1 = vmul.f32 %v14233_v51, %v2842_v19  ;;  %v3362_v3 = vadd.f32 %v14235_v31, %v3122_v18  ;;  %v721_v62 = vld [vmem:[%s5482_s17 + $0x378] sm:$0x3f]  ;;  %v9517_v18 = vsel %vm1101_vm0, %v1016_v2, %v1080_v25 }
 0x258   : > { %14226 = vst [vmem:[#allocation194_spill] sm:$0xff] %v9476_v30  ;;  %14227 = vst [vmem:[#allocation172_spill] sm:$0xff] %v9479_v27  ;;  %v9491_v61 = vmul.f32 %v14230_v56, %v2842_v19  ;;  %v9495_v41 = vmul.f32 %v14230_v56, %v9474_v40  ;;  %v9498_v47 = vadd.f32 %v4066_v35, %v4065_v17  ;;  %v14236_v30 = vld [vmem:[#allocation199_spill] sm:$0xff]  ;;  %v14239_v19 = vld [vmem:[#allocation65_spill] sm:$0xff] }
 0x259   : > { %14229 = vst [vmem:[#allocation182_spill] sm:$0xff] %v9483_v60  ;;  %v3494_v60 = vmul.f32 %v14233_v51, %v9474_v40  ;;  %v9505_v27 = vsel %vm1101_vm0, %v1080_v25, %v1016_v2  ;;  %v9511_v56 = vmul.f32 %v9442_v63, %v14237_v9  ;;  %v1802_v17 = vmul.f32 %v14239_v19, %v9487_v0  ;;  %v9519_v35 = vld [vmem:[#allocation2 + $0x2f0] sm:$0xff]  ;;  %v14242_v40 = vld [vmem:[#allocation67_spill] sm:$0xff] }
 0x25a   : > { %14231 = vst [vmem:[#allocation130_spill] sm:$0xff] %v9491_v61  ;;  %14232 = vst [vmem:[#allocation196_spill] sm:$0xff] %v9495_v41  ;;  %v3366_v61 = vadd.f32 %v14236_v30, %v3126_v23  ;;  %v9523_v51 = vmul.f32 %v9442_v63, %v14119_v7  ;;  %v2714_v23 = vrot.slane %v9442_v63, 1  ;;  %v9528_v30 = vmul.f32 %v9460_v16, %v13415_v22  ;;  %v9545_v41 = vld [vmem:[#allocation2 + $0x2d0] sm:$0xff] }
 0x25b   : > { %14234 = vst [vmem:[#allocation183_spill] sm:$0xff] %v9498_v47  ;;  %14238 = vst [vmem:[#allocation28_spill] sm:$0xff] %v9511_v56  ;;  %v1210_v31 = vsel %vm1101_vm0, %v1079_v29, %v1015_v28  ;;  %v9534_v2 = vmul.f32 %v9460_v16, %v13545_v54  ;;  %v9538_v25 = vmul.f32 %v9460_v16, %v13667_v15  ;;  %v1081_v29 = vrot.slane %v9519_v35, 7 }
 0x25c   : > { %834 = vst [vmem:[#allocation2 + $0x3b8] sm:$0x3f] %v721_v62  ;;  %14240 = vst [vmem:[#allocation200_spill] sm:$0xff] %v9528_v30  ;;  %v1799_v63 = vmul.f32 %v14242_v40, %v9505_v27  ;;  %v9543_v56 = vadd.f32 %v3490_v1, %v3362_v3  ;;  %v1017_v30 = vrot.slane %v9545_v41, 7  ;;  %v1803_v28 = vmul.f32 %v14242_v40, %v9517_v18 }
 0x25d   : > { %14241 = vst [vmem:[#allocation138_spill] sm:$0xff] %v9534_v2  ;;  %v9551_v2 = vadd.f32 %v3494_v60, %v3366_v61  ;;  %v9555_v47 = vmul.f32 %v9545_v41, %v14174_v21  ;;  %v1798_v62 = vmul.f32 %v14239_v19, %v1210_v31  ;;  %v1914_v1 = vadd.f32 %v1802_v17, %v9223_v4  ;;  %v9568_v60 = vld [vmem:[#allocation2 + $0x2d8] sm:$0xff] }
 0x25e   : > { %14243 = vst [vmem:[#allocation147_spill] sm:$0xff] %v9543_v56  ;;  %v9561_v3 = vmul.f32 %v9545_v41, %v14187_v44  ;;  %v9565_v45 = vmul.f32 %v9545_v41, %v13587_v33  ;;  %v9575_v4 = vmul.f32 %v9568_v60, %v14211_v58  ;;  %v9579_v17 = vmul.f32 %v9568_v60, %v14222_v57  ;;  %v14252_v58 = vld [vmem:[#allocation146_spill] sm:$0xff]  ;;  %v14254_v57 = vld [vmem:[#allocation135_spill] sm:$0xff] }
 0x25f   : > { %14244 = vst [vmem:[#allocation160_spill] sm:$0xff] %v9551_v2  ;;  %14245 = vst [vmem:[#allocation199_spill] sm:$0xff] %v9555_v47  ;;  %v3812_v47 = vadd.f32 %v9180_v42, %v9543_v56  ;;  %v3903_v40 = vmul.f32 %v9543_v56, %v9543_v56  ;;  %v1915_v19 = vadd.f32 %v1803_v28, %v9308_v38  ;;  %v3813_v38 = vsel %vm3647_vm2, %v9551_v2, 0.0 }
 0x260   : > { %14246 = vst [vmem:[#allocation210_spill] sm:$0xff] %v9561_v3  ;;  %14247 = vst [vmem:[#allocation211_spill] sm:$0xff] %v9575_v4  ;;  %v1911_v3 = vadd.f32 %v1799_v63, %v9299_v55  ;;  %v9587_v61 = vsel %vm1101_vm0, %v1017_v30, %v1081_v29  ;;  %v9591_v42 = vsel %vm1101_vm0, %v1081_v29, %v1017_v30  ;;  %v14250_v63 = vld [vmem:[#allocation197_spill] sm:$0xff]  ;;  %v2778_v29 = vrot.slane %v9416_v39, 1 }
 0x261   : > { %14248 = vst [vmem:[#allocation212_spill] sm:$0xff] %v9579_v17  ;;  %v3907_v4 = vmul.f32 %v9551_v2, %v9551_v2  ;;  %v9597_v17 = vmul.f32 %v9568_v60, %v14091_v5  ;;  %v1910_v55 = vadd.f32 %v1798_v62, %v9220_v13  ;;  %v2154_v56 = vadd.f32 %v14250_v63, %v1914_v1  ;;  %v14253_v63 = vld [vmem:[#allocation7_spill] sm:$0xff] }
 0x262   : > { %v4112_v28 = vadd.f32 %v9203_v53, %v3903_v40  ;;  %v9607_v30 = vmul.f32 %v14228_v14, %v9416_v39  ;;  %v2151_v5 = vadd.f32 %v14252_v58, %v1911_v3  ;;  %v1800_v13 = vmul.f32 %v14134_v52, %v9591_v42  ;;  %v14255_v14 = vld [vmem:[#allocation186_spill] sm:$0xff]  ;;  %v14256_v3 = vld [vmem:[#allocation73_spill] sm:$0xff] }
 0x263   : > { %14249 = vst [vmem:[#allocation213_spill] sm:$0xff] %v9597_v17  ;;  %v1804_v62 = vmul.f32 %v14134_v52, %v9587_v61  ;;  %v9615_v1 = vadd.f32 %v3813_v38, %v3812_v47  ;;  %v1566_v53 = vmul.f32 %v14253_v63, %v1210_v31  ;;  %v9620_v40 = vmul.f32 %v14237_v9, %v9416_v39 }
 0x264   : > { %14251 = vst [vmem:[#allocation197_spill] sm:$0xff] %v9607_v30  ;;  %v2155_v2 = vadd.f32 %v14254_v57, %v1915_v19  ;;  %v4113_v30 = vsel %vm3647_vm2, %v3907_v4, 0.0  ;;  %v2150_v58 = vadd.f32 %v14255_v14, %v1910_v55  ;;  %v2394_v17 = vadd.f32 %v14256_v3, %v2154_v56  ;;  %v9639_v19 = vld [vmem:[#allocation2 + $0x2f8] sm:$0xff]  ;;  %v14259_v14 = vld [vmem:[#allocation107_spill] sm:$0xff]  ;;  %v14261_v3 = vld [vmem:[#allocation202_spill] sm:$0xff] }
 0x265   : > { %v2522_v44 = vmul.f32 %v14119_v7, %v9416_v39  ;;  %v9628_v52 = vadd.f32 %v4113_v30, %v4112_v28  ;;  %v9631_v47 = vmul.f32 %v13901_v26, %v1210_v31  ;;  %v9635_v38 = vmul.f32 %v13901_v26, %v9487_v0 }
 0x266   : > { %v1570_v57 = vmul.f32 %v14253_v63, %v9487_v0  ;;  %v2843_v56 = vsel %vm2798_vm1, %v2714_v23, %v2778_v29  ;;  %v2391_v4 = vadd.f32 %v14259_v14, %v2151_v5  ;;  %v1912_v39 = vadd.f32 %v1800_v13, %v9378_v49  ;;  %v14262_v5 = vld [vmem:[#allocation152_spill] sm:$0xff]  ;;  %v14268_v14 = vld [vmem:[#allocation154_spill] sm:$0xff] }
 0x267   : > { %14257 = vst [vmem:[#allocation146_spill] sm:$0xff] %v9631_v47  ;;  %14258 = vst [vmem:[#allocation135_spill] sm:$0xff] %v9635_v38  ;;  %v1916_v55 = vadd.f32 %v1804_v62, %v9386_v59  ;;  %v9647_v31 = vadd.f32 %v1566_v53, %v9199_v24  ;;  %v9651_v28 = vsel %vm2798_vm1, %v2778_v29, %v2714_v23  ;;  %v1082_v59 = vrot.slane %v9639_v19, 7  ;;  %v14267_v62 = vld [vmem:[#allocation44_spill] sm:$0xff] }
 0x268   : > { %14260 = vst [vmem:[#allocation186_spill] sm:$0xff] %v9651_v28  ;;  %v2395_v0 = vadd.f32 %v9247_v12, %v2155_v2  ;;  %v2523_v30 = vmul.f32 %v13667_v15, %v9436_v43  ;;  %v2390_v38 = vadd.f32 %v14261_v3, %v2150_v58  ;;  %v2634_v47 = vadd.f32 %v2522_v44, %v2394_v17  ;;  %v14266_v17 = vld [vmem:[#allocation121_spill] sm:$0xff] }
 0x269   : > { %v3019_v49 = vmul.f32 %v8334_v10, %v14262_v5  ;;  %v9661_v24 = vadd.f32 %v1570_v57, %v9206_v32  ;;  %v9664_v13 = vmul.f32 %v8334_v10, %v2843_v56  ;;  %v9667_v23 = vmul.f32 %v7898_v46, %v2843_v56 }
 0x26a   : > { %v2779_v12 = vrot.slane %v9436_v43, 1  ;;  %v9672_v2 = vmul.f32 %v7898_v46, %v9651_v28  ;;  %v2631_v44 = vadd.f32 %v9538_v25, %v2391_v4  ;;  %v2152_v29 = vadd.f32 %v14266_v17, %v1912_v39  ;;  %v14272_v39 = vld [vmem:[#allocation167_spill] sm:$0xff] }
 0x26b   : > { %14263 = vst [vmem:[#allocation73_spill] sm:$0xff] %v9664_v13  ;;  %14264 = vst [vmem:[#allocation107_spill] sm:$0xff] %v9667_v23  ;;  %v2156_v53 = vadd.f32 %v14267_v62, %v1916_v55  ;;  %v3495_v32 = vmul.f32 %v8791_v20, %v2843_v56  ;;  %v3499_v58 = vmul.f32 %v8791_v20, %v9651_v28  ;;  %v14270_v25 = vrot.slane %v9568_v60, 7  ;;  %v14275_v62 = vld [vmem:[#allocation17_spill] sm:$0xff] }
 0x26c   : > { %14265 = vst [vmem:[#allocation202_spill] sm:$0xff] %v9672_v2  ;;  %v2635_v57 = vadd.f32 %v2523_v30, %v2395_v0  ;;  %v3020_v3 = vmul.f32 %v13699_v48, %v14268_v14  ;;  %v2630_v5 = vadd.f32 %v9523_v51, %v2390_v38  ;;  %v3131_v13 = vadd.f32 %v3019_v49, %v2634_v47  ;;  %v14273_v0 = vld [vmem:[#allocation204_spill] sm:$0xff]  ;;  %v14287_v2 = vld [vmem:[#allocation173_spill] sm:$0xff] }
 0x26d   : > { %v9685_v23 = vmul.f32 %v13415_v22, %v9436_v43  ;;  %v9691_v4 = vsel %vm1101_vm0, %v1082_v59, %v14270_v25  ;;  %v1567_v20 = vmul.f32 %v13811_v37, %v9505_v27  ;;  %v9697_v56 = vmul.f32 %v13545_v54, %v9436_v43 }
 0x26e   : > { %v14271_v51 = vrot.slane %v9460_v16, 1  ;;  %v2524_v38 = vmul.f32 %v13587_v33, %v9519_v35  ;;  %v3128_v55 = vadd.f32 %v14272_v39, %v2631_v44  ;;  %v2392_v30 = vadd.f32 %v14273_v0, %v2152_v29  ;;  %v14277_v44 = vld [vmem:[#allocation80_spill] sm:$0xff]  ;;  %v14278_v29 = vld [vmem:[#allocation35_spill] sm:$0xff] }
 0x26f   : > { %14269 = vst [vmem:[#allocation152_spill] sm:$0xff] %v9685_v23  ;;  %v2396_v49 = vadd.f32 %v9363_v34, %v2156_v53  ;;  %v14274_v17 = vmov %v14270_v25  ;;  %v9716_v14 = vmul.f32 %v14275_v62, %v9505_v27  ;;  %v1571_v25 = vmul.f32 %v13811_v37, %v9517_v18  ;;  %v14279_v34 = vld [vmem:[#allocation187_spill] sm:$0xff] }
 0x270   : > { %v2844_v47 = vsel %vm2798_vm1, %v14271_v51, %v2779_v12  ;;  %v9712_v43 = vsel %vm1101_vm0, %v14274_v17, %v1082_v59  ;;  %v3132_v51 = vadd.f32 %v3020_v3, %v2635_v57  ;;  %v1801_v39 = vmul.f32 %v14277_v44, %v9691_v4  ;;  %v14283_v17 = vld [vmem:[#allocation198_spill] sm:$0xff]  ;;  %v9738_v57 = vld [vmem:[%s5539_s15 + $0x28] ss:$0 sm:$0xff] }
 0x271   : > { %14276 = vst [vmem:[#allocation121_spill] sm:$0xff] %v9716_v14  ;;  %v3127_v0 = vadd.f32 %v14278_v29, %v2630_v5  ;;  %v3371_v53 = vadd.f32 %v14279_v34, %v3131_v13  ;;  %v9726_v28 = vmul.f32 %v14275_v62, %v9517_v18  ;;  %v14281_v59 = vrot.slane %v9460_v16, 1  ;;  %14284 = vst [vmem:[#allocation167_spill] sm:$0xff] %v9738_v57  ;;  %v14285_v34 = vld [vmem:[#allocation52_spill] sm:$0xff] }
 0x272   : > { %v9735_v23 = vadd.f32 %v1567_v20, %v14283_v17  ;;  %v3496_v3 = vmul.f32 %v9738_v57, %v2844_v47  ;;  %v2780_v5 = vrot.slane %v9519_v35, 1  ;;  %v1805_v13 = vmul.f32 %v14277_v44, %v9712_v43 }
 0x273   : > { %14280 = vst [vmem:[#allocation44_spill] sm:$0xff] %v9726_v28  ;;  %v9732_v27 = vsel %vm2798_vm1, %v2779_v12, %v14281_v59  ;;  %v3368_v18 = vadd.f32 %v9320_v11, %v3128_v55  ;;  %v2632_v16 = vadd.f32 %v9565_v45, %v2392_v30  ;;  %v2636_v29 = vadd.f32 %v2524_v38, %v2396_v49  ;;  %v14286_v59 = vld [vmem:[#allocation166_spill] sm:$0xff]  ;;  %v14290_v11 = vld [vmem:[#allocation36_spill] sm:$0xff] }
 0x274   : > { %14282 = vst [vmem:[#allocation154_spill] sm:$0xff] %v9732_v27  ;;  %v3021_v12 = vmul.f32 %v14165_v8, %v14285_v34  ;;  %v9749_v20 = vadd.f32 %v1571_v25, %v14286_v59  ;;  %v3372_v17 = vadd.f32 %v9328_v50, %v3132_v51  ;;  %v3500_v28 = vmul.f32 %v9738_v57, %v9732_v27  ;;  %v14291_v50 = vld [vmem:[#allocation40_spill] sm:$0xff] }
 0x275   : > { %v1913_v14 = vadd.f32 %v1801_v39, %v9449_v36  ;;  %v3367_v44 = vadd.f32 %v14287_v2, %v3127_v0  ;;  %v9756_v37 = vadd.f32 %v3499_v58, %v3371_v53  ;;  %v9759_v45 = vmul.f32 %v13699_v48, %v2844_v47  ;;  %v14293_v2 = vld [vmem:[#allocation53_spill] sm:$0xff]  ;;  %v14296_v51 = vld [vmem:[#allocation24_spill] sm:$0xff] }
 0x276   : > { %v9762_v38 = vmul.f32 %v14290_v11, %v2844_v47  ;;  %v9766_v55 = vmul.f32 %v14290_v11, %v9732_v27  ;;  %v1568_v30 = vmul.f32 %v14291_v50, %v9591_v42  ;;  %v9772_v36 = vmul.f32 %v14174_v21, %v9519_v35  ;;  %v10014_v11 = vld [vmem:[#allocation2 + $0x318] sm:$0xff] }
 0x277   : > { %14288 = vst [vmem:[#allocation204_spill] sm:$0xff] %v9756_v37  ;;  %14289 = vst [vmem:[#allocation35_spill] sm:$0xff] %v9759_v45  ;;  %v1917_v58 = vadd.f32 %v1805_v13, %v14293_v2  ;;  %v9775_v49 = vadd.f32 %v3496_v3, %v3368_v18  ;;  %v14295_v25 = vrot.slane %v9545_v41, 1  ;;  %v3129_v39 = vadd.f32 %v14296_v51, %v2632_v16  ;;  %v14300_v3 = vld [vmem:[#allocation193_spill] sm:$0xff]  ;;  %v14306_v41 = vld [vmem:[#allocation159_spill] sm:$0xff] }
 0x278   : > { %14292 = vst [vmem:[#allocation187_spill] sm:$0xff] %v9772_v36  ;;  %v3133_v0 = vadd.f32 %v3021_v12, %v2636_v29  ;;  %v9782_v53 = vadd.f32 %v3500_v28, %v3372_v17  ;;  %v1572_v34 = vmul.f32 %v14291_v50, %v9587_v61  ;;  %v2153_v18 = vadd.f32 %v14300_v3, %v1913_v14  ;;  %v14303_v28 = vld [vmem:[#allocation18_spill] sm:$0xff]  ;;  %v14309_v17 = vld [vmem:[#allocation144_spill] sm:$0xff]  ;;  %v14313_v45 = vld [vmem:[#allocation29_spill] sm:$0xff] }
 0x279   : > { %14294 = vst [vmem:[#allocation198_spill] sm:$0xff] %v9775_v49  ;;  %v2845_v47 = vsel %vm2798_vm1, %v14295_v25, %v2780_v5  ;;  %v14298_v59 = vmov %v14295_v25  ;;  %v9793_v2 = vadd.f32 %v3495_v32, %v3367_v44  ;;  %v9797_v25 = vmul.f32 %v9756_v37, %v9756_v37  ;;  %v14305_v29 = vld [vmem:[#allocation30_spill] sm:$0xff]  ;;  %v9814_v32 = vld [vmem:[%s5539_s15 + $0x30] ss:$0 sm:$0xff]  ;;  %v14315_v36 = vld [vmem:[#allocation179_spill] sm:$0xff] }
 0x27a   : > { %14297 = vst [vmem:[#allocation52_spill] sm:$0xff] %v9782_v53  ;;  %v9790_v13 = vsel %vm2798_vm1, %v2780_v5, %v14298_v59  ;;  %v9801_v16 = vmul.f32 %v14303_v28, %v9591_v42  ;;  %v9805_v12 = vmul.f32 %v14305_v29, %v9519_v35  ;;  %v3721_v5 = vadd.f32 %v14306_v41, %v9775_v49  ;;  %v14310_v59 = vld [vmem:[#allocation161_spill] sm:$0xff]  ;;  %v14311_v35 = vld [vmem:[#allocation11_spill] sm:$0xff]  ;;  %v14312_v37 = vld [vmem:[#allocation176_spill] sm:$0xff] }
 0x27b   : > { %14299 = vst [vmem:[#allocation166_spill] sm:$0xff] %v9790_v13  ;;  %14301 = vst [vmem:[#allocation173_spill] sm:$0xff] %v9793_v2  ;;  %v9811_v14 = vmul.f32 %v14303_v28, %v9587_v61  ;;  %v3497_v44 = vmul.f32 %v9814_v32, %v2845_v47  ;;  %v2157_v51 = vadd.f32 %v14309_v17, %v1917_v58  ;;  %v14314_v58 = vld [vmem:[#allocation208_spill] sm:$0xff]  ;;  %v14343_v28 = vrot.slane %v9568_v60, 1 }
 0x27c   : > { %14302 = vst [vmem:[#allocation53_spill] sm:$0xff] %v9797_v25  ;;  %14304 = vst [vmem:[#allocation24_spill] sm:$0xff] %v9801_v16  ;;  %v3909_v42 = vmul.f32 %v9775_v49, %v9775_v49  ;;  %v3369_v3 = vadd.f32 %v14310_v59, %v3129_v39  ;;  %v3373_v25 = vadd.f32 %v14311_v35, %v3133_v0  ;;  %v14317_v0 = vld [vmem:[#allocation41_spill] sm:$0xff]  ;;  %v14319_v35 = vld [vmem:[#allocation42_spill] sm:$0xff] }
 0x27d   : > { %14307 = vst [vmem:[#allocation193_spill] sm:$0xff] %v9811_v14  ;;  %14308 = vst [vmem:[#allocation159_spill] sm:$0xff] %v9814_v32  ;;  %v3501_v41 = vmul.f32 %v9814_v32, %v9790_v13  ;;  %v3913_v61 = vmul.f32 %v9782_v53, %v9782_v53  ;;  %v9827_v2 = vadd.f32 %v1568_v30, %v14312_v37  ;;  %v3722_v37 = vsel %vm3647_vm2, %v9782_v53, 0.0  ;;  %v14321_v30 = vld [vmem:[#allocation180_spill] sm:$0xff] }
 0x27e   : > { %v9830_v27 = vadd.f32 %v1572_v34, %v14313_v45  ;;  %v2393_v17 = vadd.f32 %v14314_v58, %v2153_v18  ;;  %v4021_v49 = vadd.f32 %v14315_v36, %v3909_v42  ;;  %v9835_v39 = vmul.f32 %v14165_v8, %v2845_v47  ;;  %v14322_v36 = vld [vmem:[#allocation64_spill] sm:$0xff] }
 0x27f   : > { %v9838_v59 = vmul.f32 %v14317_v0, %v2845_v47  ;;  %v1569_v14 = vmul.f32 %v14319_v35, %v9691_v4  ;;  %v9846_v45 = vmul.f32 %v14317_v0, %v9790_v13  ;;  %v2397_v34 = vadd.f32 %v14321_v30, %v2157_v51  ;;  %v14326_v13 = vld [vmem:[#allocation19_spill] sm:$0xff] }
 0x280   : > { %14316 = vst [vmem:[#allocation144_spill] sm:$0xff] %v9835_v39  ;;  %v2525_v18 = vmul.f32 %v14322_v36, %v9639_v19  ;;  %v9851_v42 = vadd.f32 %v3722_v37, %v3721_v5  ;;  %v9853_v58 = vadd.f32 %v3497_v44, %v3369_v3  ;;  %v9855_v47 = vadd.f32 %v3501_v41, %v3373_v25  ;;  %v14329_v5 = vld [vmem:[#allocation213_spill] sm:$0xff]  ;;  %v14331_v25 = vld [vmem:[#allocation86_spill] sm:$0xff]  ;;  %v14333_v37 = vld [vmem:[#allocation23_spill] sm:$0xff] }
 0x281   : > { %14318 = vst [vmem:[#allocation161_spill] sm:$0xff] %v9838_v59  ;;  %14320 = vst [vmem:[#allocation11_spill] sm:$0xff] %v9846_v45  ;;  %v1573_v39 = vmul.f32 %v14319_v35, %v9712_v43  ;;  %v9859_v59 = vld [vmem:[#allocation2 + $0x320] sm:$0xff]  ;;  %v4022_v53 = vsel %vm3647_vm2, %v3913_v61, 0.0  ;;  %v9864_v0 = vmul.f32 %v14326_v13, %v9691_v4  ;;  %v9868_v51 = vmul.f32 %v14326_v13, %v9712_v43  ;;  %v9881_v35 = vld [vmem:[#allocation2 + $0x328] sm:$0xff] }
 0x282   : > { %14323 = vst [vmem:[#allocation176_spill] sm:$0xff] %v9851_v42  ;;  %14324 = vst [vmem:[#allocation29_spill] sm:$0xff] %v9853_v58  ;;  %v2633_v44 = vadd.f32 %v14329_v5, %v2393_v17  ;;  %v9871_v3 = vadd.f32 %v4022_v53, %v4021_v49  ;;  %v9874_v41 = vadd.f32 %v1569_v14, %v14331_v25  ;;  %v2781_v61 = vrot.slane %v9639_v19, 1  ;;  %v14336_v45 = vld [vmem:[#allocation26_spill] sm:$0xff]  ;;  %v14341_v13 = vld [vmem:[#allocation181_spill] sm:$0xff] }
 0x283   : > { %14325 = vst [vmem:[#allocation208_spill] sm:$0xff] %v9855_v47  ;;  %14327 = vst [vmem:[#allocation179_spill] sm:$0xff] %v9864_v0  ;;  %v9878_v30 = vmul.f32 %v14333_v37, %v9639_v19  ;;  %v2637_v4 = vadd.f32 %v2525_v18, %v2397_v34  ;;  %v14335_v0 = vld [vmem:[#allocation185_spill] sm:$0xff]  ;;  %v1083_v53 = vrot.slane %v9859_v59, 7  ;;  %v14337_v14 = vld [vmem:[#allocation194_spill] sm:$0xff]  ;;  %v3910_v5 = vmul.f32 %v9853_v58, %v9853_v58 }
 0x284   : > { %14328 = vst [vmem:[#allocation180_spill] sm:$0xff] %v9868_v51  ;;  %14330 = vst [vmem:[#allocation64_spill] sm:$0xff] %v9871_v3  ;;  %v3022_v43 = vmul.f32 %v14336_v45, %v14335_v0  ;;  %v9885_v51 = vld [vmem:[#allocation2 + $0x300] sm:$0xff]  ;;  %v3768_v17 = vadd.f32 %v14337_v14, %v9853_v58  ;;  %v3914_v25 = vmul.f32 %v9855_v47, %v9855_v47  ;;  %v14339_v0 = vld [vmem:[#allocation32_spill] sm:$0xff]  ;;  %v1084_v14 = vrot.slane %v9881_v35, 7 }
 0x285   : > { %14332 = vst [vmem:[#allocation213_spill] sm:$0xff] %v9874_v41  ;;  %14334 = vst [vmem:[#allocation86_spill] sm:$0xff] %v9878_v30  ;;  %v1019_v49 = vrot.slane %v9885_v51, 7  ;;  %v14338_v30 = vld [vmem:[#allocation171_spill] sm:$0xff]  ;;  %v9900_v18 = vmul.f32 %v14339_v0, %v9639_v19  ;;  %v3130_v3 = vadd.f32 %v14341_v13, %v2633_v44  ;;  %v14346_v13 = vld [vmem:[#allocation100_spill] sm:$0xff] }
 0x286   : > { %v9896_v34 = vadd.f32 %v1573_v39, %v14338_v30  ;;  %v9903_v42 = vld [vmem:[#allocation2 + $0x308] sm:$0xff]  ;;  %v2846_v39 = vsel %vm2798_vm1, %v14343_v28, %v2781_v61  ;;  %v14344_v30 = vmov %v14343_v28  ;;  %v9920_v44 = vmul.f32 %v9885_v51, %v14346_v13 }
 0x287   : > { %14340 = vst [vmem:[#allocation185_spill] sm:$0xff] %v9900_v18  ;;  %v1020_v32 = vrot.slane %v9903_v42, 7  ;;  %v14342_v58 = vld [vmem:[#allocation183_spill] sm:$0xff]  ;;  %v9916_v19 = vsel %vm2798_vm1, %v2781_v61, %v14344_v30  ;;  %v3769_v18 = vsel %vm3647_vm2, %v9855_v47, 0.0  ;;  %v3134_v41 = vadd.f32 %v3022_v43, %v2637_v4  ;;  %v14354_v43 = vld [vmem:[#allocation130_spill] sm:$0xff] }
 0x288   : > { %v4068_v16 = vadd.f32 %v14342_v58, %v3910_v5  ;;  %14345 = vst [vmem:[#allocation194_spill] sm:$0xff] %v9916_v19  ;;  %14347 = vst [vmem:[#allocation171_spill] sm:$0xff] %v9920_v44  ;;  %v9926_v58 = vmul.f32 %v9885_v51, %v14237_v9  ;;  %v9930_v28 = vsel %vm1101_vm0, %v1019_v49, %v1083_v53  ;;  %v4069_v61 = vsel %vm3647_vm2, %v3914_v25, 0.0  ;;  %v14351_v30 = vld [vmem:[#allocation47_spill] sm:$0xff] }
 0x289   : > { %v9932_v60 = vadd.f32 %v3769_v18, %v3768_v17  ;;  %v9936_v5 = vmul.f32 %v14336_v45, %v2846_v39  ;;  %v9939_v44 = vmul.f32 %v14351_v30, %v2846_v39  ;;  %v9943_v4 = vmul.f32 %v14351_v30, %v9916_v19 }
 0x28a   : > { %14348 = vst [vmem:[#allocation181_spill] sm:$0xff] %v9926_v58  ;;  %v3370_v47 = vadd.f32 %v14354_v43, %v3130_v3  ;;  %v9947_v58 = vld [vmem:[%s5539_s15 + $0x38] ss:$0 sm:$0xff]  ;;  %v9952_v17 = vsel %vm1101_vm0, %v1084_v14, %v1020_v32  ;;  %v9954_v25 = vadd.f32 %v4069_v61, %v4068_v16  ;;  %v9964_v3 = vld [vmem:[#allocation2 + $0x330] sm:$0xff]  ;;  %v9969_v30 = vmul.f32 %v9885_v51, %v14119_v7 }
 0x28b   : > { %14349 = vst [vmem:[#allocation183_spill] sm:$0xff] %v9932_v60  ;;  %14350 = vst [vmem:[#allocation214_spill] sm:$0xff] %v9936_v5  ;;  %v3498_v50 = vmul.f32 %v9947_v58, %v2846_v39  ;;  %v3502_v18 = vmul.f32 %v9947_v58, %v9916_v19  ;;  %v14357_v5 = vld [vmem:[#allocation65_spill] sm:$0xff]  ;;  %v14358_v43 = vld [vmem:[#allocation196_spill] sm:$0xff]  ;;  %v1214_v61 = vsel %vm1101_vm0, %v1083_v53, %v1019_v49 }
 0x28c   : > { %14352 = vst [vmem:[#allocation215_spill] sm:$0xff] %v9939_v44  ;;  %14353 = vst [vmem:[#allocation216_spill] sm:$0xff] %v9943_v4  ;;  %v1810_v44 = vmul.f32 %v14357_v5, %v9930_v28  ;;  %v9962_v4 = vsel %vm1101_vm0, %v1020_v32, %v1084_v14  ;;  %v3374_v39 = vadd.f32 %v14358_v43, %v3134_v41  ;;  %v14361_v14 = vld [vmem:[#allocation67_spill] sm:$0xff]  ;;  %v9990_v16 = vld [vmem:[#allocation2 + $0x310] sm:$0xff] }
 0x28d   : > { %14355 = vst [vmem:[#allocation130_spill] sm:$0xff] %v9947_v58  ;;  %14356 = vst [vmem:[#allocation217_spill] sm:$0xff] %v9954_v25  ;;  %v9976_v19 = vmul.f32 %v9903_v42, %v13415_v22  ;;  %v9980_v32 = vmul.f32 %v9903_v42, %v13545_v54  ;;  %v9984_v41 = vmul.f32 %v9903_v42, %v13667_v15  ;;  %v1021_v49 = vrot.slane %v9990_v16, 7 }
 0x28e   : > { %v1807_v43 = vmul.f32 %v14361_v14, %v9952_v17  ;;  %v9988_v58 = vadd.f32 %v3498_v50, %v3370_v47  ;;  %v1811_v53 = vmul.f32 %v14361_v14, %v9962_v4  ;;  %v9999_v25 = vmul.f32 %v9990_v16, %v14174_v21 }
 0x28f   : > { %14359 = vst [vmem:[#allocation196_spill] sm:$0xff] %v9976_v19  ;;  %14360 = vst [vmem:[#allocation218_spill] sm:$0xff] %v9980_v32  ;;  %v1085_v19 = vrot.slane %v9964_v3, 7  ;;  %v1806_v60 = vmul.f32 %v14357_v5, %v1214_v61  ;;  %v1922_v50 = vadd.f32 %v1810_v44, %v9661_v24  ;;  %v10003_v47 = vadd.f32 %v3502_v18, %v3374_v39 }
 0x290   : > { %14362 = vst [vmem:[#allocation219_spill] sm:$0xff] %v9988_v58  ;;  %14363 = vst [vmem:[#allocation220_spill] sm:$0xff] %v9999_v25  ;;  %v10007_v45 = vmul.f32 %v9990_v16, %v14305_v29  ;;  %v10011_v14 = vmul.f32 %v9990_v16, %v13587_v33  ;;  %v10019_v5 = vmul.f32 %v10014_v11, %v14333_v37 }
 0x291   : > { %14364 = vst [vmem:[#allocation221_spill] sm:$0xff] %v10003_v47  ;;  %v10023_v24 = vmul.f32 %v10014_v11, %v14339_v0  ;;  %v1919_v44 = vadd.f32 %v1807_v43, %v9735_v23  ;;  %v3815_v18 = vadd.f32 %v9615_v1, %v9988_v58  ;;  %v3911_v39 = vmul.f32 %v9988_v58, %v9988_v58 }
 0x292   : > { %14365 = vst [vmem:[#allocation222_spill] sm:$0xff] %v10007_v45  ;;  %14366 = vst [vmem:[#allocation223_spill] sm:$0xff] %v10019_v5  ;;  %v1923_v32 = vadd.f32 %v1811_v53, %v9749_v20  ;;  %v10033_v25 = vsel %vm1101_vm0, %v1021_v49, %v1085_v19  ;;  %v10037_v5 = vmul.f32 %v10014_v11, %v14322_v36  ;;  %v14369_v45 = vld [vmem:[#allocation209_spill] sm:$0xff]  ;;  %v3816_v20 = vsel %vm3647_vm2, %v10003_v47, 0.0 }
 0x293   : > { %14367 = vst [vmem:[#allocation224_spill] sm:$0xff] %v10023_v24  ;;  %v1918_v24 = vadd.f32 %v1806_v60, %v9647_v31  ;;  %v2162_v23 = vadd.f32 %v14369_v45, %v1922_v50  ;;  %v10043_v1 = vsel %vm1101_vm0, %v1085_v19, %v1021_v49  ;;  %v3915_v43 = vmul.f32 %v10003_v47, %v10003_v47  ;;  %v14372_v60 = vld [vmem:[#allocation203_spill] sm:$0xff] }
 0x294   : > { %14368 = vst [vmem:[#allocation225_spill] sm:$0xff] %v10037_v5  ;;  %v10050_v53 = vmul.f32 %v14346_v13, %v9859_v59  ;;  %v10054_v58 = vmul.f32 %v14237_v9, %v9859_v59  ;;  %v4115_v31 = vadd.f32 %v9628_v52, %v3911_v39  ;;  %v1574_v45 = vmul.f32 %v14253_v63, %v1214_v61  ;;  %v14373_v49 = vld [vmem:[#allocation75_spill] sm:$0xff]  ;;  %v14374_v13 = vld [vmem:[#allocation190_spill] sm:$0xff]  ;;  %v14375_v52 = vld [vmem:[#allocation201_spill] sm:$0xff] }
 0x295   : > { %v2159_v19 = vadd.f32 %v14372_v60, %v1919_v44  ;;  %v1812_v50 = vmul.f32 %v14373_v49, %v10033_v25  ;;  %v2782_v5 = vrot.slane %v9859_v59, 1  ;;  %v1808_v9 = vmul.f32 %v14373_v49, %v10043_v1 }
 0x296   : > { %14370 = vst [vmem:[#allocation209_spill] sm:$0xff] %v10050_v53  ;;  %14371 = vst [vmem:[#allocation226_spill] sm:$0xff] %v10054_v58  ;;  %v2163_v53 = vadd.f32 %v14374_v13, %v1923_v32  ;;  %v10067_v58 = vadd.f32 %v3816_v20, %v3815_v18  ;;  %v2158_v39 = vadd.f32 %v14375_v52, %v1918_v24  ;;  %v4116_v60 = vsel %vm3647_vm2, %v3915_v43, 0.0  ;;  %v14378_v24 = vld [vmem:[#allocation146_spill] sm:$0xff]  ;;  %v10090_v43 = vld [vmem:[#allocation2 + $0x338] sm:$0xff] }
 0x297   : > { %v2402_v0 = vadd.f32 %v9620_v40, %v2162_v23  ;;  %v2530_v44 = vmul.f32 %v14119_v7, %v9859_v59  ;;  %v10075_v47 = vmul.f32 %v13901_v26, %v1214_v61  ;;  %v10079_v13 = vmul.f32 %v13901_v26, %v9930_v28  ;;  %v14379_v40 = vld [vmem:[#allocation138_spill] sm:$0xff] }
 0x298   : > { %v1578_v32 = vmul.f32 %v14253_v63, %v9930_v28  ;;  %v10083_v18 = vadd.f32 %v4116_v60, %v4115_v31  ;;  %v10086_v20 = vadd.f32 %v1574_v45, %v14378_v24  ;;  %v2399_v23 = vadd.f32 %v14379_v40, %v2159_v19  ;;  %v14381_v45 = vld [vmem:[#allocation28_spill] sm:$0xff] }
 0x299   : > { %14376 = vst [vmem:[#allocation203_spill] sm:$0xff] %v10075_v47  ;;  %14377 = vst [vmem:[#allocation190_spill] sm:$0xff] %v10079_v13  ;;  %v1924_v59 = vadd.f32 %v1812_v50, %v9830_v27  ;;  %v14380_v61 = vrot.slane %v9885_v51, 1  ;;  %v2403_v13 = vadd.f32 %v9697_v56, %v2163_v53  ;;  %v2531_v28 = vmul.f32 %v13667_v15, %v9881_v35  ;;  %v14384_v24 = vld [vmem:[#allocation148_spill] sm:$0xff]  ;;  %v14389_v53 = vld [vmem:[#allocation191_spill] sm:$0xff] }
 0x29a   : > { %v1920_v31 = vadd.f32 %v1808_v9, %v9827_v2  ;;  %v2398_v60 = vadd.f32 %v14381_v45, %v2158_v39  ;;  %v2642_v19 = vadd.f32 %v2530_v44, %v2402_v0  ;;  %v3027_v40 = vmul.f32 %v8334_v10, %v14384_v24  ;;  %v10127_v44 = vld [vmem:[%s5539_s15 + $0x20] ss:$0 sm:$0xff] }
 0x29b   : > { %v2847_v52 = vsel %vm2798_vm1, %v14380_v61, %v2782_v5  ;;  %v14382_v27 = vmov %v14380_v61  ;;  %v14385_v61 = vld [vmem:[#allocation135_spill] sm:$0xff]  ;;  %v1086_v2 = vrot.slane %v10090_v43, 7  ;;  %v2639_v0 = vadd.f32 %v9984_v41, %v2399_v23 }
 0x29c   : > { %v10105_v50 = vsel %vm2798_vm1, %v2782_v5, %v14382_v27  ;;  %v10110_v47 = vadd.f32 %v1578_v32, %v14385_v61  ;;  %v10113_v56 = vmul.f32 %v8334_v10, %v2847_v52  ;;  %v10116_v9 = vmul.f32 %v7898_v46, %v2847_v52  ;;  %v14390_v27 = vld [vmem:[#allocation178_spill] sm:$0xff]  ;;  %v14391_v61 = vld [vmem:[#allocation184_spill] sm:$0xff] }
 0x29d   : > { %14383 = vst [vmem:[#allocation201_spill] sm:$0xff] %v10105_v50  ;;  %v10121_v51 = vmul.f32 %v7898_v46, %v10105_v50  ;;  %v2783_v5 = vrot.slane %v9881_v35, 1  ;;  %v2164_v39 = vadd.f32 %v14389_v53, %v1924_v59  ;;  %v3503_v32 = vmul.f32 %v10127_v44, %v2847_v52 }
 0x29e   : > { %14386 = vst [vmem:[#allocation146_spill] sm:$0xff] %v10113_v56  ;;  %14387 = vst [vmem:[#allocation138_spill] sm:$0xff] %v10116_v9  ;;  %v2643_v45 = vadd.f32 %v2531_v28, %v2403_v13  ;;  %v3028_v24 = vmul.f32 %v13699_v48, %v14390_v27  ;;  %v2160_v56 = vadd.f32 %v14391_v61, %v1920_v31  ;;  %v14394_v13 = vld [vmem:[#allocation33_spill] sm:$0xff] }
 0x29f   : > { %14388 = vst [vmem:[#allocation28_spill] sm:$0xff] %v10121_v51  ;;  %v2638_v9 = vadd.f32 %v9969_v30, %v2398_v60  ;;  %v3139_v46 = vadd.f32 %v3027_v40, %v2642_v19  ;;  %v3507_v41 = vmul.f32 %v10127_v44, %v10105_v50  ;;  %v10138_v23 = vmul.f32 %v13415_v22, %v9881_v35  ;;  %v14397_v40 = vld [vmem:[#allocation14_spill] sm:$0xff] }
 0x2a0   : > { %v10142_v59 = vmul.f32 %v14275_v62, %v9952_v17  ;;  %v1575_v52 = vmul.f32 %v14394_v13, %v9952_v17  ;;  %v10148_v28 = vmul.f32 %v13545_v54, %v9881_v35  ;;  %v14395_v30 = vrot.slane %v10014_v11, 7 }
 0x2a1   : > { %14392 = vst [vmem:[#allocation148_spill] sm:$0xff] %v10138_v23  ;;  %v14396_v60 = vrot.slane %v9903_v42, 1  ;;  %v3136_v53 = vadd.f32 %v14397_v40, %v2639_v0  ;;  %v2404_v27 = vadd.f32 %v9805_v12, %v2164_v39  ;;  %v2532_v17 = vmul.f32 %v13587_v33, %v9964_v3  ;;  %v14398_v23 = vld [vmem:[#allocation210_spill] sm:$0xff] }
 0x2a2   : > { %14393 = vst [vmem:[#allocation135_spill] sm:$0xff] %v10142_v59  ;;  %v10154_v31 = vsel %vm1101_vm0, %v14395_v30, %v1086_v2  ;;  %v1579_v35 = vmul.f32 %v14394_v13, %v9962_v4  ;;  %v3140_v61 = vadd.f32 %v3028_v24, %v2643_v45  ;;  %v2400_v50 = vadd.f32 %v14398_v23, %v2160_v56  ;;  %v14400_v0 = vld [vmem:[#allocation202_spill] sm:$0xff]  ;;  %v14403_v45 = vld [vmem:[#allocation80_spill] sm:$0xff]  ;;  %v14405_v23 = vld [vmem:[#allocation121_spill] sm:$0xff] }
 0x2a3   : > { %v2848_v19 = vsel %vm2798_vm1, %v14396_v60, %v2783_v5  ;;  %v10171_v59 = vsel %vm1101_vm0, %v1086_v2, %v14395_v30  ;;  %v14399_v60 = vld [vmem:[#allocation155_spill] sm:$0xff]  ;;  %v3379_v40 = vadd.f32 %v14400_v0, %v3139_v46  ;;  %v14401_v12 = vrot.slane %v9903_v42, 1 }
 0x2a4   : > { %v3135_v51 = vadd.f32 %v14399_v60, %v2638_v9  ;;  %v1813_v24 = vmul.f32 %v14403_v45, %v10154_v31  ;;  %v10185_v56 = vmul.f32 %v14275_v62, %v9962_v4  ;;  %v10188_v2 = vadd.f32 %v1575_v52, %v14405_v23  ;;  %v14406_v60 = vld [vmem:[#allocation124_spill] sm:$0xff] }
 0x2a5   : > { %v10179_v39 = vsel %vm2798_vm1, %v2783_v5, %v14401_v12  ;;  %v3504_v9 = vmul.f32 %v9738_v57, %v2848_v19  ;;  %v2784_v46 = vrot.slane %v9964_v3, 1  ;;  %v3376_v42 = vadd.f32 %v9762_v38, %v3136_v53  ;;  %v14407_v12 = vld [vmem:[#allocation44_spill] sm:$0xff] }
 0x2a6   : > { %14402 = vst [vmem:[#allocation191_spill] sm:$0xff] %v10179_v39  ;;  %14404 = vst [vmem:[#allocation178_spill] sm:$0xff] %v10185_v56  ;;  %v2644_v30 = vadd.f32 %v2532_v17, %v2404_v27  ;;  %v3029_v5 = vmul.f32 %v14165_v8, %v14406_v60  ;;  %v1809_v0 = vmul.f32 %v14403_v45, %v10171_v59  ;;  %v14408_v56 = vld [vmem:[#allocation107_spill] sm:$0xff]  ;;  %v14411_v17 = vld [vmem:[#allocation36_spill] sm:$0xff] }
 0x2a7   : > { %v10198_v13 = vadd.f32 %v1579_v35, %v14407_v12  ;;  %v3380_v4 = vadd.f32 %v9766_v55, %v3140_v61  ;;  %v3508_v52 = vmul.f32 %v9738_v57, %v10179_v39  ;;  %v2640_v23 = vadd.f32 %v10011_v14, %v2400_v50  ;;  %v14412_v35 = vld [vmem:[#allocation40_spill] sm:$0xff] }
 0x2a8   : > { %v3375_v62 = vadd.f32 %v14408_v56, %v3135_v51  ;;  %v10205_v38 = vadd.f32 %v3507_v41, %v3379_v40  ;;  %v10208_v53 = vmul.f32 %v13699_v48, %v2848_v19  ;;  %v1925_v27 = vadd.f32 %v1813_v24, %v9896_v34 }
 0x2a9   : > { %v10212_v60 = vmul.f32 %v14411_v17, %v2848_v19  ;;  %v10216_v55 = vmul.f32 %v14411_v17, %v10179_v39  ;;  %v1576_v61 = vmul.f32 %v14412_v35, %v10043_v1  ;;  %v10222_v14 = vmul.f32 %v14174_v21, %v9964_v3  ;;  %v14417_v19 = vld [vmem:[#allocation213_spill] sm:$0xff]  ;;  %v14434_v39 = vld [vmem:[#allocation64_spill] sm:$0xff] }
 0x2aa   : > { %14409 = vst [vmem:[#allocation184_spill] sm:$0xff] %v10205_v38  ;;  %14410 = vst [vmem:[#allocation14_spill] sm:$0xff] %v10208_v53  ;;  %v10224_v50 = vadd.f32 %v3504_v9, %v3376_v42  ;;  %v14415_v51 = vrot.slane %v9990_v16, 1  ;;  %v3141_v41 = vadd.f32 %v3029_v5, %v2644_v30  ;;  %v1921_v40 = vadd.f32 %v1809_v0, %v14417_v19  ;;  %v14419_v9 = vld [vmem:[#allocation63_spill] sm:$0xff]  ;;  %v14423_v0 = vld [vmem:[#allocation62_spill] sm:$0xff] }
 0x2ab   : > { %14413 = vst [vmem:[#allocation210_spill] sm:$0xff] %v10222_v14  ;;  %v10233_v24 = vadd.f32 %v3508_v52, %v3380_v4  ;;  %v1580_v56 = vmul.f32 %v14412_v35, %v10033_v25  ;;  %v10239_v12 = vmul.f32 %v14305_v29, %v9964_v3  ;;  %v3137_v42 = vadd.f32 %v14419_v9, %v2640_v23  ;;  %v14424_v52 = vld [vmem:[#allocation18_spill] sm:$0xff]  ;;  %v14428_v23 = vld [vmem:[#allocation159_spill] sm:$0xff]  ;;  %v14462_v35 = vld [vmem:[#allocation217_spill] sm:$0xff] }
 0x2ac   : > { %14414 = vst [vmem:[#allocation155_spill] sm:$0xff] %v10224_v50  ;;  %v10230_v34 = vsel %vm2798_vm1, %v2784_v46, %v14415_v51  ;;  %v10242_v14 = vadd.f32 %v3503_v32, %v3375_v62  ;;  %v10246_v51 = vsel %vm3647_vm2, %v10205_v38, 0.0  ;;  %v14422_v30 = vrot.slane %v9990_v16, 1  ;;  %v14427_v62 = vld [vmem:[#allocation24_spill] sm:$0xff] }
 0x2ad   : > { %14416 = vst [vmem:[#allocation202_spill] sm:$0xff] %v10230_v34  ;;  %14418 = vst [vmem:[#allocation80_spill] sm:$0xff] %v10233_v24  ;;  %v2165_v4 = vadd.f32 %v14423_v0, %v1925_v27  ;;  %v10255_v19 = vmul.f32 %v14424_v52, %v10043_v1  ;;  %v10259_v3 = vmul.f32 %v14424_v52, %v10033_v25  ;;  %v14429_v16 = vld [vmem:[#allocation176_spill] sm:$0xff]  ;;  %v14430_v27 = vld [vmem:[#allocation11_spill] sm:$0xff] }
 0x2ae   : > { %14420 = vst [vmem:[#allocation121_spill] sm:$0xff] %v10242_v14  ;;  %14421 = vst [vmem:[#allocation124_spill] sm:$0xff] %v10246_v51  ;;  %v2849_v5 = vsel %vm2798_vm1, %v14422_v30, %v2784_v46  ;;  %v10262_v32 = vadd.f32 %v1576_v61, %v14427_v62  ;;  %v3509_v9 = vmul.f32 %v14428_v23, %v10230_v34  ;;  %v14431_v1 = vld [vmem:[#allocation206_spill] sm:$0xff]  ;;  %v14432_v51 = vld [vmem:[#allocation193_spill] sm:$0xff] }
 0x2af   : > { %14425 = vst [vmem:[#allocation44_spill] sm:$0xff] %v10255_v19  ;;  %14426 = vst [vmem:[#allocation107_spill] sm:$0xff] %v10259_v3  ;;  %v3724_v38 = vadd.f32 %v14429_v16, %v10224_v50  ;;  %v3917_v46 = vmul.f32 %v10224_v50, %v10224_v50  ;;  %v3381_v30 = vadd.f32 %v14430_v27, %v3141_v41  ;;  %v14433_v61 = vld [vmem:[#allocation161_spill] sm:$0xff]  ;;  %v10375_v17 = vld [vmem:[#allocation2 + $0x370] sm:$0xff] }
 0x2b0   : > { %v2161_v0 = vadd.f32 %v14431_v1, %v1921_v40  ;;  %v3921_v25 = vmul.f32 %v10233_v24, %v10233_v24  ;;  %v10275_v14 = vadd.f32 %v1580_v56, %v14432_v51  ;;  %v3377_v62 = vadd.f32 %v14433_v61, %v3137_v42  ;;  %v14436_v50 = vld [vmem:[#allocation185_spill] sm:$0xff] }
 0x2b1   : > { %v3505_v53 = vmul.f32 %v14428_v23, %v2849_v5  ;;  %v4024_v3 = vadd.f32 %v14434_v39, %v3917_v46  ;;  %v10281_v16 = vmul.f32 %v14165_v8, %v2849_v5  ;;  %v2405_v19 = vadd.f32 %v14436_v50, %v2165_v4  ;;  %v14437_v27 = vld [vmem:[#allocation41_spill] sm:$0xff]  ;;  %v14440_v39 = vld [vmem:[#allocation42_spill] sm:$0xff]  ;;  %v14444_v4 = vld [vmem:[#allocation212_spill] sm:$0xff] }
 0x2b2   : > { %v2533_v41 = vmul.f32 %v14322_v36, %v10090_v43  ;;  %v3725_v40 = vsel %vm3647_vm2, %v10233_v24, 0.0  ;;  %v10289_v56 = vmul.f32 %v14437_v27, %v2849_v5  ;;  %v10293_v42 = vmul.f32 %v14437_v27, %v10230_v34  ;;  %v14449_v27 = vld [vmem:[#allocation189_spill] sm:$0xff] }
 0x2b3   : > { %14435 = vst [vmem:[#allocation213_spill] sm:$0xff] %v10281_v16  ;;  %v1577_v51 = vmul.f32 %v14440_v39, %v10171_v59  ;;  %v10297_v46 = vadd.f32 %v3725_v40, %v3724_v38  ;;  %v10299_v1 = vadd.f32 %v3509_v9, %v3381_v30  ;;  %v10303_v50 = vmul.f32 %v14333_v37, %v10090_v43  ;;  %v14446_v16 = vld [vmem:[#allocation19_spill] sm:$0xff]  ;;  %v10315_v40 = vld [vmem:[#allocation2 + $0x360] sm:$0xff] }
 0x2b4   : > { %14438 = vst [vmem:[#allocation63_spill] sm:$0xff] %v10289_v56  ;;  %14439 = vst [vmem:[#allocation62_spill] sm:$0xff] %v10293_v42  ;;  %v2401_v61 = vadd.f32 %v14444_v4, %v2161_v0  ;;  %v4025_v5 = vsel %vm3647_vm2, %v3921_v25, 0.0  ;;  %v10307_v24 = vadd.f32 %v3505_v53, %v3377_v62  ;;  %v10311_v34 = vmul.f32 %v14446_v16, %v10154_v31  ;;  %v14450_v0 = vld [vmem:[#allocation26_spill] sm:$0xff]  ;;  %v10322_v25 = vld [vmem:[#allocation2 + $0x368] sm:$0xff] }
 0x2b5   : > { %14441 = vst [vmem:[#allocation24_spill] sm:$0xff] %v10297_v46  ;;  %14442 = vst [vmem:[#allocation176_spill] sm:$0xff] %v10299_v1  ;;  %v1581_v38 = vmul.f32 %v14440_v39, %v10154_v31  ;;  %v10317_v9 = vadd.f32 %v4025_v5, %v4024_v3  ;;  %v2645_v30 = vadd.f32 %v2533_v41, %v2405_v19  ;;  %v14451_v53 = vld [vmem:[#allocation183_spill] sm:$0xff]  ;;  %v14454_v3 = vld [vmem:[#allocation32_spill] sm:$0xff]  ;;  %v1087_v46 = vrot.slane %v10315_v40, 7 }
 0x2b6   : > { %14443 = vst [vmem:[#allocation11_spill] sm:$0xff] %v10303_v50  ;;  %14445 = vst [vmem:[#allocation206_spill] sm:$0xff] %v10307_v24  ;;  %v2785_v50 = vrot.slane %v10090_v43, 1  ;;  %v3030_v4 = vmul.f32 %v14450_v0, %v14449_v27  ;;  %v3771_v62 = vadd.f32 %v14451_v53, %v10307_v24  ;;  %v14453_v31 = vld [vmem:[#allocation179_spill] sm:$0xff]  ;;  %v10335_v19 = vmul.f32 %v14454_v3, %v10090_v43  ;;  %v14456_v27 = vld [vmem:[#allocation225_spill] sm:$0xff] }
 0x2b7   : > { %14447 = vst [vmem:[#allocation193_spill] sm:$0xff] %v10311_v34  ;;  %14448 = vst [vmem:[#allocation161_spill] sm:$0xff] %v10317_v9  ;;  %v10328_v34 = vmul.f32 %v14446_v16, %v10171_v59  ;;  %v10331_v39 = vadd.f32 %v1577_v51, %v14453_v31  ;;  %v3922_v41 = vmul.f32 %v10299_v1, %v10299_v1  ;;  %v10340_v9 = vld [vmem:[#allocation2 + $0x340] sm:$0xff]  ;;  %v14457_v51 = vld [vmem:[#allocation180_spill] sm:$0xff]  ;;  %v1088_v16 = vrot.slane %v10322_v25, 7 }
 0x2b8   : > { %14455 = vst [vmem:[#allocation185_spill] sm:$0xff] %v10335_v19  ;;  %v2641_v5 = vadd.f32 %v14456_v27, %v2401_v61  ;;  %v1023_v53 = vrot.slane %v10340_v9, 7  ;;  %v3918_v59 = vmul.f32 %v10307_v24, %v10307_v24  ;;  %v10347_v31 = vadd.f32 %v1581_v38, %v14457_v51 }
 0x2b9   : > { %14452 = vst [vmem:[#allocation64_spill] sm:$0xff] %v10328_v34  ;;  %v10349_v34 = vld [vmem:[#allocation2 + $0x348] sm:$0xff]  ;;  %v3772_v61 = vsel %vm3647_vm2, %v10299_v1, 0.0  ;;  %v14458_v27 = vrot.slane %v10014_v11, 1  ;;  %v3142_v51 = vadd.f32 %v3030_v4, %v2645_v30  ;;  %v14464_v1 = vld [vmem:[#allocation100_spill] sm:$0xff]  ;;  %v4072_v11 = vsel %vm3647_vm2, %v3922_v41, 0.0 }
 0x2ba   : > { %v1024_v43 = vrot.slane %v10349_v34, 7  ;;  %v10365_v24 = vadd.f32 %v3772_v61, %v3771_v62  ;;  %v4071_v23 = vadd.f32 %v14462_v35, %v3918_v59  ;;  %v10373_v52 = vmul.f32 %v10340_v9, %v14464_v1  ;;  %v14470_v4 = vld [vmem:[#allocation130_spill] sm:$0xff] }
 0x2bb   : > { %v2850_v19 = vsel %vm2798_vm1, %v14458_v27, %v2785_v50  ;;  %v14459_v56 = vmov %v14458_v27  ;;  %v14466_v27 = vld [vmem:[#allocation172_spill] sm:$0xff]  ;;  %v1218_v30 = vsel %vm1101_vm0, %v1087_v46, %v1023_v53 }
 0x2bc   : > { %v10363_v38 = vsel %vm2798_vm1, %v2785_v50, %v14459_v56  ;;  %14461 = vst [vmem:[#allocation189_spill] sm:$0xff] %v10365_v24  ;;  %v10369_v42 = vmul.f32 %v14450_v0, %v2850_v19  ;;  %14465 = vst [vmem:[#allocation179_spill] sm:$0xff] %v10373_v52  ;;  %v3138_v57 = vadd.f32 %v14466_v27, %v2641_v5  ;;  %v14467_v56 = vld [vmem:[#allocation47_spill] sm:$0xff]  ;;  %v14471_v5 = vld [vmem:[#allocation216_spill] sm:$0xff] }
 0x2bd   : > { %14460 = vst [vmem:[#allocation212_spill] sm:$0xff] %v10363_v38  ;;  %v10380_v50 = vmul.f32 %v14467_v56, %v2850_v19  ;;  %v10386_v35 = vmul.f32 %v14467_v56, %v10363_v38  ;;  %v3510_v62 = vmul.f32 %v14470_v4, %v10363_v38  ;;  %v10392_v59 = vsel %vm1101_vm0, %v1024_v43, %v1088_v16  ;;  %v10399_v27 = vld [vmem:[#allocation2 + $0x350] sm:$0xff]  ;;  %v14473_v56 = vld [vmem:[#allocation13_spill] sm:$0xff] }
 0x2be   : > { %14463 = vst [vmem:[#allocation183_spill] sm:$0xff] %v10369_v42  ;;  %v10396_v41 = vsel %vm1101_vm0, %v1088_v16, %v1024_v43  ;;  %v3382_v61 = vadd.f32 %v14471_v5, %v3142_v51  ;;  %v1025_v52 = vrot.slane %v10399_v27, 7  ;;  %v10404_v42 = vsel %vm1101_vm0, %v1023_v53, %v1087_v46  ;;  %v14475_v43 = vld [vmem:[#allocation65_spill] sm:$0xff]  ;;  %v14476_v5 = vld [vmem:[#allocation215_spill] sm:$0xff] }
 0x2bf   : > { %14468 = vst [vmem:[#allocation225_spill] sm:$0xff] %v10380_v50  ;;  %14469 = vst [vmem:[#allocation180_spill] sm:$0xff] %v10386_v35  ;;  %v1089_v38 = vrot.slane %v10375_v17, 7  ;;  %v10407_v35 = vadd.f32 %v4072_v11, %v4071_v23  ;;  %v3506_v50 = vmul.f32 %v14470_v4, %v2850_v19  ;;  %v10412_v16 = vmul.f32 %v10340_v9, %v14473_v56  ;;  %v14477_v46 = vld [vmem:[#allocation67_spill] sm:$0xff] }
 0x2c0   : > { %v1814_v51 = vmul.f32 %v14475_v43, %v1218_v30  ;;  %v3378_v24 = vadd.f32 %v14476_v5, %v3138_v57  ;;  %v2534_v0 = vmul.f32 %v10340_v9, %v14119_v7  ;;  %v1815_v53 = vmul.f32 %v14477_v46, %v10396_v41 }
 0x2c1   : > { %14472 = vst [vmem:[#allocation217_spill] sm:$0xff] %v10407_v35  ;;  %14474 = vst [vmem:[#allocation172_spill] sm:$0xff] %v10412_v16  ;;  %v1819_v23 = vmul.f32 %v14477_v46, %v10392_v59  ;;  %v10425_v19 = vmul.f32 %v10349_v34, %v13415_v22  ;;  %v10429_v16 = vmul.f32 %v10349_v34, %v13545_v54 }
 0x2c2   : > { %v1818_v57 = vmul.f32 %v14475_v43, %v10404_v42  ;;  %v10433_v5 = vadd.f32 %v3510_v62, %v3382_v61  ;;  %v2535_v4 = vmul.f32 %v10349_v34, %v13667_v15  ;;  %v10440_v11 = vsel %vm1101_vm0, %v1025_v52, %v1089_v38 }
 0x2c3   : > { %14478 = vst [vmem:[#allocation216_spill] sm:$0xff] %v10425_v19  ;;  %14479 = vst [vmem:[#allocation215_spill] sm:$0xff] %v10429_v16  ;;  %v10444_v19 = vmul.f32 %v10399_v27, %v14174_v21  ;;  %v10448_v16 = vmul.f32 %v10399_v27, %v14305_v29  ;;  %v1926_v62 = vadd.f32 %v1814_v51, %v10086_v20  ;;  %v10464_v29 = vld [vmem:[#allocation2 + $0x358] sm:$0xff] }
 0x2c4   : > { %14480 = vst [vmem:[#allocation227_spill] sm:$0xff] %v10433_v5  ;;  %v10453_v61 = vsel %vm1101_vm0, %v1089_v38, %v1025_v52  ;;  %v10455_v43 = vadd.f32 %v3506_v50, %v3378_v24  ;;  %v10459_v46 = vmul.f32 %v10399_v27, %v13587_v33  ;;  %v1927_v35 = vadd.f32 %v1815_v53, %v10188_v2  ;;  %v14487_v53 = vld [vmem:[#allocation182_spill] sm:$0xff] }
 0x2c5   : > { %14481 = vst [vmem:[#allocation228_spill] sm:$0xff] %v10444_v19  ;;  %14482 = vst [vmem:[#allocation229_spill] sm:$0xff] %v10448_v16  ;;  %v1931_v19 = vadd.f32 %v1819_v23, %v10198_v13  ;;  %v1026_v20 = vrot.slane %v10464_v29, 7  ;;  %v1930_v51 = vadd.f32 %v1818_v57, %v10110_v47  ;;  %v1820_v24 = vmul.f32 %v14373_v49, %v10440_v11 }
 0x2c6   : > { %14483 = vst [vmem:[#allocation230_spill] sm:$0xff] %v10455_v43  ;;  %v3818_v52 = vadd.f32 %v10067_v58, %v10455_v43  ;;  %v3923_v38 = vmul.f32 %v10433_v5, %v10433_v5  ;;  %v10476_v13 = vmul.f32 %v10464_v29, %v14333_v37  ;;  %v1816_v2 = vmul.f32 %v14373_v49, %v10453_v61  ;;  %v14489_v49 = vld [vmem:[#allocation152_spill] sm:$0xff] }
 0x2c7   : > { %v10482_v50 = vmul.f32 %v10464_v29, %v14454_v3  ;;  %v10486_v47 = vmul.f32 %v10464_v29, %v14322_v36  ;;  %v2166_v23 = vadd.f32 %v14487_v53, %v1926_v62  ;;  %v3819_v57 = vsel %vm3647_vm2, %v10433_v5, 0.0  ;;  %v14491_v3 = vld [vmem:[#allocation197_spill] sm:$0xff] }
 0x2c8   : > { %14484 = vst [vmem:[#allocation231_spill] sm:$0xff] %v10476_v13  ;;  %v3919_v21 = vmul.f32 %v10455_v43, %v10455_v43  ;;  %v14488_v13 = vld [vmem:[#allocation200_spill] sm:$0xff]  ;;  %v2171_v37 = vadd.f32 %v14489_v49, %v1931_v19  ;;  %v10503_v58 = vmul.f32 %v14473_v56, %v10315_v40  ;;  %v1932_v62 = vadd.f32 %v1820_v24, %v10275_v14  ;;  %v10506_v53 = vld [vmem:[#allocation2 + $0x378] sm:$0xff] }
 0x2c9   : > { %14485 = vst [vmem:[#allocation232_spill] sm:$0xff] %v10482_v50  ;;  %14486 = vst [vmem:[#allocation233_spill] sm:$0xff] %v10486_v47  ;;  %v2167_v16 = vadd.f32 %v14488_v13, %v1927_v35  ;;  %v10498_v50 = vmul.f32 %v14464_v1, %v10315_v40  ;;  %v2170_v47 = vadd.f32 %v14491_v3, %v1930_v51  ;;  %v4119_v49 = vsel %vm3647_vm2, %v3923_v38, 0.0  ;;  %v14493_v14 = vld [vmem:[#allocation181_spill] sm:$0xff]  ;;  %v14495_v38 = vld [vmem:[#allocation226_spill] sm:$0xff] }
 0x2ca   : > { %14492 = vst [vmem:[#allocation200_spill] sm:$0xff] %v10503_v58  ;;  %v10508_v5 = vadd.f32 %v3819_v57, %v3818_v52  ;;  %v4118_v35 = vadd.f32 %v10083_v18, %v3919_v21  ;;  %v1928_v19 = vadd.f32 %v1816_v2, %v10262_v32  ;;  %v10514_v13 = vmul.f32 %v13901_v26, %v1218_v30  ;;  %v14494_v52 = vld [vmem:[#allocation218_spill] sm:$0xff] }
 0x2cb   : > { %14490 = vst [vmem:[#allocation182_spill] sm:$0xff] %v10498_v50  ;;  %v10518_v3 = vmul.f32 %v13901_v26, %v10404_v42  ;;  %v10521_v51 = vmul.f32 %v14253_v63, %v1218_v30  ;;  %v2406_v24 = vadd.f32 %v14493_v14, %v2166_v23  ;;  %v2407_v57 = vadd.f32 %v14494_v52, %v2167_v16  ;;  %v14496_v30 = vld [vmem:[#allocation187_spill] sm:$0xff] }
 0x2cc   : > { %v2411_v21 = vadd.f32 %v10148_v28, %v2171_v37  ;;  %v2539_v18 = vmul.f32 %v13667_v15, %v10322_v25  ;;  %v1090_v32 = vrot.slane %v10506_v53, 7  ;;  %v2410_v2 = vadd.f32 %v14495_v38, %v2170_v47  ;;  %v14497_v37 = vld [vmem:[#allocation186_spill] sm:$0xff]  ;;  %v14498_v23 = vld [vmem:[#allocation199_spill] sm:$0xff] }
 0x2cd   : > { %v2538_v43 = vmul.f32 %v14119_v7, %v10315_v40  ;;  %v2786_v50 = vrot.slane %v10315_v40, 1  ;;  %v2172_v1 = vadd.f32 %v14496_v30, %v1932_v62  ;;  %v10534_v26 = vadd.f32 %v4119_v49, %v4118_v35  ;;  %v14500_v38 = vld [vmem:[#allocation154_spill] sm:$0xff] }
 0x2ce   : > { %v10538_v16 = vmul.f32 %v14253_v63, %v10404_v42  ;;  %v3035_v28 = vmul.f32 %v8334_v10, %v14497_v37  ;;  %v2168_v14 = vadd.f32 %v14498_v23, %v1928_v19  ;;  %v2646_v52 = vadd.f32 %v2534_v0, %v2406_v24 }
 0x2cf   : > { %v10545_v47 = vmul.f32 %v13415_v22, %v10322_v25  ;;  %v2787_v40 = vrot.slane %v10322_v25, 1  ;;  %v3036_v62 = vmul.f32 %v13699_v48, %v14500_v38  ;;  %v2647_v35 = vadd.f32 %v2535_v4, %v2407_v57 }
 0x2d0   : > { %v2651_v49 = vadd.f32 %v2539_v18, %v2411_v21  ;;  %v10552_v42 = vsel %vm1101_vm0, %v1026_v20, %v1090_v32  ;;  %v10556_v30 = vsel %vm1101_vm0, %v1090_v32, %v1026_v20  ;;  %v2650_v0 = vadd.f32 %v2538_v43, %v2410_v2  ;;  %v14505_v18 = vld [vmem:[#allocation222_spill] sm:$0xff]  ;;  %v14506_v2 = vld [vmem:[#allocation73_spill] sm:$0xff] }
 0x2d1   : > { %14499 = vst [vmem:[#allocation152_spill] sm:$0xff] %v10545_v47  ;;  %v14501_v19 = vrot.slane %v10340_v9, 1  ;;  %v2412_v24 = vadd.f32 %v10239_v12, %v2172_v1  ;;  %v2540_v4 = vmul.f32 %v13587_v33, %v10375_v17  ;;  %v10576_v43 = vmul.f32 %v13545_v54, %v10322_v25  ;;  %v14507_v1 = vld [vmem:[#allocation119_spill] sm:$0xff] }
 0x2d2   : > { %v2408_v32 = vadd.f32 %v14505_v18, %v2168_v14  ;;  %v3143_v12 = vadd.f32 %v14506_v2, %v2646_v52  ;;  %v1817_v9 = vmul.f32 %v14403_v45, %v10556_v30  ;;  %v14509_v38 = vrot.slane %v10349_v34, 1  ;;  %v14514_v34 = vld [vmem:[#allocation138_spill] sm:$0xff] }
 0x2d3   : > { %v2851_v22 = vsel %vm2798_vm1, %v14501_v19, %v2786_v50  ;;  %v14502_v57 = vmov %v14501_v19  ;;  %v14510_v19 = vld [vmem:[#allocation35_spill] sm:$0xff]  ;;  %v3147_v52 = vadd.f32 %v3035_v28, %v2650_v0  ;;  %v2788_v28 = vrot.slane %v10375_v17, 1 }
 0x2d4   : > { %v10569_v21 = vsel %vm2798_vm1, %v2786_v50, %v14502_v57  ;;  %v10572_v20 = vmul.f32 %v8334_v10, %v2851_v22  ;;  %v10581_v37 = vmul.f32 %v14507_v1, %v2851_v22  ;;  %v1821_v50 = vmul.f32 %v14403_v45, %v10552_v42 }
 0x2d5   : > { %14503 = vst [vmem:[#allocation197_spill] sm:$0xff] %v10569_v21  ;;  %v3511_v23 = vmul.f32 %v10127_v44, %v2851_v22  ;;  %v2852_v25 = vsel %vm2798_vm1, %v14509_v38, %v2787_v40  ;;  %v3144_v14 = vadd.f32 %v14510_v19, %v2647_v35  ;;  %v3148_v57 = vadd.f32 %v3036_v62, %v2651_v49 }
 0x2d6   : > { %14504 = vst [vmem:[#allocation181_spill] sm:$0xff] %v10572_v20  ;;  %14508 = vst [vmem:[#allocation218_spill] sm:$0xff] %v10581_v37  ;;  %v14511_v18 = vmov %v14509_v38  ;;  %v2652_v20 = vadd.f32 %v2540_v4, %v2412_v24  ;;  %v14512_v37 = vld [vmem:[#allocation166_spill] sm:$0xff]  ;;  %v3515_v22 = vmul.f32 %v10127_v44, %v10569_v21  ;;  %v10605_v38 = vmul.f32 %v8334_v10, %v10569_v21  ;;  %v14551_v21 = vld [vmem:[#allocation161_spill] sm:$0xff] }
 0x2d7   : > { %v10597_v2 = vsel %vm2798_vm1, %v2787_v40, %v14511_v18  ;;  %v3037_v58 = vmul.f32 %v14165_v8, %v14512_v37  ;;  %v2648_v62 = vadd.f32 %v10459_v46, %v2408_v32  ;;  %v3383_v35 = vadd.f32 %v14514_v34, %v3143_v12  ;;  %v14515_v40 = vld [vmem:[#allocation17_spill] sm:$0xff]  ;;  %v14516_v37 = vld [vmem:[#allocation167_spill] sm:$0xff]  ;;  %v14517_v32 = vld [vmem:[#allocation28_spill] sm:$0xff] }
 0x2d8   : > { %14513 = vst [vmem:[#allocation226_spill] sm:$0xff] %v10605_v38  ;;  %v10612_v49 = vmul.f32 %v14515_v40, %v10392_v59  ;;  %v1929_v0 = vadd.f32 %v1817_v9, %v10331_v39  ;;  %v1933_v24 = vadd.f32 %v1821_v50, %v10347_v31  ;;  %v3384_v44 = vadd.f32 %v10212_v60, %v3144_v14  ;;  %v14518_v34 = vld [vmem:[#allocation33_spill] sm:$0xff]  ;;  %v14522_v14 = vld [vmem:[#allocation144_spill] sm:$0xff] }
 0x2d9   : > { %v3388_v4 = vadd.f32 %v10216_v55, %v3148_v57  ;;  %v3512_v19 = vmul.f32 %v14516_v37, %v2852_v25  ;;  %v3516_v46 = vmul.f32 %v14516_v37, %v10597_v2  ;;  %v3387_v18 = vadd.f32 %v14517_v32, %v3147_v52  ;;  %v14523_v52 = vld [vmem:[#allocation36_spill] sm:$0xff]  ;;  %v14527_v37 = vld [vmem:[#allocation86_spill] sm:$0xff] }
 0x2da   : > { %v10624_v12 = vmul.f32 %v14515_v40, %v10396_v41  ;;  %v10628_v39 = vmul.f32 %v14518_v34, %v10392_v59  ;;  %v3149_v31 = vadd.f32 %v3037_v58, %v2652_v20  ;;  %v10632_v60 = vmul.f32 %v14518_v34, %v10396_v41  ;;  %v14526_v58 = vld [vmem:[#allocation211_spill] sm:$0xff] }
 0x2db   : > { %v10635_v55 = vmul.f32 %v13699_v48, %v2852_v25  ;;  %v14520_v9 = vrot.slane %v10399_v27, 1  ;;  %v3145_v57 = vadd.f32 %v14522_v14, %v2648_v62  ;;  %v10645_v40 = vmul.f32 %v14523_v52, %v2852_v25  ;;  %v14533_v27 = vld [vmem:[#allocation18_spill] sm:$0xff] }
 0x2dc   : > { %v2169_v20 = vadd.f32 %v14526_v58, %v1929_v0  ;;  %v2173_v32 = vadd.f32 %v14527_v37, %v1933_v24  ;;  %v10653_v38 = vadd.f32 %v3511_v23, %v3383_v35  ;;  %v10655_v1 = vadd.f32 %v3512_v19, %v3384_v44  ;;  %v14535_v24 = vld [vmem:[#allocation159_spill] sm:$0xff]  ;;  %v14536_v44 = vld [vmem:[#allocation40_spill] sm:$0xff]  ;;  %v14539_v58 = vld [vmem:[#allocation185_spill] sm:$0xff] }
 0x2dd   : > { %14519 = vst [vmem:[#allocation187_spill] sm:$0xff] %v10635_v55  ;;  %v10641_v50 = vsel %vm2798_vm1, %v2788_v28, %v14520_v9  ;;  %14524 = vst [vmem:[#allocation199_spill] sm:$0xff] %v10645_v40  ;;  %v14525_v59 = vmov %v14520_v9  ;;  %v10657_v9 = vadd.f32 %v3516_v46, %v3388_v4  ;;  %v10661_v62 = vmul.f32 %v13699_v48, %v10597_v2  ;;  %v14537_v19 = vld [vmem:[#allocation63_spill] sm:$0xff]  ;;  %v14573_v40 = vld [vmem:[#allocation217_spill] sm:$0xff] }
 0x2de   : > { %14521 = vst [vmem:[#allocation186_spill] sm:$0xff] %v10641_v50  ;;  %v2853_v41 = vsel %vm2798_vm1, %v14525_v59, %v2788_v28  ;;  %14528 = vst [vmem:[#allocation154_spill] sm:$0xff] %v10653_v38  ;;  %v10663_v25 = vadd.f32 %v3515_v22, %v3387_v18  ;;  %v10667_v14 = vmul.f32 %v14533_v27, %v10440_v11  ;;  %v14534_v28 = vld [vmem:[#allocation62_spill] sm:$0xff]  ;;  %v14548_v38 = vld [vmem:[#allocation23_spill] sm:$0xff] }
 0x2df   : > { %14529 = vst [vmem:[#allocation222_spill] sm:$0xff] %v10655_v1  ;;  %14530 = vst [vmem:[#allocation73_spill] sm:$0xff] %v10657_v9  ;;  %v3389_v0 = vadd.f32 %v14534_v28, %v3149_v31  ;;  %v3517_v23 = vmul.f32 %v14535_v24, %v10641_v50  ;;  %v10674_v35 = vmul.f32 %v14533_v27, %v10453_v61  ;;  %v14538_v31 = vld [vmem:[#allocation224_spill] sm:$0xff] }
 0x2e0   : > { %14531 = vst [vmem:[#allocation35_spill] sm:$0xff] %v10661_v62  ;;  %14532 = vst [vmem:[#allocation166_spill] sm:$0xff] %v10663_v25  ;;  %v10678_v4 = vmul.f32 %v14536_v44, %v10453_v61  ;;  %v3385_v22 = vadd.f32 %v14537_v19, %v3145_v57  ;;  %v3513_v46 = vmul.f32 %v14535_v24, %v2853_v41  ;;  %v14540_v57 = vld [vmem:[#allocation22_spill] sm:$0xff]  ;;  %v14553_v62 = vld [vmem:[#allocation41_spill] sm:$0xff] }
 0x2e1   : > { %v10684_v18 = vmul.f32 %v14536_v44, %v10440_v11  ;;  %v2409_v59 = vadd.f32 %v14538_v31, %v2169_v20  ;;  %v2413_v37 = vadd.f32 %v14539_v58, %v2173_v32  ;;  %v2541_v27 = vmul.f32 %v14322_v36, %v10506_v53  ;;  %v14542_v11 = vld [vmem:[#allocation30_spill] sm:$0xff]  ;;  %v14544_v20 = vld [vmem:[#allocation24_spill] sm:$0xff] }
 0x2e2   : > { %v3925_v28 = vmul.f32 %v10655_v1, %v10655_v1  ;;  %v3929_v61 = vmul.f32 %v10657_v9, %v10657_v9  ;;  %v10696_v24 = vmul.f32 %v14540_v57, %v10375_v17  ;;  %v10700_v19 = vmul.f32 %v14542_v11, %v10375_v17 }
 0x2e3   : > { %v10704_v32 = vadd.f32 %v14544_v20, %v10655_v1  ;;  %v10707_v31 = vmul.f32 %v14165_v8, %v2853_v41  ;;  %v10709_v58 = vadd.f32 %v3517_v23, %v3389_v0  ;;  %v10713_v25 = vmul.f32 %v14548_v38, %v10506_v53  ;;  %v10727_v1 = vld [vmem:[#allocation2 + $0x3a8] sm:$0xff]  ;;  %v14556_v0 = vld [vmem:[#allocation233_spill] sm:$0xff] }
 0x2e4   : > { %14541 = vst [vmem:[#allocation138_spill] sm:$0xff] %v10696_v24  ;;  %14543 = vst [vmem:[#allocation17_spill] sm:$0xff] %v10700_v19  ;;  %v10717_v57 = vsel %vm3647_vm2, %v10657_v9, 0.0  ;;  %v10720_v17 = vadd.f32 %v14551_v21, %v3925_v28  ;;  %v10723_v55 = vmul.f32 %v14553_v62, %v2853_v41  ;;  %v10725_v20 = vadd.f32 %v3513_v46, %v3385_v22  ;;  %v14558_v24 = vld [vmem:[#allocation26_spill] sm:$0xff]  ;;  %v14561_v41 = vld [vmem:[#allocation19_spill] sm:$0xff] }
 0x2e5   : > { %14545 = vst [vmem:[#allocation167_spill] sm:$0xff] %v10704_v32  ;;  %14546 = vst [vmem:[#allocation28_spill] sm:$0xff] %v10707_v31  ;;  %v2649_v23 = vadd.f32 %v14556_v0, %v2409_v59  ;;  %v2653_v31 = vadd.f32 %v2541_v27, %v2413_v37  ;;  %v2789_v38 = vrot.slane %v10506_v53, 1  ;;  %v10734_v9 = vsel %vm3647_vm2, %v3929_v61, 0.0  ;;  %v14563_v46 = vld [vmem:[#allocation42_spill] sm:$0xff]  ;;  %v10754_v27 = vld [vmem:[#allocation2 + $0x388] sm:$0xff] }
 0x2e6   : > { %14547 = vst [vmem:[#allocation33_spill] sm:$0xff] %v10709_v58  ;;  %14549 = vst [vmem:[#allocation144_spill] sm:$0xff] %v10713_v25  ;;  %v14557_v25 = vld [vmem:[#allocation194_spill] sm:$0xff]  ;;  %v10738_v21 = vmul.f32 %v14165_v8, %v10641_v50  ;;  %v10742_v22 = vmul.f32 %v14561_v41, %v10552_v42  ;;  %v10746_v59 = vmul.f32 %v14563_v46, %v10552_v42  ;;  %v1028_v28 = vrot.slane %v10754_v27, 7 }
 0x2e7   : > { %14550 = vst [vmem:[#allocation36_spill] sm:$0xff] %v10717_v57  ;;  %14552 = vst [vmem:[#allocation211_spill] sm:$0xff] %v10720_v17  ;;  %v3038_v47 = vmul.f32 %v14558_v24, %v14557_v25  ;;  %v3930_v37 = vmul.f32 %v10709_v58, %v10709_v58  ;;  %v10752_v25 = vmul.f32 %v14561_v41, %v10556_v30  ;;  %v1092_v61 = vrot.slane %v10727_v1, 7 }
 0x2e8   : > { %14554 = vst [vmem:[#allocation86_spill] sm:$0xff] %v10723_v55  ;;  %14555 = vst [vmem:[#allocation18_spill] sm:$0xff] %v10725_v20  ;;  %v3926_v0 = vmul.f32 %v10725_v20, %v10725_v20  ;;  %v10762_v42 = vmul.f32 %v14563_v46, %v10556_v30  ;;  %v14566_v55 = vrot.slane %v10464_v29, 1  ;;  %v14569_v30 = vld [vmem:[#allocation214_spill] sm:$0xff]  ;;  %v10788_v32 = vsel %vm3647_vm2, %v10709_v58, 0.0  ;;  %v14583_v58 = vld [vmem:[#allocation225_spill] sm:$0xff] }
 0x2e9   : > { %14559 = vst [vmem:[#allocation62_spill] sm:$0xff] %v10734_v9  ;;  %14560 = vst [vmem:[#allocation159_spill] sm:$0xff] %v10738_v21  ;;  %v14564_v9 = vld [vmem:[#allocation32_spill] sm:$0xff]  ;;  %v10768_v21 = vld [vmem:[#allocation2 + $0x380] sm:$0xff]  ;;  %v3146_v19 = vadd.f32 %v14569_v30, %v2649_v23  ;;  %v3150_v57 = vadd.f32 %v3038_v47, %v2653_v31  ;;  %v10808_v23 = vsel %vm1101_vm0, %v1092_v61, %v1028_v28 }
 0x2ea   : > { %14562 = vst [vmem:[#allocation40_spill] sm:$0xff] %v10742_v22  ;;  %v10766_v17 = vmul.f32 %v14564_v9, %v10506_v53  ;;  %v1027_v41 = vrot.slane %v10768_v21, 7  ;;  %v2854_v62 = vsel %vm2798_vm1, %v14566_v55, %v2789_v38  ;;  %v14567_v50 = vmov %v14566_v55  ;;  %v14570_v53 = vld [vmem:[#allocation189_spill] sm:$0xff]  ;;  %14572 = vst [vmem:[#allocation22_spill] sm:$0xff] %v10788_v32 }
 0x2eb   : > { %v10779_v8 = vsel %vm2798_vm1, %v2789_v38, %v14567_v50  ;;  %v10791_v22 = vadd.f32 %v14573_v40, %v3926_v0  ;;  %v10795_v29 = vmul.f32 %v10768_v21, %v14473_v56  ;;  %v10798_v55 = vsel %vm3647_vm2, %v3930_v37, 0.0  ;;  %v14578_v50 = vld [vmem:[#allocation47_spill] sm:$0xff]  ;;  %v14580_v38 = vld [vmem:[#allocation130_spill] sm:$0xff] }
 0x2ec   : > { %14565 = vst [vmem:[#allocation63_spill] sm:$0xff] %v10766_v17  ;;  %14568 = vst [vmem:[#allocation224_spill] sm:$0xff] %v10779_v8  ;;  %v10784_v17 = vadd.f32 %v14570_v53, %v10725_v20  ;;  %v10801_v47 = vmul.f32 %v14558_v24, %v2854_v62  ;;  %v10804_v31 = vmul.f32 %v14578_v50, %v2854_v62  ;;  %v10821_v53 = vld [vmem:[#allocation2 + $0x3a0] sm:$0xff] }
 0x2ed   : > { %14574 = vst [vmem:[#allocation30_spill] sm:$0xff] %v10791_v22  ;;  %14575 = vst [vmem:[#allocation24_spill] sm:$0xff] %v10795_v29  ;;  %v3514_v40 = vmul.f32 %v14580_v38, %v2854_v62  ;;  %v3518_v0 = vmul.f32 %v14580_v38, %v10779_v8  ;;  %v10815_v30 = vmul.f32 %v14558_v24, %v10779_v8  ;;  %v14584_v29 = vld [vmem:[#allocation180_spill] sm:$0xff]  ;;  %v1091_v22 = vrot.slane %v10821_v53, 7  ;;  %v10864_v8 = vld [vmem:[#allocation2 + $0x398] sm:$0xff] }
 0x2ee   : > { %14571 = vst [vmem:[#allocation185_spill] sm:$0xff] %v10784_v17  ;;  %14576 = vst [vmem:[#allocation23_spill] sm:$0xff] %v10798_v55  ;;  %v10819_v37 = vmul.f32 %v10768_v21, %v14119_v7  ;;  %v3386_v20 = vadd.f32 %v14583_v58, %v3146_v19  ;;  %v3390_v55 = vadd.f32 %v14584_v29, %v3150_v57  ;;  %v14587_v19 = vld [vmem:[#allocation67_spill] sm:$0xff]  ;;  %v10843_v29 = vld [vmem:[#allocation2 + $0x390] sm:$0xff] }
 0x2ef   : > { %14577 = vst [vmem:[#allocation161_spill] sm:$0xff] %v10801_v47  ;;  %14579 = vst [vmem:[#allocation233_spill] sm:$0xff] %v10804_v31  ;;  %v10828_v62 = vsel %vm1101_vm0, %v1028_v28, %v1092_v61  ;;  %v10832_v38 = vmul.f32 %v10754_v27, %v13545_v54  ;;  %v1823_v58 = vmul.f32 %v14587_v19, %v10808_v23  ;;  %v1029_v28 = vrot.slane %v10843_v29, 7  ;;  %v10871_v24 = vld [vmem:[#allocation2 + $0x3b0] sm:$0xff] }
 0x2f0   : > { %14581 = vst [vmem:[#allocation194_spill] sm:$0xff] %v10815_v30  ;;  %14582 = vst [vmem:[#allocation19_spill] sm:$0xff] %v10819_v37  ;;  %v10836_v30 = vmul.f32 %v10754_v27, %v13667_v15  ;;  %v14586_v37 = vld [vmem:[#allocation135_spill] sm:$0xff]  ;;  %v10848_v61 = vmul.f32 %v10843_v29, %v14542_v11  ;;  %v10853_v32 = vmul.f32 %v10843_v29, %v13587_v33 }
 0x2f1   : > { %14585 = vst [vmem:[#allocation42_spill] sm:$0xff] %v10832_v38  ;;  %v1695_v47 = vadd.f32 %v10632_v60, %v14586_v37  ;;  %14588 = vst [vmem:[#allocation214_spill] sm:$0xff] %v10843_v29  ;;  %v14590_v37 = vld [vmem:[#allocation178_spill] sm:$0xff]  ;;  %v1827_v57 = vmul.f32 %v14587_v19, %v10828_v62  ;;  %v10860_v31 = vadd.f32 %v3514_v40, %v3386_v20  ;;  %v14596_v20 = vld [vmem:[#allocation203_spill] sm:$0xff] }
 0x2f2   : > { %14589 = vst [vmem:[#allocation189_spill] sm:$0xff] %v10848_v61  ;;  %v1699_v17 = vadd.f32 %v10628_v39, %v14590_v37  ;;  %v10862_v50 = vadd.f32 %v3518_v0, %v3390_v55  ;;  %14593 = vst [vmem:[#allocation225_spill] sm:$0xff] %v10864_v8  ;;  %v1030_v61 = vrot.slane %v10864_v8, 7  ;;  %v10869_v38 = vmul.f32 %v10864_v8, %v14564_v9  ;;  %v10880_v0 = vld [vmem:[#allocation2 + $0x3b8] sm:$0xff]  ;;  %v14597_v60 = vld [vmem:[#allocation190_spill] sm:$0xff] }
 0x2f3   : > { %14591 = vst [vmem:[#allocation217_spill] sm:$0xff] %v10860_v31  ;;  %v10875_v39 = vmul.f32 %v10864_v8, %v14322_v36  ;;  %v1694_v55 = vadd.f32 %v10521_v51, %v14596_v20  ;;  %v1935_v40 = vadd.f32 %v1823_v58, %v1695_v47  ;;  %v1222_v37 = vsel %vm1101_vm0, %v1091_v22, %v1027_v41 }
 0x2f4   : > { %14592 = vst [vmem:[#allocation130_spill] sm:$0xff] %v10862_v50  ;;  %14594 = vst [vmem:[#allocation180_spill] sm:$0xff] %v10869_v38  ;;  %v1698_v38 = vadd.f32 %v10538_v16, %v14597_v60  ;;  %v10888_v29 = vmul.f32 %v14473_v56, %v10821_v53  ;;  %v1158_v19 = vsel %vm1101_vm0, %v1027_v41, %v1091_v22  ;;  %v1093_v58 = vrot.slane %v10871_v24, 7  ;;  %v14599_v56 = vld [vmem:[#allocation65_spill] sm:$0xff] }
 0x2f5   : > { %14595 = vst [vmem:[#allocation135_spill] sm:$0xff] %v10875_v39  ;;  %v1590_v51 = vmul.f32 %v14253_v63, %v1222_v37  ;;  %v1939_v47 = vadd.f32 %v1827_v57, %v1699_v17  ;;  %v3927_v20 = vmul.f32 %v10860_v31, %v10860_v31  ;;  %v3931_v16 = vmul.f32 %v10862_v50, %v10862_v50  ;;  %v14601_v41 = vld [vmem:[#allocation201_spill] sm:$0xff]  ;;  %v14603_v57 = vld [vmem:[#allocation196_spill] sm:$0xff] }
 0x2f6   : > { %14598 = vst [vmem:[#allocation67_spill] sm:$0xff] %v10888_v29  ;;  %v1594_v60 = vmul.f32 %v14253_v63, %v1158_v19  ;;  %v1094_v29 = vrot.slane %v10880_v0, 7  ;;  %v1822_v39 = vmul.f32 %v14599_v56, %v1222_v37  ;;  %v10904_v22 = vmul.f32 %v14119_v7, %v10821_v53 }
 0x2f7   : > { %v10908_v17 = vmul.f32 %v8334_v10, %v14601_v41  ;;  %v2175_v8 = vadd.f32 %v14603_v57, %v1935_v40  ;;  %v10913_v9 = vadd.f32 %v10508_v5, %v10860_v31  ;;  %v10917_v63 = vsel %vm3647_vm2, %v10862_v50, 0.0  ;;  %v14604_v41 = vld [vmem:[#allocation148_spill] sm:$0xff] }
 0x2f8   : > { %14600 = vst [vmem:[#allocation178_spill] sm:$0xff] %v10904_v22  ;;  %v10920_v37 = vadd.f32 %v10534_v26, %v3927_v20  ;;  %v1826_v7 = vmul.f32 %v14599_v56, %v1158_v19  ;;  %v10924_v22 = vadd.f32 %v1590_v51, %v10514_v13  ;;  %v1160_v40 = vsel %vm1101_vm0, %v1029_v28, %v1093_v58 }
 0x2f9   : > { %14602 = vst [vmem:[#allocation203_spill] sm:$0xff] %v10908_v17  ;;  %v2179_v17 = vadd.f32 %v14604_v41, %v1939_v47  ;;  %v1224_v5 = vsel %vm1101_vm0, %v1093_v58, %v1029_v28  ;;  %v10932_v57 = vsel %vm3647_vm2, %v3931_v16, 0.0  ;;  %v10935_v50 = vadd.f32 %v1594_v60, %v10518_v3  ;;  %v14608_v28 = vld [vmem:[#allocation215_spill] sm:$0xff]  ;;  %v14609_v16 = vld [vmem:[#allocation44_spill] sm:$0xff] }
 0x2fa   : > { %v14605_v26 = vrot.slane %v10821_v53, 1  ;;  %v14606_v19 = vrot.slane %v10768_v21, 1  ;;  %v1225_v51 = vsel %vm1101_vm0, %v1094_v29, %v1030_v61  ;;  %v10947_v47 = vadd.f32 %v1822_v39, %v1694_v55  ;;  %v14610_v41 = vld [vmem:[#allocation107_spill] sm:$0xff]  ;;  %v14612_v55 = vld [vmem:[#allocation64_spill] sm:$0xff] }
 0x2fb   : > { %v2415_v58 = vadd.f32 %v14608_v28, %v2175_v8  ;;  %v2791_v20 = vrot.slane %v10727_v1, 1  ;;  %v1161_v3 = vsel %vm1101_vm0, %v1030_v61, %v1094_v29  ;;  %v1696_v60 = vadd.f32 %v10678_v4, %v14609_v16 }
 0x2fc   : > { %v10943_v13 = vsel %vm2798_vm1, %v14606_v19, %v14605_v26  ;;  %v1700_v31 = vadd.f32 %v10684_v18, %v14610_v41  ;;  %v14611_v26 = vld [vmem:[#allocation75_spill] sm:$0xff]  ;;  %v2419_v39 = vadd.f32 %v10576_v43, %v2179_v17  ;;  %v2547_v8 = vmul.f32 %v13667_v15, %v10727_v1  ;;  %v14613_v18 = vld [vmem:[#allocation193_spill] sm:$0xff] }
 0x2fd   : > { %14607 = vst [vmem:[#allocation190_spill] sm:$0xff] %v10943_v13  ;;  %v1824_v19 = vmul.f32 %v14611_v26, %v1224_v5  ;;  %v1828_v10 = vmul.f32 %v14611_v26, %v1160_v40  ;;  %v1697_v28 = vadd.f32 %v10762_v42, %v14612_v55  ;;  %v1825_v29 = vmul.f32 %v14403_v45, %v1225_v51  ;;  %v14614_v17 = vld [vmem:[#allocation191_spill] sm:$0xff] }
 0x2fe   : > { %v10965_v61 = vadd.f32 %v1826_v7, %v1698_v38  ;;  %v1591_v4 = vmul.f32 %v14518_v34, %v10808_v23  ;;  %v1701_v16 = vadd.f32 %v10746_v59, %v14613_v18  ;;  %v1829_v41 = vmul.f32 %v14403_v45, %v1161_v3 }
 0x2ff   : > { %v1595_v43 = vmul.f32 %v14518_v34, %v10828_v62  ;;  %v10976_v15 = vmul.f32 %v13545_v54, %v10727_v1  ;;  %v2655_v42 = vadd.f32 %v10836_v30, %v2415_v58  ;;  %v3044_v7 = vmul.f32 %v13699_v48, %v14614_v17  ;;  %v14617_v17 = vld [vmem:[#allocation14_spill] sm:$0xff] }
 0x300   : > { %v14615_v38 = vrot.slane %v10754_v27, 1  ;;  %v1936_v34 = vadd.f32 %v1824_v19, %v1696_v60  ;;  %v1940_v62 = vadd.f32 %v1828_v10, %v1700_v31  ;;  %v2659_v54 = vadd.f32 %v2547_v8, %v2419_v39  ;;  %v14618_v60 = vld [vmem:[#allocation220_spill] sm:$0xff]  ;;  %v14620_v39 = vld [vmem:[#allocation223_spill] sm:$0xff] }
 0x301   : > { %v1592_v1 = vmul.f32 %v14536_v44, %v1224_v5  ;;  %v1593_v30 = vmul.f32 %v14563_v46, %v1225_v51  ;;  %v1937_v58 = vadd.f32 %v1825_v29, %v1697_v28  ;;  %v1703_v48 = vadd.f32 %v1591_v4, %v10624_v12  ;;  %v5058_v51 = vld [vmem:[%s5539_s15 + $0x28] ss:$0 sm:$0xff]  ;;  %v14621_v29 = vld [vmem:[#allocation40_spill] sm:$0xff] }
 0x302   : > { %v2856_v23 = vsel %vm2798_vm1, %v14615_v38, %v2791_v20  ;;  %v14616_v59 = vmov %v14615_v38  ;;  %v1596_v26 = vmul.f32 %v14536_v44, %v1160_v40  ;;  %v1597_v55 = vmul.f32 %v14563_v46, %v1161_v3  ;;  %v14619_v40 = vld [vmem:[#allocation210_spill] sm:$0xff]  ;;  %v14625_v38 = vld [vmem:[#allocation36_spill] sm:$0xff] }
 0x303   : > { %v2920_v45 = vsel %vm2798_vm1, %v2791_v20, %v14616_v59  ;;  %v1941_v18 = vadd.f32 %v1829_v41, %v1701_v16  ;;  %v1707_v27 = vadd.f32 %v1595_v43, %v10612_v49  ;;  %v3152_v20 = vadd.f32 %v14617_v17, %v2655_v42  ;;  %v14623_v41 = vld [vmem:[#allocation199_spill] sm:$0xff]  ;;  %v14632_v17 = vld [vmem:[#allocation96_spill] sm:$0xff] }
 0x304   : > { %v3284_v10 = vmul.f32 %v14523_v52, %v10597_v2  ;;  %v10999_v31 = vmul.f32 %v14523_v52, %v2856_v23  ;;  %v11002_v5 = vmul.f32 %v14523_v52, %v2920_v45  ;;  %v3520_v12 = vmul.f32 %v5058_v51, %v2856_v23  ;;  %v14622_v52 = vld [vmem:[#allocation11_spill] sm:$0xff] }
 0x305   : > { %v2176_v44 = vadd.f32 %v14618_v60, %v1936_v34  ;;  %v2180_v46 = vadd.f32 %v14619_v40, %v1940_v62  ;;  %v3156_v3 = vadd.f32 %v3044_v7, %v2659_v54  ;;  %v1704_v49 = vadd.f32 %v1592_v1, %v10674_v35  ;;  %v14624_v42 = vld [vmem:[#allocation167_spill] sm:$0xff]  ;;  %v14627_v35 = vld [vmem:[#allocation85_spill] sm:$0xff] }
 0x306   : > { %v1705_v19 = vadd.f32 %v1593_v30, %v10752_v25  ;;  %v2177_v8 = vadd.f32 %v14620_v39, %v1937_v58  ;;  %v3524_v2 = vmul.f32 %v5058_v51, %v2920_v45  ;;  %v1708_v28 = vadd.f32 %v1596_v26, %v10667_v14  ;;  %v14626_v7 = vld [vmem:[#allocation39_spill] sm:$0xff]  ;;  %v14628_v45 = vld [vmem:[#allocation229_spill] sm:$0xff]  ;;  %v14630_v58 = vld [vmem:[#allocation90_spill] sm:$0xff] }
 0x307   : > { %v1709_v4 = vadd.f32 %v1597_v55, %v14621_v29  ;;  %v2181_v16 = vadd.f32 %v14622_v52, %v1941_v18  ;;  %v3392_v43 = vadd.f32 %v14623_v41, %v3152_v20  ;;  %v11016_v23 = vadd.f32 %v14625_v38, %v14624_v42  ;;  %v14629_v14 = vld [vmem:[#allocation17_spill] sm:$0xff]  ;;  %v14631_v55 = vld [vmem:[#allocation232_spill] sm:$0xff] }
 0x308   : > { %v1943_v59 = vadd.f32 %v14626_v7, %v1703_v48  ;;  %v1947_v34 = vadd.f32 %v14627_v35, %v1707_v27  ;;  %v2316_v25 = vmul.f32 %v14542_v11, %v10871_v24  ;;  %v2416_v62 = vadd.f32 %v14628_v45, %v2176_v44  ;;  %v14633_v48 = vld [vmem:[#allocation91_spill] sm:$0xff]  ;;  %v14635_v44 = vld [vmem:[#allocation97_spill] sm:$0xff]  ;;  %v14639_v39 = vld [vmem:[#allocation216_spill] sm:$0xff] }
 0x309   : > { %v2420_v54 = vadd.f32 %v14629_v14, %v2180_v46  ;;  %v2548_v1 = vmul.f32 %v13587_v33, %v10871_v24  ;;  %v3396_v30 = vadd.f32 %v3284_v10, %v3156_v3  ;;  %v1944_v26 = vadd.f32 %v14630_v58, %v1704_v49  ;;  %v14634_v27 = vld [vmem:[#allocation63_spill] sm:$0xff]  ;;  %v14637_v10 = vld [vmem:[#allocation202_spill] sm:$0xff]  ;;  %v14638_v3 = vld [vmem:[#allocation25_spill] sm:$0xff] }
 0x30a   : > { %v2417_v18 = vadd.f32 %v14631_v55, %v2177_v8  ;;  %v1945_v20 = vadd.f32 %v14632_v17, %v1705_v19  ;;  %v1948_v51 = vadd.f32 %v14633_v48, %v1708_v28  ;;  %v2421_v60 = vadd.f32 %v14634_v27, %v2181_v16  ;;  %v14640_v28 = vld [vmem:[#allocation152_spill] sm:$0xff]  ;;  %v14646_v45 = vld [vmem:[#allocation26_spill] sm:$0xff] }
 0x30b   : > { %v2549_v11 = vmul.f32 %v14322_v36, %v10880_v0  ;;  %v1949_v40 = vadd.f32 %v14635_v44, %v1709_v4  ;;  %v11034_v46 = vadd.f32 %v3520_v12, %v3392_v43  ;;  %v2792_v33 = vrot.slane %v10871_v24, 1  ;;  %v14641_v16 = vld [vmem:[#allocation32_spill] sm:$0xff]  ;;  %v14642_v36 = vld [vmem:[#allocation135_spill] sm:$0xff]  ;;  %v14647_v14 = vld [vmem:[#allocation138_spill] sm:$0xff] }
 0x30c   : > { %v3045_v49 = vmul.f32 %v14638_v3, %v14637_v10  ;;  %v2183_v8 = vadd.f32 %v14639_v39, %v1943_v59  ;;  %v2656_v19 = vadd.f32 %v10853_v32, %v2416_v62  ;;  %v2660_v29 = vadd.f32 %v2548_v1, %v2420_v54  ;;  %v14643_v4 = vld [vmem:[#allocation228_spill] sm:$0xff]  ;;  %v14644_v24 = vld [vmem:[#allocation231_spill] sm:$0xff]  ;;  %v14650_v1 = vld [vmem:[#allocation214_spill] sm:$0xff] }
 0x30d   : > { %14636 = vst [vmem:[#allocation65_spill] sm:$0xff] %v11034_v46  ;;  %v2187_v52 = vadd.f32 %v14640_v28, %v1947_v34  ;;  %v2317_v41 = vmul.f32 %v14641_v16, %v10880_v0  ;;  %v2657_v42 = vadd.f32 %v14642_v36, %v2417_v18  ;;  %v2793_v12 = vrot.slane %v10880_v0, 1  ;;  %v14645_v35 = vld [vmem:[#allocation212_spill] sm:$0xff]  ;;  %v14653_v18 = vld [vmem:[#allocation42_spill] sm:$0xff]  ;;  %v14659_v10 = vld [vmem:[#allocation183_spill] sm:$0xff] }
 0x30e   : > { %v2184_v43 = vadd.f32 %v14643_v4, %v1944_v26  ;;  %v2185_v38 = vadd.f32 %v14644_v24, %v1945_v20  ;;  %v2661_v7 = vadd.f32 %v2549_v11, %v2421_v60  ;;  %v3046_v59 = vmul.f32 %v14646_v45, %v14645_v35  ;;  %v14648_v62 = vld [vmem:[#allocation144_spill] sm:$0xff]  ;;  %v14654_v20 = vld [vmem:[#allocation213_spill] sm:$0xff]  ;;  %v14655_v27 = vld [vmem:[#allocation186_spill] sm:$0xff] }
 0x30f   : > { %v2188_v32 = vadd.f32 %v14647_v14, %v1948_v51  ;;  %v2189_v54 = vadd.f32 %v14648_v62, %v1949_v40  ;;  %v11052_v34 = vadd.f32 %v3524_v2, %v3396_v30  ;;  %v14651_v58 = vrot.slane %v14650_v1, 1  ;;  %v14656_v60 = vld [vmem:[#allocation41_spill] sm:$0xff]  ;;  %v14665_v45 = vld [vmem:[#allocation60_spill] sm:$0xff]  ;;  %v14666_v14 = vld [vmem:[#allocation86_spill] sm:$0xff] }
 0x310   : > { %v2423_v17 = vadd.f32 %v14653_v18, %v2183_v8  ;;  %v3153_v48 = vadd.f32 %v14654_v20, %v2656_v19  ;;  %v3157_v51 = vadd.f32 %v3045_v49, %v2660_v29  ;;  %v3285_v2 = vmul.f32 %v14656_v60, %v14655_v27  ;;  %v14657_v11 = vld [vmem:[#allocation225_spill] sm:$0xff]  ;;  %v14662_v19 = vld [vmem:[#allocation224_spill] sm:$0xff]  ;;  %v14663_v49 = vld [vmem:[#allocation47_spill] sm:$0xff] }
 0x311   : > { %14649 = vst [vmem:[#allocation201_spill] sm:$0xff] %v11052_v34  ;;  %v2857_v55 = vsel %vm2798_vm1, %v14651_v58, %v2792_v33  ;;  %v14652_v0 = vmov %v14651_v58  ;;  %v2427_v30 = vadd.f32 %v10976_v15, %v2187_v52  ;;  %v14658_v44 = vrot.slane %v14657_v11, 1  ;;  %v14660_v39 = vld [vmem:[#allocation189_spill] sm:$0xff]  ;;  %v5059_v52 = vld [vmem:[%s5539_s15 + $0x30] ss:$0 sm:$0xff]  ;;  %v14671_v11 = vld [vmem:[#allocation82_spill] sm:$0xff] }
 0x312   : > { %v2921_v26 = vsel %vm2798_vm1, %v2792_v33, %v14652_v0  ;;  %v3154_v3 = vadd.f32 %v14659_v10, %v2657_v42  ;;  %v2424_v28 = vadd.f32 %v14660_v39, %v2184_v43  ;;  %v14661_v33 = vld [vmem:[#allocation180_spill] sm:$0xff]  ;;  %v3158_v16 = vadd.f32 %v3046_v59, %v2661_v7  ;;  %v14667_v59 = vld [vmem:[#allocation45_spill] sm:$0xff] }
 0x313   : > { %v2858_v40 = vsel %vm2798_vm1, %v14658_v44, %v2793_v12  ;;  %v2425_v8 = vadd.f32 %v14661_v33, %v2185_v38  ;;  %v3286_v29 = vmul.f32 %v14663_v49, %v14662_v19  ;;  %v2428_v36 = vadd.f32 %v2316_v25, %v2188_v32  ;;  %v14668_v58 = vld [vmem:[#allocation233_spill] sm:$0xff] }
 0x314   : > { %v2429_v4 = vadd.f32 %v2317_v41, %v2189_v54  ;;  %v3289_v15 = vmul.f32 %v14656_v60, %v2857_v55  ;;  %v3521_v24 = vmul.f32 %v5059_v52, %v2857_v55  ;;  %v14664_v35 = vmov %v14658_v44  ;;  %v5060_v41 = vld [vmem:[%s5539_s15 + $0x38] ss:$0 sm:$0xff]  ;;  %v14670_v55 = vld [vmem:[#allocation83_spill] sm:$0xff]  ;;  %v14672_v44 = vld [vmem:[#allocation84_spill] sm:$0xff] }
 0x315   : > { %v2922_v42 = vsel %vm2798_vm1, %v2793_v12, %v14664_v35  ;;  %v2663_v43 = vadd.f32 %v14665_v45, %v2423_v17  ;;  %v3393_v62 = vadd.f32 %v14666_v14, %v3153_v48  ;;  %v3397_v38 = vadd.f32 %v3285_v2, %v3157_v51  ;;  %v14669_v54 = vld [vmem:[#allocation81_spill] sm:$0xff]  ;;  %v14674_v2 = vld [vmem:[#allocation22_spill] sm:$0xff]  ;;  %v14683_v45 = vld [vmem:[#allocation159_spill] sm:$0xff] }
 0x316   : > { %v3525_v7 = vmul.f32 %v5059_v52, %v2921_v26  ;;  %v2667_v1 = vadd.f32 %v14667_v59, %v2427_v30  ;;  %v3394_v25 = vadd.f32 %v14668_v58, %v3154_v3  ;;  %v3522_v32 = vmul.f32 %v5060_v41, %v2858_v40  ;;  %v14673_v51 = vld [vmem:[#allocation185_spill] sm:$0xff]  ;;  %v14675_v3 = vld [vmem:[#allocation187_spill] sm:$0xff] }
 0x317   : > { %v2664_v0 = vadd.f32 %v14669_v54, %v2424_v28  ;;  %v2665_v18 = vadd.f32 %v14670_v55, %v2425_v8  ;;  %v3398_v20 = vadd.f32 %v3286_v29, %v3158_v16  ;;  %v3526_v27 = vmul.f32 %v5060_v41, %v2922_v42  ;;  %v14678_v16 = vld [vmem:[#allocation35_spill] sm:$0xff]  ;;  %v14681_v52 = vld [vmem:[#allocation161_spill] sm:$0xff] }
 0x318   : > { %v2668_v12 = vadd.f32 %v14671_v11, %v2428_v36  ;;  %v2669_v17 = vadd.f32 %v14672_v44, %v2429_v4  ;;  %v3730_v48 = vadd.f32 %v11016_v23, %v11034_v46  ;;  %v3776_v30 = vadd.f32 %v14674_v2, %v14673_v51  ;;  %v14680_v23 = vld [vmem:[#allocation28_spill] sm:$0xff]  ;;  %v14689_v59 = vld [vmem:[#allocation197_spill] sm:$0xff]  ;;  %v14694_v11 = vld [vmem:[#allocation87_spill] sm:$0xff] }
 0x319   : > { %v3823_v10 = vadd.f32 %v10917_v63, %v10913_v9  ;;  %v3160_v39 = vadd.f32 %v14675_v3, %v2663_v43  ;;  %v3293_v28 = vmul.f32 %v14656_v60, %v2921_v26  ;;  %v11099_v33 = vadd.f32 %v3521_v24, %v3393_v62  ;;  %v14684_v60 = vld [vmem:[#allocation194_spill] sm:$0xff]  ;;  %v14696_v44 = vld [vmem:[#allocation172_spill] sm:$0xff]  ;;  %v14701_v3 = vld [vmem:[#allocation89_spill] sm:$0xff] }
 0x31a   : > { %v11101_v8 = vadd.f32 %v3525_v7, %v3397_v38  ;;  %v3164_v19 = vadd.f32 %v14678_v16, %v2667_v1  ;;  %v3290_v29 = vmul.f32 %v14663_v49, %v2858_v40  ;;  %v11105_v36 = vadd.f32 %v3522_v32, %v3394_v25  ;;  %v14690_v1 = vld [vmem:[#allocation119_spill] sm:$0xff]  ;;  %v14699_v2 = vld [vmem:[#allocation30_spill] sm:$0xff] }
 0x31b   : > { %14676 = vst [vmem:[#allocation196_spill] sm:$0xff] %v11099_v33  ;;  %v3161_v4 = vadd.f32 %v14680_v23, %v2664_v0  ;;  %v3162_v35 = vadd.f32 %v14681_v52, %v2665_v18  ;;  %v3294_v63 = vmul.f32 %v14663_v49, %v2922_v42  ;;  %v11110_v9 = vadd.f32 %v3526_v27, %v3398_v20  ;;  %v14688_v42 = vld [vmem:[#allocation171_spill] sm:$0xff]  ;;  %v14693_v18 = vld [vmem:[#allocation209_spill] sm:$0xff] }
 0x31c   : > { %14677 = vst [vmem:[#allocation148_spill] sm:$0xff] %v11101_v8  ;;  %14679 = vst [vmem:[#allocation215_spill] sm:$0xff] %v11105_v36  ;;  %v3165_v26 = vadd.f32 %v14683_v45, %v2668_v12  ;;  %v3166_v24 = vadd.f32 %v14684_v60, %v2669_v17  ;;  %v14685_v43 = vrot.slane %v10768_v21, 1  ;;  %v14686_v14 = vrot.slane %v10821_v53, 1  ;;  %v14709_v45 = vld [vmem:[#allocation99_spill] sm:$0xff] }
 0x31d   : > { %14682 = vst [vmem:[#allocation44_spill] sm:$0xff] %v11110_v9  ;;  %v3777_v62 = vadd.f32 %v3776_v30, %v11099_v33  ;;  %v3824_v38 = vadd.f32 %v3823_v10, %v11105_v36  ;;  %v3400_v49 = vadd.f32 %v10999_v31, %v3160_v39  ;;  %v2174_v7 = vadd.f32 %v14688_v42, %v10947_v47  ;;  %v14700_v30 = vld [vmem:[#allocation23_spill] sm:$0xff] }
 0x31e   : > { %v11120_v40 = vsel %vm2798_vm1, %v14686_v14, %v14685_v43  ;;  %v11129_v58 = vmul.f32 %v14690_v1, %v14689_v59  ;;  %v3731_v21 = vsel %vm3647_vm2, %v11052_v34, 0.0  ;;  %v3404_v53 = vadd.f32 %v11002_v5, %v3164_v19  ;;  %v14705_v19 = vld [vmem:[#allocation98_spill] sm:$0xff] }
 0x31f   : > { %14687 = vst [vmem:[#allocation107_spill] sm:$0xff] %v11120_v40  ;;  %v11136_v25 = vmul.f32 %v14690_v1, %v10943_v13  ;;  %v3732_v41 = vadd.f32 %v3731_v21, %v3730_v48  ;;  %v3401_v32 = vadd.f32 %v3289_v15, %v3161_v4  ;;  %v3402_v54 = vadd.f32 %v3290_v29, %v3162_v35  ;;  %v14697_v15 = vld [vmem:[#allocation211_spill] sm:$0xff]  ;;  %v14698_v48 = vld [vmem:[#allocation62_spill] sm:$0xff] }
 0x320   : > { %14691 = vst [vmem:[#allocation75_spill] sm:$0xff] %v11129_v58  ;;  %v3778_v31 = vsel %vm3647_vm2, %v11101_v8, 0.0  ;;  %v3825_v47 = vsel %vm3647_vm2, %v11110_v9, 0.0  ;;  %v3405_v0 = vadd.f32 %v3293_v28, %v3165_v26  ;;  %v3406_v55 = vadd.f32 %v3294_v63, %v3166_v24  ;;  %v14707_v35 = vld [vmem:[#allocation95_spill] sm:$0xff] }
 0x321   : > { %14692 = vst [vmem:[#allocation64_spill] sm:$0xff] %v11136_v25  ;;  %v2178_v20 = vadd.f32 %v14693_v18, %v10965_v61  ;;  %v3779_v27 = vadd.f32 %v3778_v31, %v3777_v62  ;;  %v3826_v5 = vadd.f32 %v3825_v47, %v3824_v38  ;;  %v11145_v12 = vadd.f32 %v14694_v11, %v3400_v49  ;;  %v14703_v61 = vld [vmem:[#allocation92_spill] sm:$0xff]  ;;  %v14713_v21 = vld [vmem:[#allocation19_spill] sm:$0xff] }
 0x322   : > { %v2414_v17 = vadd.f32 %v14696_v44, %v2174_v7  ;;  %v4029_v51 = vadd.f32 %v14698_v48, %v14697_v15  ;;  %v4076_v10 = vadd.f32 %v14700_v30, %v14699_v2  ;;  %v11153_v39 = vadd.f32 %v14701_v3, %v3404_v53  ;;  %v14712_v7 = vld [vmem:[#allocation200_spill] sm:$0xff] }
 0x323   : > { %14695 = vst [vmem:[#allocation193_spill] sm:$0xff] %v11145_v12  ;;  %v3933_v28 = vmul.f32 %v11034_v46, %v11034_v46  ;;  %v11158_v16 = vadd.f32 %v14703_v61, %v3401_v32  ;;  %v11161_v29 = vadd.f32 %v14705_v19, %v3402_v54  ;;  %v3733_v23 = vadd.f32 %v3732_v41, %v11145_v12  ;;  %v14718_v48 = vld [vmem:[#allocation120_spill] sm:$0xff]  ;;  %v11221_v19 = vld [vmem:[#allocation2 + $0x20] sm:$0xff] }
 0x324   : > { %14702 = vst [vmem:[#allocation191_spill] sm:$0xff] %v11153_v39  ;;  %v3937_v4 = vmul.f32 %v11052_v34, %v11052_v34  ;;  %v3934_v52 = vmul.f32 %v11099_v33, %v11099_v33  ;;  %v11169_v63 = vadd.f32 %v14707_v35, %v3405_v0  ;;  %v11172_v26 = vadd.f32 %v14709_v45, %v3406_v55  ;;  %v11227_v45 = vld [vmem:[#allocation2 + $0x60] sm:$0xff] }
 0x325   : > { %14704 = vst [vmem:[#allocation14_spill] sm:$0xff] %v11158_v16  ;;  %14706 = vst [vmem:[#allocation220_spill] sm:$0xff] %v11161_v29  ;;  %v3938_v60 = vmul.f32 %v11101_v8, %v11101_v8  ;;  %v4123_v24 = vadd.f32 %v10932_v57, %v10920_v37  ;;  %v3780_v43 = vadd.f32 %v3779_v27, %v11158_v16  ;;  %v3734_v42 = vsel %vm3647_vm2, %v11153_v39, 0.0 }
 0x326   : > { %14708 = vst [vmem:[#allocation210_spill] sm:$0xff] %v11169_v63  ;;  %14710 = vst [vmem:[#allocation223_spill] sm:$0xff] %v11172_v26  ;;  %v3827_v14 = vadd.f32 %v3826_v5, %v11161_v29  ;;  %v11182_v62 = vmul.f32 %v14690_v1, %v11120_v40  ;;  %v4030_v38 = vadd.f32 %v4029_v51, %v3933_v28  ;;  %v4031_v41 = vsel %vm3647_vm2, %v3937_v4, 0.0 }
 0x327   : > { %v4077_v49 = vadd.f32 %v4076_v10, %v3934_v52  ;;  %v2418_v59 = vadd.f32 %v14712_v7, %v2178_v20  ;;  %v2654_v53 = vadd.f32 %v14713_v21, %v2414_v17  ;;  %v3935_v37 = vmul.f32 %v11105_v36, %v11105_v36  ;;  %v14714_v20 = vld [vmem:[#allocation104_spill] sm:$0xff]  ;;  %v14716_v17 = vld [vmem:[#allocation178_spill] sm:$0xff] }
 0x328   : > { %14711 = vst [vmem:[#allocation40_spill] sm:$0xff] %v11182_v62  ;;  %v3735_v57 = vadd.f32 %v3734_v42, %v3733_v23  ;;  %v3939_v32 = vmul.f32 %v11110_v9, %v11110_v9  ;;  %v3781_v54 = vsel %vm3647_vm2, %v11169_v63, 0.0  ;;  %v3828_v31 = vsel %vm3647_vm2, %v11172_v26, 0.0  ;;  %v14720_v10 = vld [vmem:[#allocation146_spill] sm:$0xff] }
 0x329   : > { %v4078_v47 = vsel %vm3647_vm2, %v3938_v60, 0.0  ;;  %v4124_v0 = vadd.f32 %v4123_v24, %v3935_v37  ;;  %v3782_v55 = vadd.f32 %v3781_v54, %v3780_v43  ;;  %v3829_v18 = vadd.f32 %v3828_v31, %v3827_v14  ;;  %v11223_v23 = vld [vmem:[#allocation2 + $0x40] sm:$0xff] }
 0x32a   : > { %v11200_v27 = vadd.f32 %v14714_v20, %v10924_v22  ;;  %v4032_v5 = vadd.f32 %v4031_v41, %v4030_v38  ;;  %v4079_v11 = vadd.f32 %v4078_v47, %v4077_v49  ;;  %v3945_v44 = vmul.f32 %v11153_v39, %v11153_v39  ;;  %v11229_v60 = vld [vmem:[#allocation2 + $0x80] sm:$0xff] }
 0x32b   : > { %v11205_v15 = vadd.f32 %v14716_v17, %v2418_v59  ;;  %v11209_v51 = vadd.f32 %v14718_v48, %v10935_v50  ;;  %v3736_v2 = vrot.slane %v3735_v57, 4  ;;  %v3946_v30 = vmul.f32 %v11169_v63, %v11169_v63  ;;  %v11231_v24 = vld [vmem:[#allocation2 + $0xa0] sm:$0xff] }
 0x32c   : > { %14715 = vst [vmem:[#allocation11_spill] sm:$0xff] %v11200_v27  ;;  %v11214_v3 = vadd.f32 %v14720_v10, %v2654_v53  ;;  %v4125_v22 = vsel %vm3647_vm2, %v3939_v32, 0.0  ;;  %v3941_v28 = vmul.f32 %v11145_v12, %v11145_v12  ;;  %v3942_v61 = vmul.f32 %v11158_v16, %v11158_v16  ;;  %v11236_v42 = vld [vmem:[#allocation2 + $0xc0] sm:$0xff] }
 0x32d   : > { %14717 = vst [vmem:[#allocation199_spill] sm:$0xff] %v11205_v15  ;;  %14719 = vst [vmem:[#allocation167_spill] sm:$0xff] %v11209_v51  ;;  %v4126_v50 = vadd.f32 %v4125_v22, %v4124_v0  ;;  %v3783_v4 = vrot.slane %v3782_v55, 4  ;;  %v3830_v52 = vrot.slane %v3829_v18, 4  ;;  %v3943_v35 = vmul.f32 %v11161_v29, %v11161_v29  ;;  %v11238_v7 = vld [vmem:[#allocation2 + $0x100] sm:$0xff]  ;;  %v14733_v29 = vld [vmem:[#allocation7_spill] sm:$0xff] }
 0x32e   : > { %14721 = vst [vmem:[#allocation36_spill] sm:$0xff] %v11214_v3  ;;  %v3947_v43 = vmul.f32 %v11172_v26, %v11172_v26  ;;  %v4033_v14 = vadd.f32 %v4032_v5, %v3941_v28  ;;  %v4034_v38 = vsel %vm3647_vm2, %v3945_v44, 0.0  ;;  %v4080_v49 = vadd.f32 %v4079_v11, %v3942_v61  ;;  %v11243_v53 = vld [vmem:[#allocation2] sm:$0xff] }
 0x32f   : > { %v11240_v59 = vadd.f32 %v3736_v2, %v3735_v57  ;;  %v4081_v21 = vsel %vm3647_vm2, %v3946_v30, 0.0  ;;  %v971_v37 = vrot.slane %v11243_v53, 7  ;;  %v1035_v41 = vrot.slane %v11221_v19, 7  ;;  %v11253_v20 = vld [vmem:[#allocation2 + $0xe0] sm:$0xff] }
 0x330   : > { %v975_v32 = vrot.slane %v11223_v23, 7  ;;  %v979_v54 = vrot.slane %v11229_v60, 7  ;;  %v1039_v31 = vrot.slane %v11227_v45, 7  ;;  %v1043_v47 = vrot.slane %v11231_v24, 7  ;;  %v11256_v11 = vld [vmem:[#allocation2 + $0x120] sm:$0xff] }
 0x331   : > { %14722 = vst [vmem:[#allocation39_spill] sm:$0xff] %v11240_v59  ;;  %v983_v0 = vrot.slane %v11236_v42, 7  ;;  %v987_v57 = vrot.slane %v11238_v7, 7  ;;  %v1047_v5 = vrot.slane %v11253_v20, 7  ;;  %v1051_v44 = vrot.slane %v11256_v11, 7  ;;  %v14732_v63 = vld [vmem:[#allocation122_spill] sm:$0xff] }
 0x332   : > { %v11259_v17 = vadd.f32 %v3783_v4, %v3782_v55  ;;  %v11261_v48 = vadd.f32 %v3830_v52, %v3829_v18  ;;  %v11263_v2 = vadd.f32 %v4034_v38, %v4033_v14  ;;  %v11265_v30 = vadd.f32 %v4081_v21, %v4080_v49  ;;  %v14724_v38 = vld [vmem:[#allocation71_spill] sm:$0xff]  ;;  %v14726_v21 = vld [vmem:[#allocation116_spill] sm:$0xff]  ;;  %v14734_v62 = vld [vmem:[#allocation66_spill] sm:$0xff] }
 0x333   : > { %v11267_v10 = vadd.f32 %v4126_v50, %v3943_v35  ;;  %v11270_v22 = vsel %vm3647_vm2, %v3947_v43, 0.0  ;;  %v1102_v28 = vsel %vm1101_vm0, %v971_v37, %v1035_v41  ;;  %v1166_v61 = vsel %vm1101_vm0, %v1035_v41, %v971_v37 }
 0x334   : > { %14723 = vst [vmem:[#allocation85_spill] sm:$0xff] %v11259_v17  ;;  %v1106_v55 = vsel %vm1101_vm0, %v975_v32, %v1039_v31  ;;  %v1110_v18 = vsel %vm1101_vm0, %v979_v54, %v1043_v47  ;;  %v1170_v4 = vsel %vm1101_vm0, %v1039_v31, %v975_v32  ;;  %v1174_v50 = vsel %vm1101_vm0, %v1043_v47, %v979_v54  ;;  %v14728_v32 = vld [vmem:[#allocation132_spill] sm:$0xff]  ;;  %v14730_v31 = vld [vmem:[#allocation137_spill] sm:$0xff] }
 0x335   : > { %v1114_v52 = vsel %vm1101_vm0, %v983_v0, %v1047_v5  ;;  %v1118_v35 = vsel %vm1101_vm0, %v987_v57, %v1051_v44  ;;  %v1178_v43 = vsel %vm1101_vm0, %v1047_v5, %v983_v0  ;;  %v1182_v14 = vsel %vm1101_vm0, %v1051_v44, %v987_v57 }
 0x336   : > { %v14725_v49 = vrot.slane %v14724_v38, 7  ;;  %v14727_v37 = vrot.slane %v14726_v21, 7  ;;  %v14729_v54 = vrot.slane %v14728_v32, 7  ;;  %v14731_v47 = vrot.slane %v14730_v31, 7 }
 0x337   : > { %v1246_v39 = vmul.f32 %v14732_v63, %v1166_v61  ;;  %v1250_v0 = vmul.f32 %v14732_v63, %v1102_v28  ;;  %v1254_v57 = vmul.f32 %v14732_v63, %v1170_v4  ;;  %v1258_v5 = vmul.f32 %v14732_v63, %v1106_v55 }
 0x338   : > { %v1186_v41 = vsel %vm1101_vm0, %v14727_v37, %v14725_v49  ;;  %v1190_v26 = vsel %vm1101_vm0, %v14731_v47, %v14729_v54  ;;  %v1262_v44 = vmul.f32 %v14732_v63, %v1174_v50  ;;  %v1266_v38 = vmul.f32 %v14732_v63, %v1110_v18 }
 0x339   : > { %v1270_v49 = vmul.f32 %v14732_v63, %v1178_v43  ;;  %v1274_v21 = vmul.f32 %v14732_v63, %v1114_v52  ;;  %v1278_v37 = vmul.f32 %v14732_v63, %v1182_v14  ;;  %v1486_v54 = vmul.f32 %v14733_v29, %v1170_v4 }
 0x33a   : > { %v1490_v61 = vmul.f32 %v14733_v29, %v1106_v55  ;;  %v1494_v28 = vmul.f32 %v14733_v29, %v1174_v50  ;;  %v1498_v47 = vmul.f32 %v14733_v29, %v1110_v18  ;;  %v1502_v16 = vmul.f32 %v14733_v29, %v1178_v43 }
 0x33b   : > { %v1506_v12 = vmul.f32 %v14733_v29, %v1114_v52  ;;  %v1510_v9 = vmul.f32 %v14733_v29, %v1182_v14  ;;  %v1514_v8 = vmul.f32 %v14733_v29, %v1118_v35  ;;  %v1518_v34 = vmul.f32 %v14733_v29, %v1186_v41 }
 0x33c   : > { %v1282_v55 = vmul.f32 %v14732_v63, %v1118_v35  ;;  %v1286_v33 = vmul.f32 %v14732_v63, %v1186_v41  ;;  %v1294_v46 = vmul.f32 %v14732_v63, %v1190_v26  ;;  %v1522_v25 = vmul.f32 %v14733_v29, %v14734_v62 }
 0x33d   : > { %v1526_v40 = vmul.f32 %v14733_v29, %v1190_v26  ;;  %v1598_v13 = vadd.f32 %v1486_v54, %v1246_v39  ;;  %v1602_v58 = vadd.f32 %v1490_v61, %v1250_v0  ;;  %v1606_v3 = vadd.f32 %v1494_v28, %v1254_v57 }
 0x33e   : > { %v1610_v51 = vadd.f32 %v1498_v47, %v1258_v5  ;;  %v1614_v27 = vadd.f32 %v1502_v16, %v1262_v44  ;;  %v1618_v15 = vadd.f32 %v1506_v12, %v1266_v38  ;;  %v1622_v36 = vadd.f32 %v1510_v9, %v1270_v49  ;;  %v14735_v9 = vld [vmem:[#allocation70_spill] sm:$0xff]  ;;  %v14737_v5 = vld [vmem:[#allocation100_spill] sm:$0xff]  ;;  %v14738_v49 = vld [vmem:[#allocation115_spill] sm:$0xff] }
 0x33f   : > { %v1626_v59 = vadd.f32 %v1514_v8, %v1274_v21  ;;  %v1630_v4 = vadd.f32 %v1518_v34, %v1278_v37  ;;  %v1726_v17 = vmul.f32 %v14599_v56, %v1174_v50  ;;  %v1730_v1 = vmul.f32 %v14599_v56, %v1110_v18  ;;  %v14739_v37 = vld [vmem:[#allocation61_spill] sm:$0xff]  ;;  %v14740_v47 = vld [vmem:[#allocation103_spill] sm:$0xff] }
 0x340   : > { %v1734_v63 = vmul.f32 %v14599_v56, %v1178_v43  ;;  %v1738_v32 = vmul.f32 %v14599_v56, %v1114_v52  ;;  %v1634_v31 = vadd.f32 %v1522_v25, %v1282_v55  ;;  %v1742_v29 = vmul.f32 %v14599_v56, %v1182_v14  ;;  %v14736_v52 = vld [vmem:[#allocation162_spill] sm:$0xff] }
 0x341   : > { %v1746_v39 = vmul.f32 %v14599_v56, %v1118_v35  ;;  %v1750_v0 = vmul.f32 %v14599_v56, %v1186_v41  ;;  %v1638_v16 = vadd.f32 %v1526_v40, %v1286_v33  ;;  %v1754_v8 = vmul.f32 %v14599_v56, %v14734_v62 }
 0x342   : > { %v1758_v34 = vmul.f32 %v14599_v56, %v1190_v26  ;;  %v1762_v12 = vmul.f32 %v14599_v56, %v14735_v9  ;;  %v3832_v18 = vrot.slane %v11261_v48, 2  ;;  %v4036_v50 = vrot.slane %v11263_v2, 4 }
 0x343   : > { %v4083_v25 = vrot.slane %v11265_v30, 4  ;;  %v1646_v43 = vadd.f32 %v14736_v52, %v1294_v46  ;;  %v1838_v35 = vadd.f32 %v1726_v17, %v1598_v13  ;;  %v1842_v14 = vadd.f32 %v1730_v1, %v1602_v58 }
 0x344   : > { %v1846_v41 = vadd.f32 %v1734_v63, %v1606_v3  ;;  %v1850_v33 = vadd.f32 %v1738_v32, %v1610_v51  ;;  %v1854_v40 = vadd.f32 %v1742_v29, %v1614_v27  ;;  %v1858_v57 = vadd.f32 %v1746_v39, %v1618_v15  ;;  %v14741_v63 = vld [vmem:[#allocation31_spill] sm:$0xff]  ;;  %v14742_v39 = vld [vmem:[#allocation113_spill] sm:$0xff] }
 0x345   : > { %v1862_v62 = vadd.f32 %v1750_v0, %v1622_v36  ;;  %v1966_v26 = vmul.f32 %v11243_v53, %v14737_v5  ;;  %v1866_v44 = vadd.f32 %v1754_v8, %v1626_v59  ;;  %v1870_v56 = vadd.f32 %v1758_v34, %v1630_v4  ;;  %v14744_v34 = vld [vmem:[#allocation13_spill] sm:$0xff] }
 0x346   : > { %v1874_v38 = vadd.f32 %v1762_v12, %v1634_v31  ;;  %v1878_v21 = vadd.f32 %v14738_v49, %v1638_v16  ;;  %v1886_v54 = vadd.f32 %v14739_v37, %v1646_v43  ;;  %v1970_v46 = vmul.f32 %v14737_v5, %v11221_v19  ;;  %v14743_v16 = vld [vmem:[#allocation133_spill] sm:$0xff] }
 0x347   : > { %v1974_v13 = vmul.f32 %v14737_v5, %v11223_v23  ;;  %v1998_v1 = vmul.f32 %v14737_v5, %v11238_v7  ;;  %v1978_v36 = vmul.f32 %v14737_v5, %v11227_v45  ;;  %v1982_v58 = vmul.f32 %v14737_v5, %v11229_v60 }
 0x348   : > { %v1986_v27 = vmul.f32 %v14737_v5, %v11231_v24  ;;  %v1990_v15 = vmul.f32 %v14737_v5, %v11236_v42  ;;  %v11366_v51 = vadd.f32 %v11270_v22, %v11267_v10  ;;  %v2078_v3 = vadd.f32 %v1966_v26, %v1838_v35  ;;  %v11384_v35 = vld [vmem:[#allocation2 + $0x140] sm:$0xff] }
 0x349   : > { %v2082_v59 = vadd.f32 %v1970_v46, %v1842_v14  ;;  %v2086_v17 = vadd.f32 %v1974_v13, %v1846_v41  ;;  %v2090_v32 = vadd.f32 %v1978_v36, %v1850_v33  ;;  %v2094_v31 = vadd.f32 %v1982_v58, %v1854_v40  ;;  %v14747_v13 = vld [vmem:[#allocation150_spill] sm:$0xff]  ;;  %v14748_v36 = vld [vmem:[#allocation143_spill] sm:$0xff] }
 0x34a   : > { %v2098_v61 = vadd.f32 %v1986_v27, %v1858_v57  ;;  %v2102_v28 = vadd.f32 %v1990_v15, %v1862_v62  ;;  %v2106_v4 = vadd.f32 %v14740_v47, %v1866_v44  ;;  %v2110_v55 = vadd.f32 %v1998_v1, %v1870_v56  ;;  %v14749_v58 = vld [vmem:[#allocation131_spill] sm:$0xff]  ;;  %v14750_v15 = vld [vmem:[#allocation57_spill] sm:$0xff]  ;;  %v5066_v47 = vld [vmem:[#allocation2 + $0x180] sm:$0xff] }
 0x34b   : > { %v2114_v29 = vadd.f32 %v14741_v63, %v1874_v38  ;;  %v2118_v0 = vadd.f32 %v14742_v39, %v1878_v21  ;;  %v2126_v8 = vadd.f32 %v14743_v16, %v1886_v54  ;;  %v2206_v10 = vmul.f32 %v14744_v34, %v11223_v23  ;;  %v14745_v54 = vld [vmem:[#allocation101_spill] sm:$0xff] }
 0x34c   : > { %v2230_v22 = vmul.f32 %v14744_v34, %v11238_v7  ;;  %v2234_v9 = vmul.f32 %v11256_v11, %v14744_v34  ;;  %v2210_v12 = vmul.f32 %v14744_v34, %v11227_v45  ;;  %v2214_v52 = vmul.f32 %v14744_v34, %v11229_v60 }
 0x34d   : > { %v2218_v43 = vmul.f32 %v14744_v34, %v11231_v24  ;;  %v2238_v14 = vmul.f32 %v11384_v35, %v14744_v34  ;;  %v11389_v41 = vadd.f32 %v4083_v25, %v11265_v30  ;;  %v4130_v33 = vrot.slane %v11366_v51, 4  ;;  %v14746_v25 = vld [vmem:[#allocation134_spill] sm:$0xff] }
 0x34e   : > { %v2222_v40 = vmul.f32 %v14744_v34, %v11236_v42  ;;  %v2226_v57 = vmul.f32 %v11253_v20, %v14744_v34  ;;  %v2318_v62 = vadd.f32 %v2206_v10, %v2078_v3  ;;  %v2322_v5 = vadd.f32 %v2210_v12, %v2082_v59 }
 0x34f   : > { %v2326_v26 = vadd.f32 %v2214_v52, %v2086_v17  ;;  %v2330_v44 = vadd.f32 %v2218_v43, %v2090_v32  ;;  %v2342_v49 = vadd.f32 %v2230_v22, %v2102_v28  ;;  %v2346_v21 = vadd.f32 %v2234_v9, %v2106_v4  ;;  %v5065_v17 = vld [vmem:[#allocation2 + $0x160] sm:$0xff] }
 0x350   : > { %v2334_v56 = vadd.f32 %v2222_v40, %v2094_v31  ;;  %v2338_v38 = vadd.f32 %v2226_v57, %v2098_v61  ;;  %v2350_v37 = vadd.f32 %v2238_v14, %v2110_v55  ;;  %v2354_v30 = vadd.f32 %v14745_v54, %v2114_v29  ;;  %v14751_v43 = vld [vmem:[#allocation106_spill] sm:$0xff]  ;;  %v14755_v54 = vld [vmem:[#allocation137_spill] sm:$0xff] }
 0x351   : > { %v2358_v46 = vadd.f32 %v14746_v25, %v2118_v0  ;;  %v2366_v1 = vadd.f32 %v14747_v13, %v2126_v8  ;;  %v2374_v27 = vadd.f32 %v14749_v58, %v14748_v36  ;;  %v2446_v3 = vmul.f32 %v14750_v15, %v11229_v60  ;;  %v14759_v25 = vld [vmem:[#allocation151_spill] sm:$0xff] }
 0x352   : > { %v2470_v59 = vmul.f32 %v11384_v35, %v14750_v15  ;;  %v2474_v32 = vmul.f32 %v5065_v17, %v14750_v15  ;;  %v2450_v31 = vmul.f32 %v14750_v15, %v11231_v24  ;;  %v2454_v61 = vmul.f32 %v14750_v15, %v11236_v42 }
 0x353   : > { %v2458_v28 = vmul.f32 %v11253_v20, %v14750_v15  ;;  %v2478_v4 = vmul.f32 %v5066_v47, %v14750_v15  ;;  %v2462_v55 = vmul.f32 %v14750_v15, %v11238_v7  ;;  %v2466_v63 = vmul.f32 %v11256_v11, %v14750_v15 }
 0x354   : > { %v2670_v29 = vrot.slane %v11243_v53, 1  ;;  %v2734_v39 = vrot.slane %v11221_v19, 1  ;;  %v2558_v0 = vadd.f32 %v2446_v3, %v2318_v62  ;;  %v2562_v16 = vadd.f32 %v2450_v31, %v2322_v5 }
 0x355   : > { %v2566_v8 = vadd.f32 %v2454_v61, %v2326_v26  ;;  %v2570_v34 = vadd.f32 %v2458_v28, %v2330_v44  ;;  %v11419_v10 = vadd.f32 %v2462_v55, %v2334_v56  ;;  %v2578_v22 = vadd.f32 %v2466_v63, %v2338_v38  ;;  %v14752_v38 = vld [vmem:[#allocation54_spill] sm:$0xff] }
 0x356   : > { %v11421_v9 = vadd.f32 %v2470_v59, %v2342_v49  ;;  %v11423_v12 = vadd.f32 %v2474_v32, %v2346_v21  ;;  %v11425_v52 = vadd.f32 %v2478_v4, %v2350_v37  ;;  %v11428_v14 = vadd.f32 %v14751_v43, %v2354_v30  ;;  %v14753_v49 = vld [vmem:[#allocation165_spill] sm:$0xff]  ;;  %v14754_v21 = vld [vmem:[#allocation188_spill] sm:$0xff] }
 0x357   : > { %v2674_v53 = vrot.slane %v11223_v23, 1  ;;  %v2678_v19 = vrot.slane %v11229_v60, 1  ;;  %v2682_v40 = vrot.slane %v11236_v42, 1  ;;  %v2738_v57 = vrot.slane %v11227_v45, 1  ;;  %v14757_v30 = vld [vmem:[#allocation132_spill] sm:$0xff] }
 0x358   : > { %v2742_v62 = vrot.slane %v11231_v24, 1  ;;  %v2863_v5 = vsel %vm2798_vm1, %v2734_v39, %v2670_v29  ;;  %v2686_v26 = vrot.slane %v11238_v7, 1  ;;  %v2746_v44 = vrot.slane %v11253_v20, 1 }
 0x359   : > { %v2750_v56 = vrot.slane %v11256_v11, 1  ;;  %v2799_v23 = vsel %vm2798_vm1, %v2670_v29, %v2734_v39  ;;  %v2598_v60 = vadd.f32 %v14752_v38, %v2358_v46  ;;  %v11444_v42 = vadd.f32 %v14753_v49, %v2366_v1  ;;  %v14761_v46 = vld [vmem:[#allocation114_spill] sm:$0xff] }
 0x35a   : > { %v2690_v45 = vrot.slane %v11384_v35, 1  ;;  %v2754_v24 = vrot.slane %v5065_v17, 1  ;;  %v11448_v37 = vadd.f32 %v14754_v21, %v2374_v27  ;;  %v14756_v7 = vrot.slane %v14755_v54, 1  ;;  %v14763_v35 = vld [vmem:[#allocation21_spill] sm:$0xff] }
 0x35b   : > { %v14758_v20 = vrot.slane %v14757_v30, 1  ;;  %v14760_v13 = vrot.slane %v14759_v25, 1  ;;  %v14762_v36 = vrot.slane %v14761_v46, 1  ;;  %v2947_v58 = vmul.f32 %v14763_v35, %v2863_v5 }
 0x35c   : > { %v2803_v27 = vsel %vm2798_vm1, %v2674_v53, %v2738_v57  ;;  %v2807_v15 = vsel %vm2798_vm1, %v2678_v19, %v2742_v62  ;;  %v2867_v3 = vsel %vm2798_vm1, %v2738_v57, %v2674_v53  ;;  %v2943_v59 = vmul.f32 %v14763_v35, %v2799_v23  ;;  %v14766_v53 = vld [vmem:[#allocation119_spill] sm:$0xff] }
 0x35d   : > { %v11456_v11 = vsel %vm2798_vm1, %v14758_v20, %v14756_v7  ;;  %v11464_v1 = vsel %vm2798_vm1, %v14762_v36, %v14760_v13  ;;  %v2811_v17 = vsel %vm2798_vm1, %v2682_v40, %v2746_v44  ;;  %v2815_v32 = vsel %vm2798_vm1, %v2686_v26, %v2750_v56 }
 0x35e   : > { %v2871_v31 = vsel %vm2798_vm1, %v2742_v62, %v2678_v19  ;;  %v3059_v61 = vadd.f32 %v2947_v58, %v2562_v16  ;;  %v11482_v28 = vsel %vm2798_vm1, %v2690_v45, %v2754_v24  ;;  %v2875_v47 = vsel %vm2798_vm1, %v2746_v44, %v2682_v40 }
 0x35f   : > { %v2879_v4 = vsel %vm2798_vm1, %v2750_v56, %v2686_v26  ;;  %v3055_v55 = vadd.f32 %v2943_v59, %v2558_v0  ;;  %v2883_v63 = vsel %vm2798_vm1, %v2754_v24, %v2690_v45  ;;  %v14764_v29 = vmov %v14758_v20 }
 0x360   : > { %v14765_v39 = vmov %v14756_v7  ;;  %v2955_v43 = vmul.f32 %v14763_v35, %v2867_v3  ;;  %v3187_v19 = vmul.f32 %v14766_v53, %v2867_v3  ;;  %v2951_v40 = vmul.f32 %v14763_v35, %v2803_v27  ;;  %v11513_v7 = vld [vmem:[%s5539_s15 + $0x20] ss:$0 sm:$0xff] }
 0x361   : > { %v11496_v16 = vsel %vm2798_vm1, %v14765_v39, %v14764_v29  ;;  %v2959_v0 = vmul.f32 %v14763_v35, %v2807_v15  ;;  %v2963_v57 = vmul.f32 %v14763_v35, %v2871_v31  ;;  %v3183_v62 = vmul.f32 %v14766_v53, %v2803_v27 }
 0x362   : > { %v2967_v5 = vmul.f32 %v14763_v35, %v2811_v17  ;;  %v2971_v26 = vmul.f32 %v14763_v35, %v2875_v47  ;;  %v3067_v44 = vadd.f32 %v2955_v43, %v2570_v34  ;;  %v3299_v56 = vadd.f32 %v3187_v19, %v3059_v61 }
 0x363   : > { %v2975_v23 = vmul.f32 %v14763_v35, %v2815_v32  ;;  %v2979_v38 = vmul.f32 %v14763_v35, %v2879_v4  ;;  %v3063_v49 = vadd.f32 %v2951_v40, %v2566_v8  ;;  %v3295_v45 = vadd.f32 %v3183_v62, %v3055_v55 }
 0x364   : > { %v2983_v24 = vmul.f32 %v14763_v35, %v11482_v28  ;;  %v2987_v21 = vmul.f32 %v14763_v35, %v2883_v63  ;;  %v3195_v54 = vmul.f32 %v14766_v53, %v2871_v31  ;;  %v3427_v30 = vmul.f32 %v11513_v7, %v2871_v31 }
 0x365   : > { %v2991_v34 = vmul.f32 %v14763_v35, %v11456_v11  ;;  %v2995_v20 = vmul.f32 %v14763_v35, %v11496_v16  ;;  %v3191_v8 = vmul.f32 %v14766_v53, %v2807_v15  ;;  %v3423_v25 = vmul.f32 %v11513_v7, %v2807_v15 }
 0x366   : > { %v11524_v13 = vmul.f32 %v14763_v35, %v11464_v1  ;;  %v3075_v46 = vadd.f32 %v2963_v57, %v2578_v22  ;;  %v3307_v36 = vadd.f32 %v3195_v54, %v3067_v44  ;;  %v11526_v58 = vadd.f32 %v3427_v30, %v3299_v56 }
 0x367   : > { %v3071_v27 = vadd.f32 %v2959_v0, %v11419_v10  ;;  %v3079_v3 = vadd.f32 %v2967_v5, %v11421_v9  ;;  %v3303_v59 = vadd.f32 %v3191_v8, %v3063_v49  ;;  %v11530_v31 = vadd.f32 %v3423_v25, %v3295_v45 }
 0x368   : > { %v3083_v61 = vadd.f32 %v2971_v26, %v11423_v12  ;;  %v3087_v55 = vadd.f32 %v2975_v23, %v11425_v52  ;;  %v3203_v15 = vmul.f32 %v14766_v53, %v2875_v47  ;;  %v3435_v35 = vmul.f32 %v11513_v7, %v2875_v47 }
 0x369   : > { %v3091_v22 = vadd.f32 %v2979_v38, %v11428_v14  ;;  %v3095_v29 = vadd.f32 %v2983_v24, %v2598_v60  ;;  %v3199_v39 = vmul.f32 %v14766_v53, %v2811_v17  ;;  %v3431_v10 = vmul.f32 %v11513_v7, %v2811_v17  ;;  %v14767_v60 = vld [vmem:[#allocation123_spill] sm:$0xff] }
 0x36a   : > { %v3207_v9 = vmul.f32 %v14766_v53, %v2815_v32  ;;  %v3315_v43 = vadd.f32 %v3203_v15, %v3075_v46  ;;  %v11540_v19 = vadd.f32 %v3435_v35, %v3307_v36  ;;  %v3648_v12 = vsel %vm3647_vm2, %v11526_v58, 0.0 }
 0x36b   : > { %v3211_v52 = vmul.f32 %v14766_v53, %v2879_v4  ;;  %v3311_v40 = vadd.f32 %v3199_v39, %v3071_v27  ;;  %v11545_v0 = vadd.f32 %v3431_v10, %v3303_v59  ;;  %v3649_v14 = vadd.f32 %v3648_v12, %v11530_v31 }
 0x36c   : > { %v3099_v47 = vadd.f32 %v2987_v21, %v14767_v60  ;;  %v3215_v17 = vmul.f32 %v14766_v53, %v11482_v28  ;;  %v3219_v57 = vmul.f32 %v14766_v53, %v2883_v63  ;;  %v3443_v62 = vmul.f32 %v11513_v7, %v2879_v4 }
 0x36d   : > { %v3319_v5 = vadd.f32 %v3207_v9, %v3079_v3  ;;  %v3323_v26 = vadd.f32 %v3211_v52, %v3083_v61  ;;  %v3439_v44 = vmul.f32 %v11513_v7, %v2815_v32  ;;  %v3650_v56 = vadd.f32 %v3649_v14, %v11545_v0  ;;  %v14769_v9 = vld [vmem:[#allocation163_spill] sm:$0xff] }
 0x36e   : > { %v3451_v23 = vmul.f32 %v11513_v7, %v2883_v63  ;;  %v11556_v38 = vadd.f32 %v3443_v62, %v3315_v43  ;;  %v3651_v49 = vsel %vm3647_vm2, %v11540_v19, 0.0  ;;  %v3840_v45 = vmul.f32 %v11526_v58, %v11526_v58 }
 0x36f   : > { %v3447_v24 = vmul.f32 %v11513_v7, %v11482_v28  ;;  %v11564_v4 = vadd.f32 %v3439_v44, %v3311_v40  ;;  %v3652_v21 = vadd.f32 %v3651_v49, %v3650_v56  ;;  %v3836_v32 = vmul.f32 %v11530_v31, %v11530_v31  ;;  %v14771_v44 = vld [vmem:[#allocation117_spill] sm:$0xff] }
 0x370   : > { %v3103_v54 = vadd.f32 %v2991_v34, %v11444_v42  ;;  %v3223_v63 = vmul.f32 %v14766_v53, %v11456_v11  ;;  %v3227_v30 = vmul.f32 %v14766_v53, %v11496_v16  ;;  %v3327_v8 = vadd.f32 %v3215_v17, %v3087_v55 }
 0x371   : > { %v3331_v25 = vadd.f32 %v3219_v57, %v3091_v22  ;;  %v3455_v46 = vmul.f32 %v11513_v7, %v11456_v11  ;;  %v3459_v28 = vmul.f32 %v11513_v7, %v11496_v16  ;;  %v3653_v36 = vadd.f32 %v3652_v21, %v11564_v4  ;;  %v14768_v16 = vld [vmem:[#allocation69_spill] sm:$0xff] }
 0x372   : > { %v11578_v27 = vadd.f32 %v3451_v23, %v3323_v26  ;;  %v3654_v42 = vsel %vm3647_vm2, %v11556_v38, 0.0  ;;  %v3848_v34 = vmul.f32 %v11540_v19, %v11540_v19  ;;  %v3948_v3 = vsel %vm3647_vm2, %v3840_v45, 0.0  ;;  %v14772_v23 = vld [vmem:[#allocation6_spill] sm:$0xff] }
 0x373   : > { %v11585_v59 = vadd.f32 %v3447_v24, %v3319_v5  ;;  %v3655_v61 = vadd.f32 %v3654_v42, %v3653_v36  ;;  %v3844_v11 = vmul.f32 %v11545_v0, %v11545_v0  ;;  %v3949_v55 = vadd.f32 %v3948_v3, %v3836_v32  ;;  %v14770_v5 = vld [vmem:[#allocation55_spill] sm:$0xff] }
 0x374   : > { %v3107_v15 = vadd.f32 %v2995_v20, %v14768_v16  ;;  %v3231_v35 = vmul.f32 %v14766_v53, %v11464_v1  ;;  %v3335_v22 = vadd.f32 %v3223_v63, %v3095_v29  ;;  %v3339_v39 = vadd.f32 %v3227_v30, %v3099_v47  ;;  %v14773_v30 = vld [vmem:[#allocation85_spill] sm:$0xff] }
 0x375   : > { %v3463_v10 = vmul.f32 %v11513_v7, %v11464_v1  ;;  %v3467_v43 = vmul.f32 %v11513_v7, %v14769_v9  ;;  %v3656_v12 = vadd.f32 %v3655_v61, %v11585_v59  ;;  %v3950_v52 = vadd.f32 %v3949_v55, %v3844_v11  ;;  %v14778_v9 = vld [vmem:[#allocation39_spill] sm:$0xff] }
 0x376   : > { %v11597_v40 = vadd.f32 %v3459_v28, %v3331_v25  ;;  %v3657_v14 = vsel %vm3647_vm2, %v11578_v27, 0.0  ;;  %v3856_v20 = vmul.f32 %v11556_v38, %v11556_v38  ;;  %v3951_v53 = vsel %vm3647_vm2, %v3848_v34, 0.0  ;;  %v14775_v34 = vld [vmem:[#allocation125_spill] sm:$0xff] }
 0x377   : > { %v11604_v29 = vadd.f32 %v3455_v46, %v3327_v8  ;;  %v3658_v60 = vadd.f32 %v3657_v14, %v3656_v12  ;;  %v3852_v1 = vmul.f32 %v11564_v4, %v11564_v4  ;;  %v3952_v47 = vadd.f32 %v3951_v53, %v3950_v52 }
 0x378   : > { %v4131_v17 = vadd.f32 %v4130_v33, %v11366_v51  ;;  %v3111_v57 = vadd.f32 %v11524_v13, %v11448_v37  ;;  %v3343_v62 = vadd.f32 %v3231_v35, %v3103_v54  ;;  %v3347_v26 = vadd.f32 %v14770_v5, %v3107_v15 }
 0x379   : > { %v3471_v56 = vmul.f32 %v11513_v7, %v14771_v44  ;;  %v3475_v49 = vmul.f32 %v11513_v7, %v14772_v23  ;;  %v3659_v45 = vadd.f32 %v3658_v60, %v11604_v29  ;;  %v3953_v24 = vadd.f32 %v3952_v47, %v3852_v1 }
 0x37a   : > { %v11619_v21 = vadd.f32 %v3467_v43, %v3339_v39  ;;  %v3660_v51 = vsel %vm3647_vm2, %v11597_v40, 0.0  ;;  %v3864_v33 = vmul.f32 %v11578_v27, %v11578_v27  ;;  %v3954_v37 = vsel %vm3647_vm2, %v3856_v20, 0.0  ;;  %v14777_v39 = vld [vmem:[#allocation203_spill] sm:$0xff] }
 0x37b   : > { %v11626_v13 = vadd.f32 %v3463_v10, %v3335_v22  ;;  %v3661_v32 = vadd.f32 %v3660_v51, %v3659_v45  ;;  %v3860_v54 = vmul.f32 %v11585_v59, %v11585_v59  ;;  %v3955_v63 = vadd.f32 %v3954_v37, %v3953_v24  ;;  %v14776_v22 = vld [vmem:[#allocation199_spill] sm:$0xff]  ;;  %v14784_v51 = vld [vmem:[#allocation182_spill] sm:$0xff] }
 0x37c   : > { %v14774_v8 = vrot.slane %v14773_v30, 2  ;;  %v3833_v46 = vadd.f32 %v3832_v18, %v11261_v48  ;;  %v4037_v28 = vadd.f32 %v4036_v50, %v11263_v2  ;;  %v4085_v36 = vrot.slane %v11389_v41, 2  ;;  %v14782_v45 = vld [vmem:[#allocation179_spill] sm:$0xff] }
 0x37d   : > { %v4132_v42 = vrot.slane %v4131_v17, 2  ;;  %v3351_v3 = vadd.f32 %v14775_v34, %v3111_v57  ;;  %v3662_v61 = vadd.f32 %v3661_v32, %v11626_v13  ;;  %v3956_v11 = vadd.f32 %v3955_v63, %v3860_v54 }
 0x37e   : > { %v3786_v25 = vadd.f32 %v14774_v8, %v14773_v30  ;;  %v11642_v55 = vadd.f32 %v3475_v49, %v3347_v26  ;;  %v3663_v16 = vsel %vm3647_vm2, %v11619_v21, 0.0  ;;  %v3872_v48 = vmul.f32 %v11597_v40, %v11597_v40  ;;  %v14780_v26 = vld [vmem:[#allocation153_spill] sm:$0xff]  ;;  %v14781_v49 = vld [vmem:[#allocation11_spill] sm:$0xff] }
 0x37f   : > { %v3957_v18 = vsel %vm3647_vm2, %v3864_v33, 0.0  ;;  %v11649_v15 = vadd.f32 %v3471_v56, %v3343_v62  ;;  %v3664_v2 = vadd.f32 %v3663_v16, %v3662_v61  ;;  %v3868_v50 = vmul.f32 %v11604_v29, %v11604_v29 }
 0x380   : > { %v3958_v35 = vadd.f32 %v3957_v18, %v3956_v11  ;;  %v11655_v10 = vadd.f32 %v14777_v39, %v14776_v22  ;;  %v14779_v43 = vrot.slane %v14778_v9, 2  ;;  %v3787_v52 = vrot.slane %v3786_v25, 1  ;;  %v14787_v18 = vld [vmem:[#allocation67_spill] sm:$0xff] }
 0x381   : > { %v3834_v14 = vrot.slane %v3833_v46, 1  ;;  %v4038_v20 = vrot.slane %v4037_v28, 2  ;;  %v4086_v53 = vadd.f32 %v4085_v36, %v11389_v41  ;;  %v3665_v60 = vadd.f32 %v3664_v2, %v11649_v15 }
 0x382   : > { %v3739_v12 = vadd.f32 %v14779_v43, %v14778_v9  ;;  %v3959_v1 = vadd.f32 %v3958_v35, %v3868_v50  ;;  %v4133_v47 = vadd.f32 %v4132_v42, %v4131_v17  ;;  %v3666_v57 = vsel %vm3647_vm2, %v11642_v55, 0.0  ;;  %v14783_v17 = vld [vmem:[#allocation167_spill] sm:$0xff]  ;;  %v14785_v42 = vld [vmem:[#allocation141_spill] sm:$0xff]  ;;  %v14788_v9 = vld [vmem:[#allocation174_spill] sm:$0xff] }
 0x383   : > { %v3880_v62 = vmul.f32 %v11619_v21, %v11619_v21  ;;  %v3960_v5 = vsel %vm3647_vm2, %v3872_v48, 0.0  ;;  %v11668_v44 = vadd.f32 %v14780_v26, %v3351_v3  ;;  %v3667_v56 = vadd.f32 %v3666_v57, %v3665_v60 }
 0x384   : > { %v3876_v23 = vmul.f32 %v11626_v13, %v11626_v13  ;;  %v3961_v41 = vadd.f32 %v3960_v5, %v3959_v1  ;;  %v2182_v24 = vadd.f32 %v14782_v45, %v14781_v49  ;;  %v2186_v33 = vadd.f32 %v14784_v51, %v14783_v17  ;;  %v14792_v51 = vld [vmem:[#allocation173_spill] sm:$0xff] }
 0x385   : > { %v3740_v37 = vrot.slane %v3739_v12, 1  ;;  %v3788_v32 = vadd.f32 %v3787_v52, %v3786_v25  ;;  %v3835_v54 = vadd.f32 %v3834_v14, %v3833_v46  ;;  %v4039_v63 = vadd.f32 %v4038_v20, %v4037_v28  ;;  %v14786_v46 = vld [vmem:[#allocation24_spill] sm:$0xff] }
 0x386   : > { %v3668_v30 = vadd.f32 %v3667_v56, %v11668_v44  ;;  %v3962_v8 = vadd.f32 %v3961_v41, %v3876_v23  ;;  %v4087_v36 = vrot.slane %v4086_v53, 1  ;;  %v3669_v34 = vsel %vm3647_vm2, %v14785_v42, 0.0  ;;  %v14789_v20 = vld [vmem:[#allocation76_spill] sm:$0xff]  ;;  %v14790_v56 = vld [vmem:[#allocation118_spill] sm:$0xff] }
 0x387   : > { %v3888_v3 = vmul.f32 %v11642_v55, %v11642_v55  ;;  %v3963_v61 = vsel %vm3647_vm2, %v3880_v62, 0.0  ;;  %v4134_v11 = vrot.slane %v4133_v47, 1  ;;  %v3884_v48 = vmul.f32 %v11649_v15, %v11649_v15  ;;  %v14791_v41 = vld [vmem:[#allocation56_spill] sm:$0xff] }
 0x388   : > { %v3670_v16 = vadd.f32 %v3669_v34, %v3668_v30  ;;  %v3964_v25 = vadd.f32 %v3963_v61, %v3962_v8  ;;  %v2422_v28 = vadd.f32 %v14786_v46, %v2182_v24  ;;  %v2426_v2 = vadd.f32 %v14787_v18, %v2186_v33  ;;  %v14794_v61 = vld [vmem:[#allocation36_spill] sm:$0xff]  ;;  %v14797_v46 = vld [vmem:[#allocation190_spill] sm:$0xff]  ;;  %v14798_v18 = vld [vmem:[#allocation107_spill] sm:$0xff] }
 0x389   : > { %v3741_v50 = vadd.f32 %v3740_v37, %v3739_v12  ;;  %v11686_v35 = vmul.f32 0.0051020407, %v3788_v32  ;;  %v4040_v22 = vrot.slane %v4039_v63, 1  ;;  %v11688_v39 = vmul.f32 0.0051020407, %v3835_v54  ;;  %v14793_v32 = vld [vmem:[#allocation204_spill] sm:$0xff] }
 0x38a   : > { %v3671_v43 = vadd.f32 %v3670_v16, %v14788_v9  ;;  %v3965_v52 = vadd.f32 %v3964_v25, %v3884_v48  ;;  %v4088_v14 = vadd.f32 %v4087_v36, %v4086_v53  ;;  %v3672_v60 = vsel %vm3647_vm2, %v14789_v20, 0.0  ;;  %v14796_v48 = vld [vmem:[#allocation75_spill] sm:$0xff] }
 0x38b   : > { %v3896_v1 = vmul.f32 %v14785_v42, %v14785_v42  ;;  %v3966_v57 = vsel %vm3647_vm2, %v3888_v3, 0.0  ;;  %v4135_v62 = vadd.f32 %v4134_v11, %v4133_v47  ;;  %v3892_v12 = vmul.f32 %v11668_v44, %v11668_v44  ;;  %v14795_v11 = vld [vmem:[#allocation218_spill] sm:$0xff] }
 0x38c   : > { %v3673_v5 = vadd.f32 %v3672_v60, %v3671_v43  ;;  %v3967_v26 = vadd.f32 %v3966_v57, %v3965_v52  ;;  %v2662_v23 = vadd.f32 %v14790_v56, %v2422_v28  ;;  %v2666_v49 = vadd.f32 %v14791_v41, %v2426_v2  ;;  %v14800_v43 = vld [vmem:[#allocation226_spill] sm:$0xff] }
 0x38d   : > { %v11700_v45 = vmul.f32 0.0051020407, %v3741_v50  ;;  %v4146_v53 = vmul.f32 %v11686_v35, %v11686_v35  ;;  %v4041_v24 = vadd.f32 %v4040_v22, %v4039_v63  ;;  %v4147_v17 = vmul.f32 %v11688_v39, %v11688_v39  ;;  %v14799_v50 = vld [vmem:[#allocation181_spill] sm:$0xff] }
 0x38e   : > { %v3674_v47 = vadd.f32 %v3673_v5, %v14792_v51  ;;  %v3968_v33 = vadd.f32 %v3967_v26, %v3892_v12  ;;  %v4142_v37 = vmul.f32 0.0051020407, %v4088_v14  ;;  %v3675_v54 = vsel %vm3647_vm2, %v14793_v32, 0.0  ;;  %v14801_v14 = vld [vmem:[#allocation121_spill] sm:$0xff]  ;;  %v14802_v26 = vld [vmem:[#allocation124_spill] sm:$0xff] }
 0x38f   : > { %v3904_v30 = vmul.f32 %v14789_v20, %v14789_v20  ;;  %v3969_v8 = vsel %vm3647_vm2, %v3896_v1, 0.0  ;;  %v4143_v36 = vmul.f32 0.0051020407, %v4135_v62  ;;  %v3900_v63 = vmul.f32 %v14788_v9, %v14788_v9 }
 0x390   : > { %v3676_v34 = vadd.f32 %v3675_v54, %v3674_v47  ;;  %v3970_v3 = vadd.f32 %v3969_v8, %v3968_v33  ;;  %v3391_v16 = vadd.f32 %v14795_v11, %v14794_v61  ;;  %v3395_v25 = vadd.f32 %v14796_v48, %v11655_v10  ;;  %v14803_v47 = vld [vmem:[#allocation77_spill] sm:$0xff]  ;;  %v14804_v33 = vld [vmem:[#allocation184_spill] sm:$0xff]  ;;  %v14806_v8 = vld [vmem:[#allocation154_spill] sm:$0xff] }
 0x391   : > { %v3519_v28 = vmul.f32 %v11513_v7, %v14797_v46  ;;  %v3523_v2 = vmul.f32 %v11513_v7, %v14798_v18  ;;  %v3159_v22 = vadd.f32 %v14799_v50, %v2662_v23  ;;  %v3163_v52 = vadd.f32 %v14800_v43, %v2666_v49  ;;  %v14808_v61 = vld [vmem:[#allocation40_spill] sm:$0xff]  ;;  %v14809_v48 = vld [vmem:[#allocation53_spill] sm:$0xff] }
 0x392   : > { %v3677_v60 = vadd.f32 %v3676_v34, %v14801_v14  ;;  %v3971_v1 = vadd.f32 %v3970_v3, %v3900_v63  ;;  %v4141_v57 = vmul.f32 0.0051020407, %v4041_v24  ;;  %v4145_v62 = vmul.f32 %v11700_v45, %v11700_v45  ;;  %v14807_v63 = vld [vmem:[#allocation64_spill] sm:$0xff] }
 0x393   : > { %v4150_v5 = vsub.f32 %v4142_v37, %v4146_v53  ;;  %v3972_v10 = vsel %vm3647_vm2, %v3904_v30, 0.0  ;;  %v4151_v12 = vsub.f32 %v4143_v36, %v4147_v17  ;;  %v3908_v41 = vmul.f32 %v14792_v51, %v14792_v51  ;;  %v14805_v53 = vld [vmem:[#allocation166_spill] sm:$0xff] }
 0x394   : > { %v3679_v56 = vadd.f32 %v14802_v26, %v3677_v60  ;;  %v3973_v23 = vadd.f32 %v3972_v10, %v3971_v1  ;;  %v3531_v49 = vmul.f32 %v11513_v7, %v14803_v47  ;;  %v3916_v24 = vmul.f32 %v14801_v14, %v14801_v14  ;;  %v14810_v1 = vld [vmem:[#allocation149_spill] sm:$0xff] }
 0x395   : > { %v3920_v54 = vmul.f32 %v14804_v33, %v14804_v33  ;;  %v3681_v37 = vsel %vm3647_vm2, %v14805_v53, 0.0  ;;  %v11739_v17 = vadd.f32 %v3519_v28, %v3391_v16  ;;  %v11741_v30 = vadd.f32 %v3523_v2, %v3395_v25 }
 0x396   : > { %v3680_v36 = vadd.f32 %v3679_v56, %v14806_v8  ;;  %v3974_v34 = vadd.f32 %v3973_v23, %v3908_v41  ;;  %v3399_v3 = vadd.f32 %v14807_v63, %v3159_v22  ;;  %v3403_v7 = vadd.f32 %v14808_v61, %v3163_v52 }
 0x397   : > { %v4154_v11 = vmax.f32 %v4150_v5, 0.0  ;;  %v3975_v46 = vsel %vm3647_vm2, %v14809_v48, 0.0  ;;  %v4149_v18 = vsub.f32 %v4141_v57, %v4145_v62  ;;  %v4155_v50 = vmax.f32 %v4151_v12, 0.0 }
 0x398   : > { %v3682_v43 = vadd.f32 %v3681_v37, %v3680_v36  ;;  %v3976_v60 = vadd.f32 %v3975_v46, %v3974_v34  ;;  %v3978_v16 = vsel %vm3647_vm2, %v3920_v54, 0.0  ;;  %v3924_v25 = vmul.f32 %v14806_v8, %v14806_v8 }
 0x399   : > { %v3928_v28 = vmul.f32 %v14805_v53, %v14805_v53  ;;  %v3684_v52 = vsel %vm3647_vm2, %v11741_v30, 0.0  ;;  %v11758_v57 = vadd.f32 %v14810_v1, %v3399_v3  ;;  %v11760_v62 = vadd.f32 %v3531_v49, %v3403_v7 }
 0x39a   : > { %v3683_v2 = vadd.f32 %v3682_v43, %v11739_v17  ;;  %v3977_v22 = vadd.f32 %v3976_v60, %v3916_v24  ;;  %v4158_v5 = vadd.f32 0.001, %v4154_v11  ;;  %v4153_v10 = vmax.f32 %v4149_v18, 0.0  ;;  %v11781_v18 = vld [vmem:[%s521_s26] sm:$0xf] }
 0x39b   : > { %v4159_v12 = vadd.f32 0.001, %v4155_v50  ;;  %v3981_v41 = vsel %vm3647_vm2, %v3928_v28, 0.0  ;;  %v3932_v24 = vmul.f32 %v11739_v17, %v11739_v17  ;;  %v3936_v49 = vmul.f32 %v11741_v30, %v11741_v30 }
 0x39c   : > { %v3685_v26 = vadd.f32 %v3684_v52, %v3683_v2  ;;  %v3979_v56 = vadd.f32 %v3978_v16, %v3977_v22  ;;  %v3687_v54 = vsel %vm3647_vm2, %v11760_v62, 0.0  ;;  %4991 = vrsqrt.f32 %v4158_v5  ;;  %v14811_v2 = vld [vmem:[#allocation10_spill] sm:$0xff]  ;;  %v14812_v52 = vld [vmem:[#allocation20_spill] sm:$0xff] }
 0x39d   : > { %v4157_v37 = vadd.f32 0.001, %v4153_v10  ;;  %4993 = vrsqrt.f32 %v4159_v12  ;;  %v3984_v61 = vsel %vm3647_vm2, %v3936_v49, 0.0  ;;  %v3944_v7 = vmul.f32 %v11760_v62, %v11760_v62 }
 0x39e   : > { %v3686_v23 = vadd.f32 %v3685_v26, %v11758_v57  ;;  %v3980_v47 = vadd.f32 %v3979_v56, %v3924_v25  ;;  %v3940_v11 = vmul.f32 %v11758_v57, %v11758_v57  ;;  %v4177_v22 = vrot.slane %v11781_v18, %v14811_v2 }
 0x39f   : > { %4995 = vrsqrt.f32 %v4157_v37  ;;  %v3987_v60 = vsel %vm3647_vm2, %v3944_v7, 0.0  ;;  %v4181_v1 = vrot.slane %v11781_v18, %v14812_v52  ;;  %v5093_v26 = vmov 1966171168  }
 0x3a0   : > { %v3688_v36 = vadd.f32 %v3687_v54, %v3686_v23  ;;  %v3982_v34 = vadd.f32 %v3981_v41, %v3980_v47  ;;  %v4202_v56 = vunpack.c.l.s4 %v5093_v26  ;;  %v14813_v47 = vld [vmem:[#allocation8_spill] sm:$0xff]  ;;  %v14816_v26 = vld [vmem:[#allocation46_spill] sm:$0xff] }
 0x3a2   : > { %v3689_v63 = vrot.slane %v3688_v36, 4  ;;  %v3983_v3 = vadd.f32 %v3982_v34, %v3932_v24  ;;  %v4173_v24 = vrot.slane %v11781_v18, %v14813_v47  ;;  %v4203_v34 = vunpack.c.0.s8 %v4202_v56 }
 0x3a4   : > { %v3690_v48 = vadd.f32 %v3689_v63, %v3688_v36  ;;  %v3985_v46 = vadd.f32 %v3984_v61, %v3983_v3 }
 0x3a6   : > { %v3691_v50 = vrot.slane %v3690_v48, 2  ;;  %v3986_v43 = vadd.f32 %v3985_v46, %v3940_v11  ;;  %v4992_v28 = vpop.eup %4991  ;;  %v11795_v46 = vsub.s32 %v4203_v34, %v5510_v6 }
 0x3a7   : > { %v4994_v5 = vpop.eup %4993  ;;  %v4188_v49 = vmul.f32 %v4992_v28, %v4177_v22 }
 0x3a8   : > { %v3692_v16 = vadd.f32 %v3691_v50, %v3690_v48  ;;  %v3988_v25 = vadd.f32 %v3987_v60, %v3986_v43  ;;  %v4189_v54 = vmul.f32 %v4994_v5, %v4181_v1 }
 0x3a9   : > { %v4996_v37 = vpop.eup %4995  ;;  %v4193_v7 = vmul.f32 %v4188_v49, %v11686_v35 }
 0x3aa   : > { %v3693_v10 = vrot.slane %v3692_v16, 1  ;;  %v3989_v12 = vrot.slane %v3988_v25, 4  ;;  %v4187_v61 = vmul.f32 %v4996_v37, %v4173_v24  ;;  %v4194_v11 = vmul.f32 %v4189_v54, %v11688_v39  ;;  %v14837_v39 = vld [vmem:[#allocation94_spill] sm:$0xff] }
 0x3ac   : > { %v3694_v41 = vadd.f32 %v3693_v10, %v3692_v16  ;;  %v3990_v23 = vadd.f32 %v3989_v12, %v3988_v25  ;;  %v4200_v60 = vcombine.low %v4193_v7, %v4194_v11  ;;  %v14814_v16 = vld [vmem:[#allocation9_spill] sm:$0xff]  ;;  %v11811_v6 = vmul.f32 %v4187_v61, %v11700_v45  ;;  %v14815_v10 = vld [vmem:[#allocation78_spill] sm:$0xff] }
 0x3ad   : > { %v11800_v25 = vrot.slane %v4187_v61, %v14814_v16  ;;  %v11803_v28 = vrot.slane %v4188_v49, %v14814_v16  ;;  %v11806_v22 = vrot.slane %v4189_v54, %v14814_v16  ;;  %v14818_v49 = vld [vmem:[#allocation79_spill] sm:$0xff]  ;;  %v14822_v7 = vld [vmem:[#allocation37_spill] sm:$0xff] }
 0x3ae   : > { %v3991_v36 = vrot.slane %v3990_v23, 2  ;;  %v11790_v3 = vmul.f32 0.0051020407, %v3694_v41  ;;  %v11814_v5 = vrot.slane %v4200_v60, %v11795_v46  ;;  %v14817_v41 = vld [vmem:[#allocation34_spill] sm:$0xff]  ;;  %v14819_v54 = vld [vmem:[#allocation51_spill] sm:$0xff] }
 0x3af   : > { %v11818_v12 = vmul.f32 %v11800_v25, %v14815_v10  ;;  %v11822_v56 = vmul.f32 %v11803_v28, %v14816_v26  ;;  %v11830_v45 = vmul.f32 %v11800_v25, %v14818_v49  ;;  %v11834_v37 = vmul.f32 %v11803_v28, %v14819_v54  ;;  %v14826_v26 = vld [vmem:[#allocation43_spill] sm:$0xff]  ;;  %v14827_v49 = vld [vmem:[#allocation72_spill] sm:$0xff] }
 0x3b0   : > { %v3992_v63 = vadd.f32 %v3991_v36, %v3990_v23  ;;  %v4144_v43 = vmul.f32 %v11790_v3, %v11790_v3  ;;  %v11826_v23 = vmul.f32 %v11806_v22, %v14817_v41  ;;  %v14820_v36 = vld [vmem:[#allocation50_spill] sm:$0xff]  ;;  %v11846_v11 = vmul.f32 %v11803_v28, %v14822_v7  ;;  %v14831_v7 = vld [vmem:[#allocation88_spill] sm:$0xff] }
 0x3b1   : > { %v11838_v34 = vmul.f32 %v11806_v22, %v14820_v36  ;;  %v11862_v41 = vmul.f32 %v11806_v22, %v14826_v26  ;;  %v11866_v54 = vmul.f32 %v11800_v25, %v14827_v49  ;;  %v14829_v36 = vld [vmem:[#allocation58_spill] sm:$0xff]  ;;  %v11886_v49 = vmul.f32 %v11806_v22, %v14837_v39 }
 0x3b2   : > { %v3993_v48 = vrot.slane %v3992_v63, 1 }
 0x3b3   : > { %14828 = vst [vmem:[#allocation229_spill] sm:$0xff] %v11866_v54  ;;  %14838 = vst [vmem:[#allocation91_spill] sm:$0xff] %v11886_v49  ;;  %v14839_v54 = vld [vmem:[#allocation68_spill] sm:$0xff]  ;;  %v14849_v49 = vld [vmem:[#allocation139_spill] sm:$0xff] }
 0x3b4   : > { %v3994_v50 = vadd.f32 %v3993_v48, %v3992_v63  ;;  %v14821_v63 = vld [vmem:[#allocation27_spill] sm:$0xff] }
 0x3b5   : > { %v11842_v61 = vmul.f32 %v11800_v25, %v14821_v63  ;;  %v14823_v48 = vld [vmem:[#allocation59_spill] sm:$0xff]  ;;  %v11870_v63 = vmul.f32 %v11803_v28, %v14829_v36  ;;  %v11890_v36 = vmul.f32 %v11800_v25, %v14839_v54  ;;  %v11910_v54 = vmul.f32 %v11806_v22, %v14849_v49 }
 0x3b6   : > { %v4140_v35 = vmul.f32 0.0051020407, %v3994_v50  ;;  %v11850_v50 = vmul.f32 %v11806_v22, %v14823_v48  ;;  %v11874_v48 = vmul.f32 %v11806_v22, %v14831_v7 }
 0x3b7   : > { %14830 = vst [vmem:[#allocation17_spill] sm:$0xff] %v11870_v63  ;;  %14840 = vst [vmem:[#allocation63_spill] sm:$0xff] %v11890_v36  ;;  %v14841_v63 = vld [vmem:[#allocation109_spill] sm:$0xff]  ;;  %v14851_v36 = vld [vmem:[#allocation108_spill] sm:$0xff] }
 0x3b8   : > { %v4148_v1 = vsub.f32 %v4140_v35, %v4144_v43  ;;  %v14824_v43 = vld [vmem:[#allocation12_spill] sm:$0xff]  ;;  %14832 = vst [vmem:[#allocation90_spill] sm:$0xff] %v11874_v48  ;;  %v11894_v7 = vmul.f32 %v11803_v28, %v14841_v63  ;;  %v14843_v48 = vld [vmem:[#allocation142_spill] sm:$0xff]  ;;  %14850 = vst [vmem:[#allocation152_spill] sm:$0xff] %v11910_v54  ;;  %v11914_v63 = vmul.f32 %v11800_v25, %v14851_v36 }
 0x3b9   : > { %v11854_v60 = vmul.f32 %v11800_v25, %v14824_v43  ;;  %v14861_v54 = vld [vmem:[#allocation157_spill] sm:$0xff] }
 0x3ba   : > { %v4152_v24 = vmax.f32 %v4148_v1, 0.0  ;;  %v14825_v1 = vld [vmem:[#allocation38_spill] sm:$0xff]  ;;  %14842 = vst [vmem:[#allocation97_spill] sm:$0xff] %v11894_v7  ;;  %14852 = vst [vmem:[#allocation32_spill] sm:$0xff] %v11914_v63  ;;  %v14853_v7 = vld [vmem:[#allocation129_spill] sm:$0xff]  ;;  %v11934_v36 = vmul.f32 %v11806_v22, %v14861_v54 }
 0x3bb   : > { %v11858_v10 = vmul.f32 %v11803_v28, %v14825_v1  ;;  %v14835_v1 = vld [vmem:[#allocation16_spill] sm:$0xff]  ;;  %v14863_v63 = vld [vmem:[#allocation74_spill] sm:$0xff] }
 0x3bc   : > { %v4156_v35 = vadd.f32 0.001, %v4152_v24  ;;  %v14833_v24 = vld [vmem:[#allocation15_spill] sm:$0xff]  ;;  %v11882_v26 = vmul.f32 %v11803_v28, %v14835_v1  ;;  %14862 = vst [vmem:[#allocation26_spill] sm:$0xff] %v11934_v36  ;;  %v14873_v36 = vld [vmem:[#allocation169_spill] sm:$0xff] }
 0x3bd   : > { %v11878_v43 = vmul.f32 %v11800_v25, %v14833_v24  ;;  %v11898_v24 = vmul.f32 %v11806_v22, %v14843_v48  ;;  %v11918_v48 = vmul.f32 %v11803_v28, %v14853_v7  ;;  %v11938_v7 = vmul.f32 %v11800_v25, %v14863_v63 }
 0x3be   : > { %14836 = vst [vmem:[#allocation96_spill] sm:$0xff] %v11882_v26  ;;  %4997 = vrsqrt.f32 %v4156_v35  ;;  %v14847_v35 = vld [vmem:[#allocation110_spill] sm:$0xff]  ;;  %v11958_v63 = vmul.f32 %v11806_v22, %v14873_v36  ;;  %v14915_v26 = vld [vmem:[#allocation219_spill] sm:$0xff] }
 0x3bf   : > { %14834 = vst [vmem:[#allocation232_spill] sm:$0xff] %v11878_v43  ;;  %14844 = vst [vmem:[#allocation202_spill] sm:$0xff] %v11898_v24  ;;  %v14845_v43 = vld [vmem:[#allocation127_spill] sm:$0xff]  ;;  %v11906_v39 = vmul.f32 %v11803_v28, %v14847_v35  ;;  %v14855_v24 = vld [vmem:[#allocation156_spill] sm:$0xff] }
 0x3c0   : > { %v11902_v1 = vmul.f32 %v11800_v25, %v14845_v43  ;;  %14854 = vst [vmem:[#allocation135_spill] sm:$0xff] %v11918_v48  ;;  %v11922_v43 = vmul.f32 %v11806_v22, %v14855_v24  ;;  %14864 = vst [vmem:[#allocation138_spill] sm:$0xff] %v11938_v7  ;;  %v14865_v48 = vld [vmem:[#allocation102_spill] sm:$0xff]  ;;  %v14875_v7 = vld [vmem:[#allocation128_spill] sm:$0xff] }
 0x3c1   : > { %14848 = vst [vmem:[#allocation216_spill] sm:$0xff] %v11906_v39  ;;  %v14859_v39 = vld [vmem:[#allocation145_spill] sm:$0xff]  ;;  %v11942_v24 = vmul.f32 %v11803_v28, %v14865_v48  ;;  %14874 = vst [vmem:[#allocation186_spill] sm:$0xff] %v11958_v63  ;;  %v11962_v48 = vmul.f32 %v11800_v25, %v14875_v7  ;;  %v14885_v63 = vld [vmem:[#allocation192_spill] sm:$0xff] }
 0x3c2   : > { %14846 = vst [vmem:[#allocation25_spill] sm:$0xff] %v11902_v1  ;;  %14856 = vst [vmem:[#allocation228_spill] sm:$0xff] %v11922_v43  ;;  %v14857_v1 = vld [vmem:[#allocation111_spill] sm:$0xff]  ;;  %v11930_v49 = vmul.f32 %v11803_v28, %v14859_v39  ;;  %v14867_v43 = vld [vmem:[#allocation168_spill] sm:$0xff]  ;;  %v11982_v7 = vmul.f32 %v11806_v22, %v14885_v63 }
 0x3c3   : > { %v11926_v35 = vmul.f32 %v11800_v25, %v14857_v1  ;;  %14866 = vst [vmem:[#allocation144_spill] sm:$0xff] %v11942_v24  ;;  %v11946_v1 = vmul.f32 %v11806_v22, %v14867_v43  ;;  %14876 = vst [vmem:[#allocation41_spill] sm:$0xff] %v11962_v48  ;;  %v14877_v24 = vld [vmem:[#allocation48_spill] sm:$0xff] }
 0x3c4   : > { %14860 = vst [vmem:[#allocation212_spill] sm:$0xff] %v11930_v49  ;;  %v14871_v49 = vld [vmem:[#allocation164_spill] sm:$0xff]  ;;  %v11966_v43 = vmul.f32 %v11803_v28, %v14877_v24  ;;  %14886 = vst [vmem:[#allocation224_spill] sm:$0xff] %v11982_v7  ;;  %v14897_v7 = vld [vmem:[#allocation207_spill] sm:$0xff] }
 0x3c5   : > { %14858 = vst [vmem:[#allocation231_spill] sm:$0xff] %v11926_v35  ;;  %14868 = vst [vmem:[#allocation214_spill] sm:$0xff] %v11946_v1  ;;  %v14869_v35 = vld [vmem:[#allocation49_spill] sm:$0xff]  ;;  %v11954_v54 = vmul.f32 %v11803_v28, %v14871_v49  ;;  %v14879_v1 = vld [vmem:[#allocation195_spill] sm:$0xff] }
 0x3c6   : > { %v11950_v39 = vmul.f32 %v11800_v25, %v14869_v35  ;;  %14878 = vst [vmem:[#allocation225_spill] sm:$0xff] %v11966_v43  ;;  %v11970_v35 = vmul.f32 %v11806_v22, %v14879_v1  ;;  %v14887_v48 = vld [vmem:[#allocation136_spill] sm:$0xff]  ;;  %v14889_v43 = vld [vmem:[#allocation158_spill] sm:$0xff] }
 0x3c7   : > { %14872 = vst [vmem:[#allocation213_spill] sm:$0xff] %v11954_v54  ;;  %v14883_v54 = vld [vmem:[#allocation140_spill] sm:$0xff]  ;;  %v11986_v24 = vmul.f32 %v11800_v25, %v14887_v48  ;;  %v11990_v1 = vmul.f32 %v11803_v28, %v14889_v43  ;;  %v12006_v48 = vmul.f32 %v11806_v22, %v14897_v7 }
 0x3c8   : > { %14870 = vst [vmem:[#allocation42_spill] sm:$0xff] %v11950_v39  ;;  %14880 = vst [vmem:[#allocation183_spill] sm:$0xff] %v11970_v35  ;;  %v14881_v39 = vld [vmem:[#allocation177_spill] sm:$0xff]  ;;  %v11978_v36 = vmul.f32 %v11803_v28, %v14883_v54 }
 0x3c9   : > { %v11974_v49 = vmul.f32 %v11800_v25, %v14881_v39  ;;  %14888 = vst [vmem:[#allocation47_spill] sm:$0xff] %v11986_v24  ;;  %14890 = vst [vmem:[#allocation60_spill] sm:$0xff] %v11990_v1  ;;  %v14891_v35 = vld [vmem:[#allocation205_spill] sm:$0xff]  ;;  %v14899_v24 = vld [vmem:[#allocation175_spill] sm:$0xff] }
 0x3ca   : > { %14884 = vst [vmem:[#allocation180_spill] sm:$0xff] %v11978_v36  ;;  %v11994_v39 = vmul.f32 %v11806_v22, %v14891_v35  ;;  %v14895_v36 = vld [vmem:[#allocation126_spill] sm:$0xff]  ;;  %14898 = vst [vmem:[#allocation81_spill] sm:$0xff] %v12006_v48  ;;  %v12010_v43 = vmul.f32 %v11800_v25, %v14899_v24  ;;  %v14901_v1 = vld [vmem:[#allocation112_spill] sm:$0xff] }
 0x3cb   : > { %14882 = vst [vmem:[#allocation189_spill] sm:$0xff] %v11974_v49  ;;  %v14893_v49 = vld [vmem:[#allocation93_spill] sm:$0xff]  ;;  %v12002_v63 = vmul.f32 %v11803_v28, %v14895_v36  ;;  %v12014_v35 = vmul.f32 %v11803_v28, %v14901_v1  ;;  %v14909_v48 = vld [vmem:[#allocation160_spill] sm:$0xff] }
 0x3cc   : > { %14892 = vst [vmem:[#allocation86_spill] sm:$0xff] %v11994_v39  ;;  %v11998_v54 = vmul.f32 %v11800_v25, %v14893_v49  ;;  %14900 = vst [vmem:[#allocation83_spill] sm:$0xff] %v12010_v43  ;;  %v14903_v39 = vld [vmem:[#allocation147_spill] sm:$0xff]  ;;  %v12030_v24 = vmul.f32 %v11806_v22, %v14909_v48  ;;  %v14911_v43 = vld [vmem:[#allocation198_spill] sm:$0xff] }
 0x3cd   : > { %14896 = vst [vmem:[#allocation233_spill] sm:$0xff] %v12002_v63  ;;  %14902 = vst [vmem:[#allocation82_spill] sm:$0xff] %v12014_v35  ;;  %v12018_v49 = vmul.f32 %v11806_v22, %v14903_v39  ;;  %v14907_v63 = vld [vmem:[#allocation170_spill] sm:$0xff]  ;;  %v12034_v1 = vmul.f32 %v11800_v25, %v14911_v43  ;;  %v14913_v35 = vld [vmem:[#allocation29_spill] sm:$0xff] }
 0x3ce   : > { %14894 = vst [vmem:[#allocation45_spill] sm:$0xff] %v11998_v54  ;;  %v14905_v54 = vld [vmem:[#allocation105_spill] sm:$0xff]  ;;  %v12026_v7 = vmul.f32 %v11803_v28, %v14907_v63  ;;  %14910 = vst [vmem:[#allocation187_spill] sm:$0xff] %v12030_v24  ;;  %v12038_v39 = vmul.f32 %v11803_v28, %v14913_v35  ;;  %v14923_v35 = vrot.slane %v11781_v18, %v14814_v16 }
 0x3cf   : > { %14904 = vst [vmem:[#allocation84_spill] sm:$0xff] %v12018_v49  ;;  %v12022_v36 = vmul.f32 %v11800_v25, %v14905_v54  ;;  %14912 = vst [vmem:[#allocation35_spill] sm:$0xff] %v12034_v1  ;;  %v4998_v49 = vpop.eup %4997  ;;  %v12042_v54 = vmul.f32 %v11806_v22, %v14915_v26  ;;  %v14921_v24 = vld [vmem:[#allocation221_spill] sm:$0xff]  ;;  %v14924_v1 = vld [vmem:[#allocation155_spill] sm:$0xff] }
 0x3d0   : > { %14908 = vst [vmem:[#allocation22_spill] sm:$0xff] %v12026_v7  ;;  %14914 = vst [vmem:[#allocation28_spill] sm:$0xff] %v12038_v39  ;;  %v14919_v7 = vld [vmem:[#allocation208_spill] sm:$0xff]  ;;  %v12054_v43 = vmul.f32 %v11806_v22, %v14921_v24  ;;  %v4186_v39 = vmul.f32 %v4998_v49, %v14923_v35  ;;  %v12061_v26 = vmul.f32 %v11800_v25, %v14924_v1  ;;  %v14933_v49 = vld [vmem:[#allocation227_spill] sm:$0xff] }
 0x3d1   : > { %14906 = vst [vmem:[#allocation185_spill] sm:$0xff] %v12022_v36  ;;  %14916 = vst [vmem:[#allocation161_spill] sm:$0xff] %v12042_v54  ;;  %v14917_v36 = vld [vmem:[#allocation52_spill] sm:$0xff]  ;;  %v12050_v48 = vmul.f32 %v11803_v28, %v14919_v7  ;;  %v14925_v54 = vld [vmem:[#allocation206_spill] sm:$0xff]  ;;  %v12081_v1 = vmul.f32 %v11806_v22, %v14933_v49 }
 0x3d2   : > { %v12046_v63 = vmul.f32 %v11800_v25, %v14917_v36  ;;  %14922 = vst [vmem:[#allocation171_spill] sm:$0xff] %v12054_v43  ;;  %v12065_v36 = vmul.f32 %v11803_v28, %v14925_v54  ;;  %v14931_v43 = vld [vmem:[#allocation176_spill] sm:$0xff]  ;;  %v14935_v35 = vld [vmem:[#allocation222_spill] sm:$0xff]  ;;  %v4228_v49 = vrot.slane %v4186_v39, %v14814_v16 }
 0x3d3   : > { %14920 = vst [vmem:[#allocation194_spill] sm:$0xff] %v12050_v48  ;;  %v14929_v48 = vld [vmem:[#allocation80_spill] sm:$0xff]  ;;  %v12077_v18 = vmul.f32 %v11803_v28, %v14931_v43  ;;  %14934 = vst [vmem:[#allocation211_spill] sm:$0xff] %v12081_v1  ;;  %v12085_v54 = vmul.f32 %v11800_v25, %v14935_v35  ;;  %v14941_v43 = vld [vmem:[#allocation73_spill] sm:$0xff] }
 0x3d4   : > { %14918 = vst [vmem:[#allocation159_spill] sm:$0xff] %v12046_v63  ;;  %14926 = vst [vmem:[#allocation197_spill] sm:$0xff] %v12065_v36  ;;  %v14927_v63 = vld [vmem:[#allocation230_spill] sm:$0xff]  ;;  %v12073_v24 = vmul.f32 %v11800_v25, %v14929_v48  ;;  %v4191_v36 = vmul.f32 %v4186_v39, %v11790_v3  ;;  %v14939_v48 = vld [vmem:[#allocation217_spill] sm:$0xff] }
 0x3d5   : > { %v12069_v7 = vmul.f32 %v11806_v22, %v14927_v63  ;;  %14932 = vst [vmem:[#allocation172_spill] sm:$0xff] %v12077_v18  ;;  %14936 = vst [vmem:[#allocation62_spill] sm:$0xff] %v12085_v54  ;;  %v14937_v63 = vld [vmem:[#allocation18_spill] sm:$0xff]  ;;  %v12098_v18 = vmul.f32 %v11800_v25, %v14941_v43  ;;  %v14943_v1 = vld [vmem:[#allocation33_spill] sm:$0xff] }
 0x3d6   : > { %14930 = vst [vmem:[#allocation87_spill] sm:$0xff] %v12073_v24  ;;  %v12094_v24 = vmul.f32 %v11806_v22, %v14939_v48  ;;  %v12103_v35 = vmul.f32 %v11803_v28, %v14943_v1  ;;  %v14945_v3 = vld [vmem:[#allocation130_spill] sm:$0xff]  ;;  %v4199_v48 = vcombine.low %v4191_v36, %v11811_v6  ;;  %v14952_v1 = vld [vmem:[#allocation201_spill] sm:$0xff] }
 0x3d7   : > { %14928 = vst [vmem:[#allocation209_spill] sm:$0xff] %v12069_v7  ;;  %v12090_v7 = vmul.f32 %v11803_v28, %v14937_v63  ;;  %14942 = vst [vmem:[#allocation89_spill] sm:$0xff] %v12098_v18  ;;  %v12107_v54 = vmul.f32 %v11806_v22, %v14945_v3  ;;  %v14947_v63 = vld [vmem:[#allocation65_spill] sm:$0xff]  ;;  %v14950_v18 = vld [vmem:[#allocation215_spill] sm:$0xff] }
 0x3d8   : > { %14940 = vst [vmem:[#allocation23_spill] sm:$0xff] %v12094_v24  ;;  %14944 = vst [vmem:[#allocation92_spill] sm:$0xff] %v12103_v35  ;;  %v14949_v24 = vld [vmem:[#allocation196_spill] sm:$0xff]  ;;  %v12120_v39 = vmul.f32 %v11806_v22, %v14950_v18  ;;  %v12124_v35 = vmul.f32 %v11800_v25, %v14952_v1  ;;  %v14958_v6 = vld [vmem:[#allocation193_spill] sm:$0xff]  ;;  %v4207_v1 = vrot.slane %v4199_v48, %v11795_v46 }
 0x3d9   : > { %14938 = vst [vmem:[#allocation30_spill] sm:$0xff] %v12090_v7  ;;  %14946 = vst [vmem:[#allocation98_spill] sm:$0xff] %v12107_v54  ;;  %v12111_v7 = vmul.f32 %v11800_v25, %v14947_v63  ;;  %v12116_v43 = vmul.f32 %v11803_v28, %v14949_v24  ;;  %v14954_v3 = vld [vmem:[#allocation148_spill] sm:$0xff]  ;;  %v12136_v36 = vmul.f32 %v11800_v25, %v14958_v6  ;;  %v14960_v24 = vld [vmem:[#allocation14_spill] sm:$0xff] }
 0x3da   : > { %14951 = vst [vmem:[#allocation99_spill] sm:$0xff] %v12120_v39  ;;  %14953 = vst [vmem:[#allocation200_spill] sm:$0xff] %v12124_v35  ;;  %v12128_v54 = vmul.f32 %v11803_v28, %v14954_v3  ;;  %v14956_v63 = vld [vmem:[#allocation44_spill] sm:$0xff]  ;;  %v12140_v18 = vmul.f32 %v11803_v28, %v14960_v24  ;;  %v14965_v6 = vld [vmem:[#allocation210_spill] sm:$0xff]  ;;  %v4241_v24 = vmul.f32 %v4228_v49, %v11530_v31 }
 0x3db   : > { %14948 = vst [vmem:[#allocation95_spill] sm:$0xff] %v12111_v7  ;;  %v12132_v7 = vmul.f32 %v11806_v22, %v14956_v63  ;;  %14959 = vst [vmem:[#allocation178_spill] sm:$0xff] %v12136_v36  ;;  %v14962_v3 = vld [vmem:[#allocation220_spill] sm:$0xff]  ;;  %v14964_v63 = vld [vmem:[#allocation191_spill] sm:$0xff]  ;;  %v12157_v36 = vmul.f32 %v11803_v28, %v14965_v6  ;;  %v4249_v35 = vmul.f32 %v4228_v49, %v11545_v0 }
 0x3dc   : > { %14955 = vst [vmem:[#allocation19_spill] sm:$0xff] %v12128_v54  ;;  %14961 = vst [vmem:[#allocation120_spill] sm:$0xff] %v12140_v18  ;;  %v12149_v54 = vmul.f32 %v11806_v22, %v14962_v3  ;;  %v4245_v18 = vmul.f32 %v4228_v49, %v11526_v58  ;;  %v14966_v39 = vld [vmem:[#allocation223_spill] sm:$0xff]  ;;  %v4215_v3 = vcombine.low %v4207_v1, %v11814_v5  ;;  %v4190_v28 = vld [vmem:[%s526_s29] sm:$0xf] }
 0x3dd   : > { %14957 = vst [vmem:[#allocation104_spill] sm:$0xff] %v12132_v7  ;;  %v12153_v7 = vmul.f32 %v11800_v25, %v14964_v63  ;;  %v12164_v48 = vmul.f32 %v11806_v22, %v14966_v39  ;;  %v4257_v25 = vmul.f32 %v4228_v49, %v11564_v4  ;;  %v12170_v63 = vmul.f32 %v4228_v49, %v11556_v38  ;;  %v14970_v1 = vld [vmem:[#allocation232_spill] sm:$0xff] }
 0x3de   : > { %14963 = vst [vmem:[#allocation146_spill] sm:$0xff] %v12149_v54  ;;  %v4253_v54 = vmul.f32 %v4228_v49, %v11540_v19  ;;  %v12173_v31 = vmul.f32 %v4228_v49, %v11585_v59  ;;  %v12176_v58 = vmul.f32 %v4228_v49, %v11578_v27  ;;  %v12179_v0 = vmul.f32 %v4228_v49, %v11604_v29 }
 0x3df   : > { %v12182_v22 = vmul.f32 %v4228_v49, %v11597_v40  ;;  %v4222_v19 = vrot.slane %v4215_v3, %v11795_v46  ;;  %v12186_v4 = vmul.f32 %v4228_v49, %v11626_v13  ;;  %v12189_v38 = vmul.f32 %v4228_v49, %v11619_v21 }
 0x3e0   : > { %v12192_v59 = vmul.f32 %v4228_v49, %v11649_v15  ;;  %v12195_v27 = vmul.f32 %v4228_v49, %v11642_v55  ;;  %v12198_v29 = vmul.f32 %v4228_v49, %v11668_v44  ;;  %v12201_v40 = vmul.f32 %v4228_v49, %v14785_v42 }
 0x3e1   : > { %v12204_v46 = vmul.f32 %v4228_v49, %v14788_v9  ;;  %v4224_v13 = vsub.f32 %v4190_v28, %v4222_v19  ;;  %v12207_v5 = vmul.f32 %v4228_v49, %v14789_v20  ;;  %v12210_v21 = vmul.f32 %v4228_v49, %v14792_v51  ;;  %v14973_v19 = vld [vmem:[#allocation63_spill] sm:$0xff] }
 0x3e2   : > { %v12213_v15 = vmul.f32 %v4228_v49, %v14793_v32  ;;  %v12216_v55 = vmul.f32 %v4228_v49, %v14801_v14  ;;  %v12219_v44 = vmul.f32 %v4228_v49, %v14804_v33  ;;  %v12222_v42 = vmul.f32 %v4228_v49, %v14806_v8 }
 0x3e3   : > { %v12225_v9 = vmul.f32 %v4228_v49, %v14805_v53  ;;  %v12228_v20 = vrot.slane %v4224_v13, %v14814_v16  ;;  %v12231_v51 = vrot.slane %v4224_v13, %v14813_v47  ;;  %v12234_v32 = vrot.slane %v4224_v13, %v14811_v2 }
 0x3e4   : > { %v12237_v14 = vrot.slane %v4224_v13, %v14812_v52  ;;  %v12240_v33 = vmul.f32 %v4228_v49, %v11739_v17  ;;  %v12243_v8 = vmul.f32 %v4228_v49, %v11741_v30  ;;  %v12246_v53 = vmul.f32 %v4228_v49, %v11758_v57 }
 0x3e5   : > { %v12249_v16 = vmul.f32 %v4228_v49, %v11760_v62  ;;  %v4374_v47 = vadd.f32 %v12228_v20, %v4241_v24  ;;  %v4375_v2 = vadd.f32 %v12231_v51, %v11818_v12  ;;  %v4376_v52 = vadd.f32 %v12234_v32, %v11822_v56  ;;  %v14971_v24 = vld [vmem:[#allocation96_spill] sm:$0xff] }
 0x3e6   : > { %v4377_v17 = vadd.f32 %v12237_v14, %v11826_v23  ;;  %v4378_v30 = vadd.f32 %v12228_v20, %v4245_v18  ;;  %v4379_v57 = vadd.f32 %v12231_v51, %v11830_v45  ;;  %v4380_v62 = vadd.f32 %v12234_v32, %v11834_v37 }
 0x3e7   : > { %v4381_v49 = vadd.f32 %v12237_v14, %v11838_v34  ;;  %4486 = vst [vmem:[%s12266_s30] sm:$0xff] %v4374_v47  ;;  %4487 = vst [vmem:[%s12266_s30 + $0x8] sm:$0xff] %v4375_v2  ;;  %v4382_v12 = vadd.f32 %v12228_v20, %v4249_v35  ;;  %v4383_v56 = vadd.f32 %v12231_v51, %v11842_v61  ;;  %v14974_v47 = vld [vmem:[#allocation97_spill] sm:$0xff] }
 0x3e8   : > { %4488 = vst [vmem:[%s12266_s30 + $0x10] sm:$0xff] %v4376_v52  ;;  %4489 = vst [vmem:[%s12266_s30 + $0x18] sm:$0xff] %v4377_v17  ;;  %v4384_v23 = vadd.f32 %v12234_v32, %v11846_v11  ;;  %v4385_v45 = vadd.f32 %v12237_v14, %v11850_v50  ;;  %v4386_v37 = vadd.f32 %v12228_v20, %v4253_v54  ;;  %v14967_v54 = vld [vmem:[#allocation229_spill] sm:$0xff]  ;;  %v14975_v52 = vld [vmem:[#allocation202_spill] sm:$0xff] }
 0x3e9   : > { %4490 = vst [vmem:[%s12266_s30 + $0x20] sm:$0x3f] %v4378_v30  ;;  %4491 = vst [vmem:[%s12266_s30 + $0x28] sm:$0x3f] %v4379_v57  ;;  %v4387_v34 = vadd.f32 %v12231_v51, %v11854_v60  ;;  %v4388_v61 = vadd.f32 %v12234_v32, %v11858_v10  ;;  %v4389_v11 = vadd.f32 %v12237_v14, %v11862_v41  ;;  %v14968_v60 = vld [vmem:[#allocation17_spill] sm:$0xff]  ;;  %v14969_v10 = vld [vmem:[#allocation90_spill] sm:$0xff] }
 0x3ea   : > { %4492 = vst [vmem:[%s12266_s30 + $0x30] sm:$0x3f] %v4380_v62  ;;  %4493 = vst [vmem:[%s12266_s30 + $0x38] sm:$0x3f] %v4381_v49  ;;  %v4390_v50 = vadd.f32 %v12228_v20, %v4257_v25  ;;  %v4391_v35 = vadd.f32 %v12231_v51, %v14967_v54  ;;  %v4392_v39 = vadd.f32 %v12234_v32, %v14968_v60  ;;  %v14972_v25 = vld [vmem:[#allocation91_spill] sm:$0xff]  ;;  %v14976_v30 = vld [vmem:[#allocation25_spill] sm:$0xff] }
 0x3eb   : > { %4494 = vst [vmem:[%s12266_s30 + $0x40] sm:$0xff] %v4382_v12  ;;  %4495 = vst [vmem:[%s12266_s30 + $0x48] sm:$0xff] %v4383_v56  ;;  %v4393_v18 = vadd.f32 %v12237_v14, %v14969_v10  ;;  %v4394_v41 = vadd.f32 %v12228_v20, %v12170_v63  ;;  %v4395_v6 = vadd.f32 %v12231_v51, %v14970_v1  ;;  %v14977_v62 = vld [vmem:[#allocation216_spill] sm:$0xff] }
 0x3ec   : > { %4496 = vst [vmem:[%s12266_s30 + $0x50] sm:$0xff] %v4384_v23  ;;  %4497 = vst [vmem:[%s12266_s30 + $0x58] sm:$0xff] %v4385_v45  ;;  %v4396_v3 = vadd.f32 %v12234_v32, %v14971_v24  ;;  %v4397_v28 = vadd.f32 %v12237_v14, %v14972_v25  ;;  %v4398_v63 = vadd.f32 %v12228_v20, %v12173_v31  ;;  %v14978_v12 = vld [vmem:[#allocation152_spill] sm:$0xff]  ;;  %v14987_v24 = vld [vmem:[#allocation214_spill] sm:$0xff] }
 0x3ed   : > { %4498 = vst [vmem:[%s12266_s30 + $0x60] sm:$0x3f] %v4386_v37  ;;  %4499 = vst [vmem:[%s12266_s30 + $0x68] sm:$0x3f] %v4387_v34  ;;  %v4399_v13 = vadd.f32 %v12231_v51, %v14973_v19  ;;  %v4400_v2 = vadd.f32 %v12234_v32, %v14974_v47  ;;  %v4401_v17 = vadd.f32 %v12237_v14, %v14975_v52  ;;  %v14979_v23 = vld [vmem:[#allocation32_spill] sm:$0xff]  ;;  %v14980_v37 = vld [vmem:[#allocation135_spill] sm:$0xff] }
 0x3ee   : > { %4500 = vst [vmem:[%s12266_s30 + $0x70] sm:$0x3f] %v4388_v61  ;;  %4501 = vst [vmem:[%s12266_s30 + $0x78] sm:$0x3f] %v4389_v11  ;;  %v4402_v31 = vadd.f32 %v12228_v20, %v12176_v58  ;;  %v4403_v57 = vadd.f32 %v12231_v51, %v14976_v30  ;;  %v4404_v49 = vadd.f32 %v12234_v32, %v14977_v62  ;;  %v14981_v61 = vld [vmem:[#allocation228_spill] sm:$0xff]  ;;  %v14988_v25 = vld [vmem:[#allocation42_spill] sm:$0xff] }
 0x3ef   : > { %4502 = vst [vmem:[%s12266_s30 + $0x80] sm:$0xff] %v4390_v50  ;;  %4503 = vst [vmem:[%s12266_s30 + $0x88] sm:$0xff] %v4391_v35  ;;  %v4405_v56 = vadd.f32 %v12237_v14, %v14978_v12  ;;  %v4406_v58 = vadd.f32 %v12228_v20, %v12179_v0  ;;  %v4407_v45 = vadd.f32 %v12231_v51, %v14979_v23  ;;  %v14982_v50 = vld [vmem:[#allocation231_spill] sm:$0xff]  ;;  %v14983_v35 = vld [vmem:[#allocation212_spill] sm:$0xff] }
 0x3f0   : > { %4504 = vst [vmem:[%s12266_s30 + $0x90] sm:$0xff] %v4392_v39  ;;  %4505 = vst [vmem:[%s12266_s30 + $0x98] sm:$0xff] %v4393_v18  ;;  %v4408_v34 = vadd.f32 %v12234_v32, %v14980_v37  ;;  %v4409_v11 = vadd.f32 %v12237_v14, %v14981_v61  ;;  %v4410_v0 = vadd.f32 %v12228_v20, %v12182_v22  ;;  %v14984_v39 = vld [vmem:[#allocation26_spill] sm:$0xff]  ;;  %v14986_v1 = vld [vmem:[#allocation144_spill] sm:$0xff] }
 0x3f1   : > { %4506 = vst [vmem:[%s12266_s30 + $0xa0] sm:$0x3f] %v4394_v41  ;;  %4507 = vst [vmem:[%s12266_s30 + $0xa8] sm:$0x3f] %v4395_v6  ;;  %v4411_v54 = vadd.f32 %v12231_v51, %v14982_v50  ;;  %v4412_v60 = vadd.f32 %v12234_v32, %v14983_v35  ;;  %v4413_v10 = vadd.f32 %v12237_v14, %v14984_v39  ;;  %v14985_v18 = vld [vmem:[#allocation138_spill] sm:$0xff]  ;;  %v14993_v30 = vld [vmem:[#allocation183_spill] sm:$0xff] }
 0x3f2   : > { %4508 = vst [vmem:[%s12266_s30 + $0xb0] sm:$0x3f] %v4396_v3  ;;  %4509 = vst [vmem:[%s12266_s30 + $0xb8] sm:$0x3f] %v4397_v28  ;;  %v4414_v22 = vadd.f32 %v12228_v20, %v12186_v4  ;;  %v4415_v41 = vadd.f32 %v12231_v51, %v14985_v18  ;;  %v4416_v6 = vadd.f32 %v12234_v32, %v14986_v1  ;;  %v14994_v62 = vld [vmem:[#allocation189_spill] sm:$0xff]  ;;  %v14995_v12 = vld [vmem:[#allocation180_spill] sm:$0xff] }
 0x3f3   : > { %4510 = vst [vmem:[%s12266_s30 + $0xc0] sm:$0xff] %v4398_v63  ;;  %4511 = vst [vmem:[%s12266_s30 + $0xc8] sm:$0xff] %v4399_v13  ;;  %v4417_v3 = vadd.f32 %v12237_v14, %v14987_v24  ;;  %v4418_v4 = vadd.f32 %v12228_v20, %v12189_v38  ;;  %v4419_v28 = vadd.f32 %v12231_v51, %v14988_v25  ;;  %v14989_v63 = vld [vmem:[#allocation213_spill] sm:$0xff]  ;;  %v14990_v13 = vld [vmem:[#allocation186_spill] sm:$0xff] }
 0x3f4   : > { %4512 = vst [vmem:[%s12266_s30 + $0xd0] sm:$0xff] %v4400_v2  ;;  %4513 = vst [vmem:[%s12266_s30 + $0xd8] sm:$0xff] %v4401_v17  ;;  %v4420_v19 = vadd.f32 %v12234_v32, %v14989_v63  ;;  %v4421_v47 = vadd.f32 %v12237_v14, %v14990_v13  ;;  %v4422_v38 = vadd.f32 %v12228_v20, %v12192_v59  ;;  %v14991_v2 = vld [vmem:[#allocation41_spill] sm:$0xff]  ;;  %v15007_v25 = vld [vmem:[#allocation22_spill] sm:$0xff] }
 0x3f5   : > { %4514 = vst [vmem:[%s12266_s30 + $0xe0] sm:$0x3f] %v4402_v31  ;;  %4515 = vst [vmem:[%s12266_s30 + $0xe8] sm:$0x3f] %v4403_v57  ;;  %v4423_v52 = vadd.f32 %v12231_v51, %v14991_v2  ;;  %v14992_v17 = vld [vmem:[#allocation225_spill] sm:$0xff]  ;;  %v4425_v57 = vadd.f32 %v12237_v14, %v14993_v30  ;;  %v4426_v59 = vadd.f32 %v12228_v20, %v12195_v27  ;;  %v15008_v63 = vld [vmem:[#allocation187_spill] sm:$0xff] }
 0x3f6   : > { %4516 = vst [vmem:[%s12266_s30 + $0xf0] sm:$0x3f] %v4404_v49  ;;  %4517 = vst [vmem:[%s12266_s30 + $0xf8] sm:$0x3f] %v4405_v56  ;;  %v4424_v31 = vadd.f32 %v12234_v32, %v14992_v17  ;;  %v4427_v49 = vadd.f32 %v12231_v51, %v14994_v62  ;;  %v4428_v56 = vadd.f32 %v12234_v32, %v14995_v12  ;;  %v15000_v50 = vld [vmem:[#allocation45_spill] sm:$0xff]  ;;  %v15009_v13 = vld [vmem:[#allocation35_spill] sm:$0xff] }
 0x3f7   : > { %4518 = vst [vmem:[%s12266_s30 + $0x100] sm:$0xff] %v4406_v58  ;;  %4519 = vst [vmem:[%s12266_s30 + $0x108] sm:$0xff] %v4407_v45  ;;  %v14996_v58 = vld [vmem:[#allocation224_spill] sm:$0xff]  ;;  %v4430_v27 = vadd.f32 %v12228_v20, %v12198_v29  ;;  %v14997_v45 = vld [vmem:[#allocation47_spill] sm:$0xff]  ;;  %v4434_v29 = vadd.f32 %v12228_v20, %v12201_v40  ;;  %v4438_v40 = vadd.f32 %v12228_v20, %v12204_v46 }
 0x3f8   : > { %4520 = vst [vmem:[%s12266_s30 + $0x110] sm:$0xff] %v4408_v34  ;;  %4521 = vst [vmem:[%s12266_s30 + $0x118] sm:$0xff] %v4409_v11  ;;  %v4429_v23 = vadd.f32 %v12237_v14, %v14996_v58  ;;  %v4431_v37 = vadd.f32 %v12231_v51, %v14997_v45  ;;  %v14998_v34 = vld [vmem:[#allocation60_spill] sm:$0xff]  ;;  %v14999_v11 = vld [vmem:[#allocation86_spill] sm:$0xff]  ;;  %v4442_v46 = vadd.f32 %v12228_v20, %v12207_v5 }
 0x3f9   : > { %4522 = vst [vmem:[%s12266_s30 + $0x120] sm:$0x3f] %v4410_v0  ;;  %4523 = vst [vmem:[%s12266_s30 + $0x128] sm:$0x3f] %v4411_v54  ;;  %v4432_v61 = vadd.f32 %v12234_v32, %v14998_v34  ;;  %v4433_v0 = vadd.f32 %v12237_v14, %v14999_v11  ;;  %v4435_v54 = vadd.f32 %v12231_v51, %v15000_v50  ;;  %v15001_v35 = vld [vmem:[#allocation233_spill] sm:$0xff]  ;;  %v15014_v62 = vld [vmem:[#allocation171_spill] sm:$0xff] }
 0x3fa   : > { %4524 = vst [vmem:[%s12266_s30 + $0x130] sm:$0x3f] %v4412_v60  ;;  %4525 = vst [vmem:[%s12266_s30 + $0x138] sm:$0x3f] %v4413_v10  ;;  %v4436_v60 = vadd.f32 %v12234_v32, %v15001_v35  ;;  %v15002_v39 = vld [vmem:[#allocation81_spill] sm:$0xff]  ;;  %v4446_v5 = vadd.f32 %v12228_v20, %v12210_v21  ;;  %v4450_v21 = vadd.f32 %v12228_v20, %v12213_v15  ;;  %v15017_v45 = vld [vmem:[#allocation87_spill] sm:$0xff] }
 0x3fb   : > { %4526 = vst [vmem:[%s12266_s30 + $0x140] sm:$0xff] %v4414_v22  ;;  %4527 = vst [vmem:[%s12266_s30 + $0x148] sm:$0xff] %v4415_v41  ;;  %v4437_v10 = vadd.f32 %v12237_v14, %v15002_v39  ;;  %v15003_v22 = vld [vmem:[#allocation83_spill] sm:$0xff]  ;;  %v15004_v41 = vld [vmem:[#allocation82_spill] sm:$0xff]  ;;  %v4454_v15 = vadd.f32 %v12228_v20, %v12216_v55  ;;  %v4455_v12 = vadd.f32 %v12231_v51, %v12061_v26 }
 0x3fc   : > { %4528 = vst [vmem:[%s12266_s30 + $0x150] sm:$0xff] %v4416_v6  ;;  %4529 = vst [vmem:[%s12266_s30 + $0x158] sm:$0xff] %v4417_v3  ;;  %v4439_v18 = vadd.f32 %v12231_v51, %v15003_v22  ;;  %v4440_v1 = vadd.f32 %v12234_v32, %v15004_v41  ;;  %v15005_v6 = vld [vmem:[#allocation84_spill] sm:$0xff]  ;;  %v15006_v3 = vld [vmem:[#allocation185_spill] sm:$0xff]  ;;  %v4458_v55 = vadd.f32 %v12228_v20, %v12219_v44 }
 0x3fd   : > { %4530 = vst [vmem:[%s12266_s30 + $0x160] sm:$0x3f] %v4418_v4  ;;  %4531 = vst [vmem:[%s12266_s30 + $0x168] sm:$0x3f] %v4419_v28  ;;  %v4441_v24 = vadd.f32 %v12237_v14, %v15005_v6  ;;  %v4443_v4 = vadd.f32 %v12231_v51, %v15006_v3  ;;  %v4444_v28 = vadd.f32 %v12234_v32, %v15007_v25  ;;  %v15021_v50 = vld [vmem:[#allocation30_spill] sm:$0xff]  ;;  %v15022_v35 = vld [vmem:[#allocation23_spill] sm:$0xff] }
 0x3fe   : > { %4532 = vst [vmem:[%s12266_s30 + $0x170] sm:$0x3f] %v4420_v19  ;;  %4533 = vst [vmem:[%s12266_s30 + $0x178] sm:$0x3f] %v4421_v47  ;;  %v4445_v19 = vadd.f32 %v12237_v14, %v15008_v63  ;;  %v4447_v47 = vadd.f32 %v12231_v51, %v15009_v13  ;;  %v4459_v26 = vadd.f32 %v12231_v51, %v15017_v45  ;;  %v15023_v39 = vld [vmem:[#allocation89_spill] sm:$0xff]  ;;  %v15030_v63 = vld [vmem:[#allocation104_spill] sm:$0xff] }
 0x3ff   : > { %4534 = vst [vmem:[%s12266_s30 + $0x180] sm:$0xff] %v4422_v38  ;;  %4535 = vst [vmem:[%s12266_s30 + $0x188] sm:$0xff] %v4423_v52  ;;  %v15010_v38 = vld [vmem:[#allocation28_spill] sm:$0xff]  ;;  %v15011_v52 = vld [vmem:[#allocation161_spill] sm:$0xff]  ;;  %v4462_v44 = vadd.f32 %v12228_v20, %v12222_v42  ;;  %v4466_v42 = vadd.f32 %v12228_v20, %v12225_v9  ;;  %v4470_v9 = vadd.f32 %v12228_v20, %v12240_v33 }
 0x400   : > { %4536 = vst [vmem:[%s12266_s30 + $0x190] sm:$0xff] %v4424_v31  ;;  %4537 = vst [vmem:[%s12266_s30 + $0x198] sm:$0xff] %v4425_v57  ;;  %v4448_v2 = vadd.f32 %v12234_v32, %v15010_v38  ;;  %v4449_v17 = vadd.f32 %v12237_v14, %v15011_v52  ;;  %v15012_v31 = vld [vmem:[#allocation159_spill] sm:$0xff]  ;;  %v15013_v57 = vld [vmem:[#allocation194_spill] sm:$0xff]  ;;  %v4474_v33 = vadd.f32 %v12228_v20, %v12243_v8 }
 0x401   : > { %4538 = vst [vmem:[%s12266_s30 + $0x1a0] sm:$0x3f] %v4426_v59  ;;  %4539 = vst [vmem:[%s12266_s30 + $0x1a8] sm:$0x3f] %v4427_v49  ;;  %v4451_v30 = vadd.f32 %v12231_v51, %v15012_v31  ;;  %v4452_v59 = vadd.f32 %v12234_v32, %v15013_v57  ;;  %v4453_v49 = vadd.f32 %v12237_v14, %v15014_v62  ;;  %v4638_v57 = vld [vmem:[%s12266_s30 + $0x48] sm:$0xff] (%p5154_p5)  ;;  %v4642_v62 = vld [vmem:[%s12266_s30 + $0x58] sm:$0xff] (%p5154_p5) }
 0x402   : > { %4540 = vst [vmem:[%s12266_s30 + $0x1b0] sm:$0x3f] %v4428_v56  ;;  %4541 = vst [vmem:[%s12266_s30 + $0x1b8] sm:$0x3f] %v4429_v23  ;;  %v15015_v56 = vld [vmem:[#allocation197_spill] sm:$0xff]  ;;  %v4478_v8 = vadd.f32 %v12228_v20, %v12246_v53  ;;  %v4482_v53 = vadd.f32 %v12228_v20, %v12249_v16  ;;  %v4485_v31 = vadd.f32 %v12237_v14, %v12164_v48  ;;  %v4624_v48 = vld [vmem:[%s12266_s30 + $0x10] sm:$0xff] (%p5154_p5) }
 0x403   : > { %4542 = vst [vmem:[%s12266_s30 + $0x1c0] sm:$0xff] %v4430_v27  ;;  %4543 = vst [vmem:[%s12266_s30 + $0x1c8] sm:$0xff] %v4431_v37  ;;  %v4456_v58 = vadd.f32 %v12234_v32, %v15015_v56  ;;  %v15016_v23 = vld [vmem:[#allocation209_spill] sm:$0xff]  ;;  %v15018_v37 = vld [vmem:[#allocation172_spill] sm:$0xff] }
 0x404   : > { %4544 = vst [vmem:[%s12266_s30 + $0x1d0] sm:$0xff] %v4432_v61  ;;  %4545 = vst [vmem:[%s12266_s30 + $0x1d8] sm:$0xff] %v4433_v0  ;;  %v4457_v27 = vadd.f32 %v12237_v14, %v15016_v23  ;;  %v4460_v34 = vadd.f32 %v12234_v32, %v15018_v37  ;;  %v15019_v61 = vld [vmem:[#allocation211_spill] sm:$0xff]  ;;  %v15020_v0 = vld [vmem:[#allocation62_spill] sm:$0xff] }
 0x405   : > { %4546 = vst [vmem:[%s12266_s30 + $0x1e0] sm:$0x3f] %v4434_v29  ;;  %4547 = vst [vmem:[%s12266_s30 + $0x1e8] sm:$0x3f] %v4435_v54  ;;  %v4461_v11 = vadd.f32 %v12237_v14, %v15019_v61  ;;  %v4463_v29 = vadd.f32 %v12231_v51, %v15020_v0  ;;  %v4464_v54 = vadd.f32 %v12234_v32, %v15021_v50  ;;  %v4626_v20 = vld [vmem:[%s12266_s30 + $0x18] sm:$0xff] (%p5154_p5)  ;;  %v4654_v23 = vld [vmem:[%s12266_s30 + $0x88] sm:$0xff] (%p5154_p5) }
 0x406   : > { %4548 = vst [vmem:[%s12266_s30 + $0x1f0] sm:$0x3f] %v4436_v60  ;;  %4549 = vst [vmem:[%s12266_s30 + $0x1f8] sm:$0x3f] %v4437_v10  ;;  %v4465_v60 = vadd.f32 %v12237_v14, %v15022_v35  ;;  %v4467_v10 = vadd.f32 %v12231_v51, %v15023_v39  ;;  %v4634_v16 = vld [vmem:[%s12266_s30 + $0x38] sm:$0xff] (%p5154_p5)  ;;  %v4660_v45 = vld [vmem:[%s12266_s30 + $0xa0] sm:$0xff] (%p5154_p5) }
 0x407   : > { %4550 = vst [vmem:[%s12266_s30 + $0x200] sm:$0xff] %v4438_v40  ;;  %4551 = vst [vmem:[%s12266_s30 + $0x208] sm:$0xff] %v4439_v18  ;;  %v15024_v40 = vld [vmem:[#allocation92_spill] sm:$0xff]  ;;  %v15025_v18 = vld [vmem:[#allocation98_spill] sm:$0xff] }
 0x408   : > { %4552 = vst [vmem:[%s12266_s30 + $0x210] sm:$0xff] %v4440_v1  ;;  %4553 = vst [vmem:[%s12266_s30 + $0x218] sm:$0xff] %v4441_v24  ;;  %v4468_v22 = vadd.f32 %v12234_v32, %v15024_v40  ;;  %v4469_v41 = vadd.f32 %v12237_v14, %v15025_v18  ;;  %v15026_v1 = vld [vmem:[#allocation95_spill] sm:$0xff]  ;;  %v4472_v24 = vadd.f32 %v12234_v32, %v12116_v43  ;;  %v4650_v56 = vld [vmem:[%s12266_s30 + $0x78] sm:$0xff] (%p5154_p5) }
 0x409   : > { %4554 = vst [vmem:[%s12266_s30 + $0x220] sm:$0x3f] %v4442_v46  ;;  %4555 = vst [vmem:[%s12266_s30 + $0x228] sm:$0x3f] %v4443_v4  ;;  %v4471_v6 = vadd.f32 %v12231_v51, %v15026_v1  ;;  %v15027_v46 = vld [vmem:[#allocation99_spill] sm:$0xff]  ;;  %v15028_v4 = vld [vmem:[#allocation200_spill] sm:$0xff] }
 0x40a   : > { %4556 = vst [vmem:[%s12266_s30 + $0x230] sm:$0x3f] %v4444_v28  ;;  %4557 = vst [vmem:[%s12266_s30 + $0x238] sm:$0x3f] %v4445_v19  ;;  %v4473_v3 = vadd.f32 %v12237_v14, %v15027_v46  ;;  %v4475_v25 = vadd.f32 %v12231_v51, %v15028_v4  ;;  %v15029_v28 = vld [vmem:[#allocation19_spill] sm:$0xff]  ;;  %v4477_v19 = vadd.f32 %v12237_v14, %v15030_v63  ;;  %v4664_v37 = vld [vmem:[%s12266_s30 + $0xb0] sm:$0xff] (%p5154_p5) }
 0x40b   : > { %4558 = vst [vmem:[%s12266_s30 + $0x240] sm:$0xff] %v4446_v5  ;;  %4559 = vst [vmem:[%s12266_s30 + $0x248] sm:$0xff] %v4447_v47  ;;  %v4476_v43 = vadd.f32 %v12234_v32, %v15029_v28  ;;  %v15031_v5 = vld [vmem:[#allocation178_spill] sm:$0xff]  ;;  %v15032_v47 = vld [vmem:[#allocation120_spill] sm:$0xff] }
 0x40c   : > { %4560 = vst [vmem:[%s12266_s30 + $0x250] sm:$0xff] %v4448_v2  ;;  %4561 = vst [vmem:[%s12266_s30 + $0x258] sm:$0xff] %v4449_v17  ;;  %v4479_v13 = vadd.f32 %v12231_v51, %v15031_v5  ;;  %v4480_v38 = vadd.f32 %v12234_v32, %v15032_v47  ;;  %v15033_v2 = vld [vmem:[#allocation146_spill] sm:$0xff]  ;;  %v4483_v17 = vadd.f32 %v12231_v51, %v12153_v7  ;;  %v4674_v0 = vld [vmem:[%s12266_s30 + $0xd8] sm:$0xff] (%p5154_p5) }
 0x40d   : > { %4562 = vst [vmem:[%s12266_s30 + $0x260] sm:$0x3f] %v4450_v21  ;;  %4563 = vst [vmem:[%s12266_s30 + $0x268] sm:$0x3f] %v4451_v30  ;;  %v4481_v52 = vadd.f32 %v12237_v14, %v15033_v2  ;;  %v4484_v21 = vadd.f32 %v12234_v32, %v12157_v36  ;;  %v4620_v7 = vld [vmem:[%s12266_s30] sm:$0xff] (%p5154_p5)  ;;  %v4622_v36 = vld [vmem:[%s12266_s30 + $0x8] sm:$0xff] (%p5154_p5) }
 0x40e   : > { %4564 = vst [vmem:[%s12266_s30 + $0x270] sm:$0x3f] %v4452_v59  ;;  %4565 = vst [vmem:[%s12266_s30 + $0x278] sm:$0x3f] %v4453_v49  ;;  %v4628_v51 = vld [vmem:[%s12266_s30 + $0x20] sm:$0xff] (%p5154_p5)  ;;  %v4630_v32 = vld [vmem:[%s12266_s30 + $0x28] sm:$0xff] (%p5154_p5) }
 0x40f   : > { %4566 = vst [vmem:[%s12266_s30 + $0x280] sm:$0xff] %v4454_v15  ;;  %4567 = vst [vmem:[%s12266_s30 + $0x288] sm:$0xff] %v4455_v12  ;;  %v4632_v14 = vld [vmem:[%s12266_s30 + $0x30] sm:$0xff] (%p5154_p5)  ;;  %v4636_v30 = vld [vmem:[%s12266_s30 + $0x40] sm:$0xff] (%p5154_p5) }
 0x410   : > { %4568 = vst [vmem:[%s12266_s30 + $0x290] sm:$0xff] %v4456_v58  ;;  %4569 = vst [vmem:[%s12266_s30 + $0x298] sm:$0xff] %v4457_v27  ;;  %v4640_v59 = vld [vmem:[%s12266_s30 + $0x50] sm:$0xff] (%p5154_p5)  ;;  %v4644_v49 = vld [vmem:[%s12266_s30 + $0x60] sm:$0xff] (%p5154_p5) }
 0x411   : > { %4570 = vst [vmem:[%s12266_s30 + $0x2a0] sm:$0x3f] %v4458_v55  ;;  %4571 = vst [vmem:[%s12266_s30 + $0x2a8] sm:$0x3f] %v4459_v26  ;;  %v4646_v15 = vld [vmem:[%s12266_s30 + $0x68] sm:$0xff] (%p5154_p5)  ;;  %v4648_v12 = vld [vmem:[%s12266_s30 + $0x70] sm:$0xff] (%p5154_p5) }
 0x412   : > { %4572 = vst [vmem:[%s12266_s30 + $0x2b0] sm:$0x3f] %v4460_v34  ;;  %4573 = vst [vmem:[%s12266_s30 + $0x2b8] sm:$0x3f] %v4461_v11  ;;  %v4652_v58 = vld [vmem:[%s12266_s30 + $0x80] sm:$0xff] (%p5154_p5)  ;;  %v4656_v27 = vld [vmem:[%s12266_s30 + $0x90] sm:$0xff] (%p5154_p5) }
 0x413   : > { %4574 = vst [vmem:[%s12266_s30 + $0x2c0] sm:$0xff] %v4462_v44  ;;  %4575 = vst [vmem:[%s12266_s30 + $0x2c8] sm:$0xff] %v4463_v29  ;;  %v4658_v55 = vld [vmem:[%s12266_s30 + $0x98] sm:$0xff] (%p5154_p5)  ;;  %v4662_v26 = vld [vmem:[%s12266_s30 + $0xa8] sm:$0xff] (%p5154_p5) }
 0x414   : > { %4576 = vst [vmem:[%s12266_s30 + $0x2d0] sm:$0xff] %v4464_v54  ;;  %4577 = vst [vmem:[%s12266_s30 + $0x2d8] sm:$0xff] %v4465_v60  ;;  %v4666_v34 = vld [vmem:[%s12266_s30 + $0xb8] sm:$0xff] (%p5154_p5)  ;;  %v4668_v61 = vld [vmem:[%s12266_s30 + $0xc0] sm:$0xff] (%p5154_p5) }
 0x415   : > { %4578 = vst [vmem:[%s12266_s30 + $0x2e0] sm:$0x3f] %v4466_v42  ;;  %4579 = vst [vmem:[%s12266_s30 + $0x2e8] sm:$0x3f] %v4467_v10  ;;  %v4670_v11 = vld [vmem:[%s12266_s30 + $0xc8] sm:$0xff] (%p5154_p5)  ;;  %v4672_v44 = vld [vmem:[%s12266_s30 + $0xd0] sm:$0xff] (%p5154_p5) }
 0x416   : > { %4580 = vst [vmem:[%s12266_s30 + $0x2f0] sm:$0x3f] %v4468_v22  ;;  %4581 = vst [vmem:[%s12266_s30 + $0x2f8] sm:$0x3f] %v4469_v41  ;;  %v4676_v29 = vld [vmem:[%s12266_s30 + $0xe0] sm:$0xff] (%p5154_p5)  ;;  %v4678_v50 = vld [vmem:[%s12266_s30 + $0xe8] sm:$0xff] (%p5154_p5) }
 0x417   : > { %4582 = vst [vmem:[%s12266_s30 + $0x300] sm:$0xff] %v4470_v9  ;;  %4583 = vst [vmem:[%s12266_s30 + $0x308] sm:$0xff] %v4471_v6  ;;  %v4680_v54 = vld [vmem:[%s12266_s30 + $0xf0] sm:$0xff] (%p5154_p5)  ;;  %v4682_v35 = vld [vmem:[%s12266_s30 + $0xf8] sm:$0xff] (%p5154_p5) }
 0x418   : > { %4584 = vst [vmem:[%s12266_s30 + $0x310] sm:$0xff] %v4472_v24  ;;  %4585 = vst [vmem:[%s12266_s30 + $0x318] sm:$0xff] %v4473_v3  ;;  %4604 = sbr.rel (!%p5154_p5) target bundleno = 1111 (0x457), region = 86  ;;  %v4684_v60 = vld [vmem:[%s12266_s30 + $0x100] sm:$0xff] (%p5154_p5)  ;;  %v4686_v42 = vld [vmem:[%s12266_s30 + $0x108] sm:$0xff] (%p5154_p5) }
 0x419   : > { %4586 = vst [vmem:[%s12266_s30 + $0x320] sm:$0x3f] %v4474_v33  ;;  %4587 = vst [vmem:[%s12266_s30 + $0x328] sm:$0x3f] %v4475_v25  ;;  %v4688_v39 = vld [vmem:[%s12266_s30 + $0x110] sm:$0xff] (%p5154_p5)  ;;  %v4690_v10 = vld [vmem:[%s12266_s30 + $0x118] sm:$0xff] (%p5154_p5) }
 0x41a   : > { %4588 = vst [vmem:[%s12266_s30 + $0x330] sm:$0x3f] %v4476_v43  ;;  %4589 = vst [vmem:[%s12266_s30 + $0x338] sm:$0x3f] %v4477_v19  ;;  %v4692_v40 = vld [vmem:[%s12266_s30 + $0x120] sm:$0xff] (%p5154_p5)  ;;  %v4694_v22 = vld [vmem:[%s12266_s30 + $0x128] sm:$0xff] (%p5154_p5) }
 0x41b   : > { %4590 = vst [vmem:[%s12266_s30 + $0x340] sm:$0xff] %v4478_v8  ;;  %4591 = vst [vmem:[%s12266_s30 + $0x348] sm:$0xff] %v4479_v13  ;;  %v4696_v18 = vld [vmem:[%s12266_s30 + $0x130] sm:$0xff] (%p5154_p5)  ;;  %v4698_v41 = vld [vmem:[%s12266_s30 + $0x138] sm:$0xff] (%p5154_p5) }
 0x41c   : > { %4592 = vst [vmem:[%s12266_s30 + $0x350] sm:$0xff] %v4480_v38  ;;  %4593 = vst [vmem:[%s12266_s30 + $0x358] sm:$0xff] %v4481_v52  ;;  %v4700_v9 = vld [vmem:[%s12266_s30 + $0x140] sm:$0xff] (%p5154_p5)  ;;  %v4702_v1 = vld [vmem:[%s12266_s30 + $0x148] sm:$0xff] (%p5154_p5) }
 0x41d   : > { %4594 = vst [vmem:[%s12266_s30 + $0x360] sm:$0x3f] %v4482_v53  ;;  %4595 = vst [vmem:[%s12266_s30 + $0x368] sm:$0x3f] %v4483_v17  ;;  %v4704_v6 = vld [vmem:[%s12266_s30 + $0x150] sm:$0xff] (%p5154_p5)  ;;  %v4706_v24 = vld [vmem:[%s12266_s30 + $0x158] sm:$0xff] (%p5154_p5) }
 0x41e   : > { %4596 = vst [vmem:[%s12266_s30 + $0x370] sm:$0x3f] %v4484_v21  ;;  %4597 = vst [vmem:[%s12266_s30 + $0x378] sm:$0x3f] %v4485_v31  ;;  %v4708_v46 = vld [vmem:[%s12266_s30 + $0x160] sm:$0xff] (%p5154_p5)  ;;  %v4710_v3 = vld [vmem:[%s12266_s30 + $0x168] sm:$0xff] (%p5154_p5) }
 0x41f   : > { %4621 = vst [vmem:[%s12594_s8] sm:$0xff] %v4620_v7  ;;  %4623 = vst [vmem:[%s12594_s8 + $0x8] sm:$0xff] %v4622_v36  ;;  %v4712_v33 = vld [vmem:[%s12266_s30 + $0x170] sm:$0xff]  ;;  %v4714_v4 = vld [vmem:[%s12266_s30 + $0x178] sm:$0xff] }
 0x420   : > { %4625 = vst [vmem:[%s12594_s8 + $0x10] sm:$0xff] %v4624_v48  ;;  %4627 = vst [vmem:[%s12594_s8 + $0x18] sm:$0xff] %v4626_v20  ;;  %v4716_v25 = vld [vmem:[%s12266_s30 + $0x180] sm:$0xff]  ;;  %v4718_v28 = vld [vmem:[%s12266_s30 + $0x188] sm:$0xff] }
 0x421   : > { %4629 = vst [vmem:[%s12594_s8 + $0x40] sm:$0xff] %v4628_v51  ;;  %4631 = vst [vmem:[%s12594_s8 + $0x48] sm:$0xff] %v4630_v32  ;;  %v4720_v43 = vld [vmem:[%s12266_s30 + $0x190] sm:$0xff]  ;;  %v4722_v63 = vld [vmem:[%s12266_s30 + $0x198] sm:$0xff] }
 0x422   : > { %4633 = vst [vmem:[%s12594_s8 + $0x50] sm:$0xff] %v4632_v14  ;;  %4635 = vst [vmem:[%s12594_s8 + $0x58] sm:$0xff] %v4634_v16  ;;  %v4724_v19 = vld [vmem:[%s12266_s30 + $0x1a0] sm:$0xff]  ;;  %v4726_v8 = vld [vmem:[%s12266_s30 + $0x1a8] sm:$0xff] }
 0x423   : > { %4637 = vst [vmem:[%s12594_s8 + $0x80] sm:$0xff] %v4636_v30  ;;  %4639 = vst [vmem:[%s12594_s8 + $0x88] sm:$0xff] %v4638_v57  ;;  %v4728_v5 = vld [vmem:[%s12266_s30 + $0x1b0] sm:$0xff]  ;;  %v4730_v13 = vld [vmem:[%s12266_s30 + $0x1b8] sm:$0xff] }
 0x424   : > { %4641 = vst [vmem:[%s12594_s8 + $0x90] sm:$0xff] %v4640_v59  ;;  %4643 = vst [vmem:[%s12594_s8 + $0x98] sm:$0xff] %v4642_v62  ;;  %v4732_v47 = vld [vmem:[%s12266_s30 + $0x1c0] sm:$0xff]  ;;  %v4734_v38 = vld [vmem:[%s12266_s30 + $0x1c8] sm:$0xff] }
 0x425   : > { %4645 = vst [vmem:[%s12594_s8 + $0xc0] sm:$0xff] %v4644_v49  ;;  %4647 = vst [vmem:[%s12594_s8 + $0xc8] sm:$0xff] %v4646_v15  ;;  %v4736_v2 = vld [vmem:[%s12266_s30 + $0x1d0] sm:$0xff]  ;;  %v4738_v52 = vld [vmem:[%s12266_s30 + $0x1d8] sm:$0xff] }
 0x426   : > { %4649 = vst [vmem:[%s12594_s8 + $0xd0] sm:$0xff] %v4648_v12  ;;  %4651 = vst [vmem:[%s12594_s8 + $0xd8] sm:$0xff] %v4650_v56  ;;  %v4740_v53 = vld [vmem:[%s12266_s30 + $0x1e0] sm:$0xff]  ;;  %v4742_v17 = vld [vmem:[%s12266_s30 + $0x1e8] sm:$0xff] }
 0x427   : > { %4653 = vst [vmem:[%s12594_s8 + $0x100] sm:$0xff] %v4652_v58  ;;  %4655 = vst [vmem:[%s12594_s8 + $0x108] sm:$0xff] %v4654_v23  ;;  %v4744_v21 = vld [vmem:[%s12266_s30 + $0x1f0] sm:$0xff]  ;;  %v4746_v31 = vld [vmem:[%s12266_s30 + $0x1f8] sm:$0xff] }
 0x428   : > { %4657 = vst [vmem:[%s12594_s8 + $0x110] sm:$0xff] %v4656_v27  ;;  %4659 = vst [vmem:[%s12594_s8 + $0x118] sm:$0xff] %v4658_v55  ;;  %v4748_v7 = vld [vmem:[%s12266_s30 + $0x200] sm:$0xff]  ;;  %v4750_v36 = vld [vmem:[%s12266_s30 + $0x208] sm:$0xff] }
 0x429   : > { %4661 = vst [vmem:[%s12594_s8 + $0x140] sm:$0xff] %v4660_v45  ;;  %4663 = vst [vmem:[%s12594_s8 + $0x148] sm:$0xff] %v4662_v26  ;;  %v4752_v48 = vld [vmem:[%s12266_s30 + $0x210] sm:$0xff]  ;;  %v4754_v20 = vld [vmem:[%s12266_s30 + $0x218] sm:$0xff] }
 0x42a   : > { %4665 = vst [vmem:[%s12594_s8 + $0x150] sm:$0xff] %v4664_v37  ;;  %4667 = vst [vmem:[%s12594_s8 + $0x158] sm:$0xff] %v4666_v34  ;;  %v4756_v51 = vld [vmem:[%s12266_s30 + $0x220] sm:$0xff]  ;;  %v4758_v32 = vld [vmem:[%s12266_s30 + $0x228] sm:$0xff] }
 0x42b   : > { %4669 = vst [vmem:[%s12594_s8 + $0x180] sm:$0xff] %v4668_v61  ;;  %4671 = vst [vmem:[%s12594_s8 + $0x188] sm:$0xff] %v4670_v11  ;;  %v4760_v14 = vld [vmem:[%s12266_s30 + $0x230] sm:$0xff]  ;;  %v4762_v16 = vld [vmem:[%s12266_s30 + $0x238] sm:$0xff] }
 0x42c   : > { %4673 = vst [vmem:[%s12594_s8 + $0x190] sm:$0xff] %v4672_v44  ;;  %4675 = vst [vmem:[%s12594_s8 + $0x198] sm:$0xff] %v4674_v0  ;;  %v4764_v30 = vld [vmem:[%s12266_s30 + $0x240] sm:$0xff]  ;;  %v4766_v57 = vld [vmem:[%s12266_s30 + $0x248] sm:$0xff] }
 0x42d   : > { %4677 = vst [vmem:[%s12594_s8 + $0x1c0] sm:$0xff] %v4676_v29  ;;  %4679 = vst [vmem:[%s12594_s8 + $0x1c8] sm:$0xff] %v4678_v50  ;;  %v4768_v59 = vld [vmem:[%s12266_s30 + $0x250] sm:$0xff]  ;;  %v4770_v62 = vld [vmem:[%s12266_s30 + $0x258] sm:$0xff] }
 0x42e   : > { %4681 = vst [vmem:[%s12594_s8 + $0x1d0] sm:$0xff] %v4680_v54  ;;  %4683 = vst [vmem:[%s12594_s8 + $0x1d8] sm:$0xff] %v4682_v35  ;;  %v4772_v49 = vld [vmem:[%s12266_s30 + $0x260] sm:$0xff]  ;;  %v4774_v15 = vld [vmem:[%s12266_s30 + $0x268] sm:$0xff] }
 0x42f   : > { %4685 = vst [vmem:[%s12594_s8 + $0x200] sm:$0xff] %v4684_v60  ;;  %4687 = vst [vmem:[%s12594_s8 + $0x208] sm:$0xff] %v4686_v42  ;;  %v4776_v12 = vld [vmem:[%s12266_s30 + $0x270] sm:$0xff]  ;;  %v4778_v56 = vld [vmem:[%s12266_s30 + $0x278] sm:$0xff] }
 0x430   : > { %4689 = vst [vmem:[%s12594_s8 + $0x210] sm:$0xff] %v4688_v39  ;;  %4691 = vst [vmem:[%s12594_s8 + $0x218] sm:$0xff] %v4690_v10  ;;  %v4780_v58 = vld [vmem:[%s12266_s30 + $0x280] sm:$0xff]  ;;  %v4782_v23 = vld [vmem:[%s12266_s30 + $0x288] sm:$0xff] }
 0x431   : > { %4693 = vst [vmem:[%s12594_s8 + $0x240] sm:$0xff] %v4692_v40  ;;  %4695 = vst [vmem:[%s12594_s8 + $0x248] sm:$0xff] %v4694_v22  ;;  %v4784_v27 = vld [vmem:[%s12266_s30 + $0x290] sm:$0xff]  ;;  %v4786_v55 = vld [vmem:[%s12266_s30 + $0x298] sm:$0xff] }
 0x432   : > { %4697 = vst [vmem:[%s12594_s8 + $0x250] sm:$0xff] %v4696_v18  ;;  %4699 = vst [vmem:[%s12594_s8 + $0x258] sm:$0xff] %v4698_v41  ;;  %v4788_v45 = vld [vmem:[%s12266_s30 + $0x2a0] sm:$0xff]  ;;  %v4790_v26 = vld [vmem:[%s12266_s30 + $0x2a8] sm:$0xff] }
 0x433   : > { %4701 = vst [vmem:[%s12594_s8 + $0x280] sm:$0xff] %v4700_v9  ;;  %4703 = vst [vmem:[%s12594_s8 + $0x288] sm:$0xff] %v4702_v1  ;;  %v4792_v37 = vld [vmem:[%s12266_s30 + $0x2b0] sm:$0xff]  ;;  %v4794_v34 = vld [vmem:[%s12266_s30 + $0x2b8] sm:$0xff] }
 0x434   : > { %4705 = vst [vmem:[%s12594_s8 + $0x290] sm:$0xff] %v4704_v6  ;;  %4707 = vst [vmem:[%s12594_s8 + $0x298] sm:$0xff] %v4706_v24  ;;  %v4796_v61 = vld [vmem:[%s12266_s30 + $0x2c0] sm:$0xff]  ;;  %v4798_v11 = vld [vmem:[%s12266_s30 + $0x2c8] sm:$0xff] }
 0x435   : > { %4709 = vst [vmem:[%s12594_s8 + $0x2c0] sm:$0xff] %v4708_v46  ;;  %4711 = vst [vmem:[%s12594_s8 + $0x2c8] sm:$0xff] %v4710_v3  ;;  %v4800_v44 = vld [vmem:[%s12266_s30 + $0x2d0] sm:$0xff]  ;;  %v4802_v0 = vld [vmem:[%s12266_s30 + $0x2d8] sm:$0xff] }
 0x436   : > { %4713 = vst [vmem:[%s12594_s8 + $0x2d0] sm:$0xff] %v4712_v33  ;;  %4715 = vst [vmem:[%s12594_s8 + $0x2d8] sm:$0xff] %v4714_v4  ;;  %v4804_v29 = vld [vmem:[%s12266_s30 + $0x2e0] sm:$0xff]  ;;  %v4806_v50 = vld [vmem:[%s12266_s30 + $0x2e8] sm:$0xff] }
 0x437   : > { %4717 = vst [vmem:[%s12594_s8 + $0x300] sm:$0xff] %v4716_v25  ;;  %4719 = vst [vmem:[%s12594_s8 + $0x308] sm:$0xff] %v4718_v28  ;;  %v4808_v54 = vld [vmem:[%s12266_s30 + $0x2f0] sm:$0xff]  ;;  %v4810_v35 = vld [vmem:[%s12266_s30 + $0x2f8] sm:$0xff] }
 0x438   : > { %4721 = vst [vmem:[%s12594_s8 + $0x310] sm:$0xff] %v4720_v43  ;;  %4723 = vst [vmem:[%s12594_s8 + $0x318] sm:$0xff] %v4722_v63  ;;  %v4812_v60 = vld [vmem:[%s12266_s30 + $0x300] sm:$0xff]  ;;  %v4814_v42 = vld [vmem:[%s12266_s30 + $0x308] sm:$0xff] }
 0x439   : > { %4725 = vst [vmem:[%s12594_s8 + $0x340] sm:$0xff] %v4724_v19  ;;  %4727 = vst [vmem:[%s12594_s8 + $0x348] sm:$0xff] %v4726_v8  ;;  %v4816_v39 = vld [vmem:[%s12266_s30 + $0x310] sm:$0xff]  ;;  %v4818_v10 = vld [vmem:[%s12266_s30 + $0x318] sm:$0xff] }
 0x43a   : > { %4729 = vst [vmem:[%s12594_s8 + $0x350] sm:$0xff] %v4728_v5  ;;  %4731 = vst [vmem:[%s12594_s8 + $0x358] sm:$0xff] %v4730_v13  ;;  %v4820_v40 = vld [vmem:[%s12266_s30 + $0x320] sm:$0xff]  ;;  %v4822_v22 = vld [vmem:[%s12266_s30 + $0x328] sm:$0xff] }
 0x43b   : > { %4733 = vst [vmem:[%s12594_s8 + $0x380] sm:$0xff] %v4732_v47  ;;  %4735 = vst [vmem:[%s12594_s8 + $0x388] sm:$0xff] %v4734_v38  ;;  %v4824_v18 = vld [vmem:[%s12266_s30 + $0x330] sm:$0xff]  ;;  %v4826_v41 = vld [vmem:[%s12266_s30 + $0x338] sm:$0xff] }
 0x43c   : > { %4737 = vst [vmem:[%s12594_s8 + $0x390] sm:$0xff] %v4736_v2  ;;  %4739 = vst [vmem:[%s12594_s8 + $0x398] sm:$0xff] %v4738_v52  ;;  %v4828_v9 = vld [vmem:[%s12266_s30 + $0x340] sm:$0xff]  ;;  %v4830_v1 = vld [vmem:[%s12266_s30 + $0x348] sm:$0xff] }
 0x43d   : > { %4741 = vst [vmem:[%s12594_s8 + $0x3c0] sm:$0xff] %v4740_v53  ;;  %4743 = vst [vmem:[%s12594_s8 + $0x3c8] sm:$0xff] %v4742_v17  ;;  %v4832_v6 = vld [vmem:[%s12266_s30 + $0x350] sm:$0xff]  ;;  %v4834_v24 = vld [vmem:[%s12266_s30 + $0x358] sm:$0xff] }
 0x43e   : > { %4745 = vst [vmem:[%s12594_s8 + $0x3d0] sm:$0xff] %v4744_v21  ;;  %4747 = vst [vmem:[%s12594_s8 + $0x3d8] sm:$0xff] %v4746_v31  ;;  %v4836_v46 = vld [vmem:[%s12266_s30 + $0x360] sm:$0xff]  ;;  %v4838_v3 = vld [vmem:[%s12266_s30 + $0x368] sm:$0xff] }
 0x43f   : > { %4749 = vst [vmem:[%s12594_s8 + $0x400] sm:$0xff] %v4748_v7  ;;  %4751 = vst [vmem:[%s12594_s8 + $0x408] sm:$0xff] %v4750_v36  ;;  %v4840_v33 = vld [vmem:[%s12266_s30 + $0x370] sm:$0xff]  ;;  %v4842_v4 = vld [vmem:[%s12266_s30 + $0x378] sm:$0xff] }
 0x440   : > { %4753 = vst [vmem:[%s12594_s8 + $0x410] sm:$0xff] %v4752_v48  ;;  %4755 = vst [vmem:[%s12594_s8 + $0x418] sm:$0xff] %v4754_v20 }
 0x441   : > { %4757 = vst [vmem:[%s12594_s8 + $0x440] sm:$0xff] %v4756_v51  ;;  %4759 = vst [vmem:[%s12594_s8 + $0x448] sm:$0xff] %v4758_v32 }
 0x442   : > { %4761 = vst [vmem:[%s12594_s8 + $0x450] sm:$0xff] %v4760_v14  ;;  %4763 = vst [vmem:[%s12594_s8 + $0x458] sm:$0xff] %v4762_v16 }
 0x443   : > { %4765 = vst [vmem:[%s12594_s8 + $0x480] sm:$0xff] %v4764_v30  ;;  %4767 = vst [vmem:[%s12594_s8 + $0x488] sm:$0xff] %v4766_v57 }
 0x444   : > { %4769 = vst [vmem:[%s12594_s8 + $0x490] sm:$0xff] %v4768_v59  ;;  %4771 = vst [vmem:[%s12594_s8 + $0x498] sm:$0xff] %v4770_v62 }
 0x445   : > { %4773 = vst [vmem:[%s12594_s8 + $0x4c0] sm:$0xff] %v4772_v49  ;;  %4775 = vst [vmem:[%s12594_s8 + $0x4c8] sm:$0xff] %v4774_v15 }
 0x446   : > { %4777 = vst [vmem:[%s12594_s8 + $0x4d0] sm:$0xff] %v4776_v12  ;;  %4779 = vst [vmem:[%s12594_s8 + $0x4d8] sm:$0xff] %v4778_v56 }
 0x447   : > { %4781 = vst [vmem:[%s12594_s8 + $0x500] sm:$0xff] %v4780_v58  ;;  %4783 = vst [vmem:[%s12594_s8 + $0x508] sm:$0xff] %v4782_v23 }
 0x448   : > { %4785 = vst [vmem:[%s12594_s8 + $0x510] sm:$0xff] %v4784_v27  ;;  %4787 = vst [vmem:[%s12594_s8 + $0x518] sm:$0xff] %v4786_v55 }
 0x449   : > { %4789 = vst [vmem:[%s12594_s8 + $0x540] sm:$0xff] %v4788_v45  ;;  %4791 = vst [vmem:[%s12594_s8 + $0x548] sm:$0xff] %v4790_v26 }
 0x44a   : > { %4793 = vst [vmem:[%s12594_s8 + $0x550] sm:$0xff] %v4792_v37  ;;  %4795 = vst [vmem:[%s12594_s8 + $0x558] sm:$0xff] %v4794_v34 }
 0x44b   : > { %4797 = vst [vmem:[%s12594_s8 + $0x580] sm:$0xff] %v4796_v61  ;;  %4799 = vst [vmem:[%s12594_s8 + $0x588] sm:$0xff] %v4798_v11 }
 0x44c   : > { %4801 = vst [vmem:[%s12594_s8 + $0x590] sm:$0xff] %v4800_v44  ;;  %4803 = vst [vmem:[%s12594_s8 + $0x598] sm:$0xff] %v4802_v0 }
 0x44d   : > { %4805 = vst [vmem:[%s12594_s8 + $0x5c0] sm:$0xff] %v4804_v29  ;;  %4807 = vst [vmem:[%s12594_s8 + $0x5c8] sm:$0xff] %v4806_v50 }
 0x44e   : > { %4809 = vst [vmem:[%s12594_s8 + $0x5d0] sm:$0xff] %v4808_v54  ;;  %4811 = vst [vmem:[%s12594_s8 + $0x5d8] sm:$0xff] %v4810_v35 }
 0x44f   : > { %4813 = vst [vmem:[%s12594_s8 + $0x600] sm:$0xff] %v4812_v60  ;;  %4815 = vst [vmem:[%s12594_s8 + $0x608] sm:$0xff] %v4814_v42 }
 0x450   : > { %4817 = vst [vmem:[%s12594_s8 + $0x610] sm:$0xff] %v4816_v39  ;;  %4819 = vst [vmem:[%s12594_s8 + $0x618] sm:$0xff] %v4818_v10 }
 0x451   : > { %4821 = vst [vmem:[%s12594_s8 + $0x640] sm:$0xff] %v4820_v40  ;;  %4823 = vst [vmem:[%s12594_s8 + $0x648] sm:$0xff] %v4822_v22 }
 0x452   : > { %4825 = vst [vmem:[%s12594_s8 + $0x650] sm:$0xff] %v4824_v18  ;;  %4827 = vst [vmem:[%s12594_s8 + $0x658] sm:$0xff] %v4826_v41 }
 0x453   : > { %4829 = vst [vmem:[%s12594_s8 + $0x680] sm:$0xff] %v4828_v9  ;;  %4831 = vst [vmem:[%s12594_s8 + $0x688] sm:$0xff] %v4830_v1 }
 0x454   : > { %4833 = vst [vmem:[%s12594_s8 + $0x690] sm:$0xff] %v4832_v6  ;;  %4835 = vst [vmem:[%s12594_s8 + $0x698] sm:$0xff] %v4834_v24 }
 0x455   : > { %4837 = vst [vmem:[%s12594_s8 + $0x6c0] sm:$0xff] %v4836_v46  ;;  %4839 = vst [vmem:[%s12594_s8 + $0x6c8] sm:$0xff] %v4838_v3 }
 0x456   : > { %4841 = vst [vmem:[%s12594_s8 + $0x6d0] sm:$0xff] %v4840_v33  ;;  %4843 = vst [vmem:[%s12594_s8 + $0x6d8] sm:$0xff] %v4842_v4 }
 0x457 PF: > { %p11_p11 = scmp.ge.s32.totalorder %s5138_s19, 4   ;;  %s15034_s15 = smov %s5086_s16 }
 0x458   : > { %s15035_s16 = smov %s5148_s22  ;;  %s15036_s17 = smov %s5138_s19 }
 0x459   :  { %13 = sbr.rel (!%p11_p11) target bundleno = 2 (0x2), region = 156 }

</bundles_post_ra>
